<compile_context>
chip_gen: v7x
topology: tpu7x:2x2x1
jax: 0.10.0
libtpu: 0.0.40
codegen_flags: <defaults>
</compile_context>

<pallas_src>
import functools

import numpy as np
import jax
import jax.numpy as jnp
from jax import lax
from jax.experimental import pallas as pl
from jax.experimental.pallas import tpu as pltpu


def _fused_block_kernel(x_ref, w1_ref, s1_ref, t1_ref,
                        w2_ref, s2_ref, t2_ref,
                        w3_ref, s3_ref, t3_ref,
                        mask_ref, o_ref,
                        x0_ref, h1_ref, h2_ref):
    """Whole Convolutional_Block for one batch element, fully VMEM-resident.

    x_ref    : (1, H, W, Cin)          input tile (NHWC)
    w*_ref   : (9, Cin|Cout, Cout)     conv taps stacked in (kh, kw) order
    s*_ref   : (1, Cout)               folded BN scale  (gamma / sqrt(var+eps))
    t*_ref   : (1, Cout)               folded BN shift  (beta + scale*(bias-mean))
    mask_ref : (H*(W+2), 1)            1.0 on real columns, 0.0 on pad columns
    o_ref    : (1, H*(W+2), Cout)      lane-dense output slab (pad columns are
                                       stripped by the wrapper)
    x0_ref   : ((H+3)*(W+2), Cin)      VMEM: padded x, flat raster order
    h1_ref   : ((H+3)*(W+2), Cout)     VMEM: padded h1, flat raster order
    h2_ref   : ((H+3)*(W+2), Cout)     VMEM: padded h2, flat raster order
    """
    _, H, W, Cin = x_ref.shape
    Wp2 = W + 2
    M = H * Wp2                       # rows per stage (padded-width raster order)
    Cout = o_ref.shape[-1]
    cdt = h1_ref.dtype                # MXU input dtype (f32 or bf16)
    off = Wp2 + 1                     # flat index of original pixel (0, 0)

    # ---- one-time halo init: interiors are fully rewritten every step -------
    @pl.when(pl.program_id(0) == 0)
    def _init():
        x0_ref[...] = jnp.zeros_like(x0_ref)
        h1_ref[...] = jnp.zeros_like(h1_ref)
        h2_ref[...] = jnp.zeros_like(h2_ref)

    # ---- stage-1 input: copy rows into the flat padded raster ---------------
    # Pad rows / pad columns stay zero from the one-time init (never dirtied).
    for r in range(H):
        x0_ref[off + r * Wp2: off + r * Wp2 + W, :] = x_ref[0, r].astype(cdt)

    mask = mask_ref[...]              # (M, 1)

    def conv3x3(src_ref, w_ref):
        # 3x3 same-conv = 9 shifted (M, C) x (C, Cout) MXU matmuls, f32 acc.
        acc = None
        for kh in range(3):
            for kw in range(3):
                o = kh * Wp2 + kw
                p = jnp.dot(src_ref[o:o + M, :], w_ref[kh * 3 + kw],
                            preferred_element_type=jnp.float32)
                acc = p if acc is None else acc + p
        return acc

    def bn_relu(acc, s_ref, t_ref):
        return jnp.maximum(acc * s_ref[0, :] + t_ref[0, :], 0.0)

    # ---- stage 1: relu(bn1(conv1(x)))  -> h1 stays in VMEM ------------------
    y1 = bn_relu(conv3x3(x0_ref, w1_ref), s1_ref, t1_ref) * mask
    h1_ref[off:off + M, :] = y1.astype(cdt)

    # ---- stage 2: relu(bn2(conv2(h1))) -> h2 stays in VMEM ------------------
    y2 = bn_relu(conv3x3(h1_ref, w2_ref), s2_ref, t2_ref) * mask
    h2_ref[off:off + M, :] = y2.astype(cdt)

    # ---- stage 3: relu(bn3(conv3(h2))) + h1 (residual read from VMEM) -------
    y3 = bn_relu(conv3x3(h2_ref, w3_ref), s3_ref, t3_ref)
    y3 = y3 + h1_ref[off:off + M, :].astype(jnp.float32)
    o_ref[0] = y3.astype(o_ref.dtype)


def _fused_conv_block_nhwc(x, w1, s1, t1, w2, s2, t2, w3, s3, t3,
                           compute_dtype=jnp.float32):
    """Fused conv block, NHWC in / NHWC out. Weights are HWIO (3,3,Ci,Co)."""
    N, H, W, Cin = x.shape
    Cout = w1.shape[-1]
    Wp2 = W + 2
    M = H * Wp2
    flat_rows = (H + 3) * Wp2         # +1 slack row so shifted tap slices stay in-bounds

    cdt = np.dtype(compute_dtype)
    # HWIO (3,3,Ci,Co) -> (9,Ci,Co), taps stacked in (kh, kw) order.
    w1f = w1.reshape(9, Cin, Cout).astype(cdt)
    w2f = w2.reshape(9, Cout, Cout).astype(cdt)
    w3f = w3.reshape(9, Cout, Cout).astype(cdt)
    s1r, t1r = s1.reshape(1, Cout), t1.reshape(1, Cout)
    s2r, t2r = s2.reshape(1, Cout), t2.reshape(1, Cout)
    s3r, t3r = s3.reshape(1, Cout), t3.reshape(1, Cout)

    # 1.0 on real columns, 0.0 on the two pad columns of each padded-width row.
    colmask = (jnp.arange(M, dtype=jnp.int32) % Wp2 < W)
    colmask = colmask.astype(jnp.float32).reshape(M, 1)

    itemsize = cdt.itemsize
    vmem_need = (
        2 * (H * W * Cin + M * Cout) * 4                 # double-buffered x / out blocks
        + 2 * 9 * (Cin + 2 * Cout) * Cout * itemsize     # weights
        + (M + 6 * Cout) * 4                             # mask + scale/shift
        + flat_rows * (Cin + 2 * Cout) * itemsize)       # VMEM scratches
    vmem_limit = int(min(max(2 * vmem_need, 16 * 2**20), 64 * 2**20))

    out_flat = pl.pallas_call(
        _fused_block_kernel,
        out_shape=jax.ShapeDtypeStruct((N, M, Cout), jnp.float32),
        grid=(N,),
        in_specs=[
            pl.BlockSpec((1, H, W, Cin), lambda n: (n, 0, 0, 0)),
            pl.BlockSpec((9, Cin, Cout), lambda n: (0, 0, 0)),
            pl.BlockSpec((1, Cout), lambda n: (0, 0)),
            pl.BlockSpec((1, Cout), lambda n: (0, 0)),
            pl.BlockSpec((9, Cout, Cout), lambda n: (0, 0, 0)),
            pl.BlockSpec((1, Cout), lambda n: (0, 0)),
            pl.BlockSpec((1, Cout), lambda n: (0, 0)),
            pl.BlockSpec((9, Cout, Cout), lambda n: (0, 0, 0)),
            pl.BlockSpec((1, Cout), lambda n: (0, 0)),
            pl.BlockSpec((1, Cout), lambda n: (0, 0)),
            pl.BlockSpec((M, 1), lambda n: (0, 0)),
        ],
        out_specs=pl.BlockSpec((1, M, Cout), lambda n: (n, 0, 0)),
        scratch_shapes=[
            pltpu.VMEM((flat_rows, Cin), cdt),
            pltpu.VMEM((flat_rows, Cout), cdt),
            pltpu.VMEM((flat_rows, Cout), cdt),
        ],
        compiler_params=pltpu.CompilerParams(
            dimension_semantics=("parallel",),
            vmem_limit_bytes=vmem_limit),
    )(x, w1f, s1r, t1r, w2f, s2r, t2r, w3f, s3r, t3r, colmask)

    # Strip the two pad columns of each raster row -> (N, H, W, Cout).
    return out_flat.reshape(N, H, Wp2, Cout)[:, :, :W, :]


@functools.partial(jax.jit, static_argnames=("compute_dtype",))
def convolutional_block(x_nchw, w1, s1, t1, w2, s2, t2, w3, s3, t3,
                        compute_dtype=jnp.float32):
    """Forward pass of Convolutional_Block. NCHW in / NCHW out like PyTorch."""
    x = jnp.transpose(x_nchw, (0, 2, 3, 1))          # NCHW -> NHWC (channels on lanes)
    y = _fused_conv_block_nhwc(x, w1, s1, t1, w2, s2, t2, w3, s3, t3,
                               compute_dtype=compute_dtype)
    return jnp.transpose(y, (0, 3, 1, 2))            # NHWC -> NCHW


# ----------------------------- parameters -----------------------------------
def _fold_bn(gamma, beta, mean, var, conv_bias, eps=1e-5):
    scale = gamma / jnp.sqrt(var + eps)
    shift = beta + scale * (conv_bias - mean)
    return scale, shift


def init_params(key, in_channels, out_channels, k=3):
    """Deterministic synthetic parameters (PyTorch-shaped, converted to HWIO)."""
    keys = jax.random.split(key, 15)
    params = {}
    cins = [in_channels, out_channels, out_channels]
    for i in range(3):
        cin = cins[i]
        w_oihw = jax.random.normal(keys[5 * i + 0], (out_channels, cin, k, k),
                                   dtype=jnp.float32) * 0.1
        b = jax.random.normal(keys[5 * i + 1], (out_channels,), dtype=jnp.float32) * 0.05
        gamma = 0.5 + jax.random.uniform(keys[5 * i + 2], (out_channels,), dtype=jnp.float32)
        beta = jax.random.normal(keys[5 * i + 3], (out_channels,), dtype=jnp.float32) * 0.1
        mean = jax.random.normal(keys[5 * i + 4], (out_channels,), dtype=jnp.float32) * 0.1
        var = 0.5 + jax.random.uniform(jax.random.fold_in(keys[5 * i + 4], 1),
                                       (out_channels,), dtype=jnp.float32)
        scale, shift = _fold_bn(gamma, beta, mean, var, b)
        params[f"w{i + 1}"] = jnp.transpose(w_oihw, (2, 3, 1, 0))  # OIHW -> HWIO
        params[f"scale{i + 1}"] = scale
        params[f"shift{i + 1}"] = shift
        params[f"_raw{i + 1}"] = (w_oihw, b, gamma, beta, mean, var)
    return params


# ----------------------------- pure-JAX reference ---------------------------
def _ref_conv_bn_relu(x_nchw, w_oihw, b, gamma, beta, mean, var, eps=1e-5):
    y = lax.conv_general_dilated(
        x_nchw, w_oihw, window_strides=(1, 1), padding=((1, 1), (1, 1)),
        dimension_numbers=("NCHW", "OIHW", "NCHW"))
    y = y + b[None, :, None, None]
    y = (y - mean[None, :, None, None]) / jnp.sqrt(var[None, :, None, None] + eps)
    y = y * gamma[None, :, None, None] + beta[None, :, None, None]
    return jnp.maximum(y, 0.0)


def _ref_block(x, p):
    h1 = _ref_conv_bn_relu(x, *p["_raw1"])
    h2 = _ref_conv_bn_relu(h1, *p["_raw2"])
    h3 = _ref_conv_bn_relu(h2, *p["_raw3"])
    return h3 + h1


if __name__ == "__main__":
    N, Cin, Cout, H, W = 2, 4, 8, 16, 16
    key = jax.random.PRNGKey(0)
    kx, kp = jax.random.split(key)
    x = jax.random.normal(kx, (N, Cin, H, W), dtype=jnp.float32)

    p = init_params(kp, Cin, Cout)

    out = convolutional_block(
        x,
        p["w1"], p["scale1"], p["shift1"],
        p["w2"], p["scale2"], p["shift2"],
        p["w3"], p["scale3"], p["shift3"],
    )
    out = jax.block_until_ready(out)

    ref = jax.block_until_ready(_ref_block(x, p))
    assert out.shape == (N, Cout, H, W), out.shape
    assert jnp.allclose(out, ref, atol=1e-4, rtol=1e-4), float(jnp.max(jnp.abs(out - ref)))

    print("KERNEL_OK")
</pallas_src>

<mosaic_0001>
module attributes {stable_mosaic.version = 11 : i64} {
  func.func @_fused_block_kernel(%arg0: i32, %arg1: memref<1x16x16x4xf32, #tpu.memory_space<vmem>>, %arg2: memref<9x4x8xf32, #tpu.memory_space<vmem>>, %arg3: memref<1x8xf32, #tpu.memory_space<vmem>>, %arg4: memref<1x8xf32, #tpu.memory_space<vmem>>, %arg5: memref<9x8x8xf32, #tpu.memory_space<vmem>>, %arg6: memref<1x8xf32, #tpu.memory_space<vmem>>, %arg7: memref<1x8xf32, #tpu.memory_space<vmem>>, %arg8: memref<9x8x8xf32, #tpu.memory_space<vmem>>, %arg9: memref<1x8xf32, #tpu.memory_space<vmem>>, %arg10: memref<1x8xf32, #tpu.memory_space<vmem>>, %arg11: memref<288x1xf32, #tpu.memory_space<vmem>>, %arg12: memref<1x288x8xf32, #tpu.memory_space<vmem>>, %arg13: memref<342x4xf32, #tpu.memory_space<vmem>>, %arg14: memref<342x8xf32, #tpu.memory_space<vmem>>, %arg15: memref<342x8xf32, #tpu.memory_space<vmem>>) attributes {dimension_semantics = [#tpu.dimension_semantics<parallel>], iteration_bounds = array<i64: 2>, scalar_prefetch = 0 : i64, scratch_operands = 3 : i64, tpu.core_type = #tpu.core_type<tc>, window_params = [{transform_indices = @transform_0, window_bounds = array<i64: 1, 16, 16, 4>}, {pipeline_mode = #tpu.pipeline_mode<synchronous>, transform_indices = @transform_1, window_bounds = array<i64: 9, 4, 8>}, {pipeline_mode = #tpu.pipeline_mode<synchronous>, transform_indices = @transform_2, window_bounds = array<i64: 1, 8>}, {pipeline_mode = #tpu.pipeline_mode<synchronous>, transform_indices = @transform_3, window_bounds = array<i64: 1, 8>}, {pipeline_mode = #tpu.pipeline_mode<synchronous>, transform_indices = @transform_4, window_bounds = array<i64: 9, 8, 8>}, {pipeline_mode = #tpu.pipeline_mode<synchronous>, transform_indices = @transform_5, window_bounds = array<i64: 1, 8>}, {pipeline_mode = #tpu.pipeline_mode<synchronous>, transform_indices = @transform_6, window_bounds = array<i64: 1, 8>}, {pipeline_mode = #tpu.pipeline_mode<synchronous>, transform_indices = @transform_7, window_bounds = array<i64: 9, 8, 8>}, {pipeline_mode = #tpu.pipeline_mode<synchronous>, transform_indices = @transform_8, window_bounds = array<i64: 1, 8>}, {pipeline_mode = #tpu.pipeline_mode<synchronous>, transform_indices = @transform_9, window_bounds = array<i64: 1, 8>}, {pipeline_mode = #tpu.pipeline_mode<synchronous>, transform_indices = @transform_10, window_bounds = array<i64: 288, 1>}, {transform_indices = @transform_11, window_bounds = array<i64: 1, 288, 8>}]} {
    %c0_i32 = arith.constant 0 : i32
    %0 = arith.cmpi eq, %arg0, %c0_i32 : i32
    %1 = arith.extui %0 : i1 to i32
    %c0_i32_0 = arith.constant 0 : i32
    %2 = arith.cmpi ne, %1, %c0_i32_0 : i32
    scf.if %2 {
      %cst_248 = arith.constant 0.000000e+00 : f32
      %231 = vector.broadcast %cst_248 : f32 to vector<342x4xf32>
      %c0_249 = arith.constant 0 : index
      %c0_250 = arith.constant 0 : index
      %232 = vector.load %arg13[%c0_249, %c0_250] : memref<342x4xf32, #tpu.memory_space<vmem>>, vector<342x4xf32>
      tpu.vector_store %arg13[%c0_249, %c0_250], %231 {strides = array<i32>} : memref<342x4xf32, #tpu.memory_space<vmem>>, vector<342x4xf32>,
      %cst_251 = arith.constant 0.000000e+00 : f32
      %233 = vector.broadcast %cst_251 : f32 to vector<342x8xf32>
      %c0_252 = arith.constant 0 : index
      %c0_253 = arith.constant 0 : index
      %234 = vector.load %arg14[%c0_252, %c0_253] : memref<342x8xf32, #tpu.memory_space<vmem>>, vector<342x8xf32>
      tpu.vector_store %arg14[%c0_252, %c0_253], %233 {strides = array<i32>} : memref<342x8xf32, #tpu.memory_space<vmem>>, vector<342x8xf32>,
      %cst_254 = arith.constant 0.000000e+00 : f32
      %235 = vector.broadcast %cst_254 : f32 to vector<342x8xf32>
      %c0_255 = arith.constant 0 : index
      %c0_256 = arith.constant 0 : index
      %236 = vector.load %arg15[%c0_255, %c0_256] : memref<342x8xf32, #tpu.memory_space<vmem>>, vector<342x8xf32>
      tpu.vector_store %arg15[%c0_255, %c0_256], %235 {strides = array<i32>} : memref<342x8xf32, #tpu.memory_space<vmem>>, vector<342x8xf32>,
    } else {
    }
    %c0 = arith.constant 0 : index
    %c0_1 = arith.constant 0 : index
    %c0_2 = arith.constant 0 : index
    %c0_3 = arith.constant 0 : index
    %3 = vector.load %arg1[%c0, %c0_1, %c0_2, %c0_3] : memref<1x16x16x4xf32, #tpu.memory_space<vmem>>, vector<1x1x16x4xf32>
    %4 = vector.shape_cast %3 : vector<1x1x16x4xf32> to vector<16x4xf32>
    %c19 = arith.constant 19 : index
    %c0_4 = arith.constant 0 : index
    %5 = vector.load %arg13[%c19, %c0_4] : memref<342x4xf32, #tpu.memory_space<vmem>>, vector<16x4xf32>
    tpu.vector_store %arg13[%c19, %c0_4], %4 {strides = array<i32>} : memref<342x4xf32, #tpu.memory_space<vmem>>, vector<16x4xf32>,
    %c0_5 = arith.constant 0 : index
    %c1 = arith.constant 1 : index
    %c0_6 = arith.constant 0 : index
    %c0_7 = arith.constant 0 : index
    %6 = vector.load %arg1[%c0_5, %c1, %c0_6, %c0_7] : memref<1x16x16x4xf32, #tpu.memory_space<vmem>>, vector<1x1x16x4xf32>
    %7 = vector.shape_cast %6 : vector<1x1x16x4xf32> to vector<16x4xf32>
    %c37 = arith.constant 37 : index
    %c0_8 = arith.constant 0 : index
    %8 = vector.load %arg13[%c37, %c0_8] : memref<342x4xf32, #tpu.memory_space<vmem>>, vector<16x4xf32>
    tpu.vector_store %arg13[%c37, %c0_8], %7 {strides = array<i32>} : memref<342x4xf32, #tpu.memory_space<vmem>>, vector<16x4xf32>,
    %c0_9 = arith.constant 0 : index
    %c2 = arith.constant 2 : index
    %c0_10 = arith.constant 0 : index
    %c0_11 = arith.constant 0 : index
    %9 = vector.load %arg1[%c0_9, %c2, %c0_10, %c0_11] : memref<1x16x16x4xf32, #tpu.memory_space<vmem>>, vector<1x1x16x4xf32>
    %10 = vector.shape_cast %9 : vector<1x1x16x4xf32> to vector<16x4xf32>
    %c55 = arith.constant 55 : index
    %c0_12 = arith.constant 0 : index
    %11 = vector.load %arg13[%c55, %c0_12] : memref<342x4xf32, #tpu.memory_space<vmem>>, vector<16x4xf32>
    tpu.vector_store %arg13[%c55, %c0_12], %10 {strides = array<i32>} : memref<342x4xf32, #tpu.memory_space<vmem>>, vector<16x4xf32>,
    %c0_13 = arith.constant 0 : index
    %c3 = arith.constant 3 : index
    %c0_14 = arith.constant 0 : index
    %c0_15 = arith.constant 0 : index
    %12 = vector.load %arg1[%c0_13, %c3, %c0_14, %c0_15] : memref<1x16x16x4xf32, #tpu.memory_space<vmem>>, vector<1x1x16x4xf32>
    %13 = vector.shape_cast %12 : vector<1x1x16x4xf32> to vector<16x4xf32>
    %c73 = arith.constant 73 : index
    %c0_16 = arith.constant 0 : index
    %14 = vector.load %arg13[%c73, %c0_16] : memref<342x4xf32, #tpu.memory_space<vmem>>, vector<16x4xf32>
    tpu.vector_store %arg13[%c73, %c0_16], %13 {strides = array<i32>} : memref<342x4xf32, #tpu.memory_space<vmem>>, vector<16x4xf32>,
    %c0_17 = arith.constant 0 : index
    %c4 = arith.constant 4 : index
    %c0_18 = arith.constant 0 : index
    %c0_19 = arith.constant 0 : index
    %15 = vector.load %arg1[%c0_17, %c4, %c0_18, %c0_19] : memref<1x16x16x4xf32, #tpu.memory_space<vmem>>, vector<1x1x16x4xf32>
    %16 = vector.shape_cast %15 : vector<1x1x16x4xf32> to vector<16x4xf32>
    %c91 = arith.constant 91 : index
    %c0_20 = arith.constant 0 : index
    %17 = vector.load %arg13[%c91, %c0_20] : memref<342x4xf32, #tpu.memory_space<vmem>>, vector<16x4xf32>
    tpu.vector_store %arg13[%c91, %c0_20], %16 {strides = array<i32>} : memref<342x4xf32, #tpu.memory_space<vmem>>, vector<16x4xf32>,
    %c0_21 = arith.constant 0 : index
    %c5 = arith.constant 5 : index
    %c0_22 = arith.constant 0 : index
    %c0_23 = arith.constant 0 : index
    %18 = vector.load %arg1[%c0_21, %c5, %c0_22, %c0_23] : memref<1x16x16x4xf32, #tpu.memory_space<vmem>>, vector<1x1x16x4xf32>
    %19 = vector.shape_cast %18 : vector<1x1x16x4xf32> to vector<16x4xf32>
    %c109 = arith.constant 109 : index
    %c0_24 = arith.constant 0 : index
    %20 = vector.load %arg13[%c109, %c0_24] : memref<342x4xf32, #tpu.memory_space<vmem>>, vector<16x4xf32>
    tpu.vector_store %arg13[%c109, %c0_24], %19 {strides = array<i32>} : memref<342x4xf32, #tpu.memory_space<vmem>>, vector<16x4xf32>,
    %c0_25 = arith.constant 0 : index
    %c6 = arith.constant 6 : index
    %c0_26 = arith.constant 0 : index
    %c0_27 = arith.constant 0 : index
    %21 = vector.load %arg1[%c0_25, %c6, %c0_26, %c0_27] : memref<1x16x16x4xf32, #tpu.memory_space<vmem>>, vector<1x1x16x4xf32>
    %22 = vector.shape_cast %21 : vector<1x1x16x4xf32> to vector<16x4xf32>
    %c127 = arith.constant 127 : index
    %c0_28 = arith.constant 0 : index
    %23 = vector.load %arg13[%c127, %c0_28] : memref<342x4xf32, #tpu.memory_space<vmem>>, vector<16x4xf32>
    tpu.vector_store %arg13[%c127, %c0_28], %22 {strides = array<i32>} : memref<342x4xf32, #tpu.memory_space<vmem>>, vector<16x4xf32>,
    %c0_29 = arith.constant 0 : index
    %c7 = arith.constant 7 : index
    %c0_30 = arith.constant 0 : index
    %c0_31 = arith.constant 0 : index
    %24 = vector.load %arg1[%c0_29, %c7, %c0_30, %c0_31] : memref<1x16x16x4xf32, #tpu.memory_space<vmem>>, vector<1x1x16x4xf32>
    %25 = vector.shape_cast %24 : vector<1x1x16x4xf32> to vector<16x4xf32>
    %c145 = arith.constant 145 : index
    %c0_32 = arith.constant 0 : index
    %26 = vector.load %arg13[%c145, %c0_32] : memref<342x4xf32, #tpu.memory_space<vmem>>, vector<16x4xf32>
    tpu.vector_store %arg13[%c145, %c0_32], %25 {strides = array<i32>} : memref<342x4xf32, #tpu.memory_space<vmem>>, vector<16x4xf32>,
    %c0_33 = arith.constant 0 : index
    %c8 = arith.constant 8 : index
    %c0_34 = arith.constant 0 : index
    %c0_35 = arith.constant 0 : index
    %27 = vector.load %arg1[%c0_33, %c8, %c0_34, %c0_35] : memref<1x16x16x4xf32, #tpu.memory_space<vmem>>, vector<1x1x16x4xf32>
    %28 = vector.shape_cast %27 : vector<1x1x16x4xf32> to vector<16x4xf32>
    %c163 = arith.constant 163 : index
    %c0_36 = arith.constant 0 : index
    %29 = vector.load %arg13[%c163, %c0_36] : memref<342x4xf32, #tpu.memory_space<vmem>>, vector<16x4xf32>
    tpu.vector_store %arg13[%c163, %c0_36], %28 {strides = array<i32>} : memref<342x4xf32, #tpu.memory_space<vmem>>, vector<16x4xf32>,
    %c0_37 = arith.constant 0 : index
    %c9 = arith.constant 9 : index
    %c0_38 = arith.constant 0 : index
    %c0_39 = arith.constant 0 : index
    %30 = vector.load %arg1[%c0_37, %c9, %c0_38, %c0_39] : memref<1x16x16x4xf32, #tpu.memory_space<vmem>>, vector<1x1x16x4xf32>
    %31 = vector.shape_cast %30 : vector<1x1x16x4xf32> to vector<16x4xf32>
    %c181 = arith.constant 181 : index
    %c0_40 = arith.constant 0 : index
    %32 = vector.load %arg13[%c181, %c0_40] : memref<342x4xf32, #tpu.memory_space<vmem>>, vector<16x4xf32>
    tpu.vector_store %arg13[%c181, %c0_40], %31 {strides = array<i32>} : memref<342x4xf32, #tpu.memory_space<vmem>>, vector<16x4xf32>,
    %c0_41 = arith.constant 0 : index
    %c10 = arith.constant 10 : index
    %c0_42 = arith.constant 0 : index
    %c0_43 = arith.constant 0 : index
    %33 = vector.load %arg1[%c0_41, %c10, %c0_42, %c0_43] : memref<1x16x16x4xf32, #tpu.memory_space<vmem>>, vector<1x1x16x4xf32>
    %34 = vector.shape_cast %33 : vector<1x1x16x4xf32> to vector<16x4xf32>
    %c199 = arith.constant 199 : index
    %c0_44 = arith.constant 0 : index
    %35 = vector.load %arg13[%c199, %c0_44] : memref<342x4xf32, #tpu.memory_space<vmem>>, vector<16x4xf32>
    tpu.vector_store %arg13[%c199, %c0_44], %34 {strides = array<i32>} : memref<342x4xf32, #tpu.memory_space<vmem>>, vector<16x4xf32>,
    %c0_45 = arith.constant 0 : index
    %c11 = arith.constant 11 : index
    %c0_46 = arith.constant 0 : index
    %c0_47 = arith.constant 0 : index
    %36 = vector.load %arg1[%c0_45, %c11, %c0_46, %c0_47] : memref<1x16x16x4xf32, #tpu.memory_space<vmem>>, vector<1x1x16x4xf32>
    %37 = vector.shape_cast %36 : vector<1x1x16x4xf32> to vector<16x4xf32>
    %c217 = arith.constant 217 : index
    %c0_48 = arith.constant 0 : index
    %38 = vector.load %arg13[%c217, %c0_48] : memref<342x4xf32, #tpu.memory_space<vmem>>, vector<16x4xf32>
    tpu.vector_store %arg13[%c217, %c0_48], %37 {strides = array<i32>} : memref<342x4xf32, #tpu.memory_space<vmem>>, vector<16x4xf32>,
    %c0_49 = arith.constant 0 : index
    %c12 = arith.constant 12 : index
    %c0_50 = arith.constant 0 : index
    %c0_51 = arith.constant 0 : index
    %39 = vector.load %arg1[%c0_49, %c12, %c0_50, %c0_51] : memref<1x16x16x4xf32, #tpu.memory_space<vmem>>, vector<1x1x16x4xf32>
    %40 = vector.shape_cast %39 : vector<1x1x16x4xf32> to vector<16x4xf32>
    %c235 = arith.constant 235 : index
    %c0_52 = arith.constant 0 : index
    %41 = vector.load %arg13[%c235, %c0_52] : memref<342x4xf32, #tpu.memory_space<vmem>>, vector<16x4xf32>
    tpu.vector_store %arg13[%c235, %c0_52], %40 {strides = array<i32>} : memref<342x4xf32, #tpu.memory_space<vmem>>, vector<16x4xf32>,
    %c0_53 = arith.constant 0 : index
    %c13 = arith.constant 13 : index
    %c0_54 = arith.constant 0 : index
    %c0_55 = arith.constant 0 : index
    %42 = vector.load %arg1[%c0_53, %c13, %c0_54, %c0_55] : memref<1x16x16x4xf32, #tpu.memory_space<vmem>>, vector<1x1x16x4xf32>
    %43 = vector.shape_cast %42 : vector<1x1x16x4xf32> to vector<16x4xf32>
    %c253 = arith.constant 253 : index
    %c0_56 = arith.constant 0 : index
    %44 = vector.load %arg13[%c253, %c0_56] : memref<342x4xf32, #tpu.memory_space<vmem>>, vector<16x4xf32>
    tpu.vector_store %arg13[%c253, %c0_56], %43 {strides = array<i32>} : memref<342x4xf32, #tpu.memory_space<vmem>>, vector<16x4xf32>,
    %c0_57 = arith.constant 0 : index
    %c14 = arith.constant 14 : index
    %c0_58 = arith.constant 0 : index
    %c0_59 = arith.constant 0 : index
    %45 = vector.load %arg1[%c0_57, %c14, %c0_58, %c0_59] : memref<1x16x16x4xf32, #tpu.memory_space<vmem>>, vector<1x1x16x4xf32>
    %46 = vector.shape_cast %45 : vector<1x1x16x4xf32> to vector<16x4xf32>
    %c271 = arith.constant 271 : index
    %c0_60 = arith.constant 0 : index
    %47 = vector.load %arg13[%c271, %c0_60] : memref<342x4xf32, #tpu.memory_space<vmem>>, vector<16x4xf32>
    tpu.vector_store %arg13[%c271, %c0_60], %46 {strides = array<i32>} : memref<342x4xf32, #tpu.memory_space<vmem>>, vector<16x4xf32>,
    %c0_61 = arith.constant 0 : index
    %c15 = arith.constant 15 : index
    %c0_62 = arith.constant 0 : index
    %c0_63 = arith.constant 0 : index
    %48 = vector.load %arg1[%c0_61, %c15, %c0_62, %c0_63] : memref<1x16x16x4xf32, #tpu.memory_space<vmem>>, vector<1x1x16x4xf32>
    %49 = vector.shape_cast %48 : vector<1x1x16x4xf32> to vector<16x4xf32>
    %c289 = arith.constant 289 : index
    %c0_64 = arith.constant 0 : index
    %50 = vector.load %arg13[%c289, %c0_64] : memref<342x4xf32, #tpu.memory_space<vmem>>, vector<16x4xf32>
    tpu.vector_store %arg13[%c289, %c0_64], %49 {strides = array<i32>} : memref<342x4xf32, #tpu.memory_space<vmem>>, vector<16x4xf32>,
    %c0_65 = arith.constant 0 : index
    %c0_66 = arith.constant 0 : index
    %51 = vector.load %arg11[%c0_65, %c0_66] : memref<288x1xf32, #tpu.memory_space<vmem>>, vector<288x1xf32>
    %c0_67 = arith.constant 0 : index
    %c0_68 = arith.constant 0 : index
    %52 = vector.load %arg13[%c0_67, %c0_68] : memref<342x4xf32, #tpu.memory_space<vmem>>, vector<288x4xf32>
    %c0_69 = arith.constant 0 : index
    %c0_70 = arith.constant 0 : index
    %c0_71 = arith.constant 0 : index
    %53 = vector.load %arg2[%c0_69, %c0_70, %c0_71] : memref<9x4x8xf32, #tpu.memory_space<vmem>>, vector<1x4x8xf32>
    %54 = vector.shape_cast %53 : vector<1x4x8xf32> to vector<4x8xf32>
    %cst = arith.constant dense<0.000000e+00> : vector<288x8xf32>
    %55 = tpu.matmul %52, %54, %cst {dimension_numbers = #tpu.dot_dimension_numbers<[1], [0], [0], [1], [0, 0, 1, 1], [], []>} : vector<288x4xf32>, vector<4x8xf32>, vector<288x8xf32> -> vector<288x8xf32>
    %c1_72 = arith.constant 1 : index
    %c0_73 = arith.constant 0 : index
    %56 = vector.load %arg13[%c1_72, %c0_73] : memref<342x4xf32, #tpu.memory_space<vmem>>, vector<288x4xf32>
    %c1_74 = arith.constant 1 : index
    %c0_75 = arith.constant 0 : index
    %c0_76 = arith.constant 0 : index
    %57 = vector.load %arg2[%c1_74, %c0_75, %c0_76] : memref<9x4x8xf32, #tpu.memory_space<vmem>>, vector<1x4x8xf32>
    %58 = vector.shape_cast %57 : vector<1x4x8xf32> to vector<4x8xf32>
    %cst_77 = arith.constant dense<0.000000e+00> : vector<288x8xf32>
    %59 = tpu.matmul %56, %58, %cst_77 {dimension_numbers = #tpu.dot_dimension_numbers<[1], [0], [0], [1], [0, 0, 1, 1], [], []>} : vector<288x4xf32>, vector<4x8xf32>, vector<288x8xf32> -> vector<288x8xf32>
    %60 = arith.addf %55, %59 : vector<288x8xf32>
    %c2_78 = arith.constant 2 : index
    %c0_79 = arith.constant 0 : index
    %61 = vector.load %arg13[%c2_78, %c0_79] : memref<342x4xf32, #tpu.memory_space<vmem>>, vector<288x4xf32>
    %c2_80 = arith.constant 2 : index
    %c0_81 = arith.constant 0 : index
    %c0_82 = arith.constant 0 : index
    %62 = vector.load %arg2[%c2_80, %c0_81, %c0_82] : memref<9x4x8xf32, #tpu.memory_space<vmem>>, vector<1x4x8xf32>
    %63 = vector.shape_cast %62 : vector<1x4x8xf32> to vector<4x8xf32>
    %cst_83 = arith.constant dense<0.000000e+00> : vector<288x8xf32>
    %64 = tpu.matmul %61, %63, %cst_83 {dimension_numbers = #tpu.dot_dimension_numbers<[1], [0], [0], [1], [0, 0, 1, 1], [], []>} : vector<288x4xf32>, vector<4x8xf32>, vector<288x8xf32> -> vector<288x8xf32>
    %65 = arith.addf %60, %64 : vector<288x8xf32>
    %c18 = arith.constant 18 : index
    %c0_84 = arith.constant 0 : index
    %66 = vector.load %arg13[%c18, %c0_84] : memref<342x4xf32, #tpu.memory_space<vmem>>, vector<288x4xf32>
    %c3_85 = arith.constant 3 : index
    %c0_86 = arith.constant 0 : index
    %c0_87 = arith.constant 0 : index
    %67 = vector.load %arg2[%c3_85, %c0_86, %c0_87] : memref<9x4x8xf32, #tpu.memory_space<vmem>>, vector<1x4x8xf32>
    %68 = vector.shape_cast %67 : vector<1x4x8xf32> to vector<4x8xf32>
    %cst_88 = arith.constant dense<0.000000e+00> : vector<288x8xf32>
    %69 = tpu.matmul %66, %68, %cst_88 {dimension_numbers = #tpu.dot_dimension_numbers<[1], [0], [0], [1], [0, 0, 1, 1], [], []>} : vector<288x4xf32>, vector<4x8xf32>, vector<288x8xf32> -> vector<288x8xf32>
    %70 = arith.addf %65, %69 : vector<288x8xf32>
    %c19_89 = arith.constant 19 : index
    %c0_90 = arith.constant 0 : index
    %71 = vector.load %arg13[%c19_89, %c0_90] : memref<342x4xf32, #tpu.memory_space<vmem>>, vector<288x4xf32>
    %c4_91 = arith.constant 4 : index
    %c0_92 = arith.constant 0 : index
    %c0_93 = arith.constant 0 : index
    %72 = vector.load %arg2[%c4_91, %c0_92, %c0_93] : memref<9x4x8xf32, #tpu.memory_space<vmem>>, vector<1x4x8xf32>
    %73 = vector.shape_cast %72 : vector<1x4x8xf32> to vector<4x8xf32>
    %cst_94 = arith.constant dense<0.000000e+00> : vector<288x8xf32>
    %74 = tpu.matmul %71, %73, %cst_94 {dimension_numbers = #tpu.dot_dimension_numbers<[1], [0], [0], [1], [0, 0, 1, 1], [], []>} : vector<288x4xf32>, vector<4x8xf32>, vector<288x8xf32> -> vector<288x8xf32>
    %75 = arith.addf %70, %74 : vector<288x8xf32>
    %c20 = arith.constant 20 : index
    %c0_95 = arith.constant 0 : index
    %76 = vector.load %arg13[%c20, %c0_95] : memref<342x4xf32, #tpu.memory_space<vmem>>, vector<288x4xf32>
    %c5_96 = arith.constant 5 : index
    %c0_97 = arith.constant 0 : index
    %c0_98 = arith.constant 0 : index
    %77 = vector.load %arg2[%c5_96, %c0_97, %c0_98] : memref<9x4x8xf32, #tpu.memory_space<vmem>>, vector<1x4x8xf32>
    %78 = vector.shape_cast %77 : vector<1x4x8xf32> to vector<4x8xf32>
    %cst_99 = arith.constant dense<0.000000e+00> : vector<288x8xf32>
    %79 = tpu.matmul %76, %78, %cst_99 {dimension_numbers = #tpu.dot_dimension_numbers<[1], [0], [0], [1], [0, 0, 1, 1], [], []>} : vector<288x4xf32>, vector<4x8xf32>, vector<288x8xf32> -> vector<288x8xf32>
    %80 = arith.addf %75, %79 : vector<288x8xf32>
    %c36 = arith.constant 36 : index
    %c0_100 = arith.constant 0 : index
    %81 = vector.load %arg13[%c36, %c0_100] : memref<342x4xf32, #tpu.memory_space<vmem>>, vector<288x4xf32>
    %c6_101 = arith.constant 6 : index
    %c0_102 = arith.constant 0 : index
    %c0_103 = arith.constant 0 : index
    %82 = vector.load %arg2[%c6_101, %c0_102, %c0_103] : memref<9x4x8xf32, #tpu.memory_space<vmem>>, vector<1x4x8xf32>
    %83 = vector.shape_cast %82 : vector<1x4x8xf32> to vector<4x8xf32>
    %cst_104 = arith.constant dense<0.000000e+00> : vector<288x8xf32>
    %84 = tpu.matmul %81, %83, %cst_104 {dimension_numbers = #tpu.dot_dimension_numbers<[1], [0], [0], [1], [0, 0, 1, 1], [], []>} : vector<288x4xf32>, vector<4x8xf32>, vector<288x8xf32> -> vector<288x8xf32>
    %85 = arith.addf %80, %84 : vector<288x8xf32>
    %c37_105 = arith.constant 37 : index
    %c0_106 = arith.constant 0 : index
    %86 = vector.load %arg13[%c37_105, %c0_106] : memref<342x4xf32, #tpu.memory_space<vmem>>, vector<288x4xf32>
    %c7_107 = arith.constant 7 : index
    %c0_108 = arith.constant 0 : index
    %c0_109 = arith.constant 0 : index
    %87 = vector.load %arg2[%c7_107, %c0_108, %c0_109] : memref<9x4x8xf32, #tpu.memory_space<vmem>>, vector<1x4x8xf32>
    %88 = vector.shape_cast %87 : vector<1x4x8xf32> to vector<4x8xf32>
    %cst_110 = arith.constant dense<0.000000e+00> : vector<288x8xf32>
    %89 = tpu.matmul %86, %88, %cst_110 {dimension_numbers = #tpu.dot_dimension_numbers<[1], [0], [0], [1], [0, 0, 1, 1], [], []>} : vector<288x4xf32>, vector<4x8xf32>, vector<288x8xf32> -> vector<288x8xf32>
    %90 = arith.addf %85, %89 : vector<288x8xf32>
    %c38 = arith.constant 38 : index
    %c0_111 = arith.constant 0 : index
    %91 = vector.load %arg13[%c38, %c0_111] : memref<342x4xf32, #tpu.memory_space<vmem>>, vector<288x4xf32>
    %c8_112 = arith.constant 8 : index
    %c0_113 = arith.constant 0 : index
    %c0_114 = arith.constant 0 : index
    %92 = vector.load %arg2[%c8_112, %c0_113, %c0_114] : memref<9x4x8xf32, #tpu.memory_space<vmem>>, vector<1x4x8xf32>
    %93 = vector.shape_cast %92 : vector<1x4x8xf32> to vector<4x8xf32>
    %cst_115 = arith.constant dense<0.000000e+00> : vector<288x8xf32>
    %94 = tpu.matmul %91, %93, %cst_115 {dimension_numbers = #tpu.dot_dimension_numbers<[1], [0], [0], [1], [0, 0, 1, 1], [], []>} : vector<288x4xf32>, vector<4x8xf32>, vector<288x8xf32> -> vector<288x8xf32>
    %95 = arith.addf %90, %94 : vector<288x8xf32>
    %c0_116 = arith.constant 0 : index
    %c0_117 = arith.constant 0 : index
    %96 = vector.load %arg3[%c0_116, %c0_117] : memref<1x8xf32, #tpu.memory_space<vmem>>, vector<1x8xf32>
    %97 = vector.shape_cast %96 : vector<1x8xf32> to vector<8xf32>
    %98 = vector.shape_cast %97 : vector<8xf32> to vector<1x8xf32>
    %99 = vector.broadcast %98 : vector<1x8xf32> to vector<288x8xf32>
    %100 = arith.mulf %95, %99 : vector<288x8xf32>
    %c0_118 = arith.constant 0 : index
    %c0_119 = arith.constant 0 : index
    %101 = vector.load %arg4[%c0_118, %c0_119] : memref<1x8xf32, #tpu.memory_space<vmem>>, vector<1x8xf32>
    %102 = vector.shape_cast %101 : vector<1x8xf32> to vector<8xf32>
    %103 = vector.shape_cast %102 : vector<8xf32> to vector<1x8xf32>
    %104 = vector.broadcast %103 : vector<1x8xf32> to vector<288x8xf32>
    %105 = arith.addf %100, %104 : vector<288x8xf32>
    %cst_120 = arith.constant 0.000000e+00 : f32
    %106 = vector.broadcast %cst_120 : f32 to vector<288x8xf32>
    %107 = arith.maximumf %105, %106 : vector<288x8xf32>
    %108 = vector.broadcast %51 : vector<288x1xf32> to vector<288x8xf32>
    %109 = arith.mulf %107, %108 : vector<288x8xf32>
    %c19_121 = arith.constant 19 : index
    %c0_122 = arith.constant 0 : index
    %110 = vector.load %arg14[%c19_121, %c0_122] : memref<342x8xf32, #tpu.memory_space<vmem>>, vector<288x8xf32>
    tpu.vector_store %arg14[%c19_121, %c0_122], %109 {strides = array<i32>} : memref<342x8xf32, #tpu.memory_space<vmem>>, vector<288x8xf32>,
    %c0_123 = arith.constant 0 : index
    %c0_124 = arith.constant 0 : index
    %111 = vector.load %arg14[%c0_123, %c0_124] : memref<342x8xf32, #tpu.memory_space<vmem>>, vector<288x8xf32>
    %c0_125 = arith.constant 0 : index
    %c0_126 = arith.constant 0 : index
    %c0_127 = arith.constant 0 : index
    %112 = vector.load %arg5[%c0_125, %c0_126, %c0_127] : memref<9x8x8xf32, #tpu.memory_space<vmem>>, vector<1x8x8xf32>
    %113 = vector.shape_cast %112 : vector<1x8x8xf32> to vector<8x8xf32>
    %cst_128 = arith.constant dense<0.000000e+00> : vector<288x8xf32>
    %114 = tpu.matmul %111, %113, %cst_128 {dimension_numbers = #tpu.dot_dimension_numbers<[1], [0], [0], [1], [0, 0, 1, 1], [], []>} : vector<288x8xf32>, vector<8x8xf32>, vector<288x8xf32> -> vector<288x8xf32>
    %c1_129 = arith.constant 1 : index
    %c0_130 = arith.constant 0 : index
    %115 = vector.load %arg14[%c1_129, %c0_130] : memref<342x8xf32, #tpu.memory_space<vmem>>, vector<288x8xf32>
    %c1_131 = arith.constant 1 : index
    %c0_132 = arith.constant 0 : index
    %c0_133 = arith.constant 0 : index
    %116 = vector.load %arg5[%c1_131, %c0_132, %c0_133] : memref<9x8x8xf32, #tpu.memory_space<vmem>>, vector<1x8x8xf32>
    %117 = vector.shape_cast %116 : vector<1x8x8xf32> to vector<8x8xf32>
    %cst_134 = arith.constant dense<0.000000e+00> : vector<288x8xf32>
    %118 = tpu.matmul %115, %117, %cst_134 {dimension_numbers = #tpu.dot_dimension_numbers<[1], [0], [0], [1], [0, 0, 1, 1], [], []>} : vector<288x8xf32>, vector<8x8xf32>, vector<288x8xf32> -> vector<288x8xf32>
    %119 = arith.addf %114, %118 : vector<288x8xf32>
    %c2_135 = arith.constant 2 : index
    %c0_136 = arith.constant 0 : index
    %120 = vector.load %arg14[%c2_135, %c0_136] : memref<342x8xf32, #tpu.memory_space<vmem>>, vector<288x8xf32>
    %c2_137 = arith.constant 2 : index
    %c0_138 = arith.constant 0 : index
    %c0_139 = arith.constant 0 : index
    %121 = vector.load %arg5[%c2_137, %c0_138, %c0_139] : memref<9x8x8xf32, #tpu.memory_space<vmem>>, vector<1x8x8xf32>
    %122 = vector.shape_cast %121 : vector<1x8x8xf32> to vector<8x8xf32>
    %cst_140 = arith.constant dense<0.000000e+00> : vector<288x8xf32>
    %123 = tpu.matmul %120, %122, %cst_140 {dimension_numbers = #tpu.dot_dimension_numbers<[1], [0], [0], [1], [0, 0, 1, 1], [], []>} : vector<288x8xf32>, vector<8x8xf32>, vector<288x8xf32> -> vector<288x8xf32>
    %124 = arith.addf %119, %123 : vector<288x8xf32>
    %c18_141 = arith.constant 18 : index
    %c0_142 = arith.constant 0 : index
    %125 = vector.load %arg14[%c18_141, %c0_142] : memref<342x8xf32, #tpu.memory_space<vmem>>, vector<288x8xf32>
    %c3_143 = arith.constant 3 : index
    %c0_144 = arith.constant 0 : index
    %c0_145 = arith.constant 0 : index
    %126 = vector.load %arg5[%c3_143, %c0_144, %c0_145] : memref<9x8x8xf32, #tpu.memory_space<vmem>>, vector<1x8x8xf32>
    %127 = vector.shape_cast %126 : vector<1x8x8xf32> to vector<8x8xf32>
    %cst_146 = arith.constant dense<0.000000e+00> : vector<288x8xf32>
    %128 = tpu.matmul %125, %127, %cst_146 {dimension_numbers = #tpu.dot_dimension_numbers<[1], [0], [0], [1], [0, 0, 1, 1], [], []>} : vector<288x8xf32>, vector<8x8xf32>, vector<288x8xf32> -> vector<288x8xf32>
    %129 = arith.addf %124, %128 : vector<288x8xf32>
    %c19_147 = arith.constant 19 : index
    %c0_148 = arith.constant 0 : index
    %130 = vector.load %arg14[%c19_147, %c0_148] : memref<342x8xf32, #tpu.memory_space<vmem>>, vector<288x8xf32>
    %c4_149 = arith.constant 4 : index
    %c0_150 = arith.constant 0 : index
    %c0_151 = arith.constant 0 : index
    %131 = vector.load %arg5[%c4_149, %c0_150, %c0_151] : memref<9x8x8xf32, #tpu.memory_space<vmem>>, vector<1x8x8xf32>
    %132 = vector.shape_cast %131 : vector<1x8x8xf32> to vector<8x8xf32>
    %cst_152 = arith.constant dense<0.000000e+00> : vector<288x8xf32>
    %133 = tpu.matmul %130, %132, %cst_152 {dimension_numbers = #tpu.dot_dimension_numbers<[1], [0], [0], [1], [0, 0, 1, 1], [], []>} : vector<288x8xf32>, vector<8x8xf32>, vector<288x8xf32> -> vector<288x8xf32>
    %134 = arith.addf %129, %133 : vector<288x8xf32>
    %c20_153 = arith.constant 20 : index
    %c0_154 = arith.constant 0 : index
    %135 = vector.load %arg14[%c20_153, %c0_154] : memref<342x8xf32, #tpu.memory_space<vmem>>, vector<288x8xf32>
    %c5_155 = arith.constant 5 : index
    %c0_156 = arith.constant 0 : index
    %c0_157 = arith.constant 0 : index
    %136 = vector.load %arg5[%c5_155, %c0_156, %c0_157] : memref<9x8x8xf32, #tpu.memory_space<vmem>>, vector<1x8x8xf32>
    %137 = vector.shape_cast %136 : vector<1x8x8xf32> to vector<8x8xf32>
    %cst_158 = arith.constant dense<0.000000e+00> : vector<288x8xf32>
    %138 = tpu.matmul %135, %137, %cst_158 {dimension_numbers = #tpu.dot_dimension_numbers<[1], [0], [0], [1], [0, 0, 1, 1], [], []>} : vector<288x8xf32>, vector<8x8xf32>, vector<288x8xf32> -> vector<288x8xf32>
    %139 = arith.addf %134, %138 : vector<288x8xf32>
    %c36_159 = arith.constant 36 : index
    %c0_160 = arith.constant 0 : index
    %140 = vector.load %arg14[%c36_159, %c0_160] : memref<342x8xf32, #tpu.memory_space<vmem>>, vector<288x8xf32>
    %c6_161 = arith.constant 6 : index
    %c0_162 = arith.constant 0 : index
    %c0_163 = arith.constant 0 : index
    %141 = vector.load %arg5[%c6_161, %c0_162, %c0_163] : memref<9x8x8xf32, #tpu.memory_space<vmem>>, vector<1x8x8xf32>
    %142 = vector.shape_cast %141 : vector<1x8x8xf32> to vector<8x8xf32>
    %cst_164 = arith.constant dense<0.000000e+00> : vector<288x8xf32>
    %143 = tpu.matmul %140, %142, %cst_164 {dimension_numbers = #tpu.dot_dimension_numbers<[1], [0], [0], [1], [0, 0, 1, 1], [], []>} : vector<288x8xf32>, vector<8x8xf32>, vector<288x8xf32> -> vector<288x8xf32>
    %144 = arith.addf %139, %143 : vector<288x8xf32>
    %c37_165 = arith.constant 37 : index
    %c0_166 = arith.constant 0 : index
    %145 = vector.load %arg14[%c37_165, %c0_166] : memref<342x8xf32, #tpu.memory_space<vmem>>, vector<288x8xf32>
    %c7_167 = arith.constant 7 : index
    %c0_168 = arith.constant 0 : index
    %c0_169 = arith.constant 0 : index
    %146 = vector.load %arg5[%c7_167, %c0_168, %c0_169] : memref<9x8x8xf32, #tpu.memory_space<vmem>>, vector<1x8x8xf32>
    %147 = vector.shape_cast %146 : vector<1x8x8xf32> to vector<8x8xf32>
    %cst_170 = arith.constant dense<0.000000e+00> : vector<288x8xf32>
    %148 = tpu.matmul %145, %147, %cst_170 {dimension_numbers = #tpu.dot_dimension_numbers<[1], [0], [0], [1], [0, 0, 1, 1], [], []>} : vector<288x8xf32>, vector<8x8xf32>, vector<288x8xf32> -> vector<288x8xf32>
    %149 = arith.addf %144, %148 : vector<288x8xf32>
    %c38_171 = arith.constant 38 : index
    %c0_172 = arith.constant 0 : index
    %150 = vector.load %arg14[%c38_171, %c0_172] : memref<342x8xf32, #tpu.memory_space<vmem>>, vector<288x8xf32>
    %c8_173 = arith.constant 8 : index
    %c0_174 = arith.constant 0 : index
    %c0_175 = arith.constant 0 : index
    %151 = vector.load %arg5[%c8_173, %c0_174, %c0_175] : memref<9x8x8xf32, #tpu.memory_space<vmem>>, vector<1x8x8xf32>
    %152 = vector.shape_cast %151 : vector<1x8x8xf32> to vector<8x8xf32>
    %cst_176 = arith.constant dense<0.000000e+00> : vector<288x8xf32>
    %153 = tpu.matmul %150, %152, %cst_176 {dimension_numbers = #tpu.dot_dimension_numbers<[1], [0], [0], [1], [0, 0, 1, 1], [], []>} : vector<288x8xf32>, vector<8x8xf32>, vector<288x8xf32> -> vector<288x8xf32>
    %154 = arith.addf %149, %153 : vector<288x8xf32>
    %c0_177 = arith.constant 0 : index
    %c0_178 = arith.constant 0 : index
    %155 = vector.load %arg6[%c0_177, %c0_178] : memref<1x8xf32, #tpu.memory_space<vmem>>, vector<1x8xf32>
    %156 = vector.shape_cast %155 : vector<1x8xf32> to vector<8xf32>
    %157 = vector.shape_cast %156 : vector<8xf32> to vector<1x8xf32>
    %158 = vector.broadcast %157 : vector<1x8xf32> to vector<288x8xf32>
    %159 = arith.mulf %154, %158 : vector<288x8xf32>
    %c0_179 = arith.constant 0 : index
    %c0_180 = arith.constant 0 : index
    %160 = vector.load %arg7[%c0_179, %c0_180] : memref<1x8xf32, #tpu.memory_space<vmem>>, vector<1x8xf32>
    %161 = vector.shape_cast %160 : vector<1x8xf32> to vector<8xf32>
    %162 = vector.shape_cast %161 : vector<8xf32> to vector<1x8xf32>
    %163 = vector.broadcast %162 : vector<1x8xf32> to vector<288x8xf32>
    %164 = arith.addf %159, %163 : vector<288x8xf32>
    %cst_181 = arith.constant 0.000000e+00 : f32
    %165 = vector.broadcast %cst_181 : f32 to vector<288x8xf32>
    %166 = arith.maximumf %164, %165 : vector<288x8xf32>
    %167 = vector.broadcast %51 : vector<288x1xf32> to vector<288x8xf32>
    %168 = arith.mulf %166, %167 : vector<288x8xf32>
    %c19_182 = arith.constant 19 : index
    %c0_183 = arith.constant 0 : index
    %169 = vector.load %arg15[%c19_182, %c0_183] : memref<342x8xf32, #tpu.memory_space<vmem>>, vector<288x8xf32>
    tpu.vector_store %arg15[%c19_182, %c0_183], %168 {strides = array<i32>} : memref<342x8xf32, #tpu.memory_space<vmem>>, vector<288x8xf32>,
    %c0_184 = arith.constant 0 : index
    %c0_185 = arith.constant 0 : index
    %170 = vector.load %arg15[%c0_184, %c0_185] : memref<342x8xf32, #tpu.memory_space<vmem>>, vector<288x8xf32>
    %c0_186 = arith.constant 0 : index
    %c0_187 = arith.constant 0 : index
    %c0_188 = arith.constant 0 : index
    %171 = vector.load %arg8[%c0_186, %c0_187, %c0_188] : memref<9x8x8xf32, #tpu.memory_space<vmem>>, vector<1x8x8xf32>
    %172 = vector.shape_cast %171 : vector<1x8x8xf32> to vector<8x8xf32>
    %cst_189 = arith.constant dense<0.000000e+00> : vector<288x8xf32>
    %173 = tpu.matmul %170, %172, %cst_189 {dimension_numbers = #tpu.dot_dimension_numbers<[1], [0], [0], [1], [0, 0, 1, 1], [], []>} : vector<288x8xf32>, vector<8x8xf32>, vector<288x8xf32> -> vector<288x8xf32>
    %c1_190 = arith.constant 1 : index
    %c0_191 = arith.constant 0 : index
    %174 = vector.load %arg15[%c1_190, %c0_191] : memref<342x8xf32, #tpu.memory_space<vmem>>, vector<288x8xf32>
    %c1_192 = arith.constant 1 : index
    %c0_193 = arith.constant 0 : index
    %c0_194 = arith.constant 0 : index
    %175 = vector.load %arg8[%c1_192, %c0_193, %c0_194] : memref<9x8x8xf32, #tpu.memory_space<vmem>>, vector<1x8x8xf32>
    %176 = vector.shape_cast %175 : vector<1x8x8xf32> to vector<8x8xf32>
    %cst_195 = arith.constant dense<0.000000e+00> : vector<288x8xf32>
    %177 = tpu.matmul %174, %176, %cst_195 {dimension_numbers = #tpu.dot_dimension_numbers<[1], [0], [0], [1], [0, 0, 1, 1], [], []>} : vector<288x8xf32>, vector<8x8xf32>, vector<288x8xf32> -> vector<288x8xf32>
    %178 = arith.addf %173, %177 : vector<288x8xf32>
    %c2_196 = arith.constant 2 : index
    %c0_197 = arith.constant 0 : index
    %179 = vector.load %arg15[%c2_196, %c0_197] : memref<342x8xf32, #tpu.memory_space<vmem>>, vector<288x8xf32>
    %c2_198 = arith.constant 2 : index
    %c0_199 = arith.constant 0 : index
    %c0_200 = arith.constant 0 : index
    %180 = vector.load %arg8[%c2_198, %c0_199, %c0_200] : memref<9x8x8xf32, #tpu.memory_space<vmem>>, vector<1x8x8xf32>
    %181 = vector.shape_cast %180 : vector<1x8x8xf32> to vector<8x8xf32>
    %cst_201 = arith.constant dense<0.000000e+00> : vector<288x8xf32>
    %182 = tpu.matmul %179, %181, %cst_201 {dimension_numbers = #tpu.dot_dimension_numbers<[1], [0], [0], [1], [0, 0, 1, 1], [], []>} : vector<288x8xf32>, vector<8x8xf32>, vector<288x8xf32> -> vector<288x8xf32>
    %183 = arith.addf %178, %182 : vector<288x8xf32>
    %c18_202 = arith.constant 18 : index
    %c0_203 = arith.constant 0 : index
    %184 = vector.load %arg15[%c18_202, %c0_203] : memref<342x8xf32, #tpu.memory_space<vmem>>, vector<288x8xf32>
    %c3_204 = arith.constant 3 : index
    %c0_205 = arith.constant 0 : index
    %c0_206 = arith.constant 0 : index
    %185 = vector.load %arg8[%c3_204, %c0_205, %c0_206] : memref<9x8x8xf32, #tpu.memory_space<vmem>>, vector<1x8x8xf32>
    %186 = vector.shape_cast %185 : vector<1x8x8xf32> to vector<8x8xf32>
    %cst_207 = arith.constant dense<0.000000e+00> : vector<288x8xf32>
    %187 = tpu.matmul %184, %186, %cst_207 {dimension_numbers = #tpu.dot_dimension_numbers<[1], [0], [0], [1], [0, 0, 1, 1], [], []>} : vector<288x8xf32>, vector<8x8xf32>, vector<288x8xf32> -> vector<288x8xf32>
    %188 = arith.addf %183, %187 : vector<288x8xf32>
    %c19_208 = arith.constant 19 : index
    %c0_209 = arith.constant 0 : index
    %189 = vector.load %arg15[%c19_208, %c0_209] : memref<342x8xf32, #tpu.memory_space<vmem>>, vector<288x8xf32>
    %c4_210 = arith.constant 4 : index
    %c0_211 = arith.constant 0 : index
    %c0_212 = arith.constant 0 : index
    %190 = vector.load %arg8[%c4_210, %c0_211, %c0_212] : memref<9x8x8xf32, #tpu.memory_space<vmem>>, vector<1x8x8xf32>
    %191 = vector.shape_cast %190 : vector<1x8x8xf32> to vector<8x8xf32>
    %cst_213 = arith.constant dense<0.000000e+00> : vector<288x8xf32>
    %192 = tpu.matmul %189, %191, %cst_213 {dimension_numbers = #tpu.dot_dimension_numbers<[1], [0], [0], [1], [0, 0, 1, 1], [], []>} : vector<288x8xf32>, vector<8x8xf32>, vector<288x8xf32> -> vector<288x8xf32>
    %193 = arith.addf %188, %192 : vector<288x8xf32>
    %c20_214 = arith.constant 20 : index
    %c0_215 = arith.constant 0 : index
    %194 = vector.load %arg15[%c20_214, %c0_215] : memref<342x8xf32, #tpu.memory_space<vmem>>, vector<288x8xf32>
    %c5_216 = arith.constant 5 : index
    %c0_217 = arith.constant 0 : index
    %c0_218 = arith.constant 0 : index
    %195 = vector.load %arg8[%c5_216, %c0_217, %c0_218] : memref<9x8x8xf32, #tpu.memory_space<vmem>>, vector<1x8x8xf32>
    %196 = vector.shape_cast %195 : vector<1x8x8xf32> to vector<8x8xf32>
    %cst_219 = arith.constant dense<0.000000e+00> : vector<288x8xf32>
    %197 = tpu.matmul %194, %196, %cst_219 {dimension_numbers = #tpu.dot_dimension_numbers<[1], [0], [0], [1], [0, 0, 1, 1], [], []>} : vector<288x8xf32>, vector<8x8xf32>, vector<288x8xf32> -> vector<288x8xf32>
    %198 = arith.addf %193, %197 : vector<288x8xf32>
    %c36_220 = arith.constant 36 : index
    %c0_221 = arith.constant 0 : index
    %199 = vector.load %arg15[%c36_220, %c0_221] : memref<342x8xf32, #tpu.memory_space<vmem>>, vector<288x8xf32>
    %c6_222 = arith.constant 6 : index
    %c0_223 = arith.constant 0 : index
    %c0_224 = arith.constant 0 : index
    %200 = vector.load %arg8[%c6_222, %c0_223, %c0_224] : memref<9x8x8xf32, #tpu.memory_space<vmem>>, vector<1x8x8xf32>
    %201 = vector.shape_cast %200 : vector<1x8x8xf32> to vector<8x8xf32>
    %cst_225 = arith.constant dense<0.000000e+00> : vector<288x8xf32>
    %202 = tpu.matmul %199, %201, %cst_225 {dimension_numbers = #tpu.dot_dimension_numbers<[1], [0], [0], [1], [0, 0, 1, 1], [], []>} : vector<288x8xf32>, vector<8x8xf32>, vector<288x8xf32> -> vector<288x8xf32>
    %203 = arith.addf %198, %202 : vector<288x8xf32>
    %c37_226 = arith.constant 37 : index
    %c0_227 = arith.constant 0 : index
    %204 = vector.load %arg15[%c37_226, %c0_227] : memref<342x8xf32, #tpu.memory_space<vmem>>, vector<288x8xf32>
    %c7_228 = arith.constant 7 : index
    %c0_229 = arith.constant 0 : index
    %c0_230 = arith.constant 0 : index
    %205 = vector.load %arg8[%c7_228, %c0_229, %c0_230] : memref<9x8x8xf32, #tpu.memory_space<vmem>>, vector<1x8x8xf32>
    %206 = vector.shape_cast %205 : vector<1x8x8xf32> to vector<8x8xf32>
    %cst_231 = arith.constant dense<0.000000e+00> : vector<288x8xf32>
    %207 = tpu.matmul %204, %206, %cst_231 {dimension_numbers = #tpu.dot_dimension_numbers<[1], [0], [0], [1], [0, 0, 1, 1], [], []>} : vector<288x8xf32>, vector<8x8xf32>, vector<288x8xf32> -> vector<288x8xf32>
    %208 = arith.addf %203, %207 : vector<288x8xf32>
    %c38_232 = arith.constant 38 : index
    %c0_233 = arith.constant 0 : index
    %209 = vector.load %arg15[%c38_232, %c0_233] : memref<342x8xf32, #tpu.memory_space<vmem>>, vector<288x8xf32>
    %c8_234 = arith.constant 8 : index
    %c0_235 = arith.constant 0 : index
    %c0_236 = arith.constant 0 : index
    %210 = vector.load %arg8[%c8_234, %c0_235, %c0_236] : memref<9x8x8xf32, #tpu.memory_space<vmem>>, vector<1x8x8xf32>
    %211 = vector.shape_cast %210 : vector<1x8x8xf32> to vector<8x8xf32>
    %cst_237 = arith.constant dense<0.000000e+00> : vector<288x8xf32>
    %212 = tpu.matmul %209, %211, %cst_237 {dimension_numbers = #tpu.dot_dimension_numbers<[1], [0], [0], [1], [0, 0, 1, 1], [], []>} : vector<288x8xf32>, vector<8x8xf32>, vector<288x8xf32> -> vector<288x8xf32>
    %213 = arith.addf %208, %212 : vector<288x8xf32>
    %c0_238 = arith.constant 0 : index
    %c0_239 = arith.constant 0 : index
    %214 = vector.load %arg9[%c0_238, %c0_239] : memref<1x8xf32, #tpu.memory_space<vmem>>, vector<1x8xf32>
    %215 = vector.shape_cast %214 : vector<1x8xf32> to vector<8xf32>
    %216 = vector.shape_cast %215 : vector<8xf32> to vector<1x8xf32>
    %217 = vector.broadcast %216 : vector<1x8xf32> to vector<288x8xf32>
    %218 = arith.mulf %213, %217 : vector<288x8xf32>
    %c0_240 = arith.constant 0 : index
    %c0_241 = arith.constant 0 : index
    %219 = vector.load %arg10[%c0_240, %c0_241] : memref<1x8xf32, #tpu.memory_space<vmem>>, vector<1x8xf32>
    %220 = vector.shape_cast %219 : vector<1x8xf32> to vector<8xf32>
    %221 = vector.shape_cast %220 : vector<8xf32> to vector<1x8xf32>
    %222 = vector.broadcast %221 : vector<1x8xf32> to vector<288x8xf32>
    %223 = arith.addf %218, %222 : vector<288x8xf32>
    %cst_242 = arith.constant 0.000000e+00 : f32
    %224 = vector.broadcast %cst_242 : f32 to vector<288x8xf32>
    %225 = arith.maximumf %223, %224 : vector<288x8xf32>
    %c19_243 = arith.constant 19 : index
    %c0_244 = arith.constant 0 : index
    %226 = vector.load %arg14[%c19_243, %c0_244] : memref<342x8xf32, #tpu.memory_space<vmem>>, vector<288x8xf32>
    %227 = arith.addf %225, %226 : vector<288x8xf32>
    %c0_245 = arith.constant 0 : index
    %c0_246 = arith.constant 0 : index
    %c0_247 = arith.constant 0 : index
    %228 = vector.load %arg12[%c0_245, %c0_246, %c0_247] : memref<1x288x8xf32, #tpu.memory_space<vmem>>, vector<1x288x8xf32>
    %229 = vector.shape_cast %228 : vector<1x288x8xf32> to vector<288x8xf32>
    %230 = vector.shape_cast %227 : vector<288x8xf32> to vector<1x288x8xf32>
    tpu.vector_store %arg12[%c0_245, %c0_246, %c0_247], %230 {strides = array<i32>} : memref<1x288x8xf32, #tpu.memory_space<vmem>>, vector<1x288x8xf32>,
    return
  }
  func.func @transform_0(%arg0: i32) -> (i32, i32, i32, i32) {
    %c0_i32 = arith.constant 0 : i32
    %c0_i32_0 = arith.constant 0 : i32
    %c0_i32_1 = arith.constant 0 : i32
    %c0_i32_2 = arith.constant 0 : i32
    return %arg0, %c0_i32, %c0_i32_0, %c0_i32_1 : i32, i32, i32, i32
  }
  func.func @transform_1(%arg0: i32) -> (i32, i32, i32) {
    %c0_i32 = arith.constant 0 : i32
    %c0_i32_0 = arith.constant 0 : i32
    %c0_i32_1 = arith.constant 0 : i32
    %c0_i32_2 = arith.constant 0 : i32
    return %c0_i32, %c0_i32_0, %c0_i32_1 : i32, i32, i32
  }
  func.func @transform_2(%arg0: i32) -> (i32, i32) {
    %c0_i32 = arith.constant 0 : i32
    %c0_i32_0 = arith.constant 0 : i32
    %c0_i32_1 = arith.constant 0 : i32
    return %c0_i32, %c0_i32_0 : i32, i32
  }
  func.func @transform_3(%arg0: i32) -> (i32, i32) {
    %c0_i32 = arith.constant 0 : i32
    %c0_i32_0 = arith.constant 0 : i32
    %c0_i32_1 = arith.constant 0 : i32
    return %c0_i32, %c0_i32_0 : i32, i32
  }
  func.func @transform_4(%arg0: i32) -> (i32, i32, i32) {
    %c0_i32 = arith.constant 0 : i32
    %c0_i32_0 = arith.constant 0 : i32
    %c0_i32_1 = arith.constant 0 : i32
    %c0_i32_2 = arith.constant 0 : i32
    return %c0_i32, %c0_i32_0, %c0_i32_1 : i32, i32, i32
  }
  func.func @transform_5(%arg0: i32) -> (i32, i32) {
    %c0_i32 = arith.constant 0 : i32
    %c0_i32_0 = arith.constant 0 : i32
    %c0_i32_1 = arith.constant 0 : i32
    return %c0_i32, %c0_i32_0 : i32, i32
  }
  func.func @transform_6(%arg0: i32) -> (i32, i32) {
    %c0_i32 = arith.constant 0 : i32
    %c0_i32_0 = arith.constant 0 : i32
    %c0_i32_1 = arith.constant 0 : i32
    return %c0_i32, %c0_i32_0 : i32, i32
  }
  func.func @transform_7(%arg0: i32) -> (i32, i32, i32) {
    %c0_i32 = arith.constant 0 : i32
    %c0_i32_0 = arith.constant 0 : i32
    %c0_i32_1 = arith.constant 0 : i32
    %c0_i32_2 = arith.constant 0 : i32
    return %c0_i32, %c0_i32_0, %c0_i32_1 : i32, i32, i32
  }
  func.func @transform_8(%arg0: i32) -> (i32, i32) {
    %c0_i32 = arith.constant 0 : i32
    %c0_i32_0 = arith.constant 0 : i32
    %c0_i32_1 = arith.constant 0 : i32
    return %c0_i32, %c0_i32_0 : i32, i32
  }
  func.func @transform_9(%arg0: i32) -> (i32, i32) {
    %c0_i32 = arith.constant 0 : i32
    %c0_i32_0 = arith.constant 0 : i32
    %c0_i32_1 = arith.constant 0 : i32
    return %c0_i32, %c0_i32_0 : i32, i32
  }
  func.func @transform_10(%arg0: i32) -> (i32, i32) {
    %c0_i32 = arith.constant 0 : i32
    %c0_i32_0 = arith.constant 0 : i32
    %c0_i32_1 = arith.constant 0 : i32
    return %c0_i32, %c0_i32_0 : i32, i32
  }
  func.func @transform_11(%arg0: i32) -> (i32, i32, i32) {
    %c0_i32 = arith.constant 0 : i32
    %c0_i32_0 = arith.constant 0 : i32
    %c0_i32_1 = arith.constant 0 : i32
    return %arg0, %c0_i32, %c0_i32_0 : i32, i32, i32
  }
}

</mosaic_0001>

<bundles_post_ra>
// kernel: convolutional_block.1
= control target key start
LH: loop header
LB: loop body
LE: loop exit
PB: predicated region body
PF: predicated region fallthrough
CT: control target
= control target key end

     0   :  { %s17346_s17 = smov 0   ;;  %s19909_s0 = inlined_call_operand.vmem [shape: f32[2,16,16,4], index: 0, kind: input, shape index: {}]   ;;  %s19910_s1 = inlined_call_operand.vmem [shape: f32[9,4,8], index: 1, kind: input, shape index: {}]   ;;  %s19911_s2 = inlined_call_operand.vmem [shape: f32[1,8], index: 2, kind: input, shape index: {}]   ;;  %s19912_s3 = inlined_call_operand.vmem [shape: f32[1,8], index: 3, kind: input, shape index: {}]   ;;  %s19913_s4 = inlined_call_operand.vmem [shape: f32[9,8,8], index: 4, kind: input, shape index: {}]   ;;  %s19914_s5 = inlined_call_operand.vmem [shape: f32[1,8], index: 5, kind: input, shape index: {}]   ;;  %s19915_s6 = inlined_call_operand.vmem [shape: f32[1,8], index: 6, kind: input, shape index: {}]   ;;  %s19916_s7 = inlined_call_operand.vmem [shape: f32[9,8,8], index: 7, kind: input, shape index: {}]   ;;  %s19917_s8 = inlined_call_operand.vmem [shape: f32[1,8], index: 8, kind: input, shape index: {}]   ;;  %s19918_s9 = inlined_call_operand.vmem [shape: f32[1,8], index: 9, kind: input, shape index: {}]   ;;  %s19919_s10 = inlined_call_operand.vmem [shape: f32[288,1], index: 10, kind: input, shape index: {}]   ;;  %s19920_s11 = inlined_call_operand.vmem [shape: f32[2,288,8], index: 11, kind: output, shape index: {}]  }
   0x1 LB: > { %s12832_s18 = sadd.s32 4294967295, %s17282_s17   ;;  %p12836_p0 = scmp.ge.s32.totalorder %s17282_s17, 1  ;;  %s17282_s17 = sphi %s17346_s17, %s21_s17  }
   0x2   : > { %p337_p1 = scmp.lt.s32.totalorder %s17282_s17, 3 }
   0x4   : > { %p338_p2 = pnand %p12836_p0, %p337_p1 }
   0x6   : > { %341 = sbr.rel (%p338_p2) target bundleno = 2241 (0x8c1), region = 64 }
   0xd   : > { %p377_p3 = scmp.lt.s32.totalorder %s12832_s18, 1  ;;  %p12840_p4 = scmp.ne.s32.totalorder %s12832_s18, 0 }
   0xe   : > { %vm391_vm0 = vcmask (!%p12840_p4), 31744   ;;  %vm436_vm1 = vcmask (!%p12840_p4), 64512   ;;  %v17284_v0 = vmov (!%p12840_p4), 0.0  }
   0xf   : > { %s378_s19 = scalar_select %p377_p3, %s12832_s18, 1 }
  0x10   : > { %390 = sbr.rel (%p12840_p4) target bundleno = 78 (0x4e), region = 68  ;;  %392 = vst.msk [vmem:[#allocation2] sm:$0xff] (!%p12840_p4), %vm391_vm0, %v17284_v0  ;;  %393 = vst.msk [vmem:[#allocation2 + $0x8] sm:$0xff] (!%p12840_p4), %vm391_vm0, %v17284_v0 }
  0x11   : > { %s13884_s20 = sshll.u32 %s378_s19, 8  ;;  %s17262_s21 = smul.u32 288, %s378_s19  ;;  %394 = vst.msk [vmem:[#allocation2 + $0x10] sm:$0xff] (!%p12840_p4), %vm391_vm0, %v17284_v0  ;;  %395 = vst.msk [vmem:[#allocation2 + $0x18] sm:$0xff] (!%p12840_p4), %vm391_vm0, %v17284_v0 }
  0x12   : > { %s17357_s24 = scalar_lea.vmem %s19909_s0, %s13884_s20  ;;  %396 = vst.msk [vmem:[#allocation2 + $0x20] sm:$0xff] (!%p12840_p4), %vm391_vm0, %v17284_v0  ;;  %397 = vst.msk [vmem:[#allocation2 + $0x28] sm:$0xff] (!%p12840_p4), %vm391_vm0, %v17284_v0 }
  0x13   : > { %s17362_s27 = scalar_lea.vmem %s19920_s11, %s17262_s21  ;;  %398 = vst.msk [vmem:[#allocation2 + $0x30] sm:$0xff] (!%p12840_p4), %vm391_vm0, %v17284_v0  ;;  %399 = vst.msk [vmem:[#allocation2 + $0x38] sm:$0xff] (!%p12840_p4), %vm391_vm0, %v17284_v0 }
  0x14   : > { %400 = vst.msk [vmem:[#allocation2 + $0x40] sm:$0xff] (!%p12840_p4), %vm391_vm0, %v17284_v0  ;;  %401 = vst.msk [vmem:[#allocation2 + $0x48] sm:$0xff] (!%p12840_p4), %vm391_vm0, %v17284_v0 }
  0x15   : > { %402 = vst.msk [vmem:[#allocation2 + $0x50] sm:$0xff] (!%p12840_p4), %vm391_vm0, %v17284_v0  ;;  %403 = vst.msk [vmem:[#allocation2 + $0x58] sm:$0xff] (!%p12840_p4), %vm391_vm0, %v17284_v0 }
  0x16   : > { %404 = vst.msk [vmem:[#allocation2 + $0x60] sm:$0xff] (!%p12840_p4), %vm391_vm0, %v17284_v0  ;;  %405 = vst.msk [vmem:[#allocation2 + $0x68] sm:$0xff] (!%p12840_p4), %vm391_vm0, %v17284_v0 }
  0x17   : > { %406 = vst.msk [vmem:[#allocation2 + $0x70] sm:$0xff] %vm391_vm0, %v17284_v0  ;;  %407 = vst.msk [vmem:[#allocation2 + $0x78] sm:$0xff] %vm391_vm0, %v17284_v0 }
  0x18   : > { %408 = vst.msk [vmem:[#allocation2 + $0x80] sm:$0xff] %vm391_vm0, %v17284_v0  ;;  %409 = vst.msk [vmem:[#allocation2 + $0x88] sm:$0xff] %vm391_vm0, %v17284_v0 }
  0x19   : > { %410 = vst.msk [vmem:[#allocation2 + $0x90] sm:$0xff] %vm391_vm0, %v17284_v0  ;;  %411 = vst.msk [vmem:[#allocation2 + $0x98] sm:$0xff] %vm391_vm0, %v17284_v0 }
  0x1a   : > { %412 = vst.msk [vmem:[#allocation2 + $0xa0] sm:$0xff] %vm391_vm0, %v17284_v0  ;;  %413 = vst.msk [vmem:[#allocation2 + $0xa8] sm:$0xff] %vm391_vm0, %v17284_v0 }
  0x1b   : > { %414 = vst.msk [vmem:[#allocation2 + $0xb0] sm:$0xff] %vm391_vm0, %v17284_v0  ;;  %415 = vst.msk [vmem:[#allocation2 + $0xb8] sm:$0xff] %vm391_vm0, %v17284_v0 }
  0x1c   : > { %416 = vst.msk [vmem:[#allocation2 + $0xc0] sm:$0xff] %vm391_vm0, %v17284_v0  ;;  %417 = vst.msk [vmem:[#allocation2 + $0xc8] sm:$0xff] %vm391_vm0, %v17284_v0 }
  0x1d   : > { %418 = vst.msk [vmem:[#allocation2 + $0xd0] sm:$0xff] %vm391_vm0, %v17284_v0  ;;  %419 = vst.msk [vmem:[#allocation2 + $0xd8] sm:$0xff] %vm391_vm0, %v17284_v0 }
  0x1e   : > { %420 = vst.msk [vmem:[#allocation2 + $0xe0] sm:$0xff] %vm391_vm0, %v17284_v0  ;;  %421 = vst.msk [vmem:[#allocation2 + $0xe8] sm:$0xff] %vm391_vm0, %v17284_v0 }
  0x1f   : > { %422 = vst.msk [vmem:[#allocation2 + $0xf0] sm:$0xff] %vm391_vm0, %v17284_v0  ;;  %423 = vst.msk [vmem:[#allocation2 + $0xf8] sm:$0xff] %vm391_vm0, %v17284_v0 }
  0x20   : > { %424 = vst.msk [vmem:[#allocation2 + $0x100] sm:$0xff] %vm391_vm0, %v17284_v0  ;;  %425 = vst.msk [vmem:[#allocation2 + $0x108] sm:$0xff] %vm391_vm0, %v17284_v0 }
  0x21   : > { %426 = vst.msk [vmem:[#allocation2 + $0x110] sm:$0xff] %vm391_vm0, %v17284_v0  ;;  %427 = vst.msk [vmem:[#allocation2 + $0x118] sm:$0xff] %vm391_vm0, %v17284_v0 }
  0x22   : > { %428 = vst.msk [vmem:[#allocation2 + $0x120] sm:$0xff] %vm391_vm0, %v17284_v0  ;;  %429 = vst.msk [vmem:[#allocation2 + $0x128] sm:$0xff] %vm391_vm0, %v17284_v0 }
  0x23   : > { %430 = vst.msk [vmem:[#allocation2 + $0x130] sm:$0xff] %vm391_vm0, %v17284_v0  ;;  %431 = vst.msk [vmem:[#allocation2 + $0x138] sm:$0xff] %vm391_vm0, %v17284_v0 }
  0x24   : > { %432 = vst.msk [vmem:[#allocation2 + $0x140] sm:$0xff] %vm391_vm0, %v17284_v0 }
  0x25   : > { %437 = vst.msk [vmem:[#allocation3] sm:$0xff] %vm436_vm1, %v17284_v0  ;;  %438 = vst.msk [vmem:[#allocation3 + $0x8] sm:$0xff] %vm436_vm1, %v17284_v0 }
  0x26   : > { %439 = vst.msk [vmem:[#allocation3 + $0x10] sm:$0xff] %vm436_vm1, %v17284_v0  ;;  %440 = vst.msk [vmem:[#allocation3 + $0x18] sm:$0xff] %vm436_vm1, %v17284_v0 }
  0x27   : > { %441 = vst.msk [vmem:[#allocation3 + $0x20] sm:$0xff] %vm436_vm1, %v17284_v0  ;;  %442 = vst.msk [vmem:[#allocation3 + $0x28] sm:$0xff] %vm436_vm1, %v17284_v0 }
  0x28   : > { %443 = vst.msk [vmem:[#allocation3 + $0x30] sm:$0xff] %vm436_vm1, %v17284_v0  ;;  %444 = vst.msk [vmem:[#allocation3 + $0x38] sm:$0xff] %vm436_vm1, %v17284_v0 }
  0x29   : > { %445 = vst.msk [vmem:[#allocation3 + $0x40] sm:$0xff] %vm436_vm1, %v17284_v0  ;;  %446 = vst.msk [vmem:[#allocation3 + $0x48] sm:$0xff] %vm436_vm1, %v17284_v0 }
  0x2a   : > { %447 = vst.msk [vmem:[#allocation3 + $0x50] sm:$0xff] %vm436_vm1, %v17284_v0  ;;  %448 = vst.msk [vmem:[#allocation3 + $0x58] sm:$0xff] %vm436_vm1, %v17284_v0 }
  0x2b   : > { %449 = vst.msk [vmem:[#allocation3 + $0x60] sm:$0xff] %vm436_vm1, %v17284_v0  ;;  %450 = vst.msk [vmem:[#allocation3 + $0x68] sm:$0xff] %vm436_vm1, %v17284_v0 }
  0x2c   : > { %451 = vst.msk [vmem:[#allocation3 + $0x70] sm:$0xff] %vm436_vm1, %v17284_v0  ;;  %452 = vst.msk [vmem:[#allocation3 + $0x78] sm:$0xff] %vm436_vm1, %v17284_v0 }
  0x2d   : > { %453 = vst.msk [vmem:[#allocation3 + $0x80] sm:$0xff] %vm436_vm1, %v17284_v0  ;;  %454 = vst.msk [vmem:[#allocation3 + $0x88] sm:$0xff] %vm436_vm1, %v17284_v0 }
  0x2e   : > { %455 = vst.msk [vmem:[#allocation3 + $0x90] sm:$0xff] %vm436_vm1, %v17284_v0  ;;  %456 = vst.msk [vmem:[#allocation3 + $0x98] sm:$0xff] %vm436_vm1, %v17284_v0 }
  0x2f   : > { %457 = vst.msk [vmem:[#allocation3 + $0xa0] sm:$0xff] %vm436_vm1, %v17284_v0  ;;  %458 = vst.msk [vmem:[#allocation3 + $0xa8] sm:$0xff] %vm436_vm1, %v17284_v0 }
  0x30   : > { %459 = vst.msk [vmem:[#allocation3 + $0xb0] sm:$0xff] %vm436_vm1, %v17284_v0  ;;  %460 = vst.msk [vmem:[#allocation3 + $0xb8] sm:$0xff] %vm436_vm1, %v17284_v0 }
  0x31   : > { %461 = vst.msk [vmem:[#allocation3 + $0xc0] sm:$0xff] %vm436_vm1, %v17284_v0  ;;  %462 = vst.msk [vmem:[#allocation3 + $0xc8] sm:$0xff] %vm436_vm1, %v17284_v0 }
  0x32   : > { %463 = vst.msk [vmem:[#allocation3 + $0xd0] sm:$0xff] %vm436_vm1, %v17284_v0  ;;  %464 = vst.msk [vmem:[#allocation3 + $0xd8] sm:$0xff] %vm436_vm1, %v17284_v0 }
  0x33   : > { %465 = vst.msk [vmem:[#allocation3 + $0xe0] sm:$0xff] %vm436_vm1, %v17284_v0  ;;  %466 = vst.msk [vmem:[#allocation3 + $0xe8] sm:$0xff] %vm436_vm1, %v17284_v0 }
  0x34   : > { %467 = vst.msk [vmem:[#allocation3 + $0xf0] sm:$0xff] %vm436_vm1, %v17284_v0  ;;  %468 = vst.msk [vmem:[#allocation3 + $0xf8] sm:$0xff] %vm436_vm1, %v17284_v0 }
  0x35   : > { %469 = vst.msk [vmem:[#allocation3 + $0x100] sm:$0xff] %vm436_vm1, %v17284_v0  ;;  %470 = vst.msk [vmem:[#allocation3 + $0x108] sm:$0xff] %vm436_vm1, %v17284_v0 }
  0x36   : > { %471 = vst.msk [vmem:[#allocation3 + $0x110] sm:$0xff] %vm436_vm1, %v17284_v0  ;;  %472 = vst.msk [vmem:[#allocation3 + $0x118] sm:$0xff] %vm436_vm1, %v17284_v0 }
  0x37   : > { %473 = vst.msk [vmem:[#allocation3 + $0x120] sm:$0xff] %vm436_vm1, %v17284_v0  ;;  %474 = vst.msk [vmem:[#allocation3 + $0x128] sm:$0xff] %vm436_vm1, %v17284_v0 }
  0x38   : > { %475 = vst.msk [vmem:[#allocation3 + $0x130] sm:$0xff] %vm436_vm1, %v17284_v0  ;;  %476 = vst.msk [vmem:[#allocation3 + $0x138] sm:$0xff] %vm436_vm1, %v17284_v0 }
  0x39   : > { %477 = vst.msk [vmem:[#allocation3 + $0x140] sm:$0xff] %vm436_vm1, %v17284_v0  ;;  %481 = vst.msk [vmem:[#allocation4] sm:$0xff] %vm436_vm1, %v17284_v0 }
  0x3a   : > { %482 = vst.msk [vmem:[#allocation4 + $0x8] sm:$0xff] %vm436_vm1, %v17284_v0  ;;  %483 = vst.msk [vmem:[#allocation4 + $0x10] sm:$0xff] %vm436_vm1, %v17284_v0 }
  0x3b   : > { %484 = vst.msk [vmem:[#allocation4 + $0x18] sm:$0xff] %vm436_vm1, %v17284_v0  ;;  %485 = vst.msk [vmem:[#allocation4 + $0x20] sm:$0xff] %vm436_vm1, %v17284_v0 }
  0x3c   : > { %486 = vst.msk [vmem:[#allocation4 + $0x28] sm:$0xff] %vm436_vm1, %v17284_v0  ;;  %487 = vst.msk [vmem:[#allocation4 + $0x30] sm:$0xff] %vm436_vm1, %v17284_v0 }
  0x3d   : > { %488 = vst.msk [vmem:[#allocation4 + $0x38] sm:$0xff] %vm436_vm1, %v17284_v0  ;;  %489 = vst.msk [vmem:[#allocation4 + $0x40] sm:$0xff] %vm436_vm1, %v17284_v0 }
  0x3e   : > { %490 = vst.msk [vmem:[#allocation4 + $0x48] sm:$0xff] %vm436_vm1, %v17284_v0  ;;  %491 = vst.msk [vmem:[#allocation4 + $0x50] sm:$0xff] %vm436_vm1, %v17284_v0 }
  0x3f   : > { %492 = vst.msk [vmem:[#allocation4 + $0x58] sm:$0xff] %vm436_vm1, %v17284_v0  ;;  %493 = vst.msk [vmem:[#allocation4 + $0x60] sm:$0xff] %vm436_vm1, %v17284_v0 }
  0x40   : > { %494 = vst.msk [vmem:[#allocation4 + $0x68] sm:$0xff] %vm436_vm1, %v17284_v0  ;;  %495 = vst.msk [vmem:[#allocation4 + $0x70] sm:$0xff] %vm436_vm1, %v17284_v0 }
  0x41   : > { %496 = vst.msk [vmem:[#allocation4 + $0x78] sm:$0xff] %vm436_vm1, %v17284_v0  ;;  %497 = vst.msk [vmem:[#allocation4 + $0x80] sm:$0xff] %vm436_vm1, %v17284_v0 }
  0x42   : > { %498 = vst.msk [vmem:[#allocation4 + $0x88] sm:$0xff] %vm436_vm1, %v17284_v0  ;;  %499 = vst.msk [vmem:[#allocation4 + $0x90] sm:$0xff] %vm436_vm1, %v17284_v0 }
  0x43   : > { %500 = vst.msk [vmem:[#allocation4 + $0x98] sm:$0xff] %vm436_vm1, %v17284_v0  ;;  %501 = vst.msk [vmem:[#allocation4 + $0xa0] sm:$0xff] %vm436_vm1, %v17284_v0 }
  0x44   : > { %502 = vst.msk [vmem:[#allocation4 + $0xa8] sm:$0xff] %vm436_vm1, %v17284_v0  ;;  %503 = vst.msk [vmem:[#allocation4 + $0xb0] sm:$0xff] %vm436_vm1, %v17284_v0 }
  0x45   : > { %504 = vst.msk [vmem:[#allocation4 + $0xb8] sm:$0xff] %vm436_vm1, %v17284_v0  ;;  %505 = vst.msk [vmem:[#allocation4 + $0xc0] sm:$0xff] %vm436_vm1, %v17284_v0 }
  0x46   : > { %506 = vst.msk [vmem:[#allocation4 + $0xc8] sm:$0xff] %vm436_vm1, %v17284_v0  ;;  %507 = vst.msk [vmem:[#allocation4 + $0xd0] sm:$0xff] %vm436_vm1, %v17284_v0 }
  0x47   : > { %508 = vst.msk [vmem:[#allocation4 + $0xd8] sm:$0xff] %vm436_vm1, %v17284_v0  ;;  %509 = vst.msk [vmem:[#allocation4 + $0xe0] sm:$0xff] %vm436_vm1, %v17284_v0 }
  0x48   : > { %510 = vst.msk [vmem:[#allocation4 + $0xe8] sm:$0xff] %vm436_vm1, %v17284_v0  ;;  %511 = vst.msk [vmem:[#allocation4 + $0xf0] sm:$0xff] %vm436_vm1, %v17284_v0 }
  0x49   : > { %512 = vst.msk [vmem:[#allocation4 + $0xf8] sm:$0xff] %vm436_vm1, %v17284_v0  ;;  %513 = vst.msk [vmem:[#allocation4 + $0x100] sm:$0xff] %vm436_vm1, %v17284_v0 }
  0x4a   : > { %514 = vst.msk [vmem:[#allocation4 + $0x108] sm:$0xff] %vm436_vm1, %v17284_v0  ;;  %515 = vst.msk [vmem:[#allocation4 + $0x110] sm:$0xff] %vm436_vm1, %v17284_v0 }
  0x4b   : > { %516 = vst.msk [vmem:[#allocation4 + $0x118] sm:$0xff] %vm436_vm1, %v17284_v0  ;;  %517 = vst.msk [vmem:[#allocation4 + $0x120] sm:$0xff] %vm436_vm1, %v17284_v0 }
  0x4c   : > { %518 = vst.msk [vmem:[#allocation4 + $0x128] sm:$0xff] %vm436_vm1, %v17284_v0  ;;  %519 = vst.msk [vmem:[#allocation4 + $0x130] sm:$0xff] %vm436_vm1, %v17284_v0 }
  0x4d   : > { %520 = vst.msk [vmem:[#allocation4 + $0x138] sm:$0xff] %vm436_vm1, %v17284_v0  ;;  %521 = vst.msk [vmem:[#allocation4 + $0x140] sm:$0xff] %vm436_vm1, %v17284_v0 }
  0x4e PF: > { %v12871_v1 = vld [vmem:[%s19910_s1 + $0x4] sm:$0xf]  ;;  %vm823_vm2 = vcmask 1043456   ;;  %vm526_vm3 = vcmask 31744   ;;  %v17618_v4 = vld [vmem:[%s19910_s1 + $0x10] sm:$0xf] }
  0x4f   : > { %v677_v2 = vld [vmem:[#allocation2 + $0x1] sm:$0xff]  ;;  %v678_v3 = vld [vmem:[#allocation2 + $0x9] sm:$0xff]  ;;  %14884 = vmatprep.subr.msk.mxu1 %vm823_vm2, %v12871_v1  ;;  %15108 = vmatprep.subr.msk.mxu0 %vm823_vm2, %v17618_v4  ;;  %v13060_v7 = vld [vmem:[%s19910_s1 + $0x14] sm:$0xf]  ;;  %vm4776_vm4 = vcmask 64512  }
  0x50   : > { %14886 = vmatprep.mubr.msk.f32.mxu1 %vm526_vm3, %v677_v2  ;;  %v524_v5 = vld [vmem:[%s17357_s24] sm:$0xff]  ;;  %14885 = vmatpush3.msk.msra.mxu1 %vm823_vm2, %v12871_v1  ;;  %v525_v8 = vld [vmem:[%s17357_s24 + $0x8] sm:$0xff]  ;;  %v12841_v9 = vld [vmem:[%s17357_s24 + $0x10] sm:$0xff] }
  0x51   : > { %v676_v6 = vld [vmem:[%s19910_s1] sm:$0xf]  ;;  %527 = vst.msk [vmem:[#allocation2 + $0x13] sm:$0xff] %vm526_vm3, %v524_v5  ;;  %14887 = vmatmul.mubr.msk.f32.vlgmr.msra.gmra.mrb[0].mxu1 %vm526_vm3, %v678_v3  ;;  %15109 = vmatpush3.msk.msra.mxu0 %vm823_vm2, %v17618_v4  ;;  %528 = vst.msk [vmem:[#allocation2 + $0x1b] sm:$0xff] %vm526_vm3, %v525_v8  ;;  %v12842_v10 = vld [vmem:[%s17357_s24 + $0x18] sm:$0xff] }
  0x52   : > { %532 = vst.msk [vmem:[#allocation2 + $0x25] sm:$0xff] %vm526_vm3, %v12841_v9  ;;  %v12843_v11 = vld [vmem:[%s17357_s24 + $0x20] sm:$0xff]  ;;  %v12844_v12 = vld [vmem:[%s17357_s24 + $0x28] sm:$0xff]  ;;  %14940 = vmatprep.subr.msk.mxu1 %vm823_vm2, %v676_v6  ;;  %15164 = vmatprep.subr.msk.mxu0 %vm823_vm2, %v13060_v7  ;;  %533 = vst.msk [vmem:[#allocation2 + $0x2d] sm:$0xff] %vm526_vm3, %v12842_v10 }
  0x53   : > { %537 = vst.msk [vmem:[#allocation2 + $0x37] sm:$0xff] %vm526_vm3, %v12843_v11  ;;  %538 = vst.msk [vmem:[#allocation2 + $0x3f] sm:$0xff] %vm526_vm3, %v12844_v12  ;;  %v12845_v13 = vld [vmem:[%s17357_s24 + $0x30] sm:$0xff]  ;;  %v12846_v14 = vld [vmem:[%s17357_s24 + $0x38] sm:$0xff]  ;;  %14941 = vmatpush3.msk.msra.mxu1 %vm823_vm2, %v676_v6 }
  0x54   : > { %v12847_v15 = vld [vmem:[%s17357_s24 + $0x40] sm:$0xff]  ;;  %542 = vst.msk [vmem:[#allocation2 + $0x49] sm:$0xff] %vm526_vm3, %v12845_v13  ;;  %543 = vst.msk [vmem:[#allocation2 + $0x51] sm:$0xff] %vm526_vm3, %v12846_v14  ;;  %v12848_v16 = vld [vmem:[%s17357_s24 + $0x48] sm:$0xff] }
  0x55   : > { %547 = vst.msk [vmem:[#allocation2 + $0x5b] sm:$0xff] %vm526_vm3, %v12847_v15  ;;  %v12849_v17 = vld [vmem:[%s17357_s24 + $0x50] sm:$0xff]  ;;  %v12850_v18 = vld [vmem:[%s17357_s24 + $0x58] sm:$0xff]  ;;  %548 = vst.msk [vmem:[#allocation2 + $0x63] sm:$0xff] %vm526_vm3, %v12848_v16 }
  0x56   : > { %552 = vst.msk [vmem:[#allocation2 + $0x6d] sm:$0xff] %vm526_vm3, %v12849_v17  ;;  %553 = vst.msk [vmem:[#allocation2 + $0x75] sm:$0xff] %vm526_vm3, %v12850_v18  ;;  %v12851_v19 = vld [vmem:[%s17357_s24 + $0x60] sm:$0xff]  ;;  %v12852_v20 = vld [vmem:[%s17357_s24 + $0x68] sm:$0xff] }
  0x57   : > { %v12853_v21 = vld [vmem:[%s17357_s24 + $0x70] sm:$0xff]  ;;  %557 = vst.msk [vmem:[#allocation2 + $0x7f] sm:$0xff] %vm526_vm3, %v12851_v19  ;;  %558 = vst.msk [vmem:[#allocation2 + $0x87] sm:$0xff] %vm526_vm3, %v12852_v20  ;;  %v12854_v22 = vld [vmem:[%s17357_s24 + $0x78] sm:$0xff] }
  0x58   : > { %562 = vst.msk [vmem:[#allocation2 + $0x91] sm:$0xff] %vm526_vm3, %v12853_v21  ;;  %v12855_v23 = vld [vmem:[%s17357_s24 + $0x80] sm:$0xff]  ;;  %563 = vst.msk [vmem:[#allocation2 + $0x99] sm:$0xff] %vm526_vm3, %v12854_v22  ;;  %v17672_v24 = vld [vmem:[%s19910_s1 + $0x18] sm:$0xf] }
  0x59   : > { %567 = vst.msk [vmem:[#allocation2 + $0xa3] sm:$0xff] %vm526_vm3, %v12855_v23  ;;  %v12856_v25 = vld [vmem:[%s17357_s24 + $0x88] sm:$0xff]  ;;  %v12857_v26 = vld [vmem:[%s17357_s24 + $0x90] sm:$0xff]  ;;  %v12858_v27 = vld [vmem:[%s17357_s24 + $0x98] sm:$0xff] }
  0x5a   : > { %v679_v28 = vld [vmem:[#allocation2 + $0x11] sm:$0xff]  ;;  %568 = vst.msk [vmem:[#allocation2 + $0xab] sm:$0xff] %vm526_vm3, %v12856_v25  ;;  %572 = vst.msk [vmem:[#allocation2 + $0xb5] sm:$0xff] %vm526_vm3, %v12857_v26  ;;  %v12859_v30 = vld [vmem:[%s17357_s24 + $0xa0] sm:$0xff] }
  0x5b   : > { %v2288_v29 = vld [vmem:[#allocation2 + $0x13] sm:$0xff]  ;;  %573 = vst.msk [vmem:[#allocation2 + $0xbd] sm:$0xff] %vm526_vm3, %v12858_v27  ;;  %14889 = vmatprep.mubr.msk.f32.mxu1 %vm526_vm3, %v679_v28  ;;  %v2289_v32 = vld [vmem:[#allocation2 + $0x1b] sm:$0xff]  ;;  %577 = vst.msk [vmem:[#allocation2 + $0xc7] sm:$0xff] %vm526_vm3, %v12859_v30 }
  0x5c   : > { %15110 = vmatprep.mubr.msk.f32.mxu0 %vm526_vm3, %v2288_v29  ;;  %v680_v31 = vld [vmem:[#allocation2 + $0x19] sm:$0xff]  ;;  %v681_v33 = vld [vmem:[#allocation2 + $0x21] sm:$0xff]  ;;  %v682_v35 = vld [vmem:[#allocation2 + $0x29] sm:$0xff] }
  0x5d   : > { %14890 = vmatmul.mubr.msk.f32.gmra.mrb[2].mxu1 %vm526_vm3, %v680_v31  ;;  %15111 = vmatmul.mubr.msk.f32.vlgmr.msra.gmra.mrb[0].mxu0 %vm526_vm3, %v2289_v32  ;;  %v2290_v34 = vld [vmem:[#allocation2 + $0x23] sm:$0xff]  ;;  %v2291_v36 = vld [vmem:[#allocation2 + $0x2b] sm:$0xff]  ;;  %v2292_v38 = vld [vmem:[#allocation2 + $0x33] sm:$0xff] }
  0x5e   : > { %15165 = vmatpush3.msk.msra.mxu0 %vm823_vm2, %v13060_v7  ;;  %14892 = vmatprep.mubr.msk.f32.mxu1 %vm526_vm3, %v681_v33  ;;  %v683_v37 = vld [vmem:[#allocation2 + $0x31] sm:$0xff]  ;;  %v684_v39 = vld [vmem:[#allocation2 + $0x39] sm:$0xff]  ;;  %v685_v41 = vld [vmem:[#allocation2 + $0x41] sm:$0xff] }
  0x5f   : > { %15113 = vmatprep.mubr.msk.f32.mxu0 %vm526_vm3, %v2290_v34  ;;  %15220 = vmatprep.subr.msk.mxu0 %vm823_vm2, %v17672_v24  ;;  %v2293_v40 = vld [vmem:[#allocation2 + $0x3b] sm:$0xff]  ;;  %v2294_v42 = vld [vmem:[#allocation2 + $0x43] sm:$0xff]  ;;  %v2295_v44 = vld [vmem:[#allocation2 + $0x4b] sm:$0xff] }
  0x60   : > { %v686_v43 = vld [vmem:[#allocation2 + $0x49] sm:$0xff]  ;;  %v687_v45 = vld [vmem:[#allocation2 + $0x51] sm:$0xff]  ;;  %v688_v47 = vld [vmem:[#allocation2 + $0x59] sm:$0xff] }
  0x61   : > { %14893 = vmatmul.mubr.msk.f32.gmra.mrb[4].mxu1 %vm526_vm3, %v682_v35  ;;  %15114 = vmatmul.mubr.msk.f32.gmra.mrb[2].mxu0 %vm526_vm3, %v2291_v36  ;;  %v2296_v46 = vld [vmem:[#allocation2 + $0x53] sm:$0xff]  ;;  %v2297_v48 = vld [vmem:[#allocation2 + $0x5b] sm:$0xff]  ;;  %v12860_v49 = vld [vmem:[%s17357_s24 + $0xa8] sm:$0xff] }
  0x62   : > { %14895 = vmatprep.mubr.msk.f32.mxu1 %vm526_vm3, %v683_v37  ;;  %15116 = vmatprep.mubr.msk.f32.mxu0 %vm526_vm3, %v2292_v38  ;;  %v689_v50 = vld [vmem:[#allocation2 + $0x61] sm:$0xff]  ;;  %578 = vst.msk [vmem:[#allocation2 + $0xcf] sm:$0xff] %vm526_vm3, %v12860_v49  ;;  %v12861_v52 = vld [vmem:[%s17357_s24 + $0xb0] sm:$0xff]  ;;  %v12862_v53 = vld [vmem:[%s17357_s24 + $0xb8] sm:$0xff] }
  0x63   : > { %v2298_v51 = vld [vmem:[#allocation2 + $0x63] sm:$0xff]  ;;  %582 = vst.msk [vmem:[#allocation2 + $0xd9] sm:$0xff] %vm526_vm3, %v12861_v52  ;;  %583 = vst.msk [vmem:[#allocation2 + $0xe1] sm:$0xff] %vm526_vm3, %v12862_v53  ;;  %v2299_v57 = vld [vmem:[#allocation2 + $0x6b] sm:$0xff] }
  0x64   : > { %v690_v54 = vld [vmem:[#allocation2 + $0x69] sm:$0xff]  ;;  %v12863_v55 = vld [vmem:[%s17357_s24 + $0xc0] sm:$0xff]  ;;  %v691_v58 = vld [vmem:[#allocation2 + $0x71] sm:$0xff] }
  0x65   : > { %14896 = vmatmul.mubr.msk.f32.gmra.mrb[6].mxu1 %vm526_vm3, %v684_v39  ;;  %15117 = vmatmul.mubr.msk.f32.gmra.mrb[4].mxu0 %vm526_vm3, %v2293_v40  ;;  %v12864_v56 = vld [vmem:[%s17357_s24 + $0xc8] sm:$0xff]  ;;  %587 = vst.msk [vmem:[#allocation2 + $0xeb] sm:$0xff] %vm526_vm3, %v12863_v55  ;;  %v12865_v59 = vld [vmem:[%s17357_s24 + $0xd0] sm:$0xff]  ;;  %v12866_v61 = vld [vmem:[%s17357_s24 + $0xd8] sm:$0xff] }
  0x66   : > { %14898 = vmatprep.mubr.msk.f32.mxu1 %vm526_vm3, %v685_v41  ;;  %15119 = vmatprep.mubr.msk.f32.mxu0 %vm526_vm3, %v2294_v42  ;;  %588 = vst.msk [vmem:[#allocation2 + $0xf3] sm:$0xff] %vm526_vm3, %v12864_v56  ;;  %v2300_v60 = vld [vmem:[#allocation2 + $0x73] sm:$0xff]  ;;  %592 = vst.msk [vmem:[#allocation2 + $0xfd] sm:$0xff] %vm526_vm3, %v12865_v59  ;;  %v12867_v62 = vld [vmem:[%s17357_s24 + $0xe0] sm:$0xff] }
  0x67   : > { %593 = vst.msk [vmem:[#allocation2 + $0x105] sm:$0xff] %vm526_vm3, %v12866_v61  ;;  %597 = vst.msk [vmem:[#allocation2 + $0x10f] sm:$0xff] %vm526_vm3, %v12867_v62  ;;  %v12868_v63 = vld [vmem:[%s17357_s24 + $0xe8] sm:$0xff]  ;;  %v692_v0 = vld [vmem:[#allocation2 + $0x79] sm:$0xff] }
  0x68   : > { %598 = vst.msk [vmem:[#allocation2 + $0x117] sm:$0xff] %vm526_vm3, %v12868_v63  ;;  %v2301_v1 = vld [vmem:[#allocation2 + $0x7b] sm:$0xff]  ;;  %v2302_v3 = vld [vmem:[#allocation2 + $0x83] sm:$0xff]  ;;  %v2303_v7 = vld [vmem:[#allocation2 + $0x8b] sm:$0xff] }
  0x69   : > { %14899 = vmatmul.mubr.msk.f32.gmra.mrb[8].mxu1 %vm526_vm3, %v686_v43  ;;  %15120 = vmatmul.mubr.msk.f32.gmra.mrb[6].mxu0 %vm526_vm3, %v2295_v44  ;;  %v693_v2 = vld [vmem:[#allocation2 + $0x81] sm:$0xff]  ;;  %v694_v6 = vld [vmem:[#allocation2 + $0x89] sm:$0xff]  ;;  %v695_v8 = vld [vmem:[#allocation2 + $0x91] sm:$0xff] }
  0x6a   : > { %14901 = vmatprep.mubr.msk.f32.mxu1 %vm526_vm3, %v687_v45  ;;  %15122 = vmatprep.mubr.msk.f32.mxu0 %vm526_vm3, %v2296_v46  ;;  %v17732_v5 = vld [vmem:[%s19910_s1 + $0x8] sm:$0xf]  ;;  %v2304_v9 = vld [vmem:[#allocation2 + $0x93] sm:$0xff]  ;;  %v2305_v11 = vld [vmem:[#allocation2 + $0x9b] sm:$0xff] }
  0x6b   : > { %14996 = vmatprep.subr.msk.mxu1 %vm823_vm2, %v17732_v5  ;;  %v696_v10 = vld [vmem:[#allocation2 + $0x99] sm:$0xff]  ;;  %v697_v12 = vld [vmem:[#allocation2 + $0xa1] sm:$0xff]  ;;  %v698_v14 = vld [vmem:[#allocation2 + $0xa9] sm:$0xff] }
  0x6c   : > { %v2718_v13 = vld [vmem:[#allocation2 + $0x14] sm:$0xff]  ;;  %v2719_v15 = vld [vmem:[#allocation2 + $0x1c] sm:$0xff]  ;;  %v17748_v17 = vld [vmem:[#allocation2 + $0x24] sm:$0xff] }
  0x6d   : > { %14902 = vmatmul.mubr.msk.f32.gmra.mrb[10].mxu1 %vm526_vm3, %v688_v47  ;;  %15123 = vmatmul.mubr.msk.f32.gmra.mrb[8].mxu0 %vm526_vm3, %v2297_v48  ;;  %v699_v16 = vld [vmem:[#allocation2 + $0xb1] sm:$0xff]  ;;  %v700_v20 = vld [vmem:[#allocation2 + $0xb9] sm:$0xff]  ;;  %v701_v23 = vld [vmem:[#allocation2 + $0xc1] sm:$0xff] }
  0x6e   : > { %14904 = vmatprep.mubr.msk.f32.mxu1 %vm526_vm3, %v689_v50  ;;  %15125 = vmatprep.mubr.msk.f32.mxu0 %vm526_vm3, %v2298_v51  ;;  %v12869_v18 = vld [vmem:[%s17357_s24 + $0xf0] sm:$0xff]  ;;  %v12870_v19 = vld [vmem:[%s17357_s24 + $0xf8] sm:$0xff]  ;;  %v17780_v28 = vld [vmem:[#allocation2 + $0x44] sm:$0xff] }
  0x6f   : > { %v17757_v21 = vld [vmem:[#allocation2 + $0x2c] sm:$0xff]  ;;  %602 = vst.msk [vmem:[#allocation2 + $0x121] sm:$0xff] %vm526_vm3, %v12869_v18  ;;  %603 = vst.msk [vmem:[#allocation2 + $0x129] sm:$0xff] %vm526_vm3, %v12870_v19  ;;  %v17764_v22 = vld [vmem:[%s19910_s1 + $0x1c] sm:$0xf] }
  0x70   : > { %v17768_v25 = vld [vmem:[#allocation2 + $0x34] sm:$0xff]  ;;  %v17778_v26 = vld [vmem:[#allocation2 + $0x3c] sm:$0xff]  ;;  %v17788_v30 = vld [vmem:[#allocation2 + $0x4c] sm:$0xff] }
  0x71   : > { %14905 = vmatmul.mubr.msk.f32.gmra.mrb[12].mxu1 %vm526_vm3, %v690_v54  ;;  %15126 = vmatmul.mubr.msk.f32.gmra.mrb[10].mxu0 %vm526_vm3, %v2299_v57  ;;  %v703_v27 = vld [vmem:[#allocation2 + $0xd1] sm:$0xff]  ;;  %v704_v29 = vld [vmem:[#allocation2 + $0xd9] sm:$0xff]  ;;  %v705_v31 = vld [vmem:[#allocation2 + $0xe1] sm:$0xff] }
  0x72   : > { %14907 = vmatprep.mubr.msk.f32.mxu1 %vm526_vm3, %v691_v58  ;;  %15128 = vmatprep.mubr.msk.f32.mxu0 %vm526_vm3, %v2300_v60  ;;  %v17790_v32 = vld [vmem:[#allocation2 + $0x54] sm:$0xff]  ;;  %v706_v33 = vld [vmem:[#allocation2 + $0xe9] sm:$0xff]  ;;  %v17798_v34 = vld [vmem:[#allocation2 + $0x5c] sm:$0xff] }
  0x73   : > { %v707_v35 = vld [vmem:[#allocation2 + $0xf1] sm:$0xff]  ;;  %v17800_v36 = vld [vmem:[#allocation2 + $0x64] sm:$0xff]  ;;  %v708_v37 = vld [vmem:[#allocation2 + $0xf9] sm:$0xff] }
  0x74   : > { %v17808_v38 = vld [vmem:[#allocation2 + $0x6c] sm:$0xff]  ;;  %v709_v39 = vld [vmem:[#allocation2 + $0x101] sm:$0xff]  ;;  %v17810_v40 = vld [vmem:[#allocation2 + $0x74] sm:$0xff] }
  0x75   : > { %14908 = vmatmul.mubr.msk.f32.gmra.mrb[14].mxu1 %vm526_vm3, %v692_v0  ;;  %15129 = vmatmul.mubr.msk.f32.gmra.mrb[12].mxu0 %vm526_vm3, %v2301_v1  ;;  %v710_v41 = vld [vmem:[#allocation2 + $0x109] sm:$0xff]  ;;  %v17818_v42 = vld [vmem:[#allocation2 + $0x7c] sm:$0xff]  ;;  %v711_v43 = vld [vmem:[#allocation2 + $0x111] sm:$0xff] }
  0x76   : > { %14910 = vmatprep.mubr.msk.f32.mxu1 %vm526_vm3, %v693_v2  ;;  %15131 = vmatprep.mubr.msk.f32.mxu0 %vm526_vm3, %v2302_v3  ;;  %v17820_v44 = vld [vmem:[#allocation2 + $0x84] sm:$0xff]  ;;  %v712_v45 = vld [vmem:[#allocation2 + $0x119] sm:$0xff]  ;;  %v17828_v46 = vld [vmem:[#allocation2 + $0x8c] sm:$0xff] }
  0x77   : > { %v640_v47 = vld [vmem:[#allocation2] sm:$0xff]  ;;  %v17830_v48 = vld [vmem:[#allocation2 + $0x94] sm:$0xff]  ;;  %v641_v49 = vld [vmem:[#allocation2 + $0x8] sm:$0xff] }
  0x78   : > { %v17838_v50 = vld [vmem:[#allocation2 + $0x9c] sm:$0xff]  ;;  %v642_v51 = vld [vmem:[#allocation2 + $0x10] sm:$0xff]  ;;  %v17840_v52 = vld [vmem:[#allocation2 + $0xa4] sm:$0xff] }
  0x79   : > { %14911 = vmatmul.mubr.msk.f32.gmra.mrb[16].mxu1 %vm526_vm3, %v694_v6  ;;  %15132 = vmatmul.mubr.msk.f32.gmra.mrb[14].mxu0 %vm526_vm3, %v2303_v7  ;;  %v17848_v53 = vld [vmem:[%s19910_s1 + $0xc] sm:$0xf]  ;;  %v643_v54 = vld [vmem:[#allocation2 + $0x18] sm:$0xff]  ;;  %v644_v56 = vld [vmem:[#allocation2 + $0x20] sm:$0xff] }
  0x7a   : > { %14913 = vmatprep.mubr.msk.f32.mxu1 %vm526_vm3, %v695_v8  ;;  %15134 = vmatprep.mubr.msk.f32.mxu0 %vm526_vm3, %v2304_v9  ;;  %v17853_v55 = vld [vmem:[#allocation2 + $0xac] sm:$0xff]  ;;  %v17857_v57 = vld [vmem:[#allocation2 + $0xb4] sm:$0xff]  ;;  %v17867_v59 = vld [vmem:[#allocation2 + $0xbc] sm:$0xff] }
  0x7b   : > { %v645_v58 = vld [vmem:[#allocation2 + $0x28] sm:$0xff]  ;;  %v646_v60 = vld [vmem:[#allocation2 + $0x30] sm:$0xff]  ;;  %v647_v62 = vld [vmem:[#allocation2 + $0x38] sm:$0xff] }
  0x7c   : > { %v17869_v61 = vld [vmem:[#allocation2 + $0xc4] sm:$0xff]  ;;  %v17877_v63 = vld [vmem:[#allocation2 + $0xcc] sm:$0xff]  ;;  %v17879_v1 = vld [vmem:[#allocation2 + $0xd4] sm:$0xff] }
  0x7d   : > { %14914 = vmatmul.mubr.msk.f32.gmra.mrb[18].mxu1 %vm526_vm3, %v696_v10  ;;  %15135 = vmatmul.mubr.msk.f32.gmra.mrb[16].mxu0 %vm526_vm3, %v2305_v11  ;;  %v648_v0 = vld [vmem:[#allocation2 + $0x40] sm:$0xff]  ;;  %v649_v2 = vld [vmem:[#allocation2 + $0x48] sm:$0xff]  ;;  %v651_v7 = vld [vmem:[#allocation2 + $0x58] sm:$0xff] }
  0x7e   : > { %14916 = vmatprep.mubr.msk.f32.mxu1 %vm526_vm3, %v697_v12  ;;  %15166 = vmatprep.mubr.msk.f32.mxu0 %vm526_vm3, %v2718_v13  ;;  %v17887_v3 = vld [vmem:[#allocation2 + $0xdc] sm:$0xff]  ;;  %v17889_v6 = vld [vmem:[#allocation2 + $0xe4] sm:$0xff]  ;;  %v17897_v8 = vld [vmem:[#allocation2 + $0xec] sm:$0xff] }
  0x7f   : > { %v652_v9 = vld [vmem:[#allocation2 + $0x60] sm:$0xff]  ;;  %v17899_v10 = vld [vmem:[#allocation2 + $0xf4] sm:$0xff]  ;;  %v653_v11 = vld [vmem:[#allocation2 + $0x68] sm:$0xff] }
  0x80   : > { %v17907_v12 = vld [vmem:[#allocation2 + $0xfc] sm:$0xff]  ;;  %v654_v13 = vld [vmem:[#allocation2 + $0x70] sm:$0xff] }
  0x81   : > { %14917 = vmatmul.mubr.msk.f32.gmra.mrb[20].mxu1 %vm526_vm3, %v698_v14  ;;  %15167 = vmatmul.mubr.msk.f32.vlgmr.msra.gmra.mrb[0].mxu0 %vm526_vm3, %v2719_v15  ;;  %v17909_v14 = vld [vmem:[#allocation2 + $0x104] sm:$0xff]  ;;  %v655_v15 = vld [vmem:[#allocation2 + $0x78] sm:$0xff] }
  0x82   : > { %15221 = vmatpush3.msk.msra.mxu0 %vm823_vm2, %v17672_v24  ;;  %14919 = vmatprep.mubr.msk.f32.mxu1 %vm526_vm3, %v699_v16  ;;  %v702_v24 = vld [vmem:[#allocation2 + $0xc9] sm:$0xff]  ;;  %v656_v18 = vld [vmem:[#allocation2 + $0x80] sm:$0xff]  ;;  %v17919_v19 = vld [vmem:[#allocation2 + $0x114] sm:$0xff] }
  0x83   : > { %15169 = vmatprep.mubr.msk.f32.mxu0 %vm526_vm3, %v17748_v17  ;;  %15276 = vmatprep.subr.msk.mxu0 %vm823_vm2, %v17764_v22  ;;  %v17917_v16 = vld [vmem:[#allocation2 + $0x10c] sm:$0xff] }
  0x85   : > { %14920 = vmatmul.mubr.msk.f32.gmra.mrb[22].mxu1 %vm526_vm3, %v700_v20  ;;  %15170 = vmatmul.mubr.msk.f32.gmra.mrb[2].mxu0 %vm526_vm3, %v17757_v21  ;;  %v657_v20 = vld [vmem:[#allocation2 + $0x88] sm:$0xff] }
  0x86   : > { %14922 = vmatprep.mubr.msk.f32.mxu1 %vm526_vm3, %v701_v23  ;;  %15172 = vmatprep.mubr.msk.f32.mxu0 %vm526_vm3, %v17768_v25  ;;  %v17927_v23 = vld [vmem:[#allocation2 + $0x11c] sm:$0xff] }
  0x89   : > { %14923 = vmatmul.mubr.msk.f32.gmra.mrb[24].mxu1 %vm526_vm3, %v702_v24  ;;  %15173 = vmatmul.mubr.msk.f32.gmra.mrb[4].mxu0 %vm526_vm3, %v17778_v26  ;;  %v658_v24 = vld [vmem:[#allocation2 + $0x90] sm:$0xff] }
  0x8a   : > { %14925 = vmatprep.mubr.msk.f32.mxu1 %vm526_vm3, %v703_v27  ;;  %15175 = vmatprep.mubr.msk.f32.mxu0 %vm526_vm3, %v17780_v28  ;;  %v17929_v27 = vld [vmem:[#allocation2 + $0x124] sm:$0xff] }
  0x8d   : > { %14926 = vmatmul.mubr.msk.f32.gmra.mrb[26].mxu1 %vm526_vm3, %v704_v29  ;;  %15176 = vmatmul.mubr.msk.f32.gmra.mrb[6].mxu0 %vm526_vm3, %v17788_v30  ;;  %v659_v29 = vld [vmem:[#allocation2 + $0x98] sm:$0xff] }
  0x8e   : > { %14928 = vmatprep.mubr.msk.f32.mxu1 %vm526_vm3, %v705_v31  ;;  %15178 = vmatprep.mubr.msk.f32.mxu0 %vm526_vm3, %v17790_v32  ;;  %v17937_v31 = vld [vmem:[#allocation2 + $0x12c] sm:$0xff] }
  0x91   : > { %14929 = vmatmul.mubr.msk.f32.gmra.mrb[28].mxu1 %vm526_vm3, %v706_v33  ;;  %15179 = vmatmul.mubr.msk.f32.gmra.mrb[8].mxu0 %vm526_vm3, %v17798_v34  ;;  %v660_v33 = vld [vmem:[#allocation2 + $0xa0] sm:$0xff] }
  0x92   : > { %14931 = vmatprep.mubr.msk.f32.mxu1 %vm526_vm3, %v707_v35  ;;  %15181 = vmatprep.mubr.msk.f32.mxu0 %vm526_vm3, %v17800_v36  ;;  %v661_v35 = vld [vmem:[#allocation2 + $0xa8] sm:$0xff] }
  0x95   : > { %14932 = vmatmul.mubr.msk.f32.gmra.mrb[30].mxu1 %vm526_vm3, %v708_v37  ;;  %15182 = vmatmul.mubr.msk.f32.gmra.mrb[10].mxu0 %vm526_vm3, %v17808_v38  ;;  %v662_v37 = vld [vmem:[#allocation2 + $0xb0] sm:$0xff] }
  0x96   : > { %14934 = vmatprep.mubr.msk.f32.mxu1 %vm526_vm3, %v709_v39  ;;  %15184 = vmatprep.mubr.msk.f32.mxu0 %vm526_vm3, %v17810_v40  ;;  %v17948_v39 = vld [vmem:[%s19910_s1 + $0x20] sm:$0xf] }
  0x99   : > { %14935 = vmatmul.mubr.msk.f32.gmra.mrb[32].mxu1 %vm526_vm3, %v710_v41  ;;  %15185 = vmatmul.mubr.msk.f32.gmra.mrb[12].mxu0 %vm526_vm3, %v17818_v42  ;;  %v663_v41 = vld [vmem:[#allocation2 + $0xb8] sm:$0xff] }
  0x9a   : > { %14937 = vmatprep.mubr.msk.f32.mxu1 %vm526_vm3, %v711_v43  ;;  %15187 = vmatprep.mubr.msk.f32.mxu0 %vm526_vm3, %v17820_v44  ;;  %v668_v43 = vld [vmem:[#allocation2 + $0xe0] sm:$0xff] }
  0x9d   : > { %14938 = vmatmul.mubr.msk.f32.gmra.mrb[34].mxu1 %vm526_vm3, %v712_v45  ;;  %15188 = vmatmul.mubr.msk.f32.gmra.mrb[14].mxu0 %vm526_vm3, %v17828_v46  ;;  %v18011_v45 = vld [vmem:[#allocation2 + $0x1a] sm:$0xff] }
  0x9e   : > { %14942 = vmatprep.mubr.msk.f32.mxu1 %vm526_vm3, %v640_v47  ;;  %15190 = vmatprep.mubr.msk.f32.mxu0 %vm526_vm3, %v17830_v48  ;;  %v604_v47 = vld [vmem:[%s19919_s10] sm:$0xff] }
  0xa1   : > { %14943 = vmatmul.mubr.msk.f32.vlgmr.msra.gmra.mrb[0].mxu1 %vm526_vm3, %v641_v49  ;;  %15191 = vmatmul.mubr.msk.f32.gmra.mrb[16].mxu0 %vm526_vm3, %v17838_v50  ;;  %v18032_v49 = vld [vmem:[#allocation2 + $0x32] sm:$0xff] }
  0xa2   : > { %14945 = vmatprep.mubr.msk.f32.mxu1 %vm526_vm3, %v642_v51  ;;  %15193 = vmatprep.mubr.msk.f32.mxu0 %vm526_vm3, %v17840_v52  ;;  %v605_v51 = vld [vmem:[%s19919_s10 + $0x8] sm:$0xff] }
  0xa3   : > { %14997 = vmatpush3.msk.msra.mxu1 %vm823_vm2, %v17732_v5  ;;  %v650_v5 = vld [vmem:[#allocation2 + $0x50] sm:$0xff] }
  0xa4   : > { %15052 = vmatprep.subr.msk.mxu1 %vm823_vm2, %v17848_v53 }
  0xa5   : > { %14946 = vmatmul.mubr.msk.f32.gmra.mrb[2].mxu1 %vm526_vm3, %v643_v54  ;;  %15194 = vmatmul.mubr.msk.f32.gmra.mrb[18].mxu0 %vm526_vm3, %v17853_v55  ;;  %v607_v54 = vld [vmem:[%s19919_s10 + $0x18] sm:$0xff] }
  0xa6   : > { %14948 = vmatprep.mubr.msk.f32.mxu1 %vm526_vm3, %v644_v56  ;;  %15196 = vmatprep.mubr.msk.f32.mxu0 %vm526_vm3, %v17857_v57  ;;  %v18066_v56 = vld [vmem:[#allocation2 + $0x4a] sm:$0xff] }
  0xa9   : > { %14949 = vmatmul.mubr.msk.f32.gmra.mrb[4].mxu1 %vm526_vm3, %v645_v58  ;;  %15197 = vmatmul.mubr.msk.f32.gmra.mrb[20].mxu0 %vm526_vm3, %v17867_v59  ;;  %v609_v58 = vld [vmem:[%s19919_s10 + $0x28] sm:$0xff] }
  0xaa   : > { %14951 = vmatprep.mubr.msk.f32.mxu1 %vm526_vm3, %v646_v60  ;;  %15199 = vmatprep.mubr.msk.f32.mxu0 %vm526_vm3, %v17869_v61  ;;  %v18084_v60 = vld [vmem:[#allocation2 + $0x5a] sm:$0xff] }
  0xad   : > { %14952 = vmatmul.mubr.msk.f32.gmra.mrb[6].mxu1 %vm526_vm3, %v647_v62  ;;  %15200 = vmatmul.mubr.msk.f32.gmra.mrb[22].mxu0 %vm526_vm3, %v17877_v63  ;;  %v611_v62 = vld [vmem:[%s19919_s10 + $0x38] sm:$0xff] }
  0xae   : > { %14954 = vmatprep.mubr.msk.f32.mxu1 %vm526_vm3, %v648_v0  ;;  %15202 = vmatprep.mubr.msk.f32.mxu0 %vm526_vm3, %v17879_v1  ;;  %v18102_v0 = vld [vmem:[#allocation2 + $0x6a] sm:$0xff] }
  0xb1   : > { %14955 = vmatmul.mubr.msk.f32.gmra.mrb[8].mxu1 %vm526_vm3, %v649_v2  ;;  %15203 = vmatmul.mubr.msk.f32.gmra.mrb[24].mxu0 %vm526_vm3, %v17887_v3  ;;  %v613_v2 = vld [vmem:[%s19919_s10 + $0x48] sm:$0xff] }
  0xb2   : > { %14957 = vmatprep.mubr.msk.f32.mxu1 %vm526_vm3, %v650_v5  ;;  %15205 = vmatprep.mubr.msk.f32.mxu0 %vm526_vm3, %v17889_v6  ;;  %v18120_v5 = vld [vmem:[#allocation2 + $0x7a] sm:$0xff] }
  0xb5   : > { %14958 = vmatmul.mubr.msk.f32.gmra.mrb[10].mxu1 %vm526_vm3, %v651_v7  ;;  %15206 = vmatmul.mubr.msk.f32.gmra.mrb[26].mxu0 %vm526_vm3, %v17897_v8  ;;  %v615_v7 = vld [vmem:[%s19919_s10 + $0x58] sm:$0xff] }
  0xb6   : > { %14960 = vmatprep.mubr.msk.f32.mxu1 %vm526_vm3, %v652_v9  ;;  %15208 = vmatprep.mubr.msk.f32.mxu0 %vm526_vm3, %v17899_v10  ;;  %v18138_v9 = vld [vmem:[#allocation2 + $0x8a] sm:$0xff] }
  0xb9   : > { %14961 = vmatmul.mubr.msk.f32.gmra.mrb[12].mxu1 %vm526_vm3, %v653_v11  ;;  %15209 = vmatmul.mubr.msk.f32.gmra.mrb[28].mxu0 %vm526_vm3, %v17907_v12  ;;  %v3182_v11 = vld [vmem:[#allocation2 + $0x134] sm:$0xff] }
  0xba   : > { %14963 = vmatprep.mubr.msk.f32.mxu1 %vm526_vm3, %v654_v13  ;;  %15211 = vmatprep.mubr.msk.f32.mxu0 %vm526_vm3, %v17909_v14  ;;  %v618_v13 = vld [vmem:[%s19919_s10 + $0x70] sm:$0xff] }
  0xbd   : > { %14964 = vmatmul.mubr.msk.f32.gmra.mrb[14].mxu1 %vm526_vm3, %v655_v15  ;;  %15212 = vmatmul.mubr.msk.f32.gmra.mrb[30].mxu0 %vm526_vm3, %v17917_v16  ;;  %v3183_v15 = vld [vmem:[#allocation2 + $0x13c] sm:$0xff] }
  0xbe   : > { %14966 = vmatprep.mubr.msk.f32.mxu1 %vm526_vm3, %v656_v18  ;;  %15214 = vmatprep.mubr.msk.f32.mxu0 %vm526_vm3, %v17919_v19  ;;  %v3578_v18 = vld [vmem:[#allocation2 + $0x25] sm:$0xff] }
  0xc1   : > { %14967 = vmatmul.mubr.msk.f32.gmra.mrb[16].mxu1 %vm526_vm3, %v657_v20  ;;  %15215 = vmatmul.mubr.msk.f32.gmra.mrb[32].mxu0 %vm526_vm3, %v17927_v23  ;;  %v620_v20 = vld [vmem:[%s19919_s10 + $0x80] sm:$0xff] }
  0xc2   : > { %14969 = vmatprep.mubr.msk.f32.mxu1 %vm526_vm3, %v658_v24  ;;  %15217 = vmatprep.mubr.msk.f32.mxu0 %vm526_vm3, %v17929_v27  ;;  %v3579_v24 = vld [vmem:[#allocation2 + $0x2d] sm:$0xff] }
  0xc5   : > { %14970 = vmatmul.mubr.msk.f32.gmra.mrb[18].mxu1 %vm526_vm3, %v659_v29  ;;  %15218 = vmatmul.mubr.msk.f32.gmra.mrb[34].mxu0 %vm526_vm3, %v17937_v31  ;;  %v3580_v29 = vld [vmem:[#allocation2 + $0x35] sm:$0xff] }
  0xc6   : > { %14972 = vmatprep.mubr.msk.f32.mxu1 %vm526_vm3, %v660_v33  ;;  %15222 = vmatprep.mubr.msk.f32.mxu0 %vm526_vm3, %v17748_v17  ;;  %v664_v17 = vld [vmem:[#allocation2 + $0xc0] sm:$0xff]  ;;  %v622_v33 = vld [vmem:[%s19919_s10 + $0x90] sm:$0xff] }
  0xc9   : > { %14973 = vmatmul.mubr.msk.f32.gmra.mrb[20].mxu1 %vm526_vm3, %v661_v35  ;;  %15223 = vmatmul.mubr.msk.f32.vlgmr.msra.gmra.mrb[0].mxu0 %vm526_vm3, %v17757_v21  ;;  %v665_v21 = vld [vmem:[#allocation2 + $0xc8] sm:$0xff]  ;;  %v18188_v35 = vld [vmem:[#allocation2 + $0xba] sm:$0xff] }
  0xca   : > { %15277 = vmatpush3.msk.msra.mxu0 %vm823_vm2, %v17764_v22  ;;  %14975 = vmatprep.mubr.msk.f32.mxu1 %vm526_vm3, %v662_v37  ;;  %v666_v22 = vld [vmem:[#allocation2 + $0xd0] sm:$0xff]  ;;  %v3581_v37 = vld [vmem:[#allocation2 + $0x3d] sm:$0xff] }
  0xcb   : > { %15225 = vmatprep.mubr.msk.f32.mxu0 %vm526_vm3, %v17768_v25  ;;  %15332 = vmatprep.subr.msk.mxu0 %vm823_vm2, %v17948_v39  ;;  %v667_v25 = vld [vmem:[#allocation2 + $0xd8] sm:$0xff] }
  0xcd   : > { %14976 = vmatmul.mubr.msk.f32.gmra.mrb[22].mxu1 %vm526_vm3, %v663_v41  ;;  %15226 = vmatmul.mubr.msk.f32.gmra.mrb[2].mxu0 %vm526_vm3, %v17778_v26  ;;  %v669_v26 = vld [vmem:[#allocation2 + $0xe8] sm:$0xff] }
  0xce   : > { %14978 = vmatprep.mubr.msk.f32.mxu1 %vm526_vm3, %v664_v17  ;;  %15228 = vmatprep.mubr.msk.f32.mxu0 %vm526_vm3, %v17780_v28  ;;  %v670_v28 = vld [vmem:[#allocation2 + $0xf0] sm:$0xff]  ;;  %v18191_v41 = vld [vmem:[#allocation2 + $0xc2] sm:$0xff] }
  0xcf   : > { %v3582_v17 = vld [vmem:[#allocation2 + $0x45] sm:$0xff] }
  0xd1   : > { %14979 = vmatmul.mubr.msk.f32.gmra.mrb[24].mxu1 %vm526_vm3, %v665_v21  ;;  %15229 = vmatmul.mubr.msk.f32.gmra.mrb[4].mxu0 %vm526_vm3, %v17788_v30  ;;  %v671_v30 = vld [vmem:[#allocation2 + $0xf8] sm:$0xff]  ;;  %v624_v21 = vld [vmem:[%s19919_s10 + $0xa0] sm:$0xff] }
  0xd2   : > { %14981 = vmatprep.mubr.msk.f32.mxu1 %vm526_vm3, %v666_v22  ;;  %15231 = vmatprep.mubr.msk.f32.mxu0 %vm526_vm3, %v17790_v32  ;;  %v672_v32 = vld [vmem:[#allocation2 + $0x100] sm:$0xff]  ;;  %v18205_v22 = vld [vmem:[#allocation2 + $0xca] sm:$0xff] }
  0xd5   : > { %14982 = vmatmul.mubr.msk.f32.gmra.mrb[26].mxu1 %vm526_vm3, %v667_v25  ;;  %15232 = vmatmul.mubr.msk.f32.gmra.mrb[6].mxu0 %vm526_vm3, %v17798_v34  ;;  %v673_v34 = vld [vmem:[#allocation2 + $0x108] sm:$0xff] }
  0xd6   : > { %14984 = vmatprep.mubr.msk.f32.mxu1 %vm526_vm3, %v668_v43  ;;  %15234 = vmatprep.mubr.msk.f32.mxu0 %vm526_vm3, %v17800_v36  ;;  %v674_v36 = vld [vmem:[#allocation2 + $0x110] sm:$0xff] }
  0xd7   : > { %v3583_v25 = vld [vmem:[#allocation2 + $0x4d] sm:$0xff] }
  0xd8   : > { %v18207_v43 = vld [vmem:[#allocation2 + $0xd2] sm:$0xff] }
  0xd9   : > { %14985 = vmatmul.mubr.msk.f32.gmra.mrb[28].mxu1 %vm526_vm3, %v669_v26  ;;  %15235 = vmatmul.mubr.msk.f32.gmra.mrb[8].mxu0 %vm526_vm3, %v17808_v38  ;;  %v675_v38 = vld [vmem:[#allocation2 + $0x118] sm:$0xff] }
  0xda   : > { %14987 = vmatprep.mubr.msk.f32.mxu1 %vm526_vm3, %v670_v28  ;;  %15237 = vmatprep.mubr.msk.f32.mxu0 %vm526_vm3, %v17810_v40  ;;  %v1428_v40 = vld [vmem:[#allocation2 + $0x2] sm:$0xff]  ;;  %v3584_v26 = vld [vmem:[#allocation2 + $0x55] sm:$0xff] }
  0xdb   : > { %v625_v28 = vld [vmem:[%s19919_s10 + $0xa8] sm:$0xff] }
  0xdd   : > { %14988 = vmatmul.mubr.msk.f32.gmra.mrb[30].mxu1 %vm526_vm3, %v671_v30  ;;  %15238 = vmatmul.mubr.msk.f32.gmra.mrb[10].mxu0 %vm526_vm3, %v17818_v42  ;;  %v1429_v42 = vld [vmem:[#allocation2 + $0xa] sm:$0xff] }
  0xde   : > { %14990 = vmatprep.mubr.msk.f32.mxu1 %vm526_vm3, %v672_v32  ;;  %15240 = vmatprep.mubr.msk.f32.mxu0 %vm526_vm3, %v17820_v44  ;;  %v18002_v44 = vld [vmem:[#allocation2 + $0x12] sm:$0xff]  ;;  %v18221_v32 = vld [vmem:[#allocation2 + $0xda] sm:$0xff] }
  0xdf   : > { %v626_v30 = vld [vmem:[%s19919_s10 + $0xb0] sm:$0xff] }
  0xe1   : > { %14991 = vmatmul.mubr.msk.f32.gmra.mrb[32].mxu1 %vm526_vm3, %v673_v34  ;;  %15241 = vmatmul.mubr.msk.f32.gmra.mrb[12].mxu0 %vm526_vm3, %v17828_v46  ;;  %v18015_v46 = vld [vmem:[#allocation2 + $0x22] sm:$0xff] }
  0xe2   : > { %14993 = vmatprep.mubr.msk.f32.mxu1 %vm526_vm3, %v674_v36  ;;  %15243 = vmatprep.mubr.msk.f32.mxu0 %vm526_vm3, %v17830_v48  ;;  %v18030_v48 = vld [vmem:[#allocation2 + $0x2a] sm:$0xff]  ;;  %v3585_v34 = vld [vmem:[#allocation2 + $0x5d] sm:$0xff] }
  0xe3   : > { %v18223_v36 = vld [vmem:[#allocation2 + $0xe2] sm:$0xff] }
  0xe5   : > { %14994 = vmatmul.mubr.msk.f32.gmra.mrb[34].mxu1 %vm526_vm3, %v675_v38  ;;  %15244 = vmatmul.mubr.msk.f32.gmra.mrb[14].mxu0 %vm526_vm3, %v17838_v50  ;;  %v606_v50 = vld [vmem:[%s19919_s10 + $0x10] sm:$0xff]  ;;  %v3586_v38 = vld [vmem:[#allocation2 + $0x65] sm:$0xff] }
  0xe6   : > { %14998 = vmatprep.mubr.msk.f32.mxu1 %vm526_vm3, %v1428_v40  ;;  %15246 = vmatprep.mubr.msk.f32.mxu0 %vm526_vm3, %v17840_v52  ;;  %v18048_v52 = vld [vmem:[#allocation2 + $0x3a] sm:$0xff] }
  0xe7   : > { %v627_v40 = vld [vmem:[%s19919_s10 + $0xb8] sm:$0xff] }
  0xe9   : > { %14999 = vmatmul.mubr.msk.f32.vlgmr.msra.gmra.mrb[0].mxu1 %vm526_vm3, %v1429_v42  ;;  %15247 = vmatmul.mubr.msk.f32.gmra.mrb[16].mxu0 %vm526_vm3, %v17853_v55  ;;  %v608_v55 = vld [vmem:[%s19919_s10 + $0x20] sm:$0xff] }
  0xea   : > { %15001 = vmatprep.mubr.msk.f32.mxu1 %vm526_vm3, %v18002_v44  ;;  %15249 = vmatprep.mubr.msk.f32.mxu0 %vm526_vm3, %v17857_v57  ;;  %v18068_v57 = vld [vmem:[#allocation2 + $0x52] sm:$0xff]  ;;  %v628_v42 = vld [vmem:[%s19919_s10 + $0xc0] sm:$0xff] }
  0xeb   : > { %15053 = vmatpush3.msk.msra.mxu1 %vm823_vm2, %v17848_v53  ;;  %v18050_v53 = vld [vmem:[#allocation2 + $0x42] sm:$0xff] }
  0xec   : > { %16396 = vmatprep.subr.msk.mxu1 %vm823_vm2, %v17618_v4  ;;  %v17285_v4 = vmov 0  }
  0xed   : > { %15002 = vmatmul.mubr.msk.f32.gmra.mrb[2].mxu1 %vm526_vm3, %v18011_v45  ;;  %15250 = vmatmul.mubr.msk.f32.gmra.mrb[18].mxu0 %vm526_vm3, %v17867_v59  ;;  %v610_v59 = vld [vmem:[%s19919_s10 + $0x30] sm:$0xff] }
  0xee   : > { %15004 = vmatprep.mubr.msk.f32.mxu1 %vm526_vm3, %v18015_v46  ;;  %15252 = vmatprep.mubr.msk.f32.mxu0 %vm526_vm3, %v17869_v61  ;;  %v18086_v61 = vld [vmem:[#allocation2 + $0x62] sm:$0xff] }
  0xef   : > { %17273 = vset.pattern.permute.xlu0 %v17285_v4  ;;  %17274 = vset.pattern.permute.xlu1 %v17285_v4  ;;  %v3587_v4 = vld [vmem:[#allocation2 + $0x6d] sm:$0xff] }
  0xf0   : > { %4562 = vperm.xlu0 %17273, %v604_v47   ;;  %4572 = vperm.xlu1 %17274, %v606_v50   ;;  %v18237_v47 = vld [vmem:[#allocation2 + $0xea] sm:$0xff]  ;;  %v18239_v50 = vld [vmem:[#allocation2 + $0xf2] sm:$0xff] }
  0xf1   : > { %15005 = vmatmul.mubr.msk.f32.gmra.mrb[4].mxu1 %vm526_vm3, %v18030_v48  ;;  %15253 = vmatmul.mubr.msk.f32.gmra.mrb[20].mxu0 %vm526_vm3, %v17877_v63  ;;  %v612_v63 = vld [vmem:[%s19919_s10 + $0x40] sm:$0xff] }
  0xf2   : > { %15007 = vmatprep.mubr.msk.f32.mxu1 %vm526_vm3, %v18032_v49  ;;  %15255 = vmatprep.mubr.msk.f32.mxu0 %vm526_vm3, %v17879_v1  ;;  %v18104_v1 = vld [vmem:[#allocation2 + $0x72] sm:$0xff] }
  0xf4   : > { %4567 = vperm.xlu0 %17273, %v605_v51   ;;  %4577 = vperm.xlu1 %17274, %v607_v54   ;;  %v3588_v51 = vld [vmem:[#allocation2 + $0x75] sm:$0xff]  ;;  %v629_v54 = vld [vmem:[%s19919_s10 + $0xc8] sm:$0xff] }
  0xf5   : > { %15008 = vmatmul.mubr.msk.f32.gmra.mrb[6].mxu1 %vm526_vm3, %v18048_v52  ;;  %15256 = vmatmul.mubr.msk.f32.gmra.mrb[22].mxu0 %vm526_vm3, %v17887_v3  ;;  %v614_v3 = vld [vmem:[%s19919_s10 + $0x50] sm:$0xff] }
  0xf6   : > { %15010 = vmatprep.mubr.msk.f32.mxu1 %vm526_vm3, %v18050_v53  ;;  %15258 = vmatprep.mubr.msk.f32.mxu0 %vm526_vm3, %v17889_v6  ;;  %v18122_v6 = vld [vmem:[#allocation2 + $0x82] sm:$0xff] }
  0xf8   : > { %4582 = vperm.xlu0 %17273, %v608_v55   ;;  %4587 = vperm.xlu1 %17274, %v609_v58   ;;  %v630_v55 = vld [vmem:[%s19919_s10 + $0xd0] sm:$0xff]  ;;  %v18253_v58 = vld [vmem:[#allocation2 + $0xfa] sm:$0xff] }
  0xf9   : > { %15011 = vmatmul.mubr.msk.f32.gmra.mrb[8].mxu1 %vm526_vm3, %v18066_v56  ;;  %15259 = vmatmul.mubr.msk.f32.gmra.mrb[24].mxu0 %vm526_vm3, %v17897_v8  ;;  %v616_v8 = vld [vmem:[%s19919_s10 + $0x60] sm:$0xff] }
  0xfa   : > { %15013 = vmatprep.mubr.msk.f32.mxu1 %vm526_vm3, %v18068_v57  ;;  %15261 = vmatprep.mubr.msk.f32.mxu0 %vm526_vm3, %v17899_v10  ;;  %v18140_v10 = vld [vmem:[#allocation2 + $0x92] sm:$0xff] }
  0xfc   : > { %4592 = vperm.xlu0 %17273, %v610_v59   ;;  %4597 = vperm.xlu1 %17274, %v611_v62   ;;  %v3589_v59 = vld [vmem:[#allocation2 + $0x7d] sm:$0xff] }
  0xfd   : > { %15014 = vmatmul.mubr.msk.f32.gmra.mrb[10].mxu1 %vm526_vm3, %v18084_v60  ;;  %15262 = vmatmul.mubr.msk.f32.gmra.mrb[26].mxu0 %vm526_vm3, %v17907_v12  ;;  %v617_v12 = vld [vmem:[%s19919_s10 + $0x68] sm:$0xff] }
  0xfe   : > { %15016 = vmatprep.mubr.msk.f32.mxu1 %vm526_vm3, %v18086_v61  ;;  %15264 = vmatprep.mubr.msk.f32.mxu0 %vm526_vm3, %v17909_v14  ;;  %v18155_v14 = vld [vmem:[#allocation2 + $0x9a] sm:$0xff]  ;;  %v18255_v62 = vld [vmem:[#allocation2 + $0x102] sm:$0xff] }
 0x100   : > { %4602 = vperm.xlu0 %17273, %v612_v63   ;;  %4607 = vperm.xlu1 %17274, %v613_v2   ;;  %v3590_v63 = vld [vmem:[#allocation2 + $0x85] sm:$0xff]  ;;  %v631_v2 = vld [vmem:[%s19919_s10 + $0xd8] sm:$0xff] }
 0x101   : > { %15017 = vmatmul.mubr.msk.f32.gmra.mrb[12].mxu1 %vm526_vm3, %v18102_v0  ;;  %15265 = vmatmul.mubr.msk.f32.gmra.mrb[28].mxu0 %vm526_vm3, %v17917_v16  ;;  %v18157_v16 = vld [vmem:[#allocation2 + $0xa2] sm:$0xff] }
 0x102   : > { %15019 = vmatprep.mubr.msk.f32.mxu1 %vm526_vm3, %v18104_v1  ;;  %15267 = vmatprep.mubr.msk.f32.mxu0 %vm526_vm3, %v17919_v19  ;;  %v619_v19 = vld [vmem:[%s19919_s10 + $0x78] sm:$0xff] }
 0x104   : > { %4612 = vperm.xlu0 %17273, %v614_v3   ;;  %4617 = vperm.xlu1 %17274, %v615_v7   ;;  %v632_v3 = vld [vmem:[%s19919_s10 + $0xe0] sm:$0xff]  ;;  %v18269_v7 = vld [vmem:[#allocation2 + $0x10a] sm:$0xff] }
 0x105   : > { %15020 = vmatmul.mubr.msk.f32.gmra.mrb[14].mxu1 %vm526_vm3, %v18120_v5  ;;  %15268 = vmatmul.mubr.msk.f32.gmra.mrb[30].mxu0 %vm526_vm3, %v17927_v23  ;;  %v18171_v23 = vld [vmem:[#allocation2 + $0xaa] sm:$0xff] }
 0x106   : > { %15022 = vmatprep.mubr.msk.f32.mxu1 %vm526_vm3, %v18122_v6  ;;  %15270 = vmatprep.mubr.msk.f32.mxu0 %vm526_vm3, %v17929_v27  ;;  %v18173_v27 = vld [vmem:[#allocation2 + $0xb2] sm:$0xff] }
 0x108   : > { %4622 = vperm.xlu0 %17273, %v616_v8   ;;  %4627 = vperm.xlu1 %17274, %v617_v12   ;;  %v3591_v8 = vld [vmem:[#allocation2 + $0x8d] sm:$0xff]  ;;  %v3592_v12 = vld [vmem:[#allocation2 + $0x95] sm:$0xff] }
 0x109   : > { %15023 = vmatmul.mubr.msk.f32.gmra.mrb[16].mxu1 %vm526_vm3, %v18138_v9  ;;  %15271 = vmatmul.mubr.msk.f32.gmra.mrb[32].mxu0 %vm526_vm3, %v17937_v31  ;;  %v621_v31 = vld [vmem:[%s19919_s10 + $0x88] sm:$0xff] }
 0x10a   : > { %15025 = vmatprep.mubr.msk.f32.mxu1 %vm526_vm3, %v18140_v10  ;;  %15273 = vmatprep.mubr.msk.f32.mxu0 %vm526_vm3, %v3182_v11  ;;  %v18271_v11 = vld [vmem:[#allocation2 + $0x112] sm:$0xff] }
 0x10c   : > { %4632 = vperm.xlu0 %17273, %v618_v13   ;;  %4637 = vperm.xlu1 %17274, %v619_v19   ;;  %v633_v13 = vld [vmem:[%s19919_s10 + $0xe8] sm:$0xff]  ;;  %v3593_v19 = vld [vmem:[#allocation2 + $0x9d] sm:$0xff] }
 0x10d   : > { %15026 = vmatmul.mubr.msk.f32.gmra.mrb[18].mxu1 %vm526_vm3, %v18155_v14  ;;  %15274 = vmatmul.mubr.msk.f32.gmra.mrb[34].mxu0 %vm526_vm3, %v3183_v15  ;;  %v634_v15 = vld [vmem:[%s19919_s10 + $0xf0] sm:$0xff] }
 0x10e   : > { %15028 = vmatprep.mubr.msk.f32.mxu1 %vm526_vm3, %v18157_v16  ;;  %15278 = vmatprep.mubr.msk.f32.mxu0 %vm526_vm3, %v3578_v18  ;;  %v18285_v18 = vld [vmem:[#allocation2 + $0x11a] sm:$0xff] }
 0x110   : > { %4642 = vperm.xlu0 %17273, %v620_v20   ;;  %4647 = vperm.xlu1 %17274, %v621_v31   ;;  %v3594_v20 = vld [vmem:[#allocation2 + $0xa5] sm:$0xff]  ;;  %v3595_v31 = vld [vmem:[#allocation2 + $0xad] sm:$0xff] }
 0x111   : > { %15029 = vmatmul.mubr.msk.f32.gmra.mrb[20].mxu1 %vm526_vm3, %v18171_v23  ;;  %15279 = vmatmul.mubr.msk.f32.vlgmr.msra.gmra.mrb[0].mxu0 %vm526_vm3, %v3579_v24  ;;  %v635_v24 = vld [vmem:[%s19919_s10 + $0xf8] sm:$0xff] }
 0x112   : > { %15333 = vmatpush3.msk.msra.mxu0 %vm823_vm2, %v17948_v39  ;;  %15031 = vmatprep.mubr.msk.f32.mxu1 %vm526_vm3, %v18173_v27  ;;  %v623_v39 = vld [vmem:[%s19919_s10 + $0x98] sm:$0xff] }
 0x113   : > { %15281 = vmatprep.mubr.msk.f32.mxu0 %vm526_vm3, %v3580_v29  ;;  %v636_v29 = vld [vmem:[%s19919_s10 + $0x100] sm:$0xff] }
 0x114   : > { %4652 = vperm.xlu0 %17273, %v622_v33   ;;  %4657 = vperm.xlu1 %17274, %v623_v39   ;;  %v3596_v33 = vld [vmem:[#allocation2 + $0xb5] sm:$0xff]  ;;  %v17275_v39 = vld [vmem:[%s19910_s1 + $0x10] sm:$0xf] }
 0x115   : > { %15032 = vmatmul.mubr.msk.f32.gmra.mrb[22].mxu1 %vm526_vm3, %v18188_v35  ;;  %15282 = vmatmul.mubr.msk.f32.gmra.mrb[2].mxu0 %vm526_vm3, %v3581_v37  ;;  %v637_v37 = vld [vmem:[%s19919_s10 + $0x108] sm:$0xff] }
 0x116   : > { %15034 = vmatprep.mubr.msk.f32.mxu1 %vm526_vm3, %v18191_v41  ;;  %15284 = vmatprep.mubr.msk.f32.mxu0 %vm526_vm3, %v3582_v17  ;;  %v638_v17 = vld [vmem:[%s19919_s10 + $0x110] sm:$0xff] }
 0x118   : > { %4662 = vperm.xlu0 %17273, %v624_v21   ;;  %4667 = vperm.xlu1 %17274, %v625_v28   ;;  %v3598_v21 = vld [vmem:[#allocation2 + $0xc5] sm:$0xff]  ;;  %v4018_v28 = vld [vmem:[#allocation2 + $0x76] sm:$0xff] }
 0x119   : > { %15035 = vmatmul.mubr.msk.f32.gmra.mrb[24].mxu1 %vm526_vm3, %v18205_v22  ;;  %15285 = vmatmul.mubr.msk.f32.gmra.mrb[4].mxu0 %vm526_vm3, %v3583_v25  ;;  %v3600_v25 = vld [vmem:[#allocation2 + $0xd5] sm:$0xff] }
 0x11a   : > { %15037 = vmatprep.mubr.msk.f32.mxu1 %vm526_vm3, %v18207_v43  ;;  %15287 = vmatprep.mubr.msk.f32.mxu0 %vm526_vm3, %v3584_v26  ;;  %v3602_v26 = vld [vmem:[#allocation2 + $0xe5] sm:$0xff] }
 0x11c   : > { %4672 = vperm.xlu0 %17273, %v626_v30   ;;  %4677 = vperm.xlu1 %17274, %v627_v40   ;;  %v4019_v30 = vld [vmem:[#allocation2 + $0x7e] sm:$0xff]  ;;  %v1893_v40 = vld [vmem:[#allocation2 + $0x12a] sm:$0xff] }
 0x11d   : > { %15038 = vmatmul.mubr.msk.f32.gmra.mrb[26].mxu1 %vm526_vm3, %v18221_v32  ;;  %15288 = vmatmul.mubr.msk.f32.gmra.mrb[6].mxu0 %vm526_vm3, %v3585_v34  ;;  %v4021_v34 = vld [vmem:[#allocation2 + $0x8e] sm:$0xff] }
 0x11e   : > { %15040 = vmatprep.mubr.msk.f32.mxu1 %vm526_vm3, %v18223_v36  ;;  %15290 = vmatprep.mubr.msk.f32.mxu0 %vm526_vm3, %v3586_v38  ;;  %v4022_v38 = vld [vmem:[#allocation2 + $0x96] sm:$0xff] }
 0x120   : > { %4682 = vperm.xlu0 %17273, %v628_v42   ;;  %4687 = vperm.xlu1 %17274, %v629_v54   ;;  %v4023_v42 = vld [vmem:[#allocation2 + $0x9e] sm:$0xff]  ;;  %v2308_v54 = vld [vmem:[#allocation2 + $0xb3] sm:$0xff] }
 0x121   : > { %15041 = vmatmul.mubr.msk.f32.gmra.mrb[28].mxu1 %vm526_vm3, %v18237_v47  ;;  %15291 = vmatmul.mubr.msk.f32.gmra.mrb[8].mxu0 %vm526_vm3, %v3587_v4  ;;  %v4024_v4 = vld [vmem:[#allocation2 + $0xa6] sm:$0xff] }
 0x122   : > { %15043 = vmatprep.mubr.msk.f32.mxu1 %vm526_vm3, %v18239_v50  ;;  %15293 = vmatprep.mubr.msk.f32.mxu0 %vm526_vm3, %v3588_v51  ;;  %v4025_v51 = vld [vmem:[#allocation2 + $0xae] sm:$0xff] }
 0x124   : > { %4692 = vperm.xlu0 %17273, %v630_v55   ;;  %4697 = vperm.xlu1 %17274, %v631_v2   ;;  %v4026_v55 = vld [vmem:[#allocation2 + $0xb6] sm:$0xff]  ;;  %v2311_v2 = vld [vmem:[#allocation2 + $0xcb] sm:$0xff] }
 0x125   : > { %15044 = vmatmul.mubr.msk.f32.gmra.mrb[30].mxu1 %vm526_vm3, %v18253_v58  ;;  %15294 = vmatmul.mubr.msk.f32.gmra.mrb[10].mxu0 %vm526_vm3, %v3589_v59  ;;  %v4027_v59 = vld [vmem:[#allocation2 + $0xbe] sm:$0xff] }
 0x126   : > { %15046 = vmatprep.mubr.msk.f32.mxu1 %vm526_vm3, %v18255_v62  ;;  %15296 = vmatprep.mubr.msk.f32.mxu0 %vm526_vm3, %v3590_v63  ;;  %v4028_v63 = vld [vmem:[#allocation2 + $0xc6] sm:$0xff] }
 0x128   : > { %4702 = vperm.xlu0 %17273, %v632_v3   ;;  %4707 = vperm.xlu1 %17274, %v633_v13   ;;  %v4029_v3 = vld [vmem:[#allocation2 + $0xce] sm:$0xff]  ;;  %v2314_v13 = vld [vmem:[#allocation2 + $0xe3] sm:$0xff] }
 0x129   : > { %15047 = vmatmul.mubr.msk.f32.gmra.mrb[32].mxu1 %vm526_vm3, %v18269_v7  ;;  %15297 = vmatmul.mubr.msk.f32.gmra.mrb[12].mxu0 %vm526_vm3, %v3591_v8  ;;  %v4030_v8 = vld [vmem:[#allocation2 + $0xd6] sm:$0xff] }
 0x12a   : > { %15049 = vmatprep.mubr.msk.f32.mxu1 %vm526_vm3, %v18271_v11  ;;  %15299 = vmatprep.mubr.msk.f32.mxu0 %vm526_vm3, %v3592_v12  ;;  %v4031_v12 = vld [vmem:[#allocation2 + $0xde] sm:$0xff] }
 0x12c   : > { %4712 = vperm.xlu0 %17273, %v634_v15   ;;  %4717 = vperm.xlu1 %17274, %v635_v24   ;;  %v4032_v15 = vld [vmem:[#allocation2 + $0xe6] sm:$0xff]  ;;  %v4034_v24 = vld [vmem:[#allocation2 + $0xf6] sm:$0xff] }
 0x12d   : > { %15050 = vmatmul.mubr.msk.f32.gmra.mrb[34].mxu1 %vm526_vm3, %v18285_v18  ;;  %15300 = vmatmul.mubr.msk.f32.gmra.mrb[14].mxu0 %vm526_vm3, %v3593_v19  ;;  %v4033_v19 = vld [vmem:[#allocation2 + $0xee] sm:$0xff] }
 0x12e   : > { %15054 = vmatprep.mubr.msk.f32.mxu1 %vm526_vm3, %v18002_v44  ;;  %15302 = vmatprep.mubr.msk.f32.mxu0 %vm526_vm3, %v3594_v20  ;;  %v3597_v44 = vld [vmem:[#allocation2 + $0xbd] sm:$0xff]  ;;  %v2316_v20 = vld [vmem:[#allocation2 + $0xf3] sm:$0xff] }
 0x130   : > { %4722 = vperm.xlu0 %17273, %v636_v29   ;;  %4727 = vperm.xlu1 %17274, %v637_v37   ;;  %v2317_v29 = vld [vmem:[#allocation2 + $0xfb] sm:$0xff]  ;;  %v4036_v37 = vld [vmem:[#allocation2 + $0x106] sm:$0xff] }
 0x131   : > { %15055 = vmatmul.mubr.msk.f32.vlgmr.msra.gmra.mrb[0].mxu1 %vm526_vm3, %v18011_v45  ;;  %15303 = vmatmul.mubr.msk.f32.gmra.mrb[16].mxu0 %vm526_vm3, %v3595_v31  ;;  %v639_v45 = vld [vmem:[%s19919_s10 + $0x118] sm:$0xff] }
 0x132   : > { %15057 = vmatprep.mubr.msk.f32.mxu1 %vm526_vm3, %v18015_v46  ;;  %15305 = vmatprep.mubr.msk.f32.mxu0 %vm526_vm3, %v3596_v33  ;;  %v3599_v46 = vld [vmem:[#allocation2 + $0xcd] sm:$0xff]  ;;  %v4035_v31 = vld [vmem:[#allocation2 + $0xfe] sm:$0xff] }
 0x133   : > { %16397 = vmatpush3.msk.msra.mxu1 %vm823_vm2, %v17275_v39  ;;  %v2318_v33 = vld [vmem:[#allocation2 + $0x103] sm:$0xff]  ;;  %v2320_v39 = vld [vmem:[#allocation2 + $0x113] sm:$0xff] }
 0x134   : > { %4732 = vperm.xlu0 %17273, %v638_v17   ;;  %4737 = vperm.xlu1 %17274, %v639_v45   ;;  %v2319_v17 = vld [vmem:[#allocation2 + $0x10b] sm:$0xff]  ;;  %v2321_v45 = vld [vmem:[#allocation2 + $0x11b] sm:$0xff] }
 0x135   : > { %15058 = vmatmul.mubr.msk.f32.gmra.mrb[2].mxu1 %vm526_vm3, %v18030_v48  ;;  %15306 = vmatmul.mubr.msk.f32.gmra.mrb[18].mxu0 %vm526_vm3, %v3597_v44  ;;  %v3601_v48 = vld [vmem:[#allocation2 + $0xdd] sm:$0xff]  ;;  %v4037_v44 = vld [vmem:[#allocation2 + $0x10e] sm:$0xff] }
 0x136   : > { %15060 = vmatprep.mubr.msk.f32.mxu1 %vm526_vm3, %v18032_v49  ;;  %15308 = vmatprep.mubr.msk.f32.mxu0 %vm526_vm3, %v3598_v21  ;;  %v3603_v49 = vld [vmem:[#allocation2 + $0xed] sm:$0xff]  ;;  %v4038_v21 = vld [vmem:[#allocation2 + $0x116] sm:$0xff] }
 0x139   : > { %15061 = vmatmul.mubr.msk.f32.gmra.mrb[4].mxu1 %vm526_vm3, %v18048_v52  ;;  %15309 = vmatmul.mubr.msk.f32.gmra.mrb[20].mxu0 %vm526_vm3, %v3599_v46  ;;  %v3604_v52 = vld [vmem:[#allocation2 + $0xf5] sm:$0xff]  ;;  %v4039_v46 = vld [vmem:[#allocation2 + $0x11e] sm:$0xff] }
 0x13a   : > { %15063 = vmatprep.mubr.msk.f32.mxu1 %vm526_vm3, %v18050_v53  ;;  %15311 = vmatprep.mubr.msk.f32.mxu0 %vm526_vm3, %v3600_v25  ;;  %v3605_v53 = vld [vmem:[#allocation2 + $0xfd] sm:$0xff] }
 0x13b   : > { %v2322_v25 = vld [vmem:[#allocation2 + $0x123] sm:$0xff] }
 0x13d   : > { %15064 = vmatmul.mubr.msk.f32.gmra.mrb[6].mxu1 %vm526_vm3, %v18066_v56  ;;  %15312 = vmatmul.mubr.msk.f32.gmra.mrb[22].mxu0 %vm526_vm3, %v3601_v48  ;;  %v3606_v56 = vld [vmem:[#allocation2 + $0x105] sm:$0xff] }
 0x13e   : > { %15066 = vmatprep.mubr.msk.f32.mxu1 %vm526_vm3, %v18068_v57  ;;  %15314 = vmatprep.mubr.msk.f32.mxu0 %vm526_vm3, %v3602_v26  ;;  %v3607_v57 = vld [vmem:[#allocation2 + $0x10d] sm:$0xff] }
 0x13f   : > { %v4040_v48 = vld [vmem:[#allocation2 + $0x126] sm:$0xff] }
 0x140   : > { %v2323_v26 = vld [vmem:[#allocation2 + $0x12b] sm:$0xff] }
 0x141   : > { %15067 = vmatmul.mubr.msk.f32.gmra.mrb[8].mxu1 %vm526_vm3, %v18084_v60  ;;  %15315 = vmatmul.mubr.msk.f32.gmra.mrb[24].mxu0 %vm526_vm3, %v3603_v49  ;;  %v3608_v60 = vld [vmem:[#allocation2 + $0x115] sm:$0xff] }
 0x142   : > { %15069 = vmatprep.mubr.msk.f32.mxu1 %vm526_vm3, %v18086_v61  ;;  %15317 = vmatprep.mubr.msk.f32.mxu0 %vm526_vm3, %v3604_v52  ;;  %v3609_v61 = vld [vmem:[#allocation2 + $0x11d] sm:$0xff]  ;;  %v4041_v49 = vld [vmem:[#allocation2 + $0x12e] sm:$0xff] }
 0x143   : > { %v4042_v52 = vld [vmem:[#allocation2 + $0x136] sm:$0xff] }
 0x145   : > { %15070 = vmatmul.mubr.msk.f32.gmra.mrb[10].mxu1 %vm526_vm3, %v18102_v0  ;;  %15318 = vmatmul.mubr.msk.f32.gmra.mrb[26].mxu0 %vm526_vm3, %v3605_v53  ;;  %v3610_v0 = vld [vmem:[#allocation2 + $0x125] sm:$0xff] }
 0x146   : > { %15072 = vmatprep.mubr.msk.f32.mxu1 %vm526_vm3, %v18104_v1  ;;  %15320 = vmatprep.mubr.msk.f32.mxu0 %vm526_vm3, %v3606_v56  ;;  %v3611_v1 = vld [vmem:[#allocation2 + $0x12d] sm:$0xff]  ;;  %v4043_v56 = vld [vmem:[#allocation2 + $0x13e] sm:$0xff] }
 0x147   : > { %v13214_v53 = vld [vmem:[%s19913_s4 + $0x8] sm:$0xff] }
 0x148   : > { %15388 = vmatprep.subr.mxu1 %v13214_v53 }
 0x149   : > { %15073 = vmatmul.mubr.msk.f32.gmra.mrb[12].mxu1 %vm526_vm3, %v18120_v5  ;;  %15321 = vmatmul.mubr.msk.f32.gmra.mrb[28].mxu0 %vm526_vm3, %v3607_v57  ;;  %v3612_v5 = vld [vmem:[#allocation2 + $0x135] sm:$0xff] }
 0x14a   : > { %15075 = vmatprep.mubr.msk.f32.mxu1 %vm526_vm3, %v18122_v6  ;;  %15323 = vmatprep.mubr.msk.f32.mxu0 %vm526_vm3, %v3608_v60  ;;  %v3613_v6 = vld [vmem:[#allocation2 + $0x13d] sm:$0xff] }
 0x14b   : > { %v4850_v57 = vld [vmem:[#allocation3 + $0x1] sm:$0xff]  ;;  %v4851_v60 = vld [vmem:[#allocation3 + $0x9] sm:$0xff] }
 0x14d   : > { %15076 = vmatmul.mubr.msk.f32.gmra.mrb[14].mxu1 %vm526_vm3, %v18138_v9  ;;  %15324 = vmatmul.mubr.msk.f32.gmra.mrb[30].mxu0 %vm526_vm3, %v3609_v61  ;;  %v4008_v9 = vld [vmem:[#allocation2 + $0x26] sm:$0xff] }
 0x14e   : > { %15078 = vmatprep.mubr.msk.f32.mxu1 %vm526_vm3, %v18140_v10  ;;  %15326 = vmatprep.mubr.msk.f32.mxu0 %vm526_vm3, %v3610_v0  ;;  %v4009_v10 = vld [vmem:[#allocation2 + $0x2e] sm:$0xff]  ;;  %v4849_v61 = vld [vmem:[%s19913_s4] sm:$0xff] }
 0x14f   : > { %v18464_v0 = vld [vmem:[%s19913_s4 + $0x10] sm:$0xff] }
 0x151   : > { %15079 = vmatmul.mubr.msk.f32.gmra.mrb[16].mxu1 %vm526_vm3, %v18155_v14  ;;  %15327 = vmatmul.mubr.msk.f32.gmra.mrb[32].mxu0 %vm526_vm3, %v3611_v1  ;;  %v4010_v14 = vld [vmem:[#allocation2 + $0x36] sm:$0xff] }
 0x152   : > { %15081 = vmatprep.mubr.msk.f32.mxu1 %vm526_vm3, %v18157_v16  ;;  %15329 = vmatprep.mubr.msk.f32.mxu0 %vm526_vm3, %v3612_v5  ;;  %v4011_v16 = vld [vmem:[#allocation2 + $0x3e] sm:$0xff] }
 0x155   : > { %15082 = vmatmul.mubr.msk.f32.gmra.mrb[18].mxu1 %vm526_vm3, %v18171_v23  ;;  %15330 = vmatmul.mubr.msk.f32.gmra.mrb[34].mxu0 %vm526_vm3, %v3613_v6  ;;  %v4012_v23 = vld [vmem:[#allocation2 + $0x46] sm:$0xff] }
 0x156   : > { %15084 = vmatprep.mubr.msk.f32.mxu1 %vm526_vm3, %v18173_v27  ;;  %15334 = vmatprep.mubr.msk.f32.mxu0 %vm526_vm3, %v4008_v9  ;;  %v4013_v27 = vld [vmem:[#allocation2 + $0x4e] sm:$0xff] }
 0x159   : > { %15085 = vmatmul.mubr.msk.f32.gmra.mrb[20].mxu1 %vm526_vm3, %v18188_v35  ;;  %15335 = vmatmul.mubr.msk.f32.vlgmr.msra.gmra.mrb[0].mxu0 %vm526_vm3, %v4009_v10  ;;  %v4014_v35 = vld [vmem:[#allocation2 + $0x56] sm:$0xff] }
 0x15a   : > { %15087 = vmatprep.mubr.msk.f32.mxu1 %vm526_vm3, %v18191_v41  ;;  %15337 = vmatprep.mubr.msk.f32.mxu0 %vm526_vm3, %v4010_v14  ;;  %v4015_v41 = vld [vmem:[#allocation2 + $0x5e] sm:$0xff] }
 0x15d   : > { %15088 = vmatmul.mubr.msk.f32.gmra.mrb[22].mxu1 %vm526_vm3, %v18205_v22  ;;  %15338 = vmatmul.mubr.msk.f32.gmra.mrb[2].mxu0 %vm526_vm3, %v4011_v16  ;;  %v4016_v22 = vld [vmem:[#allocation2 + $0x66] sm:$0xff] }
 0x15e   : > { %15090 = vmatprep.mubr.msk.f32.mxu1 %vm526_vm3, %v18207_v43  ;;  %15340 = vmatprep.mubr.msk.f32.mxu0 %vm526_vm3, %v4012_v23  ;;  %v4017_v43 = vld [vmem:[#allocation2 + $0x6e] sm:$0xff] }
 0x161   : > { %15091 = vmatmul.mubr.msk.f32.gmra.mrb[24].mxu1 %vm526_vm3, %v18221_v32  ;;  %15341 = vmatmul.mubr.msk.f32.gmra.mrb[4].mxu0 %vm526_vm3, %v4013_v27  ;;  %v4020_v32 = vld [vmem:[#allocation2 + $0x86] sm:$0xff] }
 0x162   : > { %15093 = vmatprep.mubr.msk.f32.mxu1 %vm526_vm3, %v18223_v36  ;;  %15343 = vmatprep.mubr.msk.f32.mxu0 %vm526_vm3, %v4014_v35  ;;  %v1892_v36 = vld [vmem:[#allocation2 + $0x122] sm:$0xff] }
 0x165   : > { %15094 = vmatmul.mubr.msk.f32.gmra.mrb[26].mxu1 %vm526_vm3, %v18237_v47  ;;  %15344 = vmatmul.mubr.msk.f32.gmra.mrb[6].mxu0 %vm526_vm3, %v4015_v41  ;;  %v2306_v47 = vld [vmem:[#allocation2 + $0xa3] sm:$0xff] }
 0x166   : > { %15096 = vmatprep.mubr.msk.f32.mxu1 %vm526_vm3, %v18239_v50  ;;  %15346 = vmatprep.mubr.msk.f32.mxu0 %vm526_vm3, %v4016_v22  ;;  %v2307_v50 = vld [vmem:[#allocation2 + $0xab] sm:$0xff] }
 0x169   : > { %15097 = vmatmul.mubr.msk.f32.gmra.mrb[28].mxu1 %vm526_vm3, %v18253_v58  ;;  %15347 = vmatmul.mubr.msk.f32.gmra.mrb[8].mxu0 %vm526_vm3, %v4017_v43  ;;  %v2309_v58 = vld [vmem:[#allocation2 + $0xbb] sm:$0xff] }
 0x16a   : > { %15099 = vmatprep.mubr.msk.f32.mxu1 %vm526_vm3, %v18255_v62  ;;  %15349 = vmatprep.mubr.msk.f32.mxu0 %vm526_vm3, %v4018_v28  ;;  %v2310_v62 = vld [vmem:[#allocation2 + $0xc3] sm:$0xff] }
 0x16d   : > { %15100 = vmatmul.mubr.msk.f32.gmra.mrb[30].mxu1 %vm526_vm3, %v18269_v7  ;;  %15350 = vmatmul.mubr.msk.f32.gmra.mrb[10].mxu0 %vm526_vm3, %v4019_v30  ;;  %v2312_v7 = vld [vmem:[#allocation2 + $0xd3] sm:$0xff] }
 0x16e   : > { %15102 = vmatprep.mubr.msk.f32.mxu1 %vm526_vm3, %v18271_v11  ;;  %15352 = vmatprep.mubr.msk.f32.mxu0 %vm526_vm3, %v4020_v32  ;;  %v2313_v11 = vld [vmem:[#allocation2 + $0xdb] sm:$0xff] }
 0x16f   : > { %v18467_v6 = vpop.permute.xlu0 %4562  ;;  %v18469_v10 = vpop.permute.xlu1 %4572 }
 0x171   : > { %15103 = vmatmul.mubr.msk.f32.gmra.mrb[32].mxu1 %vm526_vm3, %v18285_v18  ;;  %15353 = vmatmul.mubr.msk.f32.gmra.mrb[12].mxu0 %vm526_vm3, %v4021_v34  ;;  %v2315_v18 = vld [vmem:[#allocation2 + $0xeb] sm:$0xff] }
 0x172   : > { %15105 = vmatprep.mubr.msk.f32.mxu1 %vm526_vm3, %v1892_v36  ;;  %15355 = vmatprep.mubr.msk.f32.mxu0 %vm526_vm3, %v4022_v38 }
 0x173   : > { %v18471_v27 = vpop.permute.xlu0 %4567  ;;  %v18473_v35 = vpop.permute.xlu1 %4577 }
 0x175   : > { %15106 = vmatmul.mubr.msk.f32.gmra.mrb[34].mxu1 %vm526_vm3, %v1893_v40  ;;  %15356 = vmatmul.mubr.msk.f32.gmra.mrb[14].mxu0 %vm526_vm3, %v4023_v42 }
 0x176   : > { %15137 = vmatprep.mubr.msk.f32.mxu1 %vm526_vm3, %v2306_v47  ;;  %15358 = vmatprep.mubr.msk.f32.mxu0 %vm526_vm3, %v4024_v4 }
 0x177   : > { %v18477_v43 = vpop.permute.xlu0 %4582  ;;  %v18481_v30 = vpop.permute.xlu1 %4587 }
 0x179   : > { %15138 = vmatmul.mubr.msk.f32.vlgmr.msra.gmra.mrb[18].mxu1 %vm526_vm3, %v2307_v50  ;;  %15359 = vmatmul.mubr.msk.f32.gmra.mrb[16].mxu0 %vm526_vm3, %v4025_v51 }
 0x17a   : > { %15140 = vmatprep.mubr.msk.f32.mxu1 %vm526_vm3, %v2308_v54  ;;  %15361 = vmatprep.mubr.msk.f32.mxu0 %vm526_vm3, %v4026_v55 }
 0x17b   : > { %15389 = vmatpush3.msra.mxu1 %v13214_v53  ;;  %v18489_v38 = vpop.permute.xlu0 %4592  ;;  %v18491_v40 = vpop.permute.xlu1 %4597 }
 0x17c   : > { %15444 = vmatprep.subr.mxu1 %v4849_v61 }
 0x17d   : > { %15141 = vmatmul.mubr.msk.f32.gmra.mrb[20].mxu1 %vm526_vm3, %v2309_v58  ;;  %15362 = vmatmul.mubr.msk.f32.gmra.mrb[18].mxu0 %vm526_vm3, %v4027_v59 }
 0x17e   : > { %15143 = vmatprep.mubr.msk.f32.mxu1 %vm526_vm3, %v2310_v62  ;;  %15364 = vmatprep.mubr.msk.f32.mxu0 %vm526_vm3, %v4028_v63 }
 0x17f   : > { %v18497_v4 = vpop.permute.xlu0 %4602  ;;  %v18501_v51 = vpop.permute.xlu1 %4607 }
 0x181   : > { %15144 = vmatmul.mubr.msk.f32.gmra.mrb[22].mxu1 %vm526_vm3, %v2311_v2  ;;  %15365 = vmatmul.mubr.msk.f32.gmra.mrb[20].mxu0 %vm526_vm3, %v4029_v3  ;;  %v18518_v3 = vld [vmem:[%s19911_s2] ss:$0 sm:$0xff] }
 0x182   : > { %15146 = vmatprep.mubr.msk.f32.mxu1 %vm526_vm3, %v2312_v7  ;;  %15367 = vmatprep.mubr.msk.f32.mxu0 %vm526_vm3, %v4030_v8 }
 0x183   : > { %v18509_v59 = vpop.permute.xlu0 %4612  ;;  %v18511_v62 = vpop.permute.xlu1 %4617 }
 0x185   : > { %15147 = vmatmul.mubr.msk.f32.gmra.mrb[24].mxu1 %vm526_vm3, %v2313_v11  ;;  %15368 = vmatmul.mubr.msk.f32.gmra.mrb[22].mxu0 %vm526_vm3, %v4031_v12  ;;  %v18525_v12 = vld [vmem:[%s19912_s3] ss:$0 sm:$0xff] }
 0x186   : > { %15149 = vmatprep.mubr.msk.f32.mxu1 %vm526_vm3, %v2314_v13  ;;  %15370 = vmatprep.mubr.msk.f32.mxu0 %vm526_vm3, %v4032_v15 }
 0x187   : > { %v18513_v63 = vpop.permute.xlu0 %4622  ;;  %v18520_v7 = vpop.permute.xlu1 %4627 }
 0x189   : > { %15150 = vmatmul.mubr.msk.f32.gmra.mrb[26].mxu1 %vm526_vm3, %v2315_v18  ;;  %15371 = vmatmul.mubr.msk.f32.gmra.mrb[24].mxu0 %vm526_vm3, %v4033_v19 }
 0x18a   : > { %15152 = vmatprep.mubr.msk.f32.mxu1 %vm526_vm3, %v2316_v20  ;;  %15373 = vmatprep.mubr.msk.f32.mxu0 %vm526_vm3, %v4034_v24 }
 0x18d   : > { %15153 = vmatmul.mubr.msk.f32.gmra.mrb[28].mxu1 %vm526_vm3, %v2317_v29  ;;  %15374 = vmatmul.mubr.msk.f32.gmra.mrb[26].mxu0 %vm526_vm3, %v4035_v31  ;;  %v18530_v31 = vpop.permute.xlu0 %4632 }
 0x18e   : > { %15155 = vmatprep.mubr.msk.f32.mxu1 %vm526_vm3, %v2318_v33  ;;  %15376 = vmatprep.mubr.msk.f32.mxu0 %vm526_vm3, %v4036_v37 }
 0x191   : > { %15156 = vmatmul.mubr.msk.f32.gmra.mrb[30].mxu1 %vm526_vm3, %v2319_v17  ;;  %15377 = vmatmul.mubr.msk.f32.gmra.mrb[28].mxu0 %vm526_vm3, %v4037_v44  ;;  %v18533_v17 = vpop.permute.xlu1 %4637 }
 0x192   : > { %15158 = vmatprep.mubr.msk.f32.mxu1 %vm526_vm3, %v2320_v39  ;;  %15379 = vmatprep.mubr.msk.f32.mxu0 %vm526_vm3, %v4038_v21 }
 0x195   : > { %15159 = vmatmul.mubr.msk.f32.gmra.mrb[32].mxu1 %vm526_vm3, %v2321_v45  ;;  %15380 = vmatmul.mubr.msk.f32.gmra.mrb[30].mxu0 %vm526_vm3, %v4039_v46 }
 0x196   : > { %15161 = vmatprep.mubr.msk.f32.mxu1 %vm526_vm3, %v2322_v25  ;;  %15382 = vmatprep.mubr.msk.f32.mxu0 %vm526_vm3, %v4040_v48 }
 0x199   : > { %15162 = vmatmul.mubr.msk.f32.gmra.mrb[34].mxu1 %vm526_vm3, %v2323_v26  ;;  %15383 = vmatmul.mubr.msk.f32.gmra.mrb[32].mxu0 %vm526_vm3, %v4041_v49 }
 0x19a   : > { %15385 = vmatprep.mubr.msk.f32.mxu0 %vm526_vm3, %v4042_v52  ;;  %15390 = vmatprep.mubr.msk.f32.mxu1 %vm4776_vm4, %v4850_v57 }
 0x19d   : > { %15386 = vmatmul.mubr.msk.f32.gmra.mrb[34].mxu0 %vm526_vm3, %v4043_v56  ;;  %15391 = vmatmul.mubr.msk.f32.vlgmr.msra.gmra.mrb[36].mxu1 %vm4776_vm4, %v4851_v60 }
 0x19e   : > { %15445 = vmatpush3.msra.mxu1 %v4849_v61  ;;  %v18543_v61 = vpop.permute.xlu0 %4642 }
 0x19f   : > { %15500 = vmatprep.subr.mxu1 %v18464_v0 }
 0x204   : > { %v15056_v1 = vpop.f32.mrb[0].mxu1 }
 0x205   : > { %v2073_v5 = vpop.f32.mrb[1].mxu1 }
 0x208   : > { %v15059_v9 = vpop.f32.mrb[2].mxu1 }
 0x209   : > { %v2083_v14 = vpop.f32.mrb[3].mxu1 }
 0x20c   : > { %v15062_v16 = vpop.f32.mrb[4].mxu1 }
 0x20d   : > { %v2093_v23 = vpop.f32.mrb[5].mxu1 }
 0x210   : > { %v15065_v41 = vpop.f32.mrb[6].mxu1 }
 0x211   : > { %v18475_v22 = vpop.f32.mrb[7].mxu1 }
 0x214   : > { %v18479_v28 = vpop.f32.mrb[8].mxu1 }
 0x215   : > { %v18483_v32 = vpop.f32.mrb[9].mxu1 }
 0x218   : > { %v18485_v34 = vpop.f32.mrb[10].mxu1 }
 0x219   : > { %v18487_v36 = vpop.f32.mrb[11].mxu1 }
 0x21c   : > { %v18493_v42 = vpop.f32.mrb[12].mxu1 }
 0x21d   : > { %v18495_v47 = vpop.f32.mrb[13].mxu1 }
 0x220   : > { %v18499_v50 = vpop.f32.mrb[14].mxu1 }
 0x221   : > { %v18503_v54 = vpop.f32.mrb[15].mxu1 }
 0x224   : > { %v18505_v55 = vpop.f32.mrb[16].mxu1 }
 0x225   : > { %v18507_v58 = vpop.f32.mrb[17].mxu1 }
 0x22c   : > { %v15336_v2 = vpop.f32.mrb[0].mxu0 }
 0x22d   : > { %v16398_v8 = vadd.f32 %v15336_v2, %v15056_v1  ;;  %v4223_v11 = vpop.f32.mrb[1].mxu0 }
 0x22e   : > { %v16399_v13 = vadd.f32 %v4223_v11, %v2073_v5 }
 0x22f   : > { %v4446_v15 = vmul.f32 %v16398_v8, %v18518_v3 }
 0x230   : > { %v4445_v18 = vmul.f32 %v16399_v13, %v18518_v3  ;;  %v15339_v19 = vpop.f32.mrb[2].mxu0 }
 0x231   : > { %v4489_v20 = vadd.f32 %v18525_v12, %v4446_v15  ;;  %v16400_v24 = vadd.f32 %v15339_v19, %v15059_v9  ;;  %v4233_v29 = vpop.f32.mrb[3].mxu0 }
 0x232   : > { %v4488_v33 = vadd.f32 %v18525_v12, %v4445_v18  ;;  %v16401_v37 = vadd.f32 %v4233_v29, %v2083_v14  ;;  %v18547_v14 = vpop.permute.xlu1 %4647 }
 0x233   : > { %v4525_v44 = vmax.f32 %v4489_v20, 0.0  ;;  %v4448_v39 = vmul.f32 %v16400_v24, %v18518_v3 }
 0x234   : > { %v4524_v21 = vmax.f32 %v4488_v33, 0.0  ;;  %v4447_v45 = vmul.f32 %v16401_v37, %v18518_v3  ;;  %v15342_v46 = vpop.f32.mrb[4].mxu0 }
 0x235   : > { %v4741_v25 = vmul.f32 %v18471_v27, %v4525_v44  ;;  %v4491_v48 = vadd.f32 %v18525_v12, %v4448_v39  ;;  %v16402_v26 = vadd.f32 %v15342_v46, %v15062_v16  ;;  %v4243_v49 = vpop.f32.mrb[5].mxu0  ;;  %v18561_v39 = vpop.permute.xlu0 %4652 }
 0x236   : > { %v4740_v52 = vmul.f32 %v18467_v6, %v4524_v21  ;;  %v4490_v53 = vadd.f32 %v18525_v12, %v4447_v45  ;;  %v16403_v56 = vadd.f32 %v4243_v49, %v2093_v23  ;;  %v18566_v46 = vpop.permute.xlu1 %4657 }
 0x237   : > { %4778 = vst.msk [vmem:[#allocation3 + $0x1b] sm:$0xff] %vm4776_vm4, %v4741_v25  ;;  %v4527_v57 = vmax.f32 %v4491_v48, 0.0  ;;  %v4450_v60 = vmul.f32 %v16402_v26, %v18518_v3 }
 0x238   : > { %4777 = vst.msk [vmem:[#allocation3 + $0x13] sm:$0xff] %vm4776_vm4, %v4740_v52  ;;  %v4526_v1 = vmax.f32 %v4490_v53, 0.0  ;;  %v4449_v5 = vmul.f32 %v16403_v56, %v18518_v3  ;;  %v15345_v9 = vpop.f32.mrb[6].mxu0 }
 0x239   : > { %v4743_v16 = vmul.f32 %v18473_v35, %v4527_v57  ;;  %v4493_v2 = vadd.f32 %v18525_v12, %v4450_v60  ;;  %v16404_v23 = vadd.f32 %v15345_v9, %v15065_v41  ;;  %v4253_v8 = vpop.f32.mrb[7].mxu0 }
 0x23a   : > { %v4742_v11 = vmul.f32 %v18469_v10, %v4526_v1  ;;  %v4492_v13 = vadd.f32 %v18525_v12, %v4449_v5  ;;  %v16405_v15 = vadd.f32 %v4253_v8, %v18475_v22 }
 0x23b   : > { %4780 = vst.msk [vmem:[#allocation3 + $0x2b] sm:$0xff] %vm4776_vm4, %v4743_v16  ;;  %v4529_v18 = vmax.f32 %v4493_v2, 0.0  ;;  %v4452_v19 = vmul.f32 %v16404_v23, %v18518_v3 }
 0x23c   : > { %4779 = vst.msk [vmem:[#allocation3 + $0x23] sm:$0xff] %vm4776_vm4, %v4742_v11  ;;  %v4528_v20 = vmax.f32 %v4492_v13, 0.0  ;;  %v4451_v24 = vmul.f32 %v16405_v15, %v18518_v3  ;;  %v15348_v29 = vpop.f32.mrb[8].mxu0  ;;  %v18582_v11 = vpop.permute.xlu0 %4662 }
 0x23d   : > { %v4745_v41 = vmul.f32 %v18481_v30, %v4529_v18  ;;  %v4495_v33 = vadd.f32 %v18525_v12, %v4452_v19  ;;  %v16406_v37 = vadd.f32 %v15348_v29, %v18479_v28  ;;  %v4263_v44 = vpop.f32.mrb[9].mxu0  ;;  %v18587_v18 = vpop.permute.xlu1 %4667 }
 0x23e   : > { %v4744_v22 = vmul.f32 %v18477_v43, %v4528_v20  ;;  %v4494_v21 = vadd.f32 %v18525_v12, %v4451_v24  ;;  %v16407_v45 = vadd.f32 %v4263_v44, %v18483_v32 }
 0x23f   : > { %4782 = vst.msk [vmem:[#allocation3 + $0x3b] sm:$0xff] %vm4776_vm4, %v4745_v41  ;;  %v4531_v25 = vmax.f32 %v4495_v33, 0.0  ;;  %v4454_v48 = vmul.f32 %v16406_v37, %v18518_v3  ;;  %v4852_v26 = vld [vmem:[#allocation3 + $0x11] sm:$0xff]  ;;  %v4853_v49 = vld [vmem:[#allocation3 + $0x19] sm:$0xff] }
 0x240   : > { %4781 = vst.msk [vmem:[#allocation3 + $0x33] sm:$0xff] %vm4776_vm4, %v4744_v22  ;;  %v4530_v28 = vmax.f32 %v4494_v21, 0.0  ;;  %v4453_v52 = vmul.f32 %v16407_v45, %v18518_v3  ;;  %v15351_v53 = vpop.f32.mrb[10].mxu0  ;;  %15393 = vmatprep.mubr.msk.f32.mxu1 %vm4776_vm4, %v4852_v26 }
 0x241   : > { %v4747_v56 = vmul.f32 %v18491_v40, %v4531_v25  ;;  %v4497_v32 = vadd.f32 %v18525_v12, %v4454_v48  ;;  %v16408_v57 = vadd.f32 %v15351_v53, %v18485_v34  ;;  %v4273_v60 = vpop.f32.mrb[11].mxu0  ;;  %15394 = vmatmul.mubr.msk.f32.gmra.mrb[38].mxu1 %vm4776_vm4, %v4853_v49 }
 0x242   : > { %v4746_v1 = vmul.f32 %v18489_v38, %v4530_v28  ;;  %v4496_v5 = vadd.f32 %v18525_v12, %v4453_v52  ;;  %v16409_v9 = vadd.f32 %v4273_v60, %v18487_v36 }
 0x243   : > { %4784 = vst.msk [vmem:[#allocation3 + $0x4b] sm:$0xff] %vm4776_vm4, %v4747_v56  ;;  %v4533_v16 = vmax.f32 %v4497_v32, 0.0  ;;  %v4456_v2 = vmul.f32 %v16408_v57, %v18518_v3  ;;  %v4854_v23 = vld [vmem:[#allocation3 + $0x21] sm:$0xff]  ;;  %v4855_v8 = vld [vmem:[#allocation3 + $0x29] sm:$0xff]  ;;  %v18608_v56 = vpop.permute.xlu0 %4672  ;;  %v18610_v32 = vpop.permute.xlu1 %4677 }
 0x244   : > { %4783 = vst.msk [vmem:[#allocation3 + $0x43] sm:$0xff] %vm4776_vm4, %v4746_v1  ;;  %v4532_v34 = vmax.f32 %v4496_v5, 0.0  ;;  %v4455_v13 = vmul.f32 %v16409_v9, %v18518_v3  ;;  %v15354_v15 = vpop.f32.mrb[12].mxu0  ;;  %15396 = vmatprep.mubr.msk.f32.mxu1 %vm4776_vm4, %v4854_v23 }
 0x245   : > { %v4749_v36 = vmul.f32 %v18501_v51, %v4533_v16  ;;  %v4499_v19 = vadd.f32 %v18525_v12, %v4456_v2  ;;  %v16410_v20 = vadd.f32 %v15354_v15, %v18493_v42  ;;  %v4283_v24 = vpop.f32.mrb[13].mxu0  ;;  %15397 = vmatmul.mubr.msk.f32.gmra.mrb[40].mxu1 %vm4776_vm4, %v4855_v8 }
 0x246   : > { %v4748_v29 = vmul.f32 %v18497_v4, %v4532_v34  ;;  %v4498_v41 = vadd.f32 %v18525_v12, %v4455_v13  ;;  %v16411_v33 = vadd.f32 %v4283_v24, %v18495_v47 }
 0x247   : > { %4786 = vst.msk [vmem:[#allocation3 + $0x5b] sm:$0xff] %vm4776_vm4, %v4749_v36  ;;  %v4535_v37 = vmax.f32 %v4499_v19, 0.0  ;;  %v4458_v44 = vmul.f32 %v16410_v20, %v18518_v3  ;;  %v4856_v22 = vld [vmem:[#allocation3 + $0x31] sm:$0xff]  ;;  %v4857_v21 = vld [vmem:[#allocation3 + $0x39] sm:$0xff] }
 0x248   : > { %4785 = vst.msk [vmem:[#allocation3 + $0x53] sm:$0xff] %vm4776_vm4, %v4748_v29  ;;  %v4534_v45 = vmax.f32 %v4498_v41, 0.0  ;;  %v4457_v42 = vmul.f32 %v16411_v33, %v18518_v3  ;;  %v15357_v25 = vpop.f32.mrb[14].mxu0  ;;  %15399 = vmatprep.mubr.msk.f32.mxu1 %vm4776_vm4, %v4856_v22 }
 0x249   : > { %v4751_v48 = vmul.f32 %v18511_v62, %v4535_v37  ;;  %v4501_v26 = vadd.f32 %v18525_v12, %v4458_v44  ;;  %v16412_v47 = vadd.f32 %v15357_v25, %v18499_v50  ;;  %v4293_v49 = vpop.f32.mrb[15].mxu0  ;;  %15400 = vmatmul.mubr.msk.f32.gmra.mrb[42].mxu1 %vm4776_vm4, %v4857_v21 }
 0x24a   : > { %v4750_v28 = vmul.f32 %v18509_v59, %v4534_v45  ;;  %v4500_v52 = vadd.f32 %v18525_v12, %v4457_v42  ;;  %v16413_v53 = vadd.f32 %v4293_v49, %v18503_v54  ;;  %v18636_v49 = vpop.permute.xlu1 %4687 }
 0x24b   : > { %4788 = vst.msk [vmem:[#allocation3 + $0x6b] sm:$0xff] %vm4776_vm4, %v4751_v48  ;;  %v4537_v57 = vmax.f32 %v4501_v26, 0.0  ;;  %v4460_v60 = vmul.f32 %v16412_v47, %v18518_v3  ;;  %v4858_v1 = vld [vmem:[#allocation3 + $0x41] sm:$0xff]  ;;  %v4859_v50 = vld [vmem:[#allocation3 + $0x49] sm:$0xff]  ;;  %v18634_v47 = vpop.permute.xlu0 %4682 }
 0x24c   : > { %4787 = vst.msk [vmem:[#allocation3 + $0x63] sm:$0xff] %vm4776_vm4, %v4750_v28  ;;  %v4536_v5 = vmax.f32 %v4500_v52, 0.0  ;;  %v4459_v9 = vmul.f32 %v16413_v53, %v18518_v3  ;;  %v15139_v16 = vpop.f32.mrb[18].mxu1  ;;  %v15360_v2 = vpop.f32.mrb[16].mxu0  ;;  %15402 = vmatprep.mubr.msk.f32.mxu1 %vm4776_vm4, %v4858_v1 }
 0x24d   : > { %v4753_v54 = vmul.f32 %v18520_v7, %v4537_v57  ;;  %v4503_v23 = vadd.f32 %v18525_v12, %v4460_v60  ;;  %v16414_v8 = vadd.f32 %v15360_v2, %v18505_v55  ;;  %v2593_v34 = vpop.f32.mrb[19].mxu1  ;;  %v4303_v13 = vpop.f32.mrb[17].mxu0  ;;  %15403 = vmatmul.mubr.msk.f32.gmra.mrb[44].mxu1 %vm4776_vm4, %v4859_v50 }
 0x24e   : > { %v4752_v15 = vmul.f32 %v18513_v63, %v4536_v5  ;;  %v4502_v36 = vadd.f32 %v18525_v12, %v4459_v9  ;;  %v16415_v19 = vadd.f32 %v4303_v13, %v18507_v58 }
 0x24f   : > { %4790 = vst.msk [vmem:[#allocation3 + $0x7b] sm:$0xff] %vm4776_vm4, %v4753_v54  ;;  %v4539_v20 = vmax.f32 %v4503_v23, 0.0  ;;  %v4462_v24 = vmul.f32 %v16414_v8, %v18518_v3  ;;  %v4860_v29 = vld [vmem:[#allocation3 + $0x51] sm:$0xff]  ;;  %v4861_v41 = vld [vmem:[#allocation3 + $0x59] sm:$0xff] }
 0x250   : > { %4789 = vst.msk [vmem:[#allocation3 + $0x73] sm:$0xff] %vm4776_vm4, %v4752_v15  ;;  %v4538_v55 = vmax.f32 %v4502_v36, 0.0  ;;  %v4461_v33 = vmul.f32 %v16415_v19, %v18518_v3  ;;  %v15142_v37 = vpop.f32.mrb[20].mxu1  ;;  %v15363_v44 = vpop.f32.mrb[18].mxu0  ;;  %15405 = vmatprep.mubr.msk.f32.mxu1 %vm4776_vm4, %v4860_v29 }
 0x251   : > { %v4755_v22 = vmul.f32 %v18533_v17, %v4539_v20  ;;  %v4505_v58 = vadd.f32 %v18525_v12, %v4462_v24  ;;  %v16416_v21 = vadd.f32 %v15363_v44, %v15139_v16  ;;  %v2603_v45 = vpop.f32.mrb[21].mxu1  ;;  %v4313_v42 = vpop.f32.mrb[19].mxu0  ;;  %15406 = vmatmul.mubr.msk.f32.gmra.mrb[46].mxu1 %vm4776_vm4, %v4861_v41 }
 0x252   : > { %v4754_v25 = vmul.f32 %v18530_v31, %v4538_v55  ;;  %v4504_v48 = vadd.f32 %v18525_v12, %v4461_v33  ;;  %v16417_v26 = vadd.f32 %v4313_v42, %v2593_v34 }
 0x253   : > { %4792 = vst.msk [vmem:[#allocation3 + $0x8b] sm:$0xff] %vm4776_vm4, %v4755_v22  ;;  %v4541_v28 = vmax.f32 %v4505_v58, 0.0  ;;  %v4464_v52 = vmul.f32 %v16416_v21, %v18518_v3  ;;  %v4862_v53 = vld [vmem:[#allocation3 + $0x61] sm:$0xff]  ;;  %v4863_v57 = vld [vmem:[#allocation3 + $0x69] sm:$0xff] }
 0x254   : > { %4791 = vst.msk [vmem:[#allocation3 + $0x83] sm:$0xff] %vm4776_vm4, %v4754_v25  ;;  %v4540_v60 = vmax.f32 %v4504_v48, 0.0  ;;  %v4463_v1 = vmul.f32 %v16417_v26, %v18518_v3  ;;  %v15145_v50 = vpop.f32.mrb[22].mxu1  ;;  %v15366_v5 = vpop.f32.mrb[20].mxu0  ;;  %15408 = vmatprep.mubr.msk.f32.mxu1 %vm4776_vm4, %v4862_v53 }
 0x255   : > { %v4757_v9 = vmul.f32 %v18547_v14, %v4541_v28  ;;  %v4507_v16 = vadd.f32 %v18525_v12, %v4464_v52  ;;  %v16418_v2 = vadd.f32 %v15366_v5, %v15142_v37  ;;  %v2613_v54 = vpop.f32.mrb[23].mxu1  ;;  %v4323_v23 = vpop.f32.mrb[21].mxu0  ;;  %15409 = vmatmul.mubr.msk.f32.gmra.mrb[48].mxu1 %vm4776_vm4, %v4863_v57 }
 0x256   : > { %v4756_v8 = vmul.f32 %v18543_v61, %v4540_v60  ;;  %v4506_v34 = vadd.f32 %v18525_v12, %v4463_v1  ;;  %v16419_v13 = vadd.f32 %v4323_v23, %v2603_v45  ;;  %v18658_v25 = vpop.permute.xlu0 %4692  ;;  %v18660_v48 = vpop.permute.xlu1 %4697 }
 0x257   : > { %4794 = vst.msk [vmem:[#allocation3 + $0x9b] sm:$0xff] %vm4776_vm4, %v4757_v9  ;;  %v4543_v15 = vmax.f32 %v4507_v16, 0.0  ;;  %v4466_v36 = vmul.f32 %v16418_v2, %v18518_v3  ;;  %v4864_v19 = vld [vmem:[#allocation3 + $0x71] sm:$0xff]  ;;  %v4865_v20 = vld [vmem:[#allocation3 + $0x79] sm:$0xff] }
 0x258   : > { %4793 = vst.msk [vmem:[#allocation3 + $0x93] sm:$0xff] %vm4776_vm4, %v4756_v8  ;;  %v4542_v24 = vmax.f32 %v4506_v34, 0.0  ;;  %v4465_v29 = vmul.f32 %v16419_v13, %v18518_v3  ;;  %v15148_v41 = vpop.f32.mrb[24].mxu1  ;;  %v15369_v55 = vpop.f32.mrb[22].mxu0  ;;  %15411 = vmatprep.mubr.msk.f32.mxu1 %vm4776_vm4, %v4864_v19 }
 0x259   : > { %v4759_v33 = vmul.f32 %v18566_v46, %v4543_v15  ;;  %v4509_v37 = vadd.f32 %v18525_v12, %v4466_v36  ;;  %v16420_v44 = vadd.f32 %v15369_v55, %v15145_v50  ;;  %v2623_v22 = vpop.f32.mrb[25].mxu1  ;;  %v4333_v58 = vpop.f32.mrb[23].mxu0  ;;  %15412 = vmatmul.mubr.msk.f32.gmra.mrb[50].mxu1 %vm4776_vm4, %v4865_v20 }
 0x25a   : > { %v4758_v21 = vmul.f32 %v18561_v39, %v4542_v24  ;;  %v4508_v45 = vadd.f32 %v18525_v12, %v4465_v29  ;;  %v16421_v42 = vadd.f32 %v4333_v58, %v2613_v54 }
 0x25b   : > { %4796 = vst.msk [vmem:[#allocation3 + $0xab] sm:$0xff] %vm4776_vm4, %v4759_v33  ;;  %v4545_v26 = vmax.f32 %v4509_v37, 0.0  ;;  %v4468_v28 = vmul.f32 %v16420_v44, %v18518_v3  ;;  %v4866_v52 = vld [vmem:[#allocation3 + $0x81] sm:$0xff]  ;;  %v4867_v53 = vld [vmem:[#allocation3 + $0x89] sm:$0xff] }
 0x25c   : > { %4795 = vst.msk [vmem:[#allocation3 + $0xa3] sm:$0xff] %vm4776_vm4, %v4758_v21  ;;  %v4544_v57 = vmax.f32 %v4508_v45, 0.0  ;;  %v4467_v60 = vmul.f32 %v16421_v42, %v18518_v3  ;;  %v15151_v1 = vpop.f32.mrb[26].mxu1  ;;  %v15372_v50 = vpop.f32.mrb[24].mxu0  ;;  %15414 = vmatprep.mubr.msk.f32.mxu1 %vm4776_vm4, %v4866_v52 }
 0x25d   : > { %v4761_v5 = vmul.f32 %v18587_v18, %v4545_v26  ;;  %v4511_v9 = vadd.f32 %v18525_v12, %v4468_v28  ;;  %v16422_v16 = vadd.f32 %v15372_v50, %v15148_v41  ;;  %v2633_v2 = vpop.f32.mrb[27].mxu1  ;;  %v4343_v54 = vpop.f32.mrb[25].mxu0  ;;  %15415 = vmatmul.mubr.msk.f32.gmra.mrb[52].mxu1 %vm4776_vm4, %v4867_v53 }
 0x25e   : > { %v4760_v23 = vmul.f32 %v18582_v11, %v4544_v57  ;;  %v4510_v8 = vadd.f32 %v18525_v12, %v4467_v60  ;;  %v16423_v34 = vadd.f32 %v4343_v54, %v2623_v22  ;;  %v18682_v42 = vpop.permute.xlu0 %4702  ;;  %v18684_v26 = vpop.permute.xlu1 %4707 }
 0x25f   : > { %4798 = vst.msk [vmem:[#allocation3 + $0xbb] sm:$0xff] %vm4776_vm4, %v4761_v5  ;;  %v4547_v13 = vmax.f32 %v4511_v9, 0.0  ;;  %v4470_v15 = vmul.f32 %v16422_v16, %v18518_v3  ;;  %v4868_v36 = vld [vmem:[#allocation3 + $0x91] sm:$0xff]  ;;  %v4869_v19 = vld [vmem:[#allocation3 + $0x99] sm:$0xff]  ;;  %19929 = vst [vmem:[#allocation5_spill] sm:$0xff] %v18682_v42 }
 0x260   : > { %4797 = vst.msk [vmem:[#allocation3 + $0xb3] sm:$0xff] %vm4776_vm4, %v4760_v23  ;;  %v4546_v20 = vmax.f32 %v4510_v8, 0.0  ;;  %v4469_v24 = vmul.f32 %v16423_v34, %v18518_v3  ;;  %v15154_v29 = vpop.f32.mrb[28].mxu1  ;;  %v15375_v41 = vpop.f32.mrb[26].mxu0  ;;  %15417 = vmatprep.mubr.msk.f32.mxu1 %vm4776_vm4, %v4868_v36  ;;  %19930 = vst [vmem:[#allocation6_spill] sm:$0xff] %v18684_v26 }
 0x261   : > { %v4763_v55 = vmul.f32 %v18610_v32, %v4547_v13  ;;  %v4513_v33 = vadd.f32 %v18525_v12, %v4470_v15  ;;  %v16424_v37 = vadd.f32 %v15375_v41, %v15151_v1  ;;  %v2643_v44 = vpop.f32.mrb[29].mxu1  ;;  %v4353_v22 = vpop.f32.mrb[27].mxu0  ;;  %15418 = vmatmul.mubr.msk.f32.gmra.mrb[54].mxu1 %vm4776_vm4, %v4869_v19 }
 0x262   : > { %v4762_v58 = vmul.f32 %v18608_v56, %v4546_v20  ;;  %v4512_v21 = vadd.f32 %v18525_v12, %v4469_v24  ;;  %v16425_v45 = vadd.f32 %v4353_v22, %v2633_v2 }
 0x263   : > { %4800 = vst.msk [vmem:[#allocation3 + $0xcb] sm:$0xff] %vm4776_vm4, %v4763_v55  ;;  %v4549_v28 = vmax.f32 %v4513_v33, 0.0  ;;  %v4472_v52 = vmul.f32 %v16424_v37, %v18518_v3  ;;  %v4870_v53 = vld [vmem:[#allocation3 + $0xa1] sm:$0xff]  ;;  %v4871_v57 = vld [vmem:[#allocation3 + $0xa9] sm:$0xff] }
 0x264   : > { %4799 = vst.msk [vmem:[#allocation3 + $0xc3] sm:$0xff] %vm4776_vm4, %v4762_v58  ;;  %v4548_v60 = vmax.f32 %v4512_v21, 0.0  ;;  %v4471_v1 = vmul.f32 %v16425_v45, %v18518_v3  ;;  %v15157_v50 = vpop.f32.mrb[30].mxu1  ;;  %v15378_v5 = vpop.f32.mrb[28].mxu0  ;;  %15420 = vmatprep.mubr.msk.f32.mxu1 %vm4776_vm4, %v4870_v53 }
 0x265   : > { %v4765_v9 = vmul.f32 %v18636_v49, %v4549_v28  ;;  %v4515_v16 = vadd.f32 %v18525_v12, %v4472_v52  ;;  %v16426_v2 = vadd.f32 %v15378_v5, %v15154_v29  ;;  %v2653_v54 = vpop.f32.mrb[31].mxu1  ;;  %v4363_v23 = vpop.f32.mrb[29].mxu0  ;;  %15421 = vmatmul.mubr.msk.f32.gmra.mrb[56].mxu1 %vm4776_vm4, %v4871_v57 }
 0x266   : > { %v4764_v8 = vmul.f32 %v18634_v47, %v4548_v60  ;;  %v4514_v34 = vadd.f32 %v18525_v12, %v4471_v1  ;;  %v16427_v13 = vadd.f32 %v4363_v23, %v2643_v44  ;;  %v18706_v52 = vpop.permute.xlu0 %4712  ;;  %v18708_v53 = vpop.permute.xlu1 %4717 }
 0x267   : > { %4802 = vst.msk [vmem:[#allocation3 + $0xdb] sm:$0xff] %vm4776_vm4, %v4765_v9  ;;  %v4551_v15 = vmax.f32 %v4515_v16, 0.0  ;;  %v4474_v36 = vmul.f32 %v16426_v2, %v18518_v3  ;;  %v4872_v19 = vld [vmem:[#allocation3 + $0xb1] sm:$0xff]  ;;  %v4873_v20 = vld [vmem:[#allocation3 + $0xb9] sm:$0xff]  ;;  %19931 = vst [vmem:[#allocation7_spill] sm:$0xff] %v18706_v52 }
 0x268   : > { %4801 = vst.msk [vmem:[#allocation3 + $0xd3] sm:$0xff] %vm4776_vm4, %v4764_v8  ;;  %v4550_v24 = vmax.f32 %v4514_v34, 0.0  ;;  %v4473_v29 = vmul.f32 %v16427_v13, %v18518_v3  ;;  %v15160_v41 = vpop.f32.mrb[32].mxu1  ;;  %v15381_v55 = vpop.f32.mrb[30].mxu0  ;;  %15423 = vmatprep.mubr.msk.f32.mxu1 %vm4776_vm4, %v4872_v19  ;;  %19932 = vst [vmem:[#allocation8_spill] sm:$0xff] %v18708_v53 }
 0x269   : > { %v4767_v33 = vmul.f32 %v18660_v48, %v4551_v15  ;;  %v4517_v37 = vadd.f32 %v18525_v12, %v4474_v36  ;;  %v16428_v44 = vadd.f32 %v15381_v55, %v15157_v50  ;;  %v2663_v22 = vpop.f32.mrb[33].mxu1  ;;  %v4373_v58 = vpop.f32.mrb[31].mxu0  ;;  %15424 = vmatmul.mubr.msk.f32.gmra.mrb[58].mxu1 %vm4776_vm4, %v4873_v20 }
 0x26a   : > { %v4766_v21 = vmul.f32 %v18658_v25, %v4550_v24  ;;  %v4516_v45 = vadd.f32 %v18525_v12, %v4473_v29  ;;  %v16429_v28 = vadd.f32 %v4373_v58, %v2653_v54 }
 0x26b   : > { %4804 = vst.msk [vmem:[#allocation3 + $0xeb] sm:$0xff] %vm4776_vm4, %v4767_v33  ;;  %v4553_v57 = vmax.f32 %v4517_v37, 0.0  ;;  %v4476_v60 = vmul.f32 %v16428_v44, %v18518_v3  ;;  %v4874_v1 = vld [vmem:[#allocation3 + $0xc1] sm:$0xff]  ;;  %v4875_v50 = vld [vmem:[#allocation3 + $0xc9] sm:$0xff] }
 0x26c   : > { %4803 = vst.msk [vmem:[#allocation3 + $0xe3] sm:$0xff] %vm4776_vm4, %v4766_v21  ;;  %v4552_v5 = vmax.f32 %v4516_v45, 0.0  ;;  %v4475_v9 = vmul.f32 %v16429_v28, %v18518_v3  ;;  %v15163_v16 = vpop.f32.mrb[34].mxu1  ;;  %v15384_v2 = vpop.f32.mrb[32].mxu0  ;;  %15426 = vmatprep.mubr.msk.f32.mxu1 %vm4776_vm4, %v4874_v1 }
 0x26d   : > { %v4769_v54 = vmul.f32 %v18684_v26, %v4553_v57  ;;  %v4519_v23 = vadd.f32 %v18525_v12, %v4476_v60  ;;  %v16430_v8 = vadd.f32 %v15384_v2, %v15160_v41  ;;  %v2673_v34 = vpop.f32.mrb[35].mxu1  ;;  %v4383_v13 = vpop.f32.mrb[33].mxu0  ;;  %15427 = vmatmul.mubr.msk.f32.gmra.mrb[60].mxu1 %vm4776_vm4, %v4875_v50  ;;  %v13398_v26 = vld [vmem:[%s19913_s4 + $0x28] sm:$0xff] }
 0x26e   : > { %v4768_v15 = vmul.f32 %v18682_v42, %v4552_v5  ;;  %v4518_v36 = vadd.f32 %v18525_v12, %v4475_v9  ;;  %v16431_v19 = vadd.f32 %v4383_v13, %v2663_v22  ;;  %v18728_v45 = vpop.permute.xlu1 %4727  ;;  %v18732_v1 = vpop.permute.xlu0 %4722 }
 0x26f   : > { %4806 = vst.msk [vmem:[#allocation3 + $0xfb] sm:$0xff] %vm4776_vm4, %v4769_v54  ;;  %v4555_v20 = vmax.f32 %v4519_v23, 0.0  ;;  %v4478_v24 = vmul.f32 %v16430_v8, %v18518_v3  ;;  %v4876_v29 = vld [vmem:[#allocation3 + $0xd1] sm:$0xff]  ;;  %v4877_v55 = vld [vmem:[#allocation3 + $0xd9] sm:$0xff]  ;;  %19933 = vst [vmem:[#allocation9_spill] sm:$0xff] %v18728_v45 }
 0x270   : > { %4805 = vst.msk [vmem:[#allocation3 + $0xf3] sm:$0xff] %vm4776_vm4, %v4768_v15  ;;  %v4554_v33 = vmax.f32 %v4518_v36, 0.0  ;;  %v4477_v41 = vmul.f32 %v16431_v19, %v18518_v3  ;;  %v15387_v37 = vpop.f32.mrb[34].mxu0  ;;  %15429 = vmatprep.mubr.msk.f32.mxu1 %vm4776_vm4, %v4876_v29  ;;  %19934 = vst [vmem:[#allocation10_spill] sm:$0xff] %v18732_v1 }
 0x271   : > { %v4771_v44 = vmul.f32 %v18708_v53, %v4555_v20  ;;  %v4521_v58 = vadd.f32 %v18525_v12, %v4478_v24  ;;  %v16432_v22 = vadd.f32 %v15387_v37, %v15163_v16  ;;  %v4393_v21 = vpop.f32.mrb[35].mxu0  ;;  %15430 = vmatmul.mubr.msk.f32.gmra.mrb[62].mxu1 %vm4776_vm4, %v4877_v55 }
 0x272   : > { %v4770_v28 = vmul.f32 %v18706_v52, %v4554_v33  ;;  %v4520_v57 = vadd.f32 %v18525_v12, %v4477_v41  ;;  %v16433_v60 = vadd.f32 %v4393_v21, %v2673_v34  ;;  %v18745_v20 = vpop.permute.xlu1 %4737  ;;  %v18749_v24 = vpop.permute.xlu0 %4732  ;;  %v4815_v21 = vld [vmem:[#allocation3 + $0x10] sm:$0xff] }
 0x273   : > { %4808 = vst.msk [vmem:[#allocation3 + $0x10b] sm:$0xff] %vm4776_vm4, %v4771_v44  ;;  %v4557_v50 = vmax.f32 %v4521_v58, 0.0  ;;  %v4480_v5 = vmul.f32 %v16432_v22, %v18518_v3  ;;  %v4878_v9 = vld [vmem:[#allocation3 + $0xe1] sm:$0xff]  ;;  %v4879_v2 = vld [vmem:[#allocation3 + $0xe9] sm:$0xff]  ;;  %19935 = vst [vmem:[#allocation11_spill] sm:$0xff] %v18745_v20 }
 0x274   : > { %4807 = vst.msk [vmem:[#allocation3 + $0x103] sm:$0xff] %vm4776_vm4, %v4770_v28  ;;  %v4556_v16 = vmax.f32 %v4520_v57, 0.0  ;;  %v4479_v54 = vmul.f32 %v16433_v60, %v18518_v3  ;;  %15432 = vmatprep.mubr.msk.f32.mxu1 %vm4776_vm4, %v4878_v9  ;;  %19936 = vst [vmem:[#allocation12_spill] sm:$0xff] %v18749_v24  ;;  %v4813_v44 = vld [vmem:[#allocation3] sm:$0xff]  ;;  %v4814_v58 = vld [vmem:[#allocation3 + $0x8] sm:$0xff] }
 0x275   : > { %v4773_v23 = vmul.f32 %v18728_v45, %v4557_v50  ;;  %v4523_v8 = vadd.f32 %v18525_v12, %v4480_v5  ;;  %15433 = vmatmul.mubr.msk.f32.gmra.mrb[64].mxu1 %vm4776_vm4, %v4879_v2  ;;  %v18764_v22 = vld [vmem:[%s19913_s4 + $0x18] sm:$0xff]  ;;  %v4816_v28 = vld [vmem:[#allocation3 + $0x18] sm:$0xff]  ;;  %v4818_v60 = vld [vmem:[#allocation3 + $0x28] sm:$0xff] }
 0x276   : > { %v4772_v34 = vmul.f32 %v18732_v1, %v4556_v16  ;;  %v4522_v13 = vadd.f32 %v18525_v12, %v4479_v54  ;;  %v4817_v57 = vld [vmem:[#allocation3 + $0x20] sm:$0xff]  ;;  %v4819_v50 = vld [vmem:[#allocation3 + $0x30] sm:$0xff]  ;;  %v4820_v5 = vld [vmem:[#allocation3 + $0x38] sm:$0xff] }
 0x277   : > { %4810 = vst.msk [vmem:[#allocation3 + $0x11b] sm:$0xff] %vm4776_vm4, %v4773_v23  ;;  %v4559_v15 = vmax.f32 %v4523_v8, 0.0  ;;  %v4880_v36 = vld [vmem:[#allocation3 + $0xf1] sm:$0xff]  ;;  %v4881_v19 = vld [vmem:[#allocation3 + $0xf9] sm:$0xff]  ;;  %v4822_v9 = vld [vmem:[#allocation3 + $0x48] sm:$0xff] }
 0x278   : > { %4809 = vst.msk [vmem:[#allocation3 + $0x113] sm:$0xff] %vm4776_vm4, %v4772_v34  ;;  %v4558_v3 = vmax.f32 %v4522_v13, 0.0  ;;  %15435 = vmatprep.mubr.msk.f32.mxu1 %vm4776_vm4, %v4880_v36  ;;  %v4823_v2 = vld [vmem:[#allocation3 + $0x50] sm:$0xff]  ;;  %v4824_v16 = vld [vmem:[#allocation3 + $0x58] sm:$0xff]  ;;  %v4825_v54 = vld [vmem:[#allocation3 + $0x60] sm:$0xff] }
 0x279   : > { %v4775_v29 = vmul.f32 %v18745_v20, %v4559_v15  ;;  %15436 = vmatmul.mubr.msk.f32.gmra.mrb[66].mxu1 %vm4776_vm4, %v4881_v19  ;;  %v4826_v23 = vld [vmem:[#allocation3 + $0x68] sm:$0xff]  ;;  %v4827_v8 = vld [vmem:[#allocation3 + $0x70] sm:$0xff]  ;;  %v4828_v34 = vld [vmem:[#allocation3 + $0x78] sm:$0xff] }
 0x27a   : > { %v4774_v12 = vmul.f32 %v18749_v24, %v4558_v3  ;;  %v4829_v13 = vld [vmem:[#allocation3 + $0x80] sm:$0xff]  ;;  %v4830_v15 = vld [vmem:[#allocation3 + $0x88] sm:$0xff]  ;;  %v4831_v36 = vld [vmem:[#allocation3 + $0x90] sm:$0xff] }
 0x27b   : > { %4812 = vst.msk [vmem:[#allocation3 + $0x12b] sm:$0xff] %vm4776_vm4, %v4775_v29  ;;  %v4882_v55 = vld [vmem:[#allocation3 + $0x101] sm:$0xff]  ;;  %v4883_v33 = vld [vmem:[#allocation3 + $0x109] sm:$0xff]  ;;  %v4832_v19 = vld [vmem:[#allocation3 + $0x98] sm:$0xff] }
 0x27c   : > { %4811 = vst.msk [vmem:[#allocation3 + $0x123] sm:$0xff] %vm4776_vm4, %v4774_v12  ;;  %15438 = vmatprep.mubr.msk.f32.mxu1 %vm4776_vm4, %v4882_v55  ;;  %v4833_v3 = vld [vmem:[#allocation3 + $0xa0] sm:$0xff]  ;;  %v4834_v29 = vld [vmem:[#allocation3 + $0xa8] sm:$0xff]  ;;  %v4835_v12 = vld [vmem:[#allocation3 + $0xb0] sm:$0xff] }
 0x27d   : > { %15439 = vmatmul.mubr.msk.f32.gmra.mrb[68].mxu1 %vm4776_vm4, %v4883_v33  ;;  %v4836_v55 = vld [vmem:[#allocation3 + $0xb8] sm:$0xff]  ;;  %v4837_v33 = vld [vmem:[#allocation3 + $0xc0] sm:$0xff]  ;;  %v5623_v24 = vld [vmem:[#allocation3 + $0xea] sm:$0xff] }
 0x27e   : > { %v5624_v20 = vld [vmem:[#allocation3 + $0xf2] sm:$0xff]  ;;  %v5625_v1 = vld [vmem:[#allocation3 + $0xfa] sm:$0xff]  ;;  %v5626_v45 = vld [vmem:[#allocation3 + $0x102] sm:$0xff] }
 0x27f   : > { %v4884_v41 = vld [vmem:[#allocation3 + $0x111] sm:$0xff]  ;;  %v4885_v37 = vld [vmem:[#allocation3 + $0x119] sm:$0xff] }
 0x280   : > { %15441 = vmatprep.mubr.msk.f32.mxu1 %vm4776_vm4, %v4884_v41  ;;  %v4838_v41 = vld [vmem:[#allocation3 + $0xc8] sm:$0xff]  ;;  %v5628_v53 = vld [vmem:[#allocation3 + $0x112] sm:$0xff]  ;;  %v5629_v42 = vld [vmem:[#allocation3 + $0x11a] sm:$0xff] }
 0x281   : > { %15442 = vmatmul.mubr.msk.f32.gmra.mrb[70].mxu1 %vm4776_vm4, %v4885_v37  ;;  %v4839_v37 = vld [vmem:[#allocation3 + $0xd0] sm:$0xff] }
 0x282   : > { %15446 = vmatprep.mubr.msk.f32.mxu1 %vm4776_vm4, %v4813_v44  ;;  %v4840_v44 = vld [vmem:[#allocation3 + $0xd8] sm:$0xff]  ;;  %v5627_v52 = vld [vmem:[#allocation3 + $0x10a] sm:$0xff] }
 0x285   : > { %15447 = vmatmul.mubr.msk.f32.vlgmr.msra.gmra.mrb[36].mxu1 %vm4776_vm4, %v4814_v58  ;;  %v4841_v58 = vld [vmem:[#allocation3 + $0xe0] sm:$0xff] }
 0x286   : > { %15501 = vmatpush3.msra.mxu1 %v18464_v0  ;;  %15449 = vmatprep.mubr.msk.f32.mxu1 %vm4776_vm4, %v4815_v21  ;;  %v4821_v0 = vld [vmem:[#allocation3 + $0x40] sm:$0xff]  ;;  %v4842_v21 = vld [vmem:[#allocation3 + $0xe8] sm:$0xff] }
 0x287   : > { %15556 = vmatprep.subr.mxu1 %v18764_v22 }
 0x289   : > { %15450 = vmatmul.mubr.msk.f32.gmra.mrb[38].mxu1 %vm4776_vm4, %v4816_v28  ;;  %v4843_v28 = vld [vmem:[#allocation3 + $0xf0] sm:$0xff] }
 0x28a   : > { %15452 = vmatprep.mubr.msk.f32.mxu1 %vm4776_vm4, %v4817_v57  ;;  %v4844_v57 = vld [vmem:[#allocation3 + $0xf8] sm:$0xff] }
 0x28d   : > { %15453 = vmatmul.mubr.msk.f32.gmra.mrb[40].mxu1 %vm4776_vm4, %v4818_v60  ;;  %v4845_v60 = vld [vmem:[#allocation3 + $0x100] sm:$0xff] }
 0x28e   : > { %15455 = vmatprep.mubr.msk.f32.mxu1 %vm4776_vm4, %v4819_v50  ;;  %v4846_v50 = vld [vmem:[#allocation3 + $0x108] sm:$0xff] }
 0x291   : > { %15456 = vmatmul.mubr.msk.f32.gmra.mrb[42].mxu1 %vm4776_vm4, %v4820_v5  ;;  %v4847_v5 = vld [vmem:[#allocation3 + $0x110] sm:$0xff] }
 0x292   : > { %15458 = vmatprep.mubr.msk.f32.mxu1 %vm4776_vm4, %v4821_v0  ;;  %v5594_v0 = vld [vmem:[#allocation3 + $0x2] sm:$0xff] }
 0x295   : > { %15459 = vmatmul.mubr.msk.f32.gmra.mrb[44].mxu1 %vm4776_vm4, %v4822_v9  ;;  %v4848_v9 = vld [vmem:[#allocation3 + $0x118] sm:$0xff] }
 0x296   : > { %15461 = vmatprep.mubr.msk.f32.mxu1 %vm4776_vm4, %v4823_v2  ;;  %v5595_v2 = vld [vmem:[#allocation3 + $0xa] sm:$0xff] }
 0x299   : > { %15462 = vmatmul.mubr.msk.f32.gmra.mrb[46].mxu1 %vm4776_vm4, %v4824_v16  ;;  %v18807_v16 = vld [vmem:[%s19913_s4 + $0x20] sm:$0xff] }
 0x29a   : > { %15464 = vmatprep.mubr.msk.f32.mxu1 %vm4776_vm4, %v4825_v54  ;;  %v18810_v54 = vld [vmem:[#allocation3 + $0x12] sm:$0xff] }
 0x29d   : > { %15465 = vmatmul.mubr.msk.f32.gmra.mrb[48].mxu1 %vm4776_vm4, %v4826_v23  ;;  %v18816_v23 = vld [vmem:[#allocation3 + $0x1a] sm:$0xff] }
 0x29e   : > { %15467 = vmatprep.mubr.msk.f32.mxu1 %vm4776_vm4, %v4827_v8  ;;  %v18820_v8 = vld [vmem:[#allocation3 + $0x22] sm:$0xff] }
 0x2a1   : > { %15468 = vmatmul.mubr.msk.f32.gmra.mrb[50].mxu1 %vm4776_vm4, %v4828_v34  ;;  %v18824_v34 = vld [vmem:[#allocation3 + $0x2a] sm:$0xff] }
 0x2a2   : > { %15470 = vmatprep.mubr.msk.f32.mxu1 %vm4776_vm4, %v4829_v13  ;;  %v18832_v13 = vld [vmem:[#allocation3 + $0x3a] sm:$0xff] }
 0x2a5   : > { %15471 = vmatmul.mubr.msk.f32.gmra.mrb[52].mxu1 %vm4776_vm4, %v4830_v15  ;;  %v18836_v15 = vld [vmem:[#allocation3 + $0x42] sm:$0xff] }
 0x2a6   : > { %15473 = vmatprep.mubr.msk.f32.mxu1 %vm4776_vm4, %v4831_v36  ;;  %v18840_v36 = vld [vmem:[#allocation3 + $0x4a] sm:$0xff] }
 0x2a9   : > { %15474 = vmatmul.mubr.msk.f32.gmra.mrb[54].mxu1 %vm4776_vm4, %v4832_v19  ;;  %v18844_v19 = vld [vmem:[#allocation3 + $0x52] sm:$0xff] }
 0x2aa   : > { %15476 = vmatprep.mubr.msk.f32.mxu1 %vm4776_vm4, %v4833_v3  ;;  %v5605_v3 = vld [vmem:[#allocation3 + $0x5a] sm:$0xff] }
 0x2ad   : > { %15477 = vmatmul.mubr.msk.f32.gmra.mrb[56].mxu1 %vm4776_vm4, %v4834_v29  ;;  %v5606_v29 = vld [vmem:[#allocation3 + $0x62] sm:$0xff] }
 0x2ae   : > { %15479 = vmatprep.mubr.msk.f32.mxu1 %vm4776_vm4, %v4835_v12  ;;  %v5607_v12 = vld [vmem:[#allocation3 + $0x6a] sm:$0xff] }
 0x2b1   : > { %15480 = vmatmul.mubr.msk.f32.gmra.mrb[58].mxu1 %vm4776_vm4, %v4836_v55  ;;  %v5608_v55 = vld [vmem:[#allocation3 + $0x72] sm:$0xff] }
 0x2b2   : > { %15482 = vmatprep.mubr.msk.f32.mxu1 %vm4776_vm4, %v4837_v33  ;;  %v5609_v33 = vld [vmem:[#allocation3 + $0x7a] sm:$0xff] }
 0x2b5   : > { %15483 = vmatmul.mubr.msk.f32.gmra.mrb[60].mxu1 %vm4776_vm4, %v4838_v41  ;;  %v5610_v41 = vld [vmem:[#allocation3 + $0x82] sm:$0xff] }
 0x2b6   : > { %15485 = vmatprep.mubr.msk.f32.mxu1 %vm4776_vm4, %v4839_v37  ;;  %v5611_v37 = vld [vmem:[#allocation3 + $0x8a] sm:$0xff] }
 0x2b9   : > { %15486 = vmatmul.mubr.msk.f32.gmra.mrb[62].mxu1 %vm4776_vm4, %v4840_v44  ;;  %v5612_v44 = vld [vmem:[#allocation3 + $0x92] sm:$0xff] }
 0x2ba   : > { %15488 = vmatprep.mubr.msk.f32.mxu1 %vm4776_vm4, %v4841_v58  ;;  %v5613_v58 = vld [vmem:[#allocation3 + $0x9a] sm:$0xff] }
 0x2bd   : > { %15489 = vmatmul.mubr.msk.f32.gmra.mrb[64].mxu1 %vm4776_vm4, %v4842_v21  ;;  %v5614_v21 = vld [vmem:[#allocation3 + $0xa2] sm:$0xff] }
 0x2be   : > { %15491 = vmatprep.mubr.msk.f32.mxu1 %vm4776_vm4, %v4843_v28  ;;  %v5615_v28 = vld [vmem:[#allocation3 + $0xaa] sm:$0xff] }
 0x2c1   : > { %15492 = vmatmul.mubr.msk.f32.gmra.mrb[66].mxu1 %vm4776_vm4, %v4844_v57  ;;  %v5616_v57 = vld [vmem:[#allocation3 + $0xb2] sm:$0xff] }
 0x2c2   : > { %15494 = vmatprep.mubr.msk.f32.mxu1 %vm4776_vm4, %v4845_v60  ;;  %v5617_v60 = vld [vmem:[#allocation3 + $0xba] sm:$0xff] }
 0x2c5   : > { %15495 = vmatmul.mubr.msk.f32.gmra.mrb[68].mxu1 %vm4776_vm4, %v4846_v50  ;;  %v5618_v50 = vld [vmem:[#allocation3 + $0xc2] sm:$0xff] }
 0x2c6   : > { %15497 = vmatprep.mubr.msk.f32.mxu1 %vm4776_vm4, %v4847_v5  ;;  %v5619_v5 = vld [vmem:[#allocation3 + $0xca] sm:$0xff] }
 0x2c9   : > { %15498 = vmatmul.mubr.msk.f32.gmra.mrb[70].mxu1 %vm4776_vm4, %v4848_v9  ;;  %v5621_v9 = vld [vmem:[#allocation3 + $0xda] sm:$0xff] }
 0x2ca   : > { %15502 = vmatprep.mubr.msk.f32.mxu1 %vm4776_vm4, %v5594_v0  ;;  %v5620_v0 = vld [vmem:[#allocation3 + $0xd2] sm:$0xff] }
 0x2cd   : > { %15503 = vmatmul.mubr.msk.f32.vlgmr.msra.gmra.mrb[36].mxu1 %vm4776_vm4, %v5595_v2  ;;  %v5622_v2 = vld [vmem:[#allocation3 + $0xe2] sm:$0xff] }
 0x2ce   : > { %15557 = vmatpush3.msra.mxu1 %v18764_v22  ;;  %15505 = vmatprep.mubr.msk.f32.mxu1 %vm4776_vm4, %v18810_v54  ;;  %v18828_v22 = vld [vmem:[#allocation3 + $0x32] sm:$0xff] }
 0x2cf   : > { %15612 = vmatprep.subr.mxu1 %v18807_v16 }
 0x2d1   : > { %15506 = vmatmul.mubr.msk.f32.gmra.mrb[38].mxu1 %vm4776_vm4, %v18816_v23 }
 0x2d2   : > { %15508 = vmatprep.mubr.msk.f32.mxu1 %vm4776_vm4, %v18820_v8 }
 0x2d5   : > { %15509 = vmatmul.mubr.msk.f32.gmra.mrb[40].mxu1 %vm4776_vm4, %v18824_v34 }
 0x2d6   : > { %15511 = vmatprep.mubr.msk.f32.mxu1 %vm4776_vm4, %v18828_v22 }
 0x2d9   : > { %15512 = vmatmul.mubr.msk.f32.gmra.mrb[42].mxu1 %vm4776_vm4, %v18832_v13 }
 0x2da   : > { %15514 = vmatprep.mubr.msk.f32.mxu1 %vm4776_vm4, %v18836_v15 }
 0x2dd   : > { %15515 = vmatmul.mubr.msk.f32.gmra.mrb[44].mxu1 %vm4776_vm4, %v18840_v36 }
 0x2de   : > { %15517 = vmatprep.mubr.msk.f32.mxu1 %vm4776_vm4, %v18844_v19 }
 0x2e1   : > { %15518 = vmatmul.mubr.msk.f32.gmra.mrb[46].mxu1 %vm4776_vm4, %v5605_v3 }
 0x2e2   : > { %15520 = vmatprep.mubr.msk.f32.mxu1 %vm4776_vm4, %v5606_v29 }
 0x2e5   : > { %15521 = vmatmul.mubr.msk.f32.gmra.mrb[48].mxu1 %vm4776_vm4, %v5607_v12 }
 0x2e6   : > { %15523 = vmatprep.mubr.msk.f32.mxu1 %vm4776_vm4, %v5608_v55 }
 0x2e9   : > { %15524 = vmatmul.mubr.msk.f32.gmra.mrb[50].mxu1 %vm4776_vm4, %v5609_v33 }
 0x2ea   : > { %15526 = vmatprep.mubr.msk.f32.mxu1 %vm4776_vm4, %v5610_v41 }
 0x2ed   : > { %15527 = vmatmul.mubr.msk.f32.gmra.mrb[52].mxu1 %vm4776_vm4, %v5611_v37 }
 0x2ee   : > { %15529 = vmatprep.mubr.msk.f32.mxu1 %vm4776_vm4, %v5612_v44 }
 0x2f1   : > { %15530 = vmatmul.mubr.msk.f32.gmra.mrb[54].mxu1 %vm4776_vm4, %v5613_v58 }
 0x2f2   : > { %15532 = vmatprep.mubr.msk.f32.mxu1 %vm4776_vm4, %v5614_v21 }
 0x2f5   : > { %15533 = vmatmul.mubr.msk.f32.gmra.mrb[56].mxu1 %vm4776_vm4, %v5615_v28 }
 0x2f6   : > { %15535 = vmatprep.mubr.msk.f32.mxu1 %vm4776_vm4, %v5616_v57 }
 0x2f9   : > { %15536 = vmatmul.mubr.msk.f32.gmra.mrb[58].mxu1 %vm4776_vm4, %v5617_v60 }
 0x2fa   : > { %15538 = vmatprep.mubr.msk.f32.mxu1 %vm4776_vm4, %v5618_v50 }
 0x2fd   : > { %15539 = vmatmul.mubr.msk.f32.gmra.mrb[60].mxu1 %vm4776_vm4, %v5619_v5 }
 0x2fe   : > { %15541 = vmatprep.mubr.msk.f32.mxu1 %vm4776_vm4, %v5620_v0 }
 0x301   : > { %15542 = vmatmul.mubr.msk.f32.gmra.mrb[62].mxu1 %vm4776_vm4, %v5621_v9 }
 0x302   : > { %15544 = vmatprep.mubr.msk.f32.mxu1 %vm4776_vm4, %v5622_v2 }
 0x305   : > { %15545 = vmatmul.mubr.msk.f32.gmra.mrb[64].mxu1 %vm4776_vm4, %v5623_v24 }
 0x306   : > { %15547 = vmatprep.mubr.msk.f32.mxu1 %vm4776_vm4, %v5624_v20 }
 0x309   : > { %15548 = vmatmul.mubr.msk.f32.gmra.mrb[66].mxu1 %vm4776_vm4, %v5625_v1 }
 0x30a   : > { %15550 = vmatprep.mubr.msk.f32.mxu1 %vm4776_vm4, %v5626_v45 }
 0x30d   : > { %15551 = vmatmul.mubr.msk.f32.gmra.mrb[68].mxu1 %vm4776_vm4, %v5627_v52 }
 0x30e   : > { %15553 = vmatprep.mubr.msk.f32.mxu1 %vm4776_vm4, %v5628_v53 }
 0x311   : > { %15554 = vmatmul.mubr.msk.f32.gmra.mrb[70].mxu1 %vm4776_vm4, %v5629_v42 }
 0x312   : > { %15558 = vmatprep.mubr.msk.f32.mxu1 %vm4776_vm4, %v18810_v54  ;;  %v6056_v54 = vld [vmem:[#allocation3 + $0x12a] sm:$0xff] }
 0x315   : > { %15559 = vmatmul.mubr.msk.f32.vlgmr.msra.gmra.mrb[36].mxu1 %vm4776_vm4, %v18816_v23  ;;  %v6448_v23 = vld [vmem:[#allocation3 + $0x13] sm:$0xff] }
 0x316   : > { %15613 = vmatpush3.msra.mxu1 %v18807_v16  ;;  %15561 = vmatprep.mubr.msk.f32.mxu1 %vm4776_vm4, %v18820_v8  ;;  %v6055_v16 = vld [vmem:[#allocation3 + $0x122] sm:$0xff]  ;;  %v6455_v8 = vld [vmem:[#allocation3 + $0x4b] sm:$0xff] }
 0x317   : > { %15668 = vmatprep.subr.mxu1 %v13398_v26 }
 0x319   : > { %15562 = vmatmul.mubr.msk.f32.gmra.mrb[38].mxu1 %vm4776_vm4, %v18824_v34  ;;  %v6457_v34 = vld [vmem:[#allocation3 + $0x5b] sm:$0xff] }
 0x31a   : > { %15564 = vmatprep.mubr.msk.f32.mxu1 %vm4776_vm4, %v18828_v22  ;;  %v6458_v22 = vld [vmem:[#allocation3 + $0x63] sm:$0xff] }
 0x31d   : > { %15565 = vmatmul.mubr.msk.f32.gmra.mrb[40].mxu1 %vm4776_vm4, %v18832_v13  ;;  %v6459_v13 = vld [vmem:[#allocation3 + $0x6b] sm:$0xff] }
 0x31e   : > { %15567 = vmatprep.mubr.msk.f32.mxu1 %vm4776_vm4, %v18836_v15  ;;  %v6460_v15 = vld [vmem:[#allocation3 + $0x73] sm:$0xff] }
 0x321   : > { %15568 = vmatmul.mubr.msk.f32.gmra.mrb[42].mxu1 %vm4776_vm4, %v18840_v36  ;;  %v6461_v36 = vld [vmem:[#allocation3 + $0x7b] sm:$0xff] }
 0x322   : > { %15570 = vmatprep.mubr.msk.f32.mxu1 %vm4776_vm4, %v18844_v19  ;;  %v6462_v19 = vld [vmem:[#allocation3 + $0x83] sm:$0xff] }
 0x325   : > { %15571 = vmatmul.mubr.msk.f32.gmra.mrb[44].mxu1 %vm4776_vm4, %v5605_v3  ;;  %v6463_v3 = vld [vmem:[#allocation3 + $0x8b] sm:$0xff] }
 0x326   : > { %15573 = vmatprep.mubr.msk.f32.mxu1 %vm4776_vm4, %v5606_v29  ;;  %v6464_v29 = vld [vmem:[#allocation3 + $0x93] sm:$0xff] }
 0x329   : > { %15574 = vmatmul.mubr.msk.f32.gmra.mrb[46].mxu1 %vm4776_vm4, %v5607_v12  ;;  %v6465_v12 = vld [vmem:[#allocation3 + $0x9b] sm:$0xff] }
 0x32a   : > { %15576 = vmatprep.mubr.msk.f32.mxu1 %vm4776_vm4, %v5608_v55  ;;  %v6466_v55 = vld [vmem:[#allocation3 + $0xa3] sm:$0xff] }
 0x32d   : > { %15577 = vmatmul.mubr.msk.f32.gmra.mrb[48].mxu1 %vm4776_vm4, %v5609_v33  ;;  %v6467_v33 = vld [vmem:[#allocation3 + $0xab] sm:$0xff] }
 0x32e   : > { %15579 = vmatprep.mubr.msk.f32.mxu1 %vm4776_vm4, %v5610_v41  ;;  %v6468_v41 = vld [vmem:[#allocation3 + $0xb3] sm:$0xff] }
 0x331   : > { %15580 = vmatmul.mubr.msk.f32.gmra.mrb[50].mxu1 %vm4776_vm4, %v5611_v37  ;;  %v6469_v37 = vld [vmem:[#allocation3 + $0xbb] sm:$0xff] }
 0x332   : > { %15582 = vmatprep.mubr.msk.f32.mxu1 %vm4776_vm4, %v5612_v44  ;;  %v6470_v44 = vld [vmem:[#allocation3 + $0xc3] sm:$0xff] }
 0x335   : > { %15583 = vmatmul.mubr.msk.f32.gmra.mrb[52].mxu1 %vm4776_vm4, %v5613_v58  ;;  %v6471_v58 = vld [vmem:[#allocation3 + $0xcb] sm:$0xff] }
 0x336   : > { %15585 = vmatprep.mubr.msk.f32.mxu1 %vm4776_vm4, %v5614_v21  ;;  %v6472_v21 = vld [vmem:[#allocation3 + $0xd3] sm:$0xff] }
 0x339   : > { %15586 = vmatmul.mubr.msk.f32.gmra.mrb[54].mxu1 %vm4776_vm4, %v5615_v28  ;;  %v6473_v28 = vld [vmem:[#allocation3 + $0xdb] sm:$0xff] }
 0x33a   : > { %15588 = vmatprep.mubr.msk.f32.mxu1 %vm4776_vm4, %v5616_v57  ;;  %v6474_v57 = vld [vmem:[#allocation3 + $0xe3] sm:$0xff] }
 0x33d   : > { %15589 = vmatmul.mubr.msk.f32.gmra.mrb[56].mxu1 %vm4776_vm4, %v5617_v60  ;;  %v6475_v60 = vld [vmem:[#allocation3 + $0xeb] sm:$0xff] }
 0x33e   : > { %15591 = vmatprep.mubr.msk.f32.mxu1 %vm4776_vm4, %v5618_v50  ;;  %v6476_v50 = vld [vmem:[#allocation3 + $0xf3] sm:$0xff] }
 0x341   : > { %15592 = vmatmul.mubr.msk.f32.gmra.mrb[58].mxu1 %vm4776_vm4, %v5619_v5  ;;  %v6477_v5 = vld [vmem:[#allocation3 + $0xfb] sm:$0xff] }
 0x342   : > { %15594 = vmatprep.mubr.msk.f32.mxu1 %vm4776_vm4, %v5620_v0  ;;  %v6478_v0 = vld [vmem:[#allocation3 + $0x103] sm:$0xff] }
 0x345   : > { %15595 = vmatmul.mubr.msk.f32.gmra.mrb[60].mxu1 %vm4776_vm4, %v5621_v9  ;;  %v6479_v9 = vld [vmem:[#allocation3 + $0x10b] sm:$0xff] }
 0x346   : > { %15597 = vmatprep.mubr.msk.f32.mxu1 %vm4776_vm4, %v5622_v2  ;;  %v6480_v2 = vld [vmem:[#allocation3 + $0x113] sm:$0xff] }
 0x349   : > { %15598 = vmatmul.mubr.msk.f32.gmra.mrb[62].mxu1 %vm4776_vm4, %v5623_v24  ;;  %v6454_v24 = vld [vmem:[#allocation3 + $0x43] sm:$0xff] }
 0x34a   : > { %15600 = vmatprep.mubr.msk.f32.mxu1 %vm4776_vm4, %v5624_v20  ;;  %v6449_v20 = vld [vmem:[#allocation3 + $0x1b] sm:$0xff] }
 0x34d   : > { %15601 = vmatmul.mubr.msk.f32.gmra.mrb[64].mxu1 %vm4776_vm4, %v5625_v1  ;;  %v6453_v1 = vld [vmem:[#allocation3 + $0x3b] sm:$0xff] }
 0x34e   : > { %15603 = vmatprep.mubr.msk.f32.mxu1 %vm4776_vm4, %v5626_v45  ;;  %v18926_v45 = vld [vmem:[%s19913_s4 + $0x30] sm:$0xff] }
 0x351   : > { %15604 = vmatmul.mubr.msk.f32.gmra.mrb[66].mxu1 %vm4776_vm4, %v5627_v52  ;;  %v6450_v52 = vld [vmem:[#allocation3 + $0x23] sm:$0xff] }
 0x352   : > { %15606 = vmatprep.mubr.msk.f32.mxu1 %vm4776_vm4, %v5628_v53  ;;  %v6452_v53 = vld [vmem:[#allocation3 + $0x33] sm:$0xff] }
 0x355   : > { %15607 = vmatmul.mubr.msk.f32.gmra.mrb[68].mxu1 %vm4776_vm4, %v5629_v42  ;;  %v6451_v42 = vld [vmem:[#allocation3 + $0x2b] sm:$0xff] }
 0x356   : > { %15609 = vmatprep.mubr.msk.f32.mxu1 %vm4776_vm4, %v6055_v16  ;;  %v6481_v16 = vld [vmem:[#allocation3 + $0x11b] sm:$0xff] }
 0x359   : > { %15610 = vmatmul.mubr.msk.f32.gmra.mrb[70].mxu1 %vm4776_vm4, %v6056_v54  ;;  %v6482_v54 = vld [vmem:[#allocation3 + $0x123] sm:$0xff] }
 0x35a   : > { %15614 = vmatprep.mubr.msk.f32.mxu1 %vm4776_vm4, %v6448_v23  ;;  %v6483_v23 = vld [vmem:[#allocation3 + $0x12b] sm:$0xff] }
 0x35d   : > { %15615 = vmatmul.mubr.msk.f32.vlgmr.msra.gmra.mrb[36].mxu1 %vm4776_vm4, %v6449_v20  ;;  %v6875_v20 = vld [vmem:[#allocation3 + $0x14] sm:$0xff] }
 0x35e   : > { %15669 = vmatpush3.msra.mxu1 %v13398_v26  ;;  %15617 = vmatprep.mubr.msk.f32.mxu1 %vm4776_vm4, %v6450_v52  ;;  %v6456_v26 = vld [vmem:[#allocation3 + $0x53] sm:$0xff]  ;;  %v6876_v52 = vld [vmem:[#allocation3 + $0x1c] sm:$0xff] }
 0x35f   : > { %15724 = vmatprep.subr.mxu1 %v18926_v45 }
 0x361   : > { %15618 = vmatmul.mubr.msk.f32.gmra.mrb[38].mxu1 %vm4776_vm4, %v6451_v42  ;;  %v18968_v42 = vld [vmem:[%s19913_s4 + $0x38] sm:$0xff] }
 0x362   : > { %15620 = vmatprep.mubr.msk.f32.mxu1 %vm4776_vm4, %v6452_v53  ;;  %v18971_v53 = vld [vmem:[#allocation3 + $0x24] sm:$0xff] }
 0x365   : > { %15621 = vmatmul.mubr.msk.f32.gmra.mrb[40].mxu1 %vm4776_vm4, %v6453_v1  ;;  %v18977_v1 = vld [vmem:[#allocation3 + $0x2c] sm:$0xff] }
 0x366   : > { %15623 = vmatprep.mubr.msk.f32.mxu1 %vm4776_vm4, %v6454_v24  ;;  %v18981_v24 = vld [vmem:[#allocation3 + $0x34] sm:$0xff] }
 0x369   : > { %15624 = vmatmul.mubr.msk.f32.gmra.mrb[42].mxu1 %vm4776_vm4, %v6455_v8  ;;  %v18985_v8 = vld [vmem:[#allocation3 + $0x3c] sm:$0xff] }
 0x36a   : > { %15626 = vmatprep.mubr.msk.f32.mxu1 %vm4776_vm4, %v6456_v26  ;;  %v18993_v26 = vld [vmem:[#allocation3 + $0x4c] sm:$0xff] }
 0x36d   : > { %15627 = vmatmul.mubr.msk.f32.gmra.mrb[44].mxu1 %vm4776_vm4, %v6457_v34  ;;  %v18997_v34 = vld [vmem:[#allocation3 + $0x54] sm:$0xff] }
 0x36e   : > { %15629 = vmatprep.mubr.msk.f32.mxu1 %vm4776_vm4, %v6458_v22  ;;  %v19001_v22 = vld [vmem:[#allocation3 + $0x5c] sm:$0xff] }
 0x371   : > { %15630 = vmatmul.mubr.msk.f32.gmra.mrb[46].mxu1 %vm4776_vm4, %v6459_v13  ;;  %v19005_v13 = vld [vmem:[#allocation3 + $0x64] sm:$0xff] }
 0x372   : > { %15632 = vmatprep.mubr.msk.f32.mxu1 %vm4776_vm4, %v6460_v15  ;;  %v6886_v15 = vld [vmem:[#allocation3 + $0x6c] sm:$0xff] }
 0x375   : > { %15633 = vmatmul.mubr.msk.f32.gmra.mrb[48].mxu1 %vm4776_vm4, %v6461_v36  ;;  %v6887_v36 = vld [vmem:[#allocation3 + $0x74] sm:$0xff] }
 0x376   : > { %15635 = vmatprep.mubr.msk.f32.mxu1 %vm4776_vm4, %v6462_v19  ;;  %v6888_v19 = vld [vmem:[#allocation3 + $0x7c] sm:$0xff] }
 0x379   : > { %15636 = vmatmul.mubr.msk.f32.gmra.mrb[50].mxu1 %vm4776_vm4, %v6463_v3  ;;  %v6889_v3 = vld [vmem:[#allocation3 + $0x84] sm:$0xff] }
 0x37a   : > { %15638 = vmatprep.mubr.msk.f32.mxu1 %vm4776_vm4, %v6464_v29  ;;  %v6890_v29 = vld [vmem:[#allocation3 + $0x8c] sm:$0xff] }
 0x37d   : > { %15639 = vmatmul.mubr.msk.f32.gmra.mrb[52].mxu1 %vm4776_vm4, %v6465_v12  ;;  %v6891_v12 = vld [vmem:[#allocation3 + $0x94] sm:$0xff] }
 0x37e   : > { %15641 = vmatprep.mubr.msk.f32.mxu1 %vm4776_vm4, %v6466_v55  ;;  %v6892_v55 = vld [vmem:[#allocation3 + $0x9c] sm:$0xff] }
 0x381   : > { %15642 = vmatmul.mubr.msk.f32.gmra.mrb[54].mxu1 %vm4776_vm4, %v6467_v33  ;;  %v6893_v33 = vld [vmem:[#allocation3 + $0xa4] sm:$0xff] }
 0x382   : > { %15644 = vmatprep.mubr.msk.f32.mxu1 %vm4776_vm4, %v6468_v41  ;;  %v6894_v41 = vld [vmem:[#allocation3 + $0xac] sm:$0xff] }
 0x385   : > { %15645 = vmatmul.mubr.msk.f32.gmra.mrb[56].mxu1 %vm4776_vm4, %v6469_v37  ;;  %v6895_v37 = vld [vmem:[#allocation3 + $0xb4] sm:$0xff] }
 0x386   : > { %15647 = vmatprep.mubr.msk.f32.mxu1 %vm4776_vm4, %v6470_v44  ;;  %v6896_v44 = vld [vmem:[#allocation3 + $0xbc] sm:$0xff] }
 0x389   : > { %15648 = vmatmul.mubr.msk.f32.gmra.mrb[58].mxu1 %vm4776_vm4, %v6471_v58  ;;  %v6897_v58 = vld [vmem:[#allocation3 + $0xc4] sm:$0xff] }
 0x38a   : > { %15650 = vmatprep.mubr.msk.f32.mxu1 %vm4776_vm4, %v6472_v21  ;;  %v6898_v21 = vld [vmem:[#allocation3 + $0xcc] sm:$0xff] }
 0x38d   : > { %15651 = vmatmul.mubr.msk.f32.gmra.mrb[60].mxu1 %vm4776_vm4, %v6473_v28  ;;  %v6899_v28 = vld [vmem:[#allocation3 + $0xd4] sm:$0xff] }
 0x38e   : > { %15653 = vmatprep.mubr.msk.f32.mxu1 %vm4776_vm4, %v6474_v57  ;;  %v6900_v57 = vld [vmem:[#allocation3 + $0xdc] sm:$0xff] }
 0x391   : > { %15654 = vmatmul.mubr.msk.f32.gmra.mrb[62].mxu1 %vm4776_vm4, %v6475_v60  ;;  %v6901_v60 = vld [vmem:[#allocation3 + $0xe4] sm:$0xff] }
 0x392   : > { %15656 = vmatprep.mubr.msk.f32.mxu1 %vm4776_vm4, %v6476_v50  ;;  %v6902_v50 = vld [vmem:[#allocation3 + $0xec] sm:$0xff] }
 0x395   : > { %15657 = vmatmul.mubr.msk.f32.gmra.mrb[64].mxu1 %vm4776_vm4, %v6477_v5  ;;  %v6903_v5 = vld [vmem:[#allocation3 + $0xf4] sm:$0xff] }
 0x396   : > { %15659 = vmatprep.mubr.msk.f32.mxu1 %vm4776_vm4, %v6478_v0  ;;  %v6904_v0 = vld [vmem:[#allocation3 + $0xfc] sm:$0xff] }
 0x399   : > { %15660 = vmatmul.mubr.msk.f32.gmra.mrb[66].mxu1 %vm4776_vm4, %v6479_v9  ;;  %v6905_v9 = vld [vmem:[#allocation3 + $0x104] sm:$0xff] }
 0x39a   : > { %15662 = vmatprep.mubr.msk.f32.mxu1 %vm4776_vm4, %v6480_v2  ;;  %v6906_v2 = vld [vmem:[#allocation3 + $0x10c] sm:$0xff] }
 0x39d   : > { %15663 = vmatmul.mubr.msk.f32.gmra.mrb[68].mxu1 %vm4776_vm4, %v6481_v16  ;;  %v6907_v16 = vld [vmem:[#allocation3 + $0x114] sm:$0xff] }
 0x39e   : > { %15665 = vmatprep.mubr.msk.f32.mxu1 %vm4776_vm4, %v6482_v54  ;;  %v6908_v54 = vld [vmem:[#allocation3 + $0x11c] sm:$0xff] }
 0x3a1   : > { %15666 = vmatmul.mubr.msk.f32.gmra.mrb[70].mxu1 %vm4776_vm4, %v6483_v23  ;;  %v6909_v23 = vld [vmem:[#allocation3 + $0x124] sm:$0xff] }
 0x3a2   : > { %15670 = vmatprep.mubr.msk.f32.mxu1 %vm4776_vm4, %v6875_v20  ;;  %v6910_v20 = vld [vmem:[#allocation3 + $0x12c] sm:$0xff] }
 0x3a5   : > { %15671 = vmatmul.mubr.msk.f32.vlgmr.msra.gmra.mrb[36].mxu1 %vm4776_vm4, %v6876_v52  ;;  %v13509_v52 = vld [vmem:[%s19913_s4 + $0x40] sm:$0xff] }
 0x3a6   : > { %15725 = vmatpush3.msra.mxu1 %v18926_v45  ;;  %15673 = vmatprep.mubr.msk.f32.mxu1 %vm4776_vm4, %v18971_v53  ;;  %v18989_v45 = vld [vmem:[#allocation3 + $0x44] sm:$0xff] }
 0x3a7   : > { %15780 = vmatprep.subr.mxu1 %v18968_v42 }
 0x3a9   : > { %15674 = vmatmul.mubr.msk.f32.gmra.mrb[38].mxu1 %vm4776_vm4, %v18977_v1 }
 0x3aa   : > { %15676 = vmatprep.mubr.msk.f32.mxu1 %vm4776_vm4, %v18981_v24 }
 0x3ad   : > { %15677 = vmatmul.mubr.msk.f32.gmra.mrb[40].mxu1 %vm4776_vm4, %v18985_v8 }
 0x3ae   : > { %15679 = vmatprep.mubr.msk.f32.mxu1 %vm4776_vm4, %v18989_v45 }
 0x3b1   : > { %15680 = vmatmul.mubr.msk.f32.gmra.mrb[42].mxu1 %vm4776_vm4, %v18993_v26 }
 0x3b2   : > { %15682 = vmatprep.mubr.msk.f32.mxu1 %vm4776_vm4, %v18997_v34 }
 0x3b5   : > { %15683 = vmatmul.mubr.msk.f32.gmra.mrb[44].mxu1 %vm4776_vm4, %v19001_v22 }
 0x3b6   : > { %15685 = vmatprep.mubr.msk.f32.mxu1 %vm4776_vm4, %v19005_v13 }
 0x3b9   : > { %15686 = vmatmul.mubr.msk.f32.gmra.mrb[46].mxu1 %vm4776_vm4, %v6886_v15 }
 0x3ba   : > { %15688 = vmatprep.mubr.msk.f32.mxu1 %vm4776_vm4, %v6887_v36 }
 0x3bd   : > { %15689 = vmatmul.mubr.msk.f32.gmra.mrb[48].mxu1 %vm4776_vm4, %v6888_v19 }
 0x3be   : > { %15691 = vmatprep.mubr.msk.f32.mxu1 %vm4776_vm4, %v6889_v3 }
 0x3c1   : > { %15692 = vmatmul.mubr.msk.f32.gmra.mrb[50].mxu1 %vm4776_vm4, %v6890_v29 }
 0x3c2   : > { %15694 = vmatprep.mubr.msk.f32.mxu1 %vm4776_vm4, %v6891_v12 }
 0x3c5   : > { %15695 = vmatmul.mubr.msk.f32.gmra.mrb[52].mxu1 %vm4776_vm4, %v6892_v55 }
 0x3c6   : > { %15697 = vmatprep.mubr.msk.f32.mxu1 %vm4776_vm4, %v6893_v33 }
 0x3c9   : > { %15698 = vmatmul.mubr.msk.f32.gmra.mrb[54].mxu1 %vm4776_vm4, %v6894_v41 }
 0x3ca   : > { %15700 = vmatprep.mubr.msk.f32.mxu1 %vm4776_vm4, %v6895_v37 }
 0x3cd   : > { %15701 = vmatmul.mubr.msk.f32.gmra.mrb[56].mxu1 %vm4776_vm4, %v6896_v44 }
 0x3ce   : > { %15703 = vmatprep.mubr.msk.f32.mxu1 %vm4776_vm4, %v6897_v58 }
 0x3d1   : > { %15704 = vmatmul.mubr.msk.f32.gmra.mrb[58].mxu1 %vm4776_vm4, %v6898_v21 }
 0x3d2   : > { %15706 = vmatprep.mubr.msk.f32.mxu1 %vm4776_vm4, %v6899_v28 }
 0x3d5   : > { %15707 = vmatmul.mubr.msk.f32.gmra.mrb[60].mxu1 %vm4776_vm4, %v6900_v57 }
 0x3d6   : > { %15709 = vmatprep.mubr.msk.f32.mxu1 %vm4776_vm4, %v6901_v60 }
 0x3d9   : > { %15710 = vmatmul.mubr.msk.f32.gmra.mrb[62].mxu1 %vm4776_vm4, %v6902_v50 }
 0x3da   : > { %15712 = vmatprep.mubr.msk.f32.mxu1 %vm4776_vm4, %v6903_v5 }
 0x3dd   : > { %15713 = vmatmul.mubr.msk.f32.gmra.mrb[64].mxu1 %vm4776_vm4, %v6904_v0 }
 0x3de   : > { %15715 = vmatprep.mubr.msk.f32.mxu1 %vm4776_vm4, %v6905_v9 }
 0x3e1   : > { %15716 = vmatmul.mubr.msk.f32.gmra.mrb[66].mxu1 %vm4776_vm4, %v6906_v2 }
 0x3e2   : > { %15718 = vmatprep.mubr.msk.f32.mxu1 %vm4776_vm4, %v6907_v16 }
 0x3e5   : > { %15719 = vmatmul.mubr.msk.f32.gmra.mrb[68].mxu1 %vm4776_vm4, %v6908_v54 }
 0x3e6   : > { %15721 = vmatprep.mubr.msk.f32.mxu1 %vm4776_vm4, %v6909_v23 }
 0x3e9   : > { %15722 = vmatmul.mubr.msk.f32.gmra.mrb[70].mxu1 %vm4776_vm4, %v6910_v20 }
 0x3ea   : > { %15726 = vmatprep.mubr.msk.f32.mxu1 %vm4776_vm4, %v18971_v53  ;;  %v7337_v53 = vld [vmem:[#allocation3 + $0x13c] sm:$0xff] }
 0x3ed   : > { %15727 = vmatmul.mubr.msk.f32.vlgmr.msra.gmra.mrb[36].mxu1 %vm4776_vm4, %v18977_v1  ;;  %v7729_v1 = vld [vmem:[#allocation3 + $0x25] sm:$0xff] }
 0x3ee   : > { %15781 = vmatpush3.msra.mxu1 %v18968_v42  ;;  %15729 = vmatprep.mubr.msk.f32.mxu1 %vm4776_vm4, %v18981_v24  ;;  %v7336_v42 = vld [vmem:[#allocation3 + $0x134] sm:$0xff] }
 0x3ef   : > { %15836 = vmatprep.subr.mxu1 %v13509_v52  ;;  %v7730_v24 = vld [vmem:[#allocation3 + $0x2d] sm:$0xff] }
 0x3f1   : > { %15730 = vmatmul.mubr.msk.f32.gmra.mrb[38].mxu1 %vm4776_vm4, %v18985_v8  ;;  %v7731_v8 = vld [vmem:[#allocation3 + $0x35] sm:$0xff] }
 0x3f2   : > { %15732 = vmatprep.mubr.msk.f32.mxu1 %vm4776_vm4, %v18989_v45  ;;  %v7732_v45 = vld [vmem:[#allocation3 + $0x3d] sm:$0xff] }
 0x3f5   : > { %15733 = vmatmul.mubr.msk.f32.gmra.mrb[40].mxu1 %vm4776_vm4, %v18993_v26  ;;  %v7733_v26 = vld [vmem:[#allocation3 + $0x45] sm:$0xff] }
 0x3f6   : > { %15735 = vmatprep.mubr.msk.f32.mxu1 %vm4776_vm4, %v18997_v34  ;;  %v7734_v34 = vld [vmem:[#allocation3 + $0x4d] sm:$0xff] }
 0x3f9   : > { %15736 = vmatmul.mubr.msk.f32.gmra.mrb[42].mxu1 %vm4776_vm4, %v19001_v22  ;;  %v7735_v22 = vld [vmem:[#allocation3 + $0x55] sm:$0xff] }
 0x3fa   : > { %15738 = vmatprep.mubr.msk.f32.mxu1 %vm4776_vm4, %v19005_v13  ;;  %v7736_v13 = vld [vmem:[#allocation3 + $0x5d] sm:$0xff] }
 0x3fd   : > { %15739 = vmatmul.mubr.msk.f32.gmra.mrb[44].mxu1 %vm4776_vm4, %v6886_v15  ;;  %v7737_v15 = vld [vmem:[#allocation3 + $0x65] sm:$0xff] }
 0x3fe   : > { %15741 = vmatprep.mubr.msk.f32.mxu1 %vm4776_vm4, %v6887_v36  ;;  %v13548_v36 = vld [vmem:[%s19916_s7 + $0x8] sm:$0xff] }
 0x3ff   : > { %15892 = vmatprep.subr.mxu0 %v13548_v36 }
 0x400   : > { %15893 = vmatpush3.msra.mxu0 %v13548_v36  ;;  %v8164_v36 = vld [vmem:[#allocation3 + $0x66] sm:$0xff] }
 0x401   : > { %15742 = vmatmul.mubr.msk.f32.gmra.mrb[46].mxu1 %vm4776_vm4, %v6888_v19  ;;  %v7738_v19 = vld [vmem:[#allocation3 + $0x6d] sm:$0xff] }
 0x402   : > { %15744 = vmatprep.mubr.msk.f32.mxu1 %vm4776_vm4, %v6889_v3  ;;  %v7739_v3 = vld [vmem:[#allocation3 + $0x75] sm:$0xff] }
 0x405   : > { %15745 = vmatmul.mubr.msk.f32.gmra.mrb[48].mxu1 %vm4776_vm4, %v6890_v29  ;;  %v7740_v29 = vld [vmem:[#allocation3 + $0x7d] sm:$0xff] }
 0x406   : > { %15747 = vmatprep.mubr.msk.f32.mxu1 %vm4776_vm4, %v6891_v12  ;;  %v7741_v12 = vld [vmem:[#allocation3 + $0x85] sm:$0xff] }
 0x409   : > { %15748 = vmatmul.mubr.msk.f32.gmra.mrb[50].mxu1 %vm4776_vm4, %v6892_v55  ;;  %v7742_v55 = vld [vmem:[#allocation3 + $0x8d] sm:$0xff] }
 0x40a   : > { %15750 = vmatprep.mubr.msk.f32.mxu1 %vm4776_vm4, %v6893_v33  ;;  %v7743_v33 = vld [vmem:[#allocation3 + $0x95] sm:$0xff] }
 0x40d   : > { %15751 = vmatmul.mubr.msk.f32.gmra.mrb[52].mxu1 %vm4776_vm4, %v6894_v41  ;;  %v7744_v41 = vld [vmem:[#allocation3 + $0x9d] sm:$0xff] }
 0x40e   : > { %15753 = vmatprep.mubr.msk.f32.mxu1 %vm4776_vm4, %v6895_v37  ;;  %v7745_v37 = vld [vmem:[#allocation3 + $0xa5] sm:$0xff] }
 0x411   : > { %15754 = vmatmul.mubr.msk.f32.gmra.mrb[54].mxu1 %vm4776_vm4, %v6896_v44  ;;  %v7746_v44 = vld [vmem:[#allocation3 + $0xad] sm:$0xff] }
 0x412   : > { %15756 = vmatprep.mubr.msk.f32.mxu1 %vm4776_vm4, %v6897_v58  ;;  %v7747_v58 = vld [vmem:[#allocation3 + $0xb5] sm:$0xff] }
 0x415   : > { %15757 = vmatmul.mubr.msk.f32.gmra.mrb[56].mxu1 %vm4776_vm4, %v6898_v21  ;;  %v7748_v21 = vld [vmem:[#allocation3 + $0xbd] sm:$0xff] }
 0x416   : > { %15759 = vmatprep.mubr.msk.f32.mxu1 %vm4776_vm4, %v6899_v28  ;;  %v7749_v28 = vld [vmem:[#allocation3 + $0xc5] sm:$0xff] }
 0x419   : > { %15760 = vmatmul.mubr.msk.f32.gmra.mrb[58].mxu1 %vm4776_vm4, %v6900_v57  ;;  %v7750_v57 = vld [vmem:[#allocation3 + $0xcd] sm:$0xff] }
 0x41a   : > { %15762 = vmatprep.mubr.msk.f32.mxu1 %vm4776_vm4, %v6901_v60  ;;  %v7751_v60 = vld [vmem:[#allocation3 + $0xd5] sm:$0xff] }
 0x41d   : > { %15763 = vmatmul.mubr.msk.f32.gmra.mrb[60].mxu1 %vm4776_vm4, %v6902_v50  ;;  %v7752_v50 = vld [vmem:[#allocation3 + $0xdd] sm:$0xff] }
 0x41e   : > { %15765 = vmatprep.mubr.msk.f32.mxu1 %vm4776_vm4, %v6903_v5  ;;  %v7753_v5 = vld [vmem:[#allocation3 + $0xe5] sm:$0xff] }
 0x421   : > { %15766 = vmatmul.mubr.msk.f32.gmra.mrb[62].mxu1 %vm4776_vm4, %v6904_v0  ;;  %v7754_v0 = vld [vmem:[#allocation3 + $0xed] sm:$0xff] }
 0x422   : > { %15768 = vmatprep.mubr.msk.f32.mxu1 %vm4776_vm4, %v6905_v9  ;;  %v7755_v9 = vld [vmem:[#allocation3 + $0xf5] sm:$0xff] }
 0x425   : > { %15769 = vmatmul.mubr.msk.f32.gmra.mrb[64].mxu1 %vm4776_vm4, %v6906_v2  ;;  %v7756_v2 = vld [vmem:[#allocation3 + $0xfd] sm:$0xff] }
 0x426   : > { %15771 = vmatprep.mubr.msk.f32.mxu1 %vm4776_vm4, %v6907_v16  ;;  %v7757_v16 = vld [vmem:[#allocation3 + $0x105] sm:$0xff] }
 0x429   : > { %15772 = vmatmul.mubr.msk.f32.gmra.mrb[66].mxu1 %vm4776_vm4, %v6908_v54  ;;  %v7758_v54 = vld [vmem:[#allocation3 + $0x10d] sm:$0xff] }
 0x42a   : > { %15774 = vmatprep.mubr.msk.f32.mxu1 %vm4776_vm4, %v6909_v23  ;;  %v7759_v23 = vld [vmem:[#allocation3 + $0x115] sm:$0xff] }
 0x42d   : > { %15775 = vmatmul.mubr.msk.f32.gmra.mrb[68].mxu1 %vm4776_vm4, %v6910_v20  ;;  %v7760_v20 = vld [vmem:[#allocation3 + $0x11d] sm:$0xff] }
 0x42e   : > { %15777 = vmatprep.mubr.msk.f32.mxu1 %vm4776_vm4, %v7336_v42  ;;  %v7763_v42 = vld [vmem:[#allocation3 + $0x135] sm:$0xff] }
 0x431   : > { %15778 = vmatmul.mubr.msk.f32.gmra.mrb[70].mxu1 %vm4776_vm4, %v7337_v53  ;;  %v7762_v53 = vld [vmem:[#allocation3 + $0x12d] sm:$0xff] }
 0x432   : > { %15782 = vmatprep.mubr.msk.f32.mxu1 %vm4776_vm4, %v7729_v1  ;;  %v7764_v1 = vld [vmem:[#allocation3 + $0x13d] sm:$0xff] }
 0x435   : > { %15783 = vmatmul.mubr.msk.f32.vlgmr.msra.gmra.mrb[36].mxu1 %vm4776_vm4, %v7730_v24  ;;  %v8156_v24 = vld [vmem:[#allocation3 + $0x26] sm:$0xff] }
 0x436   : > { %15837 = vmatpush3.msra.mxu1 %v13509_v52  ;;  %15785 = vmatprep.mubr.msk.f32.mxu1 %vm4776_vm4, %v7731_v8  ;;  %v7761_v52 = vld [vmem:[#allocation3 + $0x125] sm:$0xff]  ;;  %v8157_v8 = vld [vmem:[#allocation3 + $0x2e] sm:$0xff] }
 0x439   : > { %15786 = vmatmul.mubr.msk.f32.gmra.mrb[38].mxu1 %vm4776_vm4, %v7732_v45  ;;  %v8158_v45 = vld [vmem:[#allocation3 + $0x36] sm:$0xff] }
 0x43a   : > { %15788 = vmatprep.mubr.msk.f32.mxu1 %vm4776_vm4, %v7733_v26  ;;  %v8159_v26 = vld [vmem:[#allocation3 + $0x3e] sm:$0xff] }
 0x43d   : > { %15789 = vmatmul.mubr.msk.f32.gmra.mrb[40].mxu1 %vm4776_vm4, %v7734_v34  ;;  %v8160_v34 = vld [vmem:[#allocation3 + $0x46] sm:$0xff] }
 0x43e   : > { %15791 = vmatprep.mubr.msk.f32.mxu1 %vm4776_vm4, %v7735_v22  ;;  %v8161_v22 = vld [vmem:[#allocation3 + $0x4e] sm:$0xff] }
 0x441   : > { %15792 = vmatmul.mubr.msk.f32.gmra.mrb[42].mxu1 %vm4776_vm4, %v7736_v13  ;;  %v8162_v13 = vld [vmem:[#allocation3 + $0x56] sm:$0xff] }
 0x442   : > { %15794 = vmatprep.mubr.msk.f32.mxu1 %vm4776_vm4, %v7737_v15  ;;  %v8163_v15 = vld [vmem:[#allocation3 + $0x5e] sm:$0xff] }
 0x445   : > { %15795 = vmatmul.mubr.msk.f32.gmra.mrb[44].mxu1 %vm4776_vm4, %v7738_v19  ;;  %v8165_v19 = vld [vmem:[#allocation3 + $0x6e] sm:$0xff] }
 0x446   : > { %15797 = vmatprep.mubr.msk.f32.mxu1 %vm4776_vm4, %v7739_v3  ;;  %v8166_v3 = vld [vmem:[#allocation3 + $0x76] sm:$0xff] }
 0x449   : > { %15798 = vmatmul.mubr.msk.f32.gmra.mrb[46].mxu1 %vm4776_vm4, %v7740_v29  ;;  %v8167_v29 = vld [vmem:[#allocation3 + $0x7e] sm:$0xff] }
 0x44a   : > { %15800 = vmatprep.mubr.msk.f32.mxu1 %vm4776_vm4, %v7741_v12  ;;  %v8168_v12 = vld [vmem:[#allocation3 + $0x86] sm:$0xff] }
 0x44d   : > { %15801 = vmatmul.mubr.msk.f32.gmra.mrb[48].mxu1 %vm4776_vm4, %v7742_v55  ;;  %v8169_v55 = vld [vmem:[#allocation3 + $0x8e] sm:$0xff] }
 0x44e   : > { %15803 = vmatprep.mubr.msk.f32.mxu1 %vm4776_vm4, %v7743_v33  ;;  %v8170_v33 = vld [vmem:[#allocation3 + $0x96] sm:$0xff] }
 0x451   : > { %15804 = vmatmul.mubr.msk.f32.gmra.mrb[50].mxu1 %vm4776_vm4, %v7744_v41  ;;  %v8171_v41 = vld [vmem:[#allocation3 + $0x9e] sm:$0xff] }
 0x452   : > { %15806 = vmatprep.mubr.msk.f32.mxu1 %vm4776_vm4, %v7745_v37  ;;  %v8172_v37 = vld [vmem:[#allocation3 + $0xa6] sm:$0xff] }
 0x455   : > { %15807 = vmatmul.mubr.msk.f32.gmra.mrb[52].mxu1 %vm4776_vm4, %v7746_v44  ;;  %v8173_v44 = vld [vmem:[#allocation3 + $0xae] sm:$0xff] }
 0x456   : > { %15809 = vmatprep.mubr.msk.f32.mxu1 %vm4776_vm4, %v7747_v58  ;;  %v8174_v58 = vld [vmem:[#allocation3 + $0xb6] sm:$0xff] }
 0x459   : > { %15810 = vmatmul.mubr.msk.f32.gmra.mrb[54].mxu1 %vm4776_vm4, %v7748_v21  ;;  %v8175_v21 = vld [vmem:[#allocation3 + $0xbe] sm:$0xff] }
 0x45a   : > { %15812 = vmatprep.mubr.msk.f32.mxu1 %vm4776_vm4, %v7749_v28  ;;  %v8176_v28 = vld [vmem:[#allocation3 + $0xc6] sm:$0xff] }
 0x45d   : > { %15813 = vmatmul.mubr.msk.f32.gmra.mrb[56].mxu1 %vm4776_vm4, %v7750_v57  ;;  %v8177_v57 = vld [vmem:[#allocation3 + $0xce] sm:$0xff] }
 0x45e   : > { %15815 = vmatprep.mubr.msk.f32.mxu1 %vm4776_vm4, %v7751_v60  ;;  %v8178_v60 = vld [vmem:[#allocation3 + $0xd6] sm:$0xff] }
 0x461   : > { %15816 = vmatmul.mubr.msk.f32.gmra.mrb[58].mxu1 %vm4776_vm4, %v7752_v50  ;;  %v8179_v50 = vld [vmem:[#allocation3 + $0xde] sm:$0xff] }
 0x462   : > { %15818 = vmatprep.mubr.msk.f32.mxu1 %vm4776_vm4, %v7753_v5  ;;  %v8180_v5 = vld [vmem:[#allocation3 + $0xe6] sm:$0xff] }
 0x465   : > { %15819 = vmatmul.mubr.msk.f32.gmra.mrb[60].mxu1 %vm4776_vm4, %v7754_v0  ;;  %v8181_v0 = vld [vmem:[#allocation3 + $0xee] sm:$0xff] }
 0x466   : > { %15821 = vmatprep.mubr.msk.f32.mxu1 %vm4776_vm4, %v7755_v9  ;;  %v8182_v9 = vld [vmem:[#allocation3 + $0xf6] sm:$0xff] }
 0x469   : > { %15822 = vmatmul.mubr.msk.f32.gmra.mrb[62].mxu1 %vm4776_vm4, %v7756_v2  ;;  %v8183_v2 = vld [vmem:[#allocation3 + $0xfe] sm:$0xff] }
 0x46a   : > { %15824 = vmatprep.mubr.msk.f32.mxu1 %vm4776_vm4, %v7757_v16  ;;  %v8184_v16 = vld [vmem:[#allocation3 + $0x106] sm:$0xff] }
 0x46d   : > { %15825 = vmatmul.mubr.msk.f32.gmra.mrb[64].mxu1 %vm4776_vm4, %v7758_v54  ;;  %v8185_v54 = vld [vmem:[#allocation3 + $0x10e] sm:$0xff] }
 0x46e   : > { %15827 = vmatprep.mubr.msk.f32.mxu1 %vm4776_vm4, %v7759_v23  ;;  %v8186_v23 = vld [vmem:[#allocation3 + $0x116] sm:$0xff] }
 0x471   : > { %15828 = vmatmul.mubr.msk.f32.gmra.mrb[66].mxu1 %vm4776_vm4, %v7760_v20  ;;  %v8187_v20 = vld [vmem:[#allocation3 + $0x11e] sm:$0xff] }
 0x472   : > { %15830 = vmatprep.mubr.msk.f32.mxu1 %vm4776_vm4, %v7761_v52  ;;  %v8188_v52 = vld [vmem:[#allocation3 + $0x126] sm:$0xff] }
 0x475   : > { %15831 = vmatmul.mubr.msk.f32.gmra.mrb[68].mxu1 %vm4776_vm4, %v7762_v53  ;;  %v8189_v53 = vld [vmem:[#allocation3 + $0x12e] sm:$0xff] }
 0x476   : > { %15833 = vmatprep.mubr.msk.f32.mxu1 %vm4776_vm4, %v7763_v42  ;;  %v8190_v42 = vld [vmem:[#allocation3 + $0x136] sm:$0xff] }
 0x479   : > { %15834 = vmatmul.mubr.msk.f32.gmra.mrb[70].mxu1 %vm4776_vm4, %v7764_v1  ;;  %v8191_v1 = vld [vmem:[#allocation3 + $0x13e] sm:$0xff] }
 0x47a   : > { %15838 = vmatprep.mubr.msk.f32.mxu1 %vm4776_vm4, %v8156_v24  ;;  %v8814_v24 = vld [vmem:[#allocation4 + $0x1] sm:$0xff] }
 0x47b   : > { %15894 = vmatprep.mubr.msk.f32.mxu0 %vm4776_vm4, %v8814_v24 }
 0x47d   : > { %15839 = vmatmul.mubr.msk.f32.vlgmr.msra.gmra.mrb[36].mxu1 %vm4776_vm4, %v8157_v8  ;;  %v8813_v8 = vld [vmem:[%s19916_s7] sm:$0xff] }
 0x47e   : > { %15841 = vmatprep.mubr.msk.f32.mxu1 %vm4776_vm4, %v8158_v45  ;;  %v8815_v45 = vld [vmem:[#allocation4 + $0x9] sm:$0xff]  ;;  %15948 = vmatprep.subr.mxu0 %v8813_v8 }
 0x47f   : > { %15895 = vmatmul.mubr.msk.f32.vlgmr.msra.gmra.mrb[36].mxu0 %vm4776_vm4, %v8815_v45 }
 0x480   : > { %15949 = vmatpush3.msra.mxu0 %v8813_v8 }
 0x481   : > { %15842 = vmatmul.mubr.msk.f32.gmra.mrb[38].mxu1 %vm4776_vm4, %v8159_v26  ;;  %v19166_v26 = vld [vmem:[%s19916_s7 + $0x10] sm:$0xff] }
 0x482   : > { %15844 = vmatprep.mubr.msk.f32.mxu1 %vm4776_vm4, %v8160_v34  ;;  %16004 = vmatprep.subr.mxu0 %v19166_v26  ;;  %v19172_v34 = vld [vmem:[%s19914_s5] ss:$0 sm:$0xff] }
 0x485   : > { %15845 = vmatmul.mubr.msk.f32.gmra.mrb[40].mxu1 %vm4776_vm4, %v8161_v22 }
 0x486   : > { %15847 = vmatprep.mubr.msk.f32.mxu1 %vm4776_vm4, %v8162_v13  ;;  %v19177_v13 = vld [vmem:[%s19915_s6] ss:$0 sm:$0xff] }
 0x489   : > { %15848 = vmatmul.mubr.msk.f32.gmra.mrb[42].mxu1 %vm4776_vm4, %v8163_v15 }
 0x48a   : > { %15850 = vmatprep.mubr.msk.f32.mxu1 %vm4776_vm4, %v8164_v36 }
 0x48d   : > { %15851 = vmatmul.mubr.msk.f32.gmra.mrb[44].mxu1 %vm4776_vm4, %v8165_v19 }
 0x48e   : > { %15853 = vmatprep.mubr.msk.f32.mxu1 %vm4776_vm4, %v8166_v3 }
 0x491   : > { %15854 = vmatmul.mubr.msk.f32.gmra.mrb[46].mxu1 %vm4776_vm4, %v8167_v29 }
 0x492   : > { %15856 = vmatprep.mubr.msk.f32.mxu1 %vm4776_vm4, %v8168_v12 }
 0x495   : > { %15857 = vmatmul.mubr.msk.f32.gmra.mrb[48].mxu1 %vm4776_vm4, %v8169_v55 }
 0x496   : > { %15859 = vmatprep.mubr.msk.f32.mxu1 %vm4776_vm4, %v8170_v33 }
 0x499   : > { %15860 = vmatmul.mubr.msk.f32.gmra.mrb[50].mxu1 %vm4776_vm4, %v8171_v41 }
 0x49a   : > { %15862 = vmatprep.mubr.msk.f32.mxu1 %vm4776_vm4, %v8172_v37 }
 0x49d   : > { %15863 = vmatmul.mubr.msk.f32.gmra.mrb[52].mxu1 %vm4776_vm4, %v8173_v44 }
 0x49e   : > { %15865 = vmatprep.mubr.msk.f32.mxu1 %vm4776_vm4, %v8174_v58 }
 0x4a1   : > { %15866 = vmatmul.mubr.msk.f32.gmra.mrb[54].mxu1 %vm4776_vm4, %v8175_v21 }
 0x4a2   : > { %15868 = vmatprep.mubr.msk.f32.mxu1 %vm4776_vm4, %v8176_v28 }
 0x4a5   : > { %15869 = vmatmul.mubr.msk.f32.gmra.mrb[56].mxu1 %vm4776_vm4, %v8177_v57 }
 0x4a6   : > { %15871 = vmatprep.mubr.msk.f32.mxu1 %vm4776_vm4, %v8178_v60 }
 0x4a9   : > { %15872 = vmatmul.mubr.msk.f32.gmra.mrb[58].mxu1 %vm4776_vm4, %v8179_v50 }
 0x4aa   : > { %15874 = vmatprep.mubr.msk.f32.mxu1 %vm4776_vm4, %v8180_v5 }
 0x4ad   : > { %15875 = vmatmul.mubr.msk.f32.gmra.mrb[60].mxu1 %vm4776_vm4, %v8181_v0 }
 0x4ae   : > { %15877 = vmatprep.mubr.msk.f32.mxu1 %vm4776_vm4, %v8182_v9 }
 0x4b1   : > { %15878 = vmatmul.mubr.msk.f32.gmra.mrb[62].mxu1 %vm4776_vm4, %v8183_v2 }
 0x4b2   : > { %15880 = vmatprep.mubr.msk.f32.mxu1 %vm4776_vm4, %v8184_v16 }
 0x4b5   : > { %15881 = vmatmul.mubr.msk.f32.gmra.mrb[64].mxu1 %vm4776_vm4, %v8185_v54 }
 0x4b6   : > { %15883 = vmatprep.mubr.msk.f32.mxu1 %vm4776_vm4, %v8186_v23 }
 0x4b9   : > { %15884 = vmatmul.mubr.msk.f32.gmra.mrb[66].mxu1 %vm4776_vm4, %v8187_v20 }
 0x4ba   : > { %15886 = vmatprep.mubr.msk.f32.mxu1 %vm4776_vm4, %v8188_v52 }
 0x4bd   : > { %15887 = vmatmul.mubr.msk.f32.gmra.mrb[68].mxu1 %vm4776_vm4, %v8189_v53 }
 0x4be   : > { %15889 = vmatprep.mubr.msk.f32.mxu1 %vm4776_vm4, %v8190_v42 }
 0x4c1   : > { %15890 = vmatmul.mubr.msk.f32.gmra.mrb[70].mxu1 %vm4776_vm4, %v8191_v1 }
 0x550   : > { %v15840_v22 = vpop.f32.mrb[36].mxu1 }
 0x551   : > { %v8591_v15 = vmul.f32 %v15840_v22, %v19172_v34  ;;  %v8368_v36 = vpop.f32.mrb[37].mxu1 }
 0x552   : > { %v8590_v19 = vmul.f32 %v19172_v34, %v8368_v36 }
 0x553   : > { %v8634_v3 = vadd.f32 %v19177_v13, %v8591_v15 }
 0x554   : > { %v8633_v29 = vadd.f32 %v19177_v13, %v8590_v19  ;;  %v15843_v12 = vpop.f32.mrb[38].mxu1 }
 0x555   : > { %v8670_v55 = vmax.f32 %v8634_v3, 0.0  ;;  %v8593_v33 = vmul.f32 %v15843_v12, %v19172_v34  ;;  %v8378_v41 = vpop.f32.mrb[39].mxu1 }
 0x556   : > { %v8669_v37 = vmax.f32 %v8633_v29, 0.0  ;;  %v8592_v44 = vmul.f32 %v19172_v34, %v8378_v41 }
 0x557   : > { %v8706_v58 = vmul.f32 %v8670_v55, %v18471_v27  ;;  %v8636_v21 = vadd.f32 %v19177_v13, %v8593_v33 }
 0x558   : > { %v8705_v28 = vmul.f32 %v8669_v37, %v18467_v6  ;;  %v8635_v57 = vadd.f32 %v19177_v13, %v8592_v44  ;;  %v15846_v60 = vpop.f32.mrb[40].mxu1 }
 0x559   : > { %8742 = vst.msk [vmem:[#allocation4 + $0x1b] sm:$0xff] %vm4776_vm4, %v8706_v58  ;;  %v8672_v50 = vmax.f32 %v8636_v21, 0.0  ;;  %v8595_v5 = vmul.f32 %v15846_v60, %v19172_v34  ;;  %v8388_v0 = vpop.f32.mrb[41].mxu1 }
 0x55a   : > { %8741 = vst.msk [vmem:[#allocation4 + $0x13] sm:$0xff] %vm4776_vm4, %v8705_v28  ;;  %v8671_v9 = vmax.f32 %v8635_v57, 0.0  ;;  %v8594_v2 = vmul.f32 %v19172_v34, %v8388_v0 }
 0x55b   : > { %v8708_v27 = vmul.f32 %v8672_v50, %v18473_v35  ;;  %v8638_v16 = vadd.f32 %v19177_v13, %v8595_v5 }
 0x55c   : > { %v8707_v6 = vmul.f32 %v8671_v9, %v18469_v10  ;;  %v8637_v54 = vadd.f32 %v19177_v13, %v8594_v2  ;;  %v15849_v23 = vpop.f32.mrb[42].mxu1 }
 0x55d   : > { %8744 = vst.msk [vmem:[#allocation4 + $0x2b] sm:$0xff] %vm4776_vm4, %v8708_v27  ;;  %v8674_v20 = vmax.f32 %v8638_v16, 0.0  ;;  %v8597_v52 = vmul.f32 %v15849_v23, %v19172_v34  ;;  %v8398_v42 = vpop.f32.mrb[43].mxu1 }
 0x55e   : > { %8743 = vst.msk [vmem:[#allocation4 + $0x23] sm:$0xff] %vm4776_vm4, %v8707_v6  ;;  %v8673_v53 = vmax.f32 %v8637_v54, 0.0  ;;  %v8596_v1 = vmul.f32 %v19172_v34, %v8398_v42 }
 0x55f   : > { %v8710_v35 = vmul.f32 %v8674_v20, %v18481_v30  ;;  %v8640_v24 = vadd.f32 %v19177_v13, %v8597_v52 }
 0x560   : > { %v8709_v10 = vmul.f32 %v8673_v53, %v18477_v43  ;;  %v8639_v8 = vadd.f32 %v19177_v13, %v8596_v1  ;;  %v15852_v45 = vpop.f32.mrb[44].mxu1 }
 0x561   : > { %8746 = vst.msk [vmem:[#allocation4 + $0x3b] sm:$0xff] %vm4776_vm4, %v8710_v35  ;;  %v8676_v22 = vmax.f32 %v8640_v24, 0.0  ;;  %v8599_v15 = vmul.f32 %v15852_v45, %v19172_v34  ;;  %v8408_v36 = vpop.f32.mrb[45].mxu1  ;;  %v8816_v19 = vld [vmem:[#allocation4 + $0x11] sm:$0xff]  ;;  %v8817_v3 = vld [vmem:[#allocation4 + $0x19] sm:$0xff] }
 0x562   : > { %8745 = vst.msk [vmem:[#allocation4 + $0x33] sm:$0xff] %vm4776_vm4, %v8709_v10  ;;  %v8675_v29 = vmax.f32 %v8639_v8, 0.0  ;;  %v8598_v30 = vmul.f32 %v19172_v34, %v8408_v36  ;;  %15897 = vmatprep.mubr.msk.f32.mxu0 %vm4776_vm4, %v8816_v19 }
 0x563   : > { %v8712_v43 = vmul.f32 %v8676_v22, %v18491_v40  ;;  %v8642_v12 = vadd.f32 %v19177_v13, %v8599_v15  ;;  %15898 = vmatmul.mubr.msk.f32.gmra.mrb[38].mxu0 %vm4776_vm4, %v8817_v3 }
 0x564   : > { %v8711_v55 = vmul.f32 %v8675_v29, %v18489_v38  ;;  %v8641_v33 = vadd.f32 %v19177_v13, %v8598_v30  ;;  %v15855_v41 = vpop.f32.mrb[46].mxu1 }
 0x565   : > { %8748 = vst.msk [vmem:[#allocation4 + $0x4b] sm:$0xff] %vm4776_vm4, %v8712_v43  ;;  %v8678_v37 = vmax.f32 %v8642_v12, 0.0  ;;  %v8601_v44 = vmul.f32 %v15855_v41, %v19172_v34  ;;  %v8418_v58 = vpop.f32.mrb[47].mxu1  ;;  %v8818_v21 = vld [vmem:[#allocation4 + $0x21] sm:$0xff]  ;;  %v8819_v28 = vld [vmem:[#allocation4 + $0x29] sm:$0xff] }
 0x566   : > { %8747 = vst.msk [vmem:[#allocation4 + $0x43] sm:$0xff] %vm4776_vm4, %v8711_v55  ;;  %v8677_v40 = vmax.f32 %v8641_v33, 0.0  ;;  %v8600_v57 = vmul.f32 %v19172_v34, %v8418_v58  ;;  %15900 = vmatprep.mubr.msk.f32.mxu0 %vm4776_vm4, %v8818_v21 }
 0x567   : > { %v8714_v38 = vmul.f32 %v8678_v37, %v18501_v51  ;;  %v8644_v60 = vadd.f32 %v19177_v13, %v8601_v44  ;;  %15901 = vmatmul.mubr.msk.f32.gmra.mrb[40].mxu0 %vm4776_vm4, %v8819_v28 }
 0x568   : > { %v8713_v50 = vmul.f32 %v8677_v40, %v18497_v4  ;;  %v8643_v5 = vadd.f32 %v19177_v13, %v8600_v57  ;;  %v15858_v0 = vpop.f32.mrb[48].mxu1 }
 0x569   : > { %8750 = vst.msk [vmem:[#allocation4 + $0x5b] sm:$0xff] %vm4776_vm4, %v8714_v38  ;;  %v8680_v9 = vmax.f32 %v8644_v60, 0.0  ;;  %v8603_v2 = vmul.f32 %v15858_v0, %v19172_v34  ;;  %v8428_v27 = vpop.f32.mrb[49].mxu1  ;;  %v8820_v16 = vld [vmem:[#allocation4 + $0x31] sm:$0xff]  ;;  %v8821_v6 = vld [vmem:[#allocation4 + $0x39] sm:$0xff] }
 0x56a   : > { %8749 = vst.msk [vmem:[#allocation4 + $0x53] sm:$0xff] %vm4776_vm4, %v8713_v50  ;;  %v8679_v51 = vmax.f32 %v8643_v5, 0.0  ;;  %v8602_v54 = vmul.f32 %v19172_v34, %v8428_v27  ;;  %15903 = vmatprep.mubr.msk.f32.mxu0 %vm4776_vm4, %v8820_v16 }
 0x56b   : > { %v8716_v4 = vmul.f32 %v8680_v9, %v18511_v62  ;;  %v8646_v23 = vadd.f32 %v19177_v13, %v8603_v2  ;;  %15904 = vmatmul.mubr.msk.f32.gmra.mrb[42].mxu0 %vm4776_vm4, %v8821_v6 }
 0x56c   : > { %v8715_v20 = vmul.f32 %v8679_v51, %v18509_v59  ;;  %v8645_v52 = vadd.f32 %v19177_v13, %v8602_v54  ;;  %v15861_v42 = vpop.f32.mrb[50].mxu1 }
 0x56d   : > { %8752 = vst.msk [vmem:[#allocation4 + $0x6b] sm:$0xff] %vm4776_vm4, %v8716_v4  ;;  %v8682_v53 = vmax.f32 %v8646_v23, 0.0  ;;  %v8605_v1 = vmul.f32 %v15861_v42, %v19172_v34  ;;  %v8438_v35 = vpop.f32.mrb[51].mxu1  ;;  %v8822_v24 = vld [vmem:[#allocation4 + $0x41] sm:$0xff]  ;;  %v8823_v10 = vld [vmem:[#allocation4 + $0x49] sm:$0xff] }
 0x56e   : > { %8751 = vst.msk [vmem:[#allocation4 + $0x63] sm:$0xff] %vm4776_vm4, %v8715_v20  ;;  %v8681_v62 = vmax.f32 %v8645_v52, 0.0  ;;  %v8604_v8 = vmul.f32 %v19172_v34, %v8438_v35  ;;  %15906 = vmatprep.mubr.msk.f32.mxu0 %vm4776_vm4, %v8822_v24 }
 0x56f   : > { %v8718_v59 = vmul.f32 %v8682_v53, %v18520_v7  ;;  %v8648_v45 = vadd.f32 %v19177_v13, %v8605_v1  ;;  %15907 = vmatmul.mubr.msk.f32.gmra.mrb[44].mxu0 %vm4776_vm4, %v8823_v10 }
 0x570   : > { %v8717_v22 = vmul.f32 %v8681_v62, %v18513_v63  ;;  %v8647_v15 = vadd.f32 %v19177_v13, %v8604_v8  ;;  %v15864_v36 = vpop.f32.mrb[52].mxu1 }
 0x571   : > { %8754 = vst.msk [vmem:[#allocation4 + $0x7b] sm:$0xff] %vm4776_vm4, %v8718_v59  ;;  %v8684_v19 = vmax.f32 %v8648_v45, 0.0  ;;  %v8607_v3 = vmul.f32 %v15864_v36, %v19172_v34  ;;  %v8448_v29 = vpop.f32.mrb[53].mxu1  ;;  %v8824_v30 = vld [vmem:[#allocation4 + $0x51] sm:$0xff]  ;;  %v8825_v43 = vld [vmem:[#allocation4 + $0x59] sm:$0xff] }
 0x572   : > { %8753 = vst.msk [vmem:[#allocation4 + $0x73] sm:$0xff] %vm4776_vm4, %v8717_v22  ;;  %v8683_v7 = vmax.f32 %v8647_v15, 0.0  ;;  %v8606_v12 = vmul.f32 %v19172_v34, %v8448_v29  ;;  %15909 = vmatprep.mubr.msk.f32.mxu0 %vm4776_vm4, %v8824_v30 }
 0x573   : > { %v8720_v63 = vmul.f32 %v8684_v19, %v18533_v17  ;;  %v8650_v55 = vadd.f32 %v19177_v13, %v8607_v3  ;;  %15910 = vmatmul.mubr.msk.f32.gmra.mrb[46].mxu0 %vm4776_vm4, %v8825_v43 }
 0x574   : > { %v8719_v33 = vmul.f32 %v8683_v7, %v18530_v31  ;;  %v8649_v41 = vadd.f32 %v19177_v13, %v8606_v12  ;;  %v15867_v37 = vpop.f32.mrb[54].mxu1 }
 0x575   : > { %8756 = vst.msk [vmem:[#allocation4 + $0x8b] sm:$0xff] %vm4776_vm4, %v8720_v63  ;;  %v8686_v44 = vmax.f32 %v8650_v55, 0.0  ;;  %v8609_v58 = vmul.f32 %v15867_v37, %v19172_v34  ;;  %v8458_v21 = vpop.f32.mrb[55].mxu1  ;;  %v8826_v28 = vld [vmem:[#allocation4 + $0x61] sm:$0xff]  ;;  %v8827_v40 = vld [vmem:[#allocation4 + $0x69] sm:$0xff] }
 0x576   : > { %8755 = vst.msk [vmem:[#allocation4 + $0x83] sm:$0xff] %vm4776_vm4, %v8719_v33  ;;  %v8685_v17 = vmax.f32 %v8649_v41, 0.0  ;;  %v8608_v57 = vmul.f32 %v19172_v34, %v8458_v21  ;;  %15912 = vmatprep.mubr.msk.f32.mxu0 %vm4776_vm4, %v8826_v28 }
 0x577   : > { %v8722_v31 = vmul.f32 %v8686_v44, %v18547_v14  ;;  %v8652_v38 = vadd.f32 %v19177_v13, %v8609_v58  ;;  %15913 = vmatmul.mubr.msk.f32.gmra.mrb[48].mxu0 %vm4776_vm4, %v8827_v40 }
 0x578   : > { %v8721_v60 = vmul.f32 %v8685_v17, %v18543_v61  ;;  %v8651_v50 = vadd.f32 %v19177_v13, %v8608_v57  ;;  %v15870_v5 = vpop.f32.mrb[56].mxu1 }
 0x579   : > { %8758 = vst.msk [vmem:[#allocation4 + $0x9b] sm:$0xff] %vm4776_vm4, %v8722_v31  ;;  %v8688_v0 = vmax.f32 %v8652_v38, 0.0  ;;  %v8611_v9 = vmul.f32 %v15870_v5, %v19172_v34  ;;  %v8468_v2 = vpop.f32.mrb[57].mxu1  ;;  %v8828_v27 = vld [vmem:[#allocation4 + $0x71] sm:$0xff]  ;;  %v8829_v16 = vld [vmem:[#allocation4 + $0x79] sm:$0xff] }
 0x57a   : > { %8757 = vst.msk [vmem:[#allocation4 + $0x93] sm:$0xff] %vm4776_vm4, %v8721_v60  ;;  %v8687_v14 = vmax.f32 %v8651_v50, 0.0  ;;  %v8610_v6 = vmul.f32 %v19172_v34, %v8468_v2  ;;  %15915 = vmatprep.mubr.msk.f32.mxu0 %vm4776_vm4, %v8828_v27 }
 0x57b   : > { %v8724_v61 = vmul.f32 %v8688_v0, %v18566_v46  ;;  %v8654_v51 = vadd.f32 %v19177_v13, %v8611_v9  ;;  %15916 = vmatmul.mubr.msk.f32.gmra.mrb[50].mxu0 %vm4776_vm4, %v8829_v16 }
 0x57c   : > { %v8723_v54 = vmul.f32 %v8687_v14, %v18561_v39  ;;  %v8653_v4 = vadd.f32 %v19177_v13, %v8610_v6  ;;  %v15873_v23 = vpop.f32.mrb[58].mxu1 }
 0x57d   : > { %8760 = vst.msk [vmem:[#allocation4 + $0xab] sm:$0xff] %vm4776_vm4, %v8724_v61  ;;  %v8690_v20 = vmax.f32 %v8654_v51, 0.0  ;;  %v8613_v52 = vmul.f32 %v15873_v23, %v19172_v34  ;;  %v8478_v42 = vpop.f32.mrb[59].mxu1  ;;  %v8830_v53 = vld [vmem:[#allocation4 + $0x81] sm:$0xff]  ;;  %v8831_v1 = vld [vmem:[#allocation4 + $0x89] sm:$0xff] }
 0x57e   : > { %8759 = vst.msk [vmem:[#allocation4 + $0xa3] sm:$0xff] %vm4776_vm4, %v8723_v54  ;;  %v8689_v46 = vmax.f32 %v8653_v4, 0.0  ;;  %v8612_v35 = vmul.f32 %v19172_v34, %v8478_v42  ;;  %15918 = vmatprep.mubr.msk.f32.mxu0 %vm4776_vm4, %v8830_v53  ;;  %v19937_v61 = vld [vmem:[#allocation6_spill] sm:$0xff]  ;;  %v19938_v54 = vld [vmem:[#allocation5_spill] sm:$0xff] }
 0x57f   : > { %v8726_v39 = vmul.f32 %v8690_v20, %v18587_v18  ;;  %v8656_v24 = vadd.f32 %v19177_v13, %v8613_v52  ;;  %15919 = vmatmul.mubr.msk.f32.gmra.mrb[52].mxu0 %vm4776_vm4, %v8831_v1 }
 0x580   : > { %v8725_v10 = vmul.f32 %v8689_v46, %v18582_v11  ;;  %v8655_v62 = vadd.f32 %v19177_v13, %v8612_v35  ;;  %v15876_v8 = vpop.f32.mrb[60].mxu1 }
 0x581   : > { %8762 = vst.msk [vmem:[#allocation4 + $0xbb] sm:$0xff] %vm4776_vm4, %v8726_v39  ;;  %v8692_v59 = vmax.f32 %v8656_v24, 0.0  ;;  %v8615_v45 = vmul.f32 %v15876_v8, %v19172_v34  ;;  %v8488_v22 = vpop.f32.mrb[61].mxu1  ;;  %v8832_v15 = vld [vmem:[#allocation4 + $0x91] sm:$0xff]  ;;  %v8833_v36 = vld [vmem:[#allocation4 + $0x99] sm:$0xff]  ;;  %v19940_v8 = vld [vmem:[#allocation7_spill] sm:$0xff] }
 0x582   : > { %8761 = vst.msk [vmem:[#allocation4 + $0xb3] sm:$0xff] %vm4776_vm4, %v8725_v10  ;;  %v8691_v18 = vmax.f32 %v8655_v62, 0.0  ;;  %v8614_v19 = vmul.f32 %v19172_v34, %v8488_v22  ;;  %15921 = vmatprep.mubr.msk.f32.mxu0 %vm4776_vm4, %v8832_v15  ;;  %v19939_v24 = vld [vmem:[#allocation8_spill] sm:$0xff] }
 0x583   : > { %v8728_v11 = vmul.f32 %v8692_v59, %v18610_v32  ;;  %v8658_v3 = vadd.f32 %v19177_v13, %v8615_v45  ;;  %15922 = vmatmul.mubr.msk.f32.gmra.mrb[54].mxu0 %vm4776_vm4, %v8833_v36 }
 0x584   : > { %v8727_v29 = vmul.f32 %v8691_v18, %v18608_v56  ;;  %v8657_v30 = vadd.f32 %v19177_v13, %v8614_v19  ;;  %v15879_v43 = vpop.f32.mrb[62].mxu1 }
 0x585   : > { %8764 = vst.msk [vmem:[#allocation4 + $0xcb] sm:$0xff] %vm4776_vm4, %v8728_v11  ;;  %v8694_v7 = vmax.f32 %v8658_v3, 0.0  ;;  %v8617_v12 = vmul.f32 %v15879_v43, %v19172_v34  ;;  %v8498_v63 = vpop.f32.mrb[63].mxu1  ;;  %v8834_v55 = vld [vmem:[#allocation4 + $0xa1] sm:$0xff]  ;;  %v8835_v33 = vld [vmem:[#allocation4 + $0xa9] sm:$0xff] }
 0x586   : > { %8763 = vst.msk [vmem:[#allocation4 + $0xc3] sm:$0xff] %vm4776_vm4, %v8727_v29  ;;  %v8693_v32 = vmax.f32 %v8657_v30, 0.0  ;;  %v8616_v41 = vmul.f32 %v19172_v34, %v8498_v63  ;;  %15924 = vmatprep.mubr.msk.f32.mxu0 %vm4776_vm4, %v8834_v55  ;;  %v19941_v30 = vld [vmem:[#allocation9_spill] sm:$0xff] }
 0x587   : > { %v8730_v56 = vmul.f32 %v8694_v7, %v18636_v49  ;;  %v8660_v37 = vadd.f32 %v19177_v13, %v8617_v12  ;;  %15925 = vmatmul.mubr.msk.f32.gmra.mrb[56].mxu0 %vm4776_vm4, %v8835_v33  ;;  %v19942_v12 = vld [vmem:[#allocation10_spill] sm:$0xff] }
 0x588   : > { %v8729_v44 = vmul.f32 %v8693_v32, %v18634_v47  ;;  %v8659_v58 = vadd.f32 %v19177_v13, %v8616_v41  ;;  %v15882_v21 = vpop.f32.mrb[64].mxu1 }
 0x589   : > { %8766 = vst.msk [vmem:[#allocation4 + $0xdb] sm:$0xff] %vm4776_vm4, %v8730_v56  ;;  %v8696_v28 = vmax.f32 %v8660_v37, 0.0  ;;  %v8619_v40 = vmul.f32 %v15882_v21, %v19172_v34  ;;  %v8508_v17 = vpop.f32.mrb[65].mxu1  ;;  %v8836_v57 = vld [vmem:[#allocation4 + $0xb1] sm:$0xff]  ;;  %v8837_v31 = vld [vmem:[#allocation4 + $0xb9] sm:$0xff]  ;;  %v19943_v56 = vld [vmem:[#allocation11_spill] sm:$0xff] }
 0x58a   : > { %8765 = vst.msk [vmem:[#allocation4 + $0xd3] sm:$0xff] %vm4776_vm4, %v8729_v44  ;;  %v8695_v49 = vmax.f32 %v8659_v58, 0.0  ;;  %v8618_v38 = vmul.f32 %v19172_v34, %v8508_v17  ;;  %15927 = vmatprep.mubr.msk.f32.mxu0 %vm4776_vm4, %v8836_v57  ;;  %v19944_v44 = vld [vmem:[#allocation12_spill] sm:$0xff]  ;;  %v8777_v17 = vld [vmem:[#allocation4] sm:$0xff]  ;;  %v8778_v57 = vld [vmem:[#allocation4 + $0x8] sm:$0xff] }
 0x58b   : > { %v8732_v47 = vmul.f32 %v8696_v28, %v18660_v48  ;;  %v8662_v60 = vadd.f32 %v19177_v13, %v8619_v40  ;;  %15928 = vmatmul.mubr.msk.f32.gmra.mrb[58].mxu0 %vm4776_vm4, %v8837_v31  ;;  %v19361_v31 = vld [vmem:[%s19916_s7 + $0x18] sm:$0xff] }
 0x58c   : > { %v8731_v50 = vmul.f32 %v8695_v49, %v18658_v25  ;;  %v8661_v5 = vadd.f32 %v19177_v13, %v8618_v38  ;;  %v15885_v0 = vpop.f32.mrb[66].mxu1  ;;  %v8779_v49 = vld [vmem:[#allocation4 + $0x10] sm:$0xff]  ;;  %v8780_v38 = vld [vmem:[#allocation4 + $0x18] sm:$0xff] }
 0x58d   : > { %8768 = vst.msk [vmem:[#allocation4 + $0xeb] sm:$0xff] %vm4776_vm4, %v8732_v47  ;;  %v8698_v9 = vmax.f32 %v8662_v60, 0.0  ;;  %v8621_v2 = vmul.f32 %v15885_v0, %v19172_v34  ;;  %v8518_v27 = vpop.f32.mrb[67].mxu1  ;;  %v8838_v16 = vld [vmem:[#allocation4 + $0xc1] sm:$0xff]  ;;  %v8839_v14 = vld [vmem:[#allocation4 + $0xc9] sm:$0xff] }
 0x58e   : > { %8767 = vst.msk [vmem:[#allocation4 + $0xe3] sm:$0xff] %vm4776_vm4, %v8731_v50  ;;  %v8697_v48 = vmax.f32 %v8661_v5, 0.0  ;;  %v8620_v6 = vmul.f32 %v19172_v34, %v8518_v27  ;;  %15930 = vmatprep.mubr.msk.f32.mxu0 %vm4776_vm4, %v8838_v16  ;;  %v8781_v47 = vld [vmem:[#allocation4 + $0x20] sm:$0xff]  ;;  %v8782_v60 = vld [vmem:[#allocation4 + $0x28] sm:$0xff]  ;;  %v8783_v50 = vld [vmem:[#allocation4 + $0x30] sm:$0xff] }
 0x58f   : > { %v8734_v25 = vmul.f32 %v8698_v9, %v19937_v61  ;;  %v8664_v51 = vadd.f32 %v19177_v13, %v8621_v2  ;;  %15931 = vmatmul.mubr.msk.f32.gmra.mrb[60].mxu0 %vm4776_vm4, %v8839_v14  ;;  %v8784_v5 = vld [vmem:[#allocation4 + $0x38] sm:$0xff]  ;;  %v8786_v0 = vld [vmem:[#allocation4 + $0x48] sm:$0xff]  ;;  %v8787_v9 = vld [vmem:[#allocation4 + $0x50] sm:$0xff] }
 0x590   : > { %v8733_v4 = vmul.f32 %v8697_v48, %v19938_v54  ;;  %v8663_v23 = vadd.f32 %v19177_v13, %v8620_v6  ;;  %v15888_v20 = vpop.f32.mrb[68].mxu1  ;;  %v8788_v2 = vld [vmem:[#allocation4 + $0x58] sm:$0xff]  ;;  %v8789_v27 = vld [vmem:[#allocation4 + $0x60] sm:$0xff]  ;;  %v8790_v16 = vld [vmem:[#allocation4 + $0x68] sm:$0xff] }
 0x591   : > { %8770 = vst.msk [vmem:[#allocation4 + $0xfb] sm:$0xff] %vm4776_vm4, %v8734_v25  ;;  %v8700_v52 = vmax.f32 %v8664_v51, 0.0  ;;  %v8623_v42 = vmul.f32 %v15888_v20, %v19172_v34  ;;  %v8528_v53 = vpop.f32.mrb[69].mxu1  ;;  %v8840_v1 = vld [vmem:[#allocation4 + $0xd1] sm:$0xff]  ;;  %v8841_v46 = vld [vmem:[#allocation4 + $0xd9] sm:$0xff]  ;;  %v8794_v61 = vld [vmem:[#allocation4 + $0x88] sm:$0xff] }
 0x592   : > { %8769 = vst.msk [vmem:[#allocation4 + $0xf3] sm:$0xff] %vm4776_vm4, %v8733_v4  ;;  %v8699_v35 = vmax.f32 %v8663_v23, 0.0  ;;  %v8622_v39 = vmul.f32 %v19172_v34, %v8528_v53  ;;  %15933 = vmatprep.mubr.msk.f32.mxu0 %vm4776_vm4, %v8840_v1  ;;  %v8791_v14 = vld [vmem:[#allocation4 + $0x70] sm:$0xff]  ;;  %v8792_v48 = vld [vmem:[#allocation4 + $0x78] sm:$0xff]  ;;  %v8793_v6 = vld [vmem:[#allocation4 + $0x80] sm:$0xff] }
 0x593   : > { %v8736_v10 = vmul.f32 %v8700_v52, %v19939_v24  ;;  %v8666_v62 = vadd.f32 %v19177_v13, %v8623_v42  ;;  %15934 = vmatmul.mubr.msk.f32.gmra.mrb[62].mxu0 %vm4776_vm4, %v8841_v46  ;;  %v8795_v25 = vld [vmem:[#allocation4 + $0x90] sm:$0xff]  ;;  %v8796_v51 = vld [vmem:[#allocation4 + $0x98] sm:$0xff]  ;;  %v8797_v54 = vld [vmem:[#allocation4 + $0xa0] sm:$0xff] }
 0x594   : > { %v8735_v59 = vmul.f32 %v8699_v35, %v19940_v8  ;;  %v8665_v45 = vadd.f32 %v19177_v13, %v8622_v39  ;;  %v15891_v22 = vpop.f32.mrb[70].mxu1  ;;  %v8798_v4 = vld [vmem:[#allocation4 + $0xa8] sm:$0xff]  ;;  %v8799_v23 = vld [vmem:[#allocation4 + $0xb0] sm:$0xff]  ;;  %v8800_v20 = vld [vmem:[#allocation4 + $0xb8] sm:$0xff] }
 0x595   : > { %8772 = vst.msk [vmem:[#allocation4 + $0x10b] sm:$0xff] %vm4776_vm4, %v8736_v10  ;;  %v8702_v15 = vmax.f32 %v8666_v62, 0.0  ;;  %v8625_v36 = vmul.f32 %v15891_v22, %v19172_v34  ;;  %v8538_v18 = vpop.f32.mrb[71].mxu1  ;;  %v8842_v19 = vld [vmem:[#allocation4 + $0xe1] sm:$0xff]  ;;  %v8843_v11 = vld [vmem:[#allocation4 + $0xe9] sm:$0xff]  ;;  %v8804_v1 = vld [vmem:[#allocation4 + $0xd8] sm:$0xff] }
 0x596   : > { %8771 = vst.msk [vmem:[#allocation4 + $0x103] sm:$0xff] %vm4776_vm4, %v8735_v59  ;;  %v8701_v3 = vmax.f32 %v8665_v45, 0.0  ;;  %v8624_v29 = vmul.f32 %v19172_v34, %v8538_v18  ;;  %15936 = vmatprep.mubr.msk.f32.mxu0 %vm4776_vm4, %v8842_v19  ;;  %v8801_v52 = vld [vmem:[#allocation4 + $0xc0] sm:$0xff]  ;;  %v8802_v42 = vld [vmem:[#allocation4 + $0xc8] sm:$0xff]  ;;  %v8803_v53 = vld [vmem:[#allocation4 + $0xd0] sm:$0xff] }
 0x597   : > { %v8738_v43 = vmul.f32 %v8702_v15, %v19941_v30  ;;  %v8668_v7 = vadd.f32 %v19177_v13, %v8625_v36  ;;  %15937 = vmatmul.mubr.msk.f32.gmra.mrb[64].mxu0 %vm4776_vm4, %v8843_v11  ;;  %v8805_v46 = vld [vmem:[#allocation4 + $0xe0] sm:$0xff]  ;;  %v8806_v35 = vld [vmem:[#allocation4 + $0xe8] sm:$0xff]  ;;  %v19404_v15 = vld [vmem:[%s19916_s7 + $0x20] sm:$0xff] }
 0x598   : > { %v8737_v63 = vmul.f32 %v8701_v3, %v19942_v12  ;;  %v8667_v55 = vadd.f32 %v19177_v13, %v8624_v29  ;;  %v9558_v59 = vld [vmem:[#allocation4 + $0x2] sm:$0xff]  ;;  %v9559_v22 = vld [vmem:[#allocation4 + $0xa] sm:$0xff]  ;;  %v19407_v36 = vld [vmem:[#allocation4 + $0x12] sm:$0xff] }
 0x599   : > { %8774 = vst.msk [vmem:[#allocation4 + $0x11b] sm:$0xff] %vm4776_vm4, %v8738_v43  ;;  %v8704_v33 = vmax.f32 %v8668_v7, 0.0  ;;  %v8844_v32 = vld [vmem:[#allocation4 + $0xf1] sm:$0xff]  ;;  %v8845_v41 = vld [vmem:[#allocation4 + $0xf9] sm:$0xff]  ;;  %v19417_v19 = vld [vmem:[#allocation4 + $0x22] sm:$0xff] }
 0x59a   : > { %8773 = vst.msk [vmem:[#allocation4 + $0x113] sm:$0xff] %vm4776_vm4, %v8737_v63  ;;  %v8703_v34 = vmax.f32 %v8667_v55, 0.0  ;;  %15939 = vmatprep.mubr.msk.f32.mxu0 %vm4776_vm4, %v8844_v32  ;;  %v8807_v39 = vld [vmem:[#allocation4 + $0xf0] sm:$0xff]  ;;  %v8808_v24 = vld [vmem:[#allocation4 + $0xf8] sm:$0xff]  ;;  %v19433_v30 = vld [vmem:[#allocation4 + $0x42] sm:$0xff] }
 0x59b   : > { %v8740_v37 = vmul.f32 %v8704_v33, %v19943_v56  ;;  %15940 = vmatmul.mubr.msk.f32.gmra.mrb[66].mxu0 %vm4776_vm4, %v8845_v41  ;;  %v19413_v18 = vld [vmem:[#allocation4 + $0x1a] sm:$0xff]  ;;  %v19421_v11 = vld [vmem:[#allocation4 + $0x2a] sm:$0xff]  ;;  %v19425_v3 = vld [vmem:[#allocation4 + $0x32] sm:$0xff] }
 0x59c   : > { %v8739_v58 = vmul.f32 %v8703_v34, %v19944_v44  ;;  %v19429_v29 = vld [vmem:[#allocation4 + $0x3a] sm:$0xff]  ;;  %v19437_v43 = vld [vmem:[#allocation4 + $0x4a] sm:$0xff]  ;;  %v19441_v7 = vld [vmem:[#allocation4 + $0x52] sm:$0xff] }
 0x59d   : > { %8776 = vst.msk [vmem:[#allocation4 + $0x12b] sm:$0xff] %vm4776_vm4, %v8740_v37  ;;  %v8846_v21 = vld [vmem:[#allocation4 + $0x101] sm:$0xff]  ;;  %v8847_v13 = vld [vmem:[#allocation4 + $0x109] sm:$0xff]  ;;  %v9572_v33 = vld [vmem:[#allocation4 + $0x72] sm:$0xff] }
 0x59e   : > { %8775 = vst.msk [vmem:[#allocation4 + $0x123] sm:$0xff] %vm4776_vm4, %v8739_v58  ;;  %15942 = vmatprep.mubr.msk.f32.mxu0 %vm4776_vm4, %v8846_v21  ;;  %v8809_v10 = vld [vmem:[#allocation4 + $0x100] sm:$0xff]  ;;  %v8810_v62 = vld [vmem:[#allocation4 + $0x108] sm:$0xff]  ;;  %v9576_v56 = vld [vmem:[#allocation4 + $0x92] sm:$0xff] }
 0x59f   : > { %15943 = vmatmul.mubr.msk.f32.gmra.mrb[68].mxu0 %vm4776_vm4, %v8847_v13  ;;  %v9569_v12 = vld [vmem:[#allocation4 + $0x5a] sm:$0xff]  ;;  %v9570_v63 = vld [vmem:[#allocation4 + $0x62] sm:$0xff]  ;;  %v9571_v55 = vld [vmem:[#allocation4 + $0x6a] sm:$0xff] }
 0x5a0   : > { %v9573_v32 = vld [vmem:[#allocation4 + $0x7a] sm:$0xff]  ;;  %v9574_v41 = vld [vmem:[#allocation4 + $0x82] sm:$0xff]  ;;  %v9575_v34 = vld [vmem:[#allocation4 + $0x8a] sm:$0xff] }
 0x5a1   : > { %v8848_v28 = vld [vmem:[#allocation4 + $0x111] sm:$0xff]  ;;  %v8849_v40 = vld [vmem:[#allocation4 + $0x119] sm:$0xff]  ;;  %v9578_v44 = vld [vmem:[#allocation4 + $0xa2] sm:$0xff] }
 0x5a2   : > { %15945 = vmatprep.mubr.msk.f32.mxu0 %vm4776_vm4, %v8848_v28  ;;  %v8811_v8 = vld [vmem:[#allocation4 + $0x110] sm:$0xff]  ;;  %v8812_v45 = vld [vmem:[#allocation4 + $0x118] sm:$0xff]  ;;  %v9582_v28 = vld [vmem:[#allocation4 + $0xc2] sm:$0xff] }
 0x5a3   : > { %15946 = vmatmul.mubr.msk.f32.gmra.mrb[70].mxu0 %vm4776_vm4, %v8849_v40  ;;  %v9577_v37 = vld [vmem:[#allocation4 + $0x9a] sm:$0xff]  ;;  %v9579_v58 = vld [vmem:[#allocation4 + $0xaa] sm:$0xff]  ;;  %v9580_v21 = vld [vmem:[#allocation4 + $0xb2] sm:$0xff] }
 0x5a4   : > { %15950 = vmatprep.mubr.msk.f32.mxu0 %vm4776_vm4, %v8777_v17  ;;  %v9581_v13 = vld [vmem:[#allocation4 + $0xba] sm:$0xff]  ;;  %v9583_v40 = vld [vmem:[#allocation4 + $0xca] sm:$0xff]  ;;  %v9584_v17 = vld [vmem:[#allocation4 + $0xd2] sm:$0xff] }
 0x5a7   : > { %15951 = vmatmul.mubr.msk.f32.vlgmr.msra.gmra.mrb[36].mxu0 %vm4776_vm4, %v8778_v57  ;;  %v9585_v57 = vld [vmem:[#allocation4 + $0xda] sm:$0xff] }
 0x5a8   : > { %16005 = vmatpush3.msra.mxu0 %v19166_v26  ;;  %15953 = vmatprep.mubr.msk.f32.mxu0 %vm4776_vm4, %v8779_v49  ;;  %v8785_v26 = vld [vmem:[#allocation4 + $0x40] sm:$0xff]  ;;  %v9587_v49 = vld [vmem:[#allocation4 + $0xea] sm:$0xff] }
 0x5a9   : > { %16060 = vmatprep.subr.mxu0 %v19361_v31 }
 0x5ab   : > { %15954 = vmatmul.mubr.msk.f32.gmra.mrb[38].mxu0 %vm4776_vm4, %v8780_v38  ;;  %v9588_v38 = vld [vmem:[#allocation4 + $0xf2] sm:$0xff] }
 0x5ac   : > { %15956 = vmatprep.mubr.msk.f32.mxu0 %vm4776_vm4, %v8781_v47  ;;  %v9589_v47 = vld [vmem:[#allocation4 + $0xfa] sm:$0xff] }
 0x5af   : > { %15957 = vmatmul.mubr.msk.f32.gmra.mrb[40].mxu0 %vm4776_vm4, %v8782_v60  ;;  %v9590_v60 = vld [vmem:[#allocation4 + $0x102] sm:$0xff] }
 0x5b0   : > { %15959 = vmatprep.mubr.msk.f32.mxu0 %vm4776_vm4, %v8783_v50  ;;  %v9591_v50 = vld [vmem:[#allocation4 + $0x10a] sm:$0xff] }
 0x5b3   : > { %15960 = vmatmul.mubr.msk.f32.gmra.mrb[42].mxu0 %vm4776_vm4, %v8784_v5  ;;  %v9592_v5 = vld [vmem:[#allocation4 + $0x112] sm:$0xff] }
 0x5b4   : > { %15962 = vmatprep.mubr.msk.f32.mxu0 %vm4776_vm4, %v8785_v26  ;;  %v9593_v26 = vld [vmem:[#allocation4 + $0x11a] sm:$0xff] }
 0x5b7   : > { %15963 = vmatmul.mubr.msk.f32.gmra.mrb[44].mxu0 %vm4776_vm4, %v8786_v0  ;;  %v13732_v0 = vld [vmem:[%s19916_s7 + $0x28] sm:$0xff] }
 0x5b8   : > { %15965 = vmatprep.mubr.msk.f32.mxu0 %vm4776_vm4, %v8787_v9  ;;  %v10019_v9 = vld [vmem:[#allocation4 + $0x122] sm:$0xff] }
 0x5bb   : > { %15966 = vmatmul.mubr.msk.f32.gmra.mrb[46].mxu0 %vm4776_vm4, %v8788_v2  ;;  %v10020_v2 = vld [vmem:[#allocation4 + $0x12a] sm:$0xff] }
 0x5bc   : > { %15968 = vmatprep.mubr.msk.f32.mxu0 %vm4776_vm4, %v8789_v27  ;;  %v10412_v27 = vld [vmem:[#allocation4 + $0x13] sm:$0xff] }
 0x5bf   : > { %15969 = vmatmul.mubr.msk.f32.gmra.mrb[48].mxu0 %vm4776_vm4, %v8790_v16  ;;  %v10413_v16 = vld [vmem:[#allocation4 + $0x1b] sm:$0xff] }
 0x5c0   : > { %15971 = vmatprep.mubr.msk.f32.mxu0 %vm4776_vm4, %v8791_v14  ;;  %v19523_v14 = vld [vmem:[%s19916_s7 + $0x30] sm:$0xff] }
 0x5c3   : > { %15972 = vmatmul.mubr.msk.f32.gmra.mrb[50].mxu0 %vm4776_vm4, %v8792_v48  ;;  %v10414_v48 = vld [vmem:[#allocation4 + $0x23] sm:$0xff] }
 0x5c4   : > { %15974 = vmatprep.mubr.msk.f32.mxu0 %vm4776_vm4, %v8793_v6  ;;  %v10415_v6 = vld [vmem:[#allocation4 + $0x2b] sm:$0xff] }
 0x5c7   : > { %15975 = vmatmul.mubr.msk.f32.gmra.mrb[52].mxu0 %vm4776_vm4, %v8794_v61  ;;  %v10416_v61 = vld [vmem:[#allocation4 + $0x33] sm:$0xff] }
 0x5c8   : > { %15977 = vmatprep.mubr.msk.f32.mxu0 %vm4776_vm4, %v8795_v25  ;;  %v10417_v25 = vld [vmem:[#allocation4 + $0x3b] sm:$0xff] }
 0x5cb   : > { %15978 = vmatmul.mubr.msk.f32.gmra.mrb[54].mxu0 %vm4776_vm4, %v8796_v51  ;;  %v10418_v51 = vld [vmem:[#allocation4 + $0x43] sm:$0xff] }
 0x5cc   : > { %15980 = vmatprep.mubr.msk.f32.mxu0 %vm4776_vm4, %v8797_v54  ;;  %v10419_v54 = vld [vmem:[#allocation4 + $0x4b] sm:$0xff] }
 0x5cf   : > { %15981 = vmatmul.mubr.msk.f32.gmra.mrb[56].mxu0 %vm4776_vm4, %v8798_v4  ;;  %v10420_v4 = vld [vmem:[#allocation4 + $0x53] sm:$0xff] }
 0x5d0   : > { %15983 = vmatprep.mubr.msk.f32.mxu0 %vm4776_vm4, %v8799_v23  ;;  %v10421_v23 = vld [vmem:[#allocation4 + $0x5b] sm:$0xff] }
 0x5d3   : > { %15984 = vmatmul.mubr.msk.f32.gmra.mrb[58].mxu0 %vm4776_vm4, %v8800_v20  ;;  %v10422_v20 = vld [vmem:[#allocation4 + $0x63] sm:$0xff] }
 0x5d4   : > { %15986 = vmatprep.mubr.msk.f32.mxu0 %vm4776_vm4, %v8801_v52  ;;  %v10423_v52 = vld [vmem:[#allocation4 + $0x6b] sm:$0xff] }
 0x5d7   : > { %15987 = vmatmul.mubr.msk.f32.gmra.mrb[60].mxu0 %vm4776_vm4, %v8802_v42  ;;  %v10424_v42 = vld [vmem:[#allocation4 + $0x73] sm:$0xff] }
 0x5d8   : > { %15989 = vmatprep.mubr.msk.f32.mxu0 %vm4776_vm4, %v8803_v53  ;;  %v10425_v53 = vld [vmem:[#allocation4 + $0x7b] sm:$0xff] }
 0x5db   : > { %15990 = vmatmul.mubr.msk.f32.gmra.mrb[62].mxu0 %vm4776_vm4, %v8804_v1  ;;  %v10426_v1 = vld [vmem:[#allocation4 + $0x83] sm:$0xff] }
 0x5dc   : > { %15992 = vmatprep.mubr.msk.f32.mxu0 %vm4776_vm4, %v8805_v46  ;;  %v10427_v46 = vld [vmem:[#allocation4 + $0x8b] sm:$0xff] }
 0x5df   : > { %15993 = vmatmul.mubr.msk.f32.gmra.mrb[64].mxu0 %vm4776_vm4, %v8806_v35  ;;  %v10428_v35 = vld [vmem:[#allocation4 + $0x93] sm:$0xff] }
 0x5e0   : > { %15995 = vmatprep.mubr.msk.f32.mxu0 %vm4776_vm4, %v8807_v39  ;;  %v10429_v39 = vld [vmem:[#allocation4 + $0x9b] sm:$0xff] }
 0x5e3   : > { %15996 = vmatmul.mubr.msk.f32.gmra.mrb[66].mxu0 %vm4776_vm4, %v8808_v24  ;;  %v10430_v24 = vld [vmem:[#allocation4 + $0xa3] sm:$0xff] }
 0x5e4   : > { %15998 = vmatprep.mubr.msk.f32.mxu0 %vm4776_vm4, %v8809_v10  ;;  %v10431_v10 = vld [vmem:[#allocation4 + $0xab] sm:$0xff] }
 0x5e7   : > { %15999 = vmatmul.mubr.msk.f32.gmra.mrb[68].mxu0 %vm4776_vm4, %v8810_v62  ;;  %v10432_v62 = vld [vmem:[#allocation4 + $0xb3] sm:$0xff] }
 0x5e8   : > { %16001 = vmatprep.mubr.msk.f32.mxu0 %vm4776_vm4, %v8811_v8  ;;  %v10433_v8 = vld [vmem:[#allocation4 + $0xbb] sm:$0xff] }
 0x5eb   : > { %16002 = vmatmul.mubr.msk.f32.gmra.mrb[70].mxu0 %vm4776_vm4, %v8812_v45  ;;  %v10435_v45 = vld [vmem:[#allocation4 + $0xcb] sm:$0xff] }
 0x5ec   : > { %16006 = vmatprep.mubr.msk.f32.mxu0 %vm4776_vm4, %v9558_v59  ;;  %v10434_v59 = vld [vmem:[#allocation4 + $0xc3] sm:$0xff] }
 0x5ef   : > { %16007 = vmatmul.mubr.msk.f32.vlgmr.msra.gmra.mrb[36].mxu0 %vm4776_vm4, %v9559_v22  ;;  %v10436_v22 = vld [vmem:[#allocation4 + $0xd3] sm:$0xff] }
 0x5f0   : > { %16061 = vmatpush3.msra.mxu0 %v19361_v31  ;;  %16009 = vmatprep.mubr.msk.f32.mxu0 %vm4776_vm4, %v19407_v36  ;;  %v9586_v31 = vld [vmem:[#allocation4 + $0xe2] sm:$0xff] }
 0x5f1   : > { %16116 = vmatprep.subr.mxu0 %v19404_v15 }
 0x5f3   : > { %16010 = vmatmul.mubr.msk.f32.gmra.mrb[38].mxu0 %vm4776_vm4, %v19413_v18 }
 0x5f4   : > { %16012 = vmatprep.mubr.msk.f32.mxu0 %vm4776_vm4, %v19417_v19 }
 0x5f7   : > { %16013 = vmatmul.mubr.msk.f32.gmra.mrb[40].mxu0 %vm4776_vm4, %v19421_v11 }
 0x5f8   : > { %16015 = vmatprep.mubr.msk.f32.mxu0 %vm4776_vm4, %v19425_v3 }
 0x5fb   : > { %16016 = vmatmul.mubr.msk.f32.gmra.mrb[42].mxu0 %vm4776_vm4, %v19429_v29 }
 0x5fc   : > { %16018 = vmatprep.mubr.msk.f32.mxu0 %vm4776_vm4, %v19433_v30 }
 0x5ff   : > { %16019 = vmatmul.mubr.msk.f32.gmra.mrb[44].mxu0 %vm4776_vm4, %v19437_v43 }
 0x600   : > { %16021 = vmatprep.mubr.msk.f32.mxu0 %vm4776_vm4, %v19441_v7 }
 0x603   : > { %16022 = vmatmul.mubr.msk.f32.gmra.mrb[46].mxu0 %vm4776_vm4, %v9569_v12 }
 0x604   : > { %16024 = vmatprep.mubr.msk.f32.mxu0 %vm4776_vm4, %v9570_v63 }
 0x607   : > { %16025 = vmatmul.mubr.msk.f32.gmra.mrb[48].mxu0 %vm4776_vm4, %v9571_v55 }
 0x608   : > { %16027 = vmatprep.mubr.msk.f32.mxu0 %vm4776_vm4, %v9572_v33 }
 0x60b   : > { %16028 = vmatmul.mubr.msk.f32.gmra.mrb[50].mxu0 %vm4776_vm4, %v9573_v32 }
 0x60c   : > { %16030 = vmatprep.mubr.msk.f32.mxu0 %vm4776_vm4, %v9574_v41 }
 0x60f   : > { %16031 = vmatmul.mubr.msk.f32.gmra.mrb[52].mxu0 %vm4776_vm4, %v9575_v34 }
 0x610   : > { %16033 = vmatprep.mubr.msk.f32.mxu0 %vm4776_vm4, %v9576_v56 }
 0x613   : > { %16034 = vmatmul.mubr.msk.f32.gmra.mrb[54].mxu0 %vm4776_vm4, %v9577_v37 }
 0x614   : > { %16036 = vmatprep.mubr.msk.f32.mxu0 %vm4776_vm4, %v9578_v44 }
 0x617   : > { %16037 = vmatmul.mubr.msk.f32.gmra.mrb[56].mxu0 %vm4776_vm4, %v9579_v58 }
 0x618   : > { %16039 = vmatprep.mubr.msk.f32.mxu0 %vm4776_vm4, %v9580_v21 }
 0x61b   : > { %16040 = vmatmul.mubr.msk.f32.gmra.mrb[58].mxu0 %vm4776_vm4, %v9581_v13 }
 0x61c   : > { %16042 = vmatprep.mubr.msk.f32.mxu0 %vm4776_vm4, %v9582_v28 }
 0x61f   : > { %16043 = vmatmul.mubr.msk.f32.gmra.mrb[60].mxu0 %vm4776_vm4, %v9583_v40 }
 0x620   : > { %16045 = vmatprep.mubr.msk.f32.mxu0 %vm4776_vm4, %v9584_v17 }
 0x623   : > { %16046 = vmatmul.mubr.msk.f32.gmra.mrb[62].mxu0 %vm4776_vm4, %v9585_v57 }
 0x624   : > { %16048 = vmatprep.mubr.msk.f32.mxu0 %vm4776_vm4, %v9586_v31 }
 0x627   : > { %16049 = vmatmul.mubr.msk.f32.gmra.mrb[64].mxu0 %vm4776_vm4, %v9587_v49 }
 0x628   : > { %16051 = vmatprep.mubr.msk.f32.mxu0 %vm4776_vm4, %v9588_v38 }
 0x62b   : > { %16052 = vmatmul.mubr.msk.f32.gmra.mrb[66].mxu0 %vm4776_vm4, %v9589_v47 }
 0x62c   : > { %16054 = vmatprep.mubr.msk.f32.mxu0 %vm4776_vm4, %v9590_v60 }
 0x62f   : > { %16055 = vmatmul.mubr.msk.f32.gmra.mrb[68].mxu0 %vm4776_vm4, %v9591_v50 }
 0x630   : > { %16057 = vmatprep.mubr.msk.f32.mxu0 %vm4776_vm4, %v9592_v5 }
 0x633   : > { %16058 = vmatmul.mubr.msk.f32.gmra.mrb[70].mxu0 %vm4776_vm4, %v9593_v26 }
 0x634   : > { %16062 = vmatprep.mubr.msk.f32.mxu0 %vm4776_vm4, %v19407_v36  ;;  %v10438_v36 = vld [vmem:[#allocation4 + $0xe3] sm:$0xff] }
 0x637   : > { %16063 = vmatmul.mubr.msk.f32.vlgmr.msra.gmra.mrb[36].mxu0 %vm4776_vm4, %v19413_v18  ;;  %v10439_v18 = vld [vmem:[#allocation4 + $0xeb] sm:$0xff] }
 0x638   : > { %16117 = vmatpush3.msra.mxu0 %v19404_v15  ;;  %16065 = vmatprep.mubr.msk.f32.mxu0 %vm4776_vm4, %v19417_v19  ;;  %v10437_v15 = vld [vmem:[#allocation4 + $0xdb] sm:$0xff]  ;;  %v10440_v19 = vld [vmem:[#allocation4 + $0xf3] sm:$0xff] }
 0x639   : > { %16172 = vmatprep.subr.mxu0 %v13732_v0 }
 0x63b   : > { %16066 = vmatmul.mubr.msk.f32.gmra.mrb[38].mxu0 %vm4776_vm4, %v19421_v11  ;;  %v10441_v11 = vld [vmem:[#allocation4 + $0xfb] sm:$0xff] }
 0x63c   : > { %16068 = vmatprep.mubr.msk.f32.mxu0 %vm4776_vm4, %v19425_v3  ;;  %v10442_v3 = vld [vmem:[#allocation4 + $0x103] sm:$0xff] }
 0x63f   : > { %16069 = vmatmul.mubr.msk.f32.gmra.mrb[40].mxu0 %vm4776_vm4, %v19429_v29  ;;  %v10443_v29 = vld [vmem:[#allocation4 + $0x10b] sm:$0xff] }
 0x640   : > { %16071 = vmatprep.mubr.msk.f32.mxu0 %vm4776_vm4, %v19433_v30  ;;  %v10444_v30 = vld [vmem:[#allocation4 + $0x113] sm:$0xff] }
 0x643   : > { %16072 = vmatmul.mubr.msk.f32.gmra.mrb[42].mxu0 %vm4776_vm4, %v19437_v43  ;;  %v10445_v43 = vld [vmem:[#allocation4 + $0x11b] sm:$0xff] }
 0x644   : > { %16074 = vmatprep.mubr.msk.f32.mxu0 %vm4776_vm4, %v19441_v7  ;;  %v10446_v7 = vld [vmem:[#allocation4 + $0x123] sm:$0xff] }
 0x647   : > { %16075 = vmatmul.mubr.msk.f32.gmra.mrb[44].mxu0 %vm4776_vm4, %v9569_v12  ;;  %v10447_v12 = vld [vmem:[#allocation4 + $0x12b] sm:$0xff] }
 0x648   : > { %16077 = vmatprep.mubr.msk.f32.mxu0 %vm4776_vm4, %v9570_v63  ;;  %v10839_v63 = vld [vmem:[#allocation4 + $0x14] sm:$0xff] }
 0x64b   : > { %16078 = vmatmul.mubr.msk.f32.gmra.mrb[46].mxu0 %vm4776_vm4, %v9571_v55  ;;  %v10840_v55 = vld [vmem:[#allocation4 + $0x1c] sm:$0xff] }
 0x64c   : > { %16080 = vmatprep.mubr.msk.f32.mxu0 %vm4776_vm4, %v9572_v33  ;;  %v19565_v33 = vld [vmem:[%s19916_s7 + $0x38] sm:$0xff] }
 0x64f   : > { %16081 = vmatmul.mubr.msk.f32.gmra.mrb[48].mxu0 %vm4776_vm4, %v9573_v32  ;;  %v19568_v32 = vld [vmem:[#allocation4 + $0x24] sm:$0xff] }
 0x650   : > { %16083 = vmatprep.mubr.msk.f32.mxu0 %vm4776_vm4, %v9574_v41  ;;  %v19574_v41 = vld [vmem:[#allocation4 + $0x2c] sm:$0xff] }
 0x653   : > { %16084 = vmatmul.mubr.msk.f32.gmra.mrb[50].mxu0 %vm4776_vm4, %v9575_v34  ;;  %v19578_v34 = vld [vmem:[#allocation4 + $0x34] sm:$0xff] }
 0x654   : > { %16086 = vmatprep.mubr.msk.f32.mxu0 %vm4776_vm4, %v9576_v56  ;;  %v19582_v56 = vld [vmem:[#allocation4 + $0x3c] sm:$0xff] }
 0x657   : > { %16087 = vmatmul.mubr.msk.f32.gmra.mrb[52].mxu0 %vm4776_vm4, %v9577_v37  ;;  %v19586_v37 = vld [vmem:[#allocation4 + $0x44] sm:$0xff] }
 0x658   : > { %16089 = vmatprep.mubr.msk.f32.mxu0 %vm4776_vm4, %v9578_v44  ;;  %v19590_v44 = vld [vmem:[#allocation4 + $0x4c] sm:$0xff] }
 0x65b   : > { %16090 = vmatmul.mubr.msk.f32.gmra.mrb[54].mxu0 %vm4776_vm4, %v9579_v58  ;;  %v19594_v58 = vld [vmem:[#allocation4 + $0x54] sm:$0xff] }
 0x65c   : > { %16092 = vmatprep.mubr.msk.f32.mxu0 %vm4776_vm4, %v9580_v21  ;;  %v19598_v21 = vld [vmem:[#allocation4 + $0x5c] sm:$0xff] }
 0x65f   : > { %16093 = vmatmul.mubr.msk.f32.gmra.mrb[56].mxu0 %vm4776_vm4, %v9581_v13  ;;  %v19602_v13 = vld [vmem:[#allocation4 + $0x64] sm:$0xff] }
 0x660   : > { %16095 = vmatprep.mubr.msk.f32.mxu0 %vm4776_vm4, %v9582_v28  ;;  %v10850_v28 = vld [vmem:[#allocation4 + $0x6c] sm:$0xff] }
 0x663   : > { %16096 = vmatmul.mubr.msk.f32.gmra.mrb[58].mxu0 %vm4776_vm4, %v9583_v40  ;;  %v10851_v40 = vld [vmem:[#allocation4 + $0x74] sm:$0xff] }
 0x664   : > { %16098 = vmatprep.mubr.msk.f32.mxu0 %vm4776_vm4, %v9584_v17  ;;  %v10852_v17 = vld [vmem:[#allocation4 + $0x7c] sm:$0xff] }
 0x667   : > { %16099 = vmatmul.mubr.msk.f32.gmra.mrb[60].mxu0 %vm4776_vm4, %v9585_v57  ;;  %v10853_v57 = vld [vmem:[#allocation4 + $0x84] sm:$0xff] }
 0x668   : > { %16101 = vmatprep.mubr.msk.f32.mxu0 %vm4776_vm4, %v9586_v31  ;;  %v10854_v31 = vld [vmem:[#allocation4 + $0x8c] sm:$0xff] }
 0x66b   : > { %16102 = vmatmul.mubr.msk.f32.gmra.mrb[62].mxu0 %vm4776_vm4, %v9587_v49  ;;  %v10855_v49 = vld [vmem:[#allocation4 + $0x94] sm:$0xff] }
 0x66c   : > { %16104 = vmatprep.mubr.msk.f32.mxu0 %vm4776_vm4, %v9588_v38  ;;  %v10856_v38 = vld [vmem:[#allocation4 + $0x9c] sm:$0xff] }
 0x66f   : > { %16105 = vmatmul.mubr.msk.f32.gmra.mrb[64].mxu0 %vm4776_vm4, %v9589_v47  ;;  %v10857_v47 = vld [vmem:[#allocation4 + $0xa4] sm:$0xff] }
 0x670   : > { %16107 = vmatprep.mubr.msk.f32.mxu0 %vm4776_vm4, %v9590_v60  ;;  %v10858_v60 = vld [vmem:[#allocation4 + $0xac] sm:$0xff] }
 0x673   : > { %16108 = vmatmul.mubr.msk.f32.gmra.mrb[66].mxu0 %vm4776_vm4, %v9591_v50  ;;  %v10859_v50 = vld [vmem:[#allocation4 + $0xb4] sm:$0xff] }
 0x674   : > { %16110 = vmatprep.mubr.msk.f32.mxu0 %vm4776_vm4, %v9592_v5  ;;  %v10860_v5 = vld [vmem:[#allocation4 + $0xbc] sm:$0xff] }
 0x677   : > { %16111 = vmatmul.mubr.msk.f32.gmra.mrb[68].mxu0 %vm4776_vm4, %v9593_v26  ;;  %v10861_v26 = vld [vmem:[#allocation4 + $0xc4] sm:$0xff] }
 0x678   : > { %16113 = vmatprep.mubr.msk.f32.mxu0 %vm4776_vm4, %v10019_v9  ;;  %v10863_v9 = vld [vmem:[#allocation4 + $0xd4] sm:$0xff] }
 0x67b   : > { %16114 = vmatmul.mubr.msk.f32.gmra.mrb[70].mxu0 %vm4776_vm4, %v10020_v2  ;;  %v10864_v2 = vld [vmem:[#allocation4 + $0xdc] sm:$0xff] }
 0x67c   : > { %16118 = vmatprep.mubr.msk.f32.mxu0 %vm4776_vm4, %v10412_v27  ;;  %v10865_v27 = vld [vmem:[#allocation4 + $0xe4] sm:$0xff] }
 0x67f   : > { %16119 = vmatmul.mubr.msk.f32.vlgmr.msra.gmra.mrb[36].mxu0 %vm4776_vm4, %v10413_v16  ;;  %v10866_v16 = vld [vmem:[#allocation4 + $0xec] sm:$0xff] }
 0x680   : > { %16173 = vmatpush3.msra.mxu0 %v13732_v0  ;;  %16121 = vmatprep.mubr.msk.f32.mxu0 %vm4776_vm4, %v10414_v48  ;;  %v10862_v0 = vld [vmem:[#allocation4 + $0xcc] sm:$0xff]  ;;  %v10868_v48 = vld [vmem:[#allocation4 + $0xfc] sm:$0xff] }
 0x681   : > { %16228 = vmatprep.subr.mxu0 %v19523_v14 }
 0x683   : > { %16122 = vmatmul.mubr.msk.f32.gmra.mrb[38].mxu0 %vm4776_vm4, %v10415_v6  ;;  %v10869_v6 = vld [vmem:[#allocation4 + $0x104] sm:$0xff] }
 0x684   : > { %16124 = vmatprep.mubr.msk.f32.mxu0 %vm4776_vm4, %v10416_v61  ;;  %v10870_v61 = vld [vmem:[#allocation4 + $0x10c] sm:$0xff] }
 0x687   : > { %16125 = vmatmul.mubr.msk.f32.gmra.mrb[40].mxu0 %vm4776_vm4, %v10417_v25  ;;  %v10871_v25 = vld [vmem:[#allocation4 + $0x114] sm:$0xff] }
 0x688   : > { %16127 = vmatprep.mubr.msk.f32.mxu0 %vm4776_vm4, %v10418_v51  ;;  %v10872_v51 = vld [vmem:[#allocation4 + $0x11c] sm:$0xff] }
 0x68b   : > { %16128 = vmatmul.mubr.msk.f32.gmra.mrb[42].mxu0 %vm4776_vm4, %v10419_v54  ;;  %v10873_v54 = vld [vmem:[#allocation4 + $0x124] sm:$0xff] }
 0x68c   : > { %16130 = vmatprep.mubr.msk.f32.mxu0 %vm4776_vm4, %v10420_v4  ;;  %v10874_v4 = vld [vmem:[#allocation4 + $0x12c] sm:$0xff] }
 0x68f   : > { %16131 = vmatmul.mubr.msk.f32.gmra.mrb[44].mxu0 %vm4776_vm4, %v10421_v23  ;;  %v13843_v23 = vld [vmem:[%s19916_s7 + $0x40] sm:$0xff] }
 0x690   : > { %16133 = vmatprep.mubr.msk.f32.mxu0 %vm4776_vm4, %v10422_v20  ;;  %v11300_v20 = vld [vmem:[#allocation4 + $0x134] sm:$0xff] }
 0x693   : > { %16134 = vmatmul.mubr.msk.f32.gmra.mrb[46].mxu0 %vm4776_vm4, %v10423_v52  ;;  %v11301_v52 = vld [vmem:[#allocation4 + $0x13c] sm:$0xff] }
 0x694   : > { %16136 = vmatprep.mubr.msk.f32.mxu0 %vm4776_vm4, %v10424_v42  ;;  %v11693_v42 = vld [vmem:[#allocation4 + $0x25] sm:$0xff] }
 0x697   : > { %16137 = vmatmul.mubr.msk.f32.gmra.mrb[48].mxu0 %vm4776_vm4, %v10425_v53  ;;  %v11694_v53 = vld [vmem:[#allocation4 + $0x2d] sm:$0xff] }
 0x698   : > { %16139 = vmatprep.mubr.msk.f32.mxu0 %vm4776_vm4, %v10426_v1  ;;  %v11695_v1 = vld [vmem:[#allocation4 + $0x35] sm:$0xff] }
 0x69b   : > { %16140 = vmatmul.mubr.msk.f32.gmra.mrb[50].mxu0 %vm4776_vm4, %v10427_v46  ;;  %v11696_v46 = vld [vmem:[#allocation4 + $0x3d] sm:$0xff] }
 0x69c   : > { %16142 = vmatprep.mubr.msk.f32.mxu0 %vm4776_vm4, %v10428_v35  ;;  %v11697_v35 = vld [vmem:[#allocation4 + $0x45] sm:$0xff] }
 0x69f   : > { %16143 = vmatmul.mubr.msk.f32.gmra.mrb[52].mxu0 %vm4776_vm4, %v10429_v39  ;;  %v11698_v39 = vld [vmem:[#allocation4 + $0x4d] sm:$0xff] }
 0x6a0   : > { %16145 = vmatprep.mubr.msk.f32.mxu0 %vm4776_vm4, %v10430_v24  ;;  %v11699_v24 = vld [vmem:[#allocation4 + $0x55] sm:$0xff] }
 0x6a3   : > { %16146 = vmatmul.mubr.msk.f32.gmra.mrb[54].mxu0 %vm4776_vm4, %v10431_v10  ;;  %v11700_v10 = vld [vmem:[#allocation4 + $0x5d] sm:$0xff] }
 0x6a4   : > { %16148 = vmatprep.mubr.msk.f32.mxu0 %vm4776_vm4, %v10432_v62  ;;  %v11701_v62 = vld [vmem:[#allocation4 + $0x65] sm:$0xff] }
 0x6a7   : > { %16149 = vmatmul.mubr.msk.f32.gmra.mrb[56].mxu0 %vm4776_vm4, %v10433_v8  ;;  %v11702_v8 = vld [vmem:[#allocation4 + $0x6d] sm:$0xff] }
 0x6a8   : > { %16151 = vmatprep.mubr.msk.f32.mxu0 %vm4776_vm4, %v10434_v59  ;;  %v11703_v59 = vld [vmem:[#allocation4 + $0x75] sm:$0xff] }
 0x6ab   : > { %16152 = vmatmul.mubr.msk.f32.gmra.mrb[58].mxu0 %vm4776_vm4, %v10435_v45  ;;  %v11704_v45 = vld [vmem:[#allocation4 + $0x7d] sm:$0xff] }
 0x6ac   : > { %16154 = vmatprep.mubr.msk.f32.mxu0 %vm4776_vm4, %v10436_v22  ;;  %v11705_v22 = vld [vmem:[#allocation4 + $0x85] sm:$0xff] }
 0x6af   : > { %16155 = vmatmul.mubr.msk.f32.gmra.mrb[60].mxu0 %vm4776_vm4, %v10437_v15  ;;  %v11706_v15 = vld [vmem:[#allocation4 + $0x8d] sm:$0xff] }
 0x6b0   : > { %16157 = vmatprep.mubr.msk.f32.mxu0 %vm4776_vm4, %v10438_v36  ;;  %v11707_v36 = vld [vmem:[#allocation4 + $0x95] sm:$0xff] }
 0x6b3   : > { %16158 = vmatmul.mubr.msk.f32.gmra.mrb[62].mxu0 %vm4776_vm4, %v10439_v18  ;;  %v11708_v18 = vld [vmem:[#allocation4 + $0x9d] sm:$0xff] }
 0x6b4   : > { %16160 = vmatprep.mubr.msk.f32.mxu0 %vm4776_vm4, %v10440_v19  ;;  %v11709_v19 = vld [vmem:[#allocation4 + $0xa5] sm:$0xff] }
 0x6b7   : > { %16161 = vmatmul.mubr.msk.f32.gmra.mrb[64].mxu0 %vm4776_vm4, %v10441_v11  ;;  %v11710_v11 = vld [vmem:[#allocation4 + $0xad] sm:$0xff] }
 0x6b8   : > { %16163 = vmatprep.mubr.msk.f32.mxu0 %vm4776_vm4, %v10442_v3  ;;  %v11711_v3 = vld [vmem:[#allocation4 + $0xb5] sm:$0xff] }
 0x6bb   : > { %16164 = vmatmul.mubr.msk.f32.gmra.mrb[66].mxu0 %vm4776_vm4, %v10443_v29  ;;  %v11712_v29 = vld [vmem:[#allocation4 + $0xbd] sm:$0xff] }
 0x6bc   : > { %16166 = vmatprep.mubr.msk.f32.mxu0 %vm4776_vm4, %v10444_v30  ;;  %v11713_v30 = vld [vmem:[#allocation4 + $0xc5] sm:$0xff] }
 0x6bf   : > { %16167 = vmatmul.mubr.msk.f32.gmra.mrb[68].mxu0 %vm4776_vm4, %v10445_v43  ;;  %v11714_v43 = vld [vmem:[#allocation4 + $0xcd] sm:$0xff] }
 0x6c0   : > { %16169 = vmatprep.mubr.msk.f32.mxu0 %vm4776_vm4, %v10446_v7  ;;  %v11715_v7 = vld [vmem:[#allocation4 + $0xd5] sm:$0xff] }
 0x6c3   : > { %16170 = vmatmul.mubr.msk.f32.gmra.mrb[70].mxu0 %vm4776_vm4, %v10447_v12  ;;  %v11716_v12 = vld [vmem:[#allocation4 + $0xdd] sm:$0xff] }
 0x6c4   : > { %16174 = vmatprep.mubr.msk.f32.mxu0 %vm4776_vm4, %v10839_v63  ;;  %v11717_v63 = vld [vmem:[#allocation4 + $0xe5] sm:$0xff] }
 0x6c7   : > { %16175 = vmatmul.mubr.msk.f32.vlgmr.msra.gmra.mrb[36].mxu0 %vm4776_vm4, %v10840_v55  ;;  %v11718_v55 = vld [vmem:[#allocation4 + $0xed] sm:$0xff] }
 0x6c8   : > { %16229 = vmatpush3.msra.mxu0 %v19523_v14  ;;  %16177 = vmatprep.mubr.msk.f32.mxu0 %vm4776_vm4, %v19568_v32  ;;  %v10867_v14 = vld [vmem:[#allocation4 + $0xf4] sm:$0xff] }
 0x6c9   : > { %16284 = vmatprep.subr.mxu0 %v19565_v33 }
 0x6cb   : > { %16178 = vmatmul.mubr.msk.f32.gmra.mrb[38].mxu0 %vm4776_vm4, %v19574_v41 }
 0x6cc   : > { %16180 = vmatprep.mubr.msk.f32.mxu0 %vm4776_vm4, %v19578_v34 }
 0x6cf   : > { %16181 = vmatmul.mubr.msk.f32.gmra.mrb[40].mxu0 %vm4776_vm4, %v19582_v56 }
 0x6d0   : > { %16183 = vmatprep.mubr.msk.f32.mxu0 %vm4776_vm4, %v19586_v37 }
 0x6d3   : > { %16184 = vmatmul.mubr.msk.f32.gmra.mrb[42].mxu0 %vm4776_vm4, %v19590_v44 }
 0x6d4   : > { %16186 = vmatprep.mubr.msk.f32.mxu0 %vm4776_vm4, %v19594_v58 }
 0x6d7   : > { %16187 = vmatmul.mubr.msk.f32.gmra.mrb[44].mxu0 %vm4776_vm4, %v19598_v21 }
 0x6d8   : > { %16189 = vmatprep.mubr.msk.f32.mxu0 %vm4776_vm4, %v19602_v13 }
 0x6db   : > { %16190 = vmatmul.mubr.msk.f32.gmra.mrb[46].mxu0 %vm4776_vm4, %v10850_v28 }
 0x6dc   : > { %16192 = vmatprep.mubr.msk.f32.mxu0 %vm4776_vm4, %v10851_v40 }
 0x6df   : > { %16193 = vmatmul.mubr.msk.f32.gmra.mrb[48].mxu0 %vm4776_vm4, %v10852_v17 }
 0x6e0   : > { %16195 = vmatprep.mubr.msk.f32.mxu0 %vm4776_vm4, %v10853_v57 }
 0x6e3   : > { %16196 = vmatmul.mubr.msk.f32.gmra.mrb[50].mxu0 %vm4776_vm4, %v10854_v31 }
 0x6e4   : > { %16198 = vmatprep.mubr.msk.f32.mxu0 %vm4776_vm4, %v10855_v49 }
 0x6e7   : > { %16199 = vmatmul.mubr.msk.f32.gmra.mrb[52].mxu0 %vm4776_vm4, %v10856_v38 }
 0x6e8   : > { %16201 = vmatprep.mubr.msk.f32.mxu0 %vm4776_vm4, %v10857_v47 }
 0x6eb   : > { %16202 = vmatmul.mubr.msk.f32.gmra.mrb[54].mxu0 %vm4776_vm4, %v10858_v60 }
 0x6ec   : > { %16204 = vmatprep.mubr.msk.f32.mxu0 %vm4776_vm4, %v10859_v50 }
 0x6ef   : > { %16205 = vmatmul.mubr.msk.f32.gmra.mrb[56].mxu0 %vm4776_vm4, %v10860_v5 }
 0x6f0   : > { %16207 = vmatprep.mubr.msk.f32.mxu0 %vm4776_vm4, %v10861_v26 }
 0x6f3   : > { %16208 = vmatmul.mubr.msk.f32.gmra.mrb[58].mxu0 %vm4776_vm4, %v10862_v0 }
 0x6f4   : > { %16210 = vmatprep.mubr.msk.f32.mxu0 %vm4776_vm4, %v10863_v9 }
 0x6f7   : > { %16211 = vmatmul.mubr.msk.f32.gmra.mrb[60].mxu0 %vm4776_vm4, %v10864_v2 }
 0x6f8   : > { %16213 = vmatprep.mubr.msk.f32.mxu0 %vm4776_vm4, %v10865_v27 }
 0x6fb   : > { %16214 = vmatmul.mubr.msk.f32.gmra.mrb[62].mxu0 %vm4776_vm4, %v10866_v16 }
 0x6fc   : > { %16216 = vmatprep.mubr.msk.f32.mxu0 %vm4776_vm4, %v10867_v14 }
 0x6ff   : > { %16217 = vmatmul.mubr.msk.f32.gmra.mrb[64].mxu0 %vm4776_vm4, %v10868_v48 }
 0x700   : > { %16219 = vmatprep.mubr.msk.f32.mxu0 %vm4776_vm4, %v10869_v6 }
 0x703   : > { %16220 = vmatmul.mubr.msk.f32.gmra.mrb[66].mxu0 %vm4776_vm4, %v10870_v61 }
 0x704   : > { %16222 = vmatprep.mubr.msk.f32.mxu0 %vm4776_vm4, %v10871_v25 }
 0x707   : > { %16223 = vmatmul.mubr.msk.f32.gmra.mrb[68].mxu0 %vm4776_vm4, %v10872_v51 }
 0x708   : > { %16225 = vmatprep.mubr.msk.f32.mxu0 %vm4776_vm4, %v10873_v54 }
 0x70b   : > { %16226 = vmatmul.mubr.msk.f32.gmra.mrb[70].mxu0 %vm4776_vm4, %v10874_v4 }
 0x70c   : > { %16230 = vmatprep.mubr.msk.f32.mxu0 %vm4776_vm4, %v19568_v32  ;;  %v11720_v32 = vld [vmem:[#allocation4 + $0xfd] sm:$0xff] }
 0x70f   : > { %16231 = vmatmul.mubr.msk.f32.vlgmr.msra.gmra.mrb[36].mxu0 %vm4776_vm4, %v19574_v41  ;;  %v11721_v41 = vld [vmem:[#allocation4 + $0x105] sm:$0xff] }
 0x710   : > { %16285 = vmatpush3.msra.mxu0 %v19565_v33  ;;  %16233 = vmatprep.mubr.msk.f32.mxu0 %vm4776_vm4, %v19578_v34  ;;  %v11719_v33 = vld [vmem:[#allocation4 + $0xf5] sm:$0xff]  ;;  %v11722_v34 = vld [vmem:[#allocation4 + $0x10d] sm:$0xff] }
 0x711   : > { %16340 = vmatprep.subr.mxu0 %v13843_v23 }
 0x713   : > { %16234 = vmatmul.mubr.msk.f32.gmra.mrb[38].mxu0 %vm4776_vm4, %v19582_v56  ;;  %v11723_v56 = vld [vmem:[#allocation4 + $0x115] sm:$0xff] }
 0x714   : > { %16236 = vmatprep.mubr.msk.f32.mxu0 %vm4776_vm4, %v19586_v37  ;;  %v11724_v37 = vld [vmem:[#allocation4 + $0x11d] sm:$0xff] }
 0x717   : > { %16237 = vmatmul.mubr.msk.f32.gmra.mrb[40].mxu0 %vm4776_vm4, %v19590_v44  ;;  %v11725_v44 = vld [vmem:[#allocation4 + $0x125] sm:$0xff] }
 0x718   : > { %16239 = vmatprep.mubr.msk.f32.mxu0 %vm4776_vm4, %v19594_v58  ;;  %v11727_v58 = vld [vmem:[#allocation4 + $0x135] sm:$0xff] }
 0x71b   : > { %16240 = vmatmul.mubr.msk.f32.gmra.mrb[42].mxu0 %vm4776_vm4, %v19598_v21  ;;  %v11726_v21 = vld [vmem:[#allocation4 + $0x12d] sm:$0xff] }
 0x71c   : > { %16242 = vmatprep.mubr.msk.f32.mxu0 %vm4776_vm4, %v19602_v13  ;;  %v11728_v13 = vld [vmem:[#allocation4 + $0x13d] sm:$0xff] }
 0x71f   : > { %16243 = vmatmul.mubr.msk.f32.gmra.mrb[44].mxu0 %vm4776_vm4, %v10850_v28  ;;  %v12120_v28 = vld [vmem:[#allocation4 + $0x26] sm:$0xff] }
 0x720   : > { %16245 = vmatprep.mubr.msk.f32.mxu0 %vm4776_vm4, %v10851_v40  ;;  %v12121_v40 = vld [vmem:[#allocation4 + $0x2e] sm:$0xff] }
 0x723   : > { %16246 = vmatmul.mubr.msk.f32.gmra.mrb[46].mxu0 %vm4776_vm4, %v10852_v17  ;;  %v12122_v17 = vld [vmem:[#allocation4 + $0x36] sm:$0xff] }
 0x724   : > { %16248 = vmatprep.mubr.msk.f32.mxu0 %vm4776_vm4, %v10853_v57  ;;  %v12123_v57 = vld [vmem:[#allocation4 + $0x3e] sm:$0xff] }
 0x727   : > { %16249 = vmatmul.mubr.msk.f32.gmra.mrb[48].mxu0 %vm4776_vm4, %v10854_v31  ;;  %v12124_v31 = vld [vmem:[#allocation4 + $0x46] sm:$0xff] }
 0x728   : > { %16251 = vmatprep.mubr.msk.f32.mxu0 %vm4776_vm4, %v10855_v49  ;;  %v12125_v49 = vld [vmem:[#allocation4 + $0x4e] sm:$0xff] }
 0x72b   : > { %16252 = vmatmul.mubr.msk.f32.gmra.mrb[50].mxu0 %vm4776_vm4, %v10856_v38  ;;  %v12126_v38 = vld [vmem:[#allocation4 + $0x56] sm:$0xff] }
 0x72c   : > { %16254 = vmatprep.mubr.msk.f32.mxu0 %vm4776_vm4, %v10857_v47  ;;  %v12127_v47 = vld [vmem:[#allocation4 + $0x5e] sm:$0xff] }
 0x72f   : > { %16255 = vmatmul.mubr.msk.f32.gmra.mrb[52].mxu0 %vm4776_vm4, %v10858_v60  ;;  %v12128_v60 = vld [vmem:[#allocation4 + $0x66] sm:$0xff] }
 0x730   : > { %16257 = vmatprep.mubr.msk.f32.mxu0 %vm4776_vm4, %v10859_v50  ;;  %v12129_v50 = vld [vmem:[#allocation4 + $0x6e] sm:$0xff] }
 0x733   : > { %16258 = vmatmul.mubr.msk.f32.gmra.mrb[54].mxu0 %vm4776_vm4, %v10860_v5  ;;  %v12130_v5 = vld [vmem:[#allocation4 + $0x76] sm:$0xff] }
 0x734   : > { %16260 = vmatprep.mubr.msk.f32.mxu0 %vm4776_vm4, %v10861_v26  ;;  %v12131_v26 = vld [vmem:[#allocation4 + $0x7e] sm:$0xff] }
 0x737   : > { %16261 = vmatmul.mubr.msk.f32.gmra.mrb[56].mxu0 %vm4776_vm4, %v10862_v0  ;;  %v12132_v0 = vld [vmem:[#allocation4 + $0x86] sm:$0xff] }
 0x738   : > { %16263 = vmatprep.mubr.msk.f32.mxu0 %vm4776_vm4, %v10863_v9  ;;  %v12133_v9 = vld [vmem:[#allocation4 + $0x8e] sm:$0xff] }
 0x73b   : > { %16264 = vmatmul.mubr.msk.f32.gmra.mrb[58].mxu0 %vm4776_vm4, %v10864_v2  ;;  %v12134_v2 = vld [vmem:[#allocation4 + $0x96] sm:$0xff] }
 0x73c   : > { %16266 = vmatprep.mubr.msk.f32.mxu0 %vm4776_vm4, %v10865_v27  ;;  %v12135_v27 = vld [vmem:[#allocation4 + $0x9e] sm:$0xff] }
 0x73f   : > { %16267 = vmatmul.mubr.msk.f32.gmra.mrb[60].mxu0 %vm4776_vm4, %v10866_v16  ;;  %v12136_v16 = vld [vmem:[#allocation4 + $0xa6] sm:$0xff] }
 0x740   : > { %16269 = vmatprep.mubr.msk.f32.mxu0 %vm4776_vm4, %v10867_v14  ;;  %v12137_v14 = vld [vmem:[#allocation4 + $0xae] sm:$0xff] }
 0x743   : > { %16270 = vmatmul.mubr.msk.f32.gmra.mrb[62].mxu0 %vm4776_vm4, %v10868_v48  ;;  %v12138_v48 = vld [vmem:[#allocation4 + $0xb6] sm:$0xff] }
 0x744   : > { %16272 = vmatprep.mubr.msk.f32.mxu0 %vm4776_vm4, %v10869_v6  ;;  %v12139_v6 = vld [vmem:[#allocation4 + $0xbe] sm:$0xff] }
 0x747   : > { %16273 = vmatmul.mubr.msk.f32.gmra.mrb[64].mxu0 %vm4776_vm4, %v10870_v61  ;;  %v12140_v61 = vld [vmem:[#allocation4 + $0xc6] sm:$0xff] }
 0x748   : > { %16275 = vmatprep.mubr.msk.f32.mxu0 %vm4776_vm4, %v10871_v25  ;;  %v12141_v25 = vld [vmem:[#allocation4 + $0xce] sm:$0xff] }
 0x74b   : > { %16276 = vmatmul.mubr.msk.f32.gmra.mrb[66].mxu0 %vm4776_vm4, %v10872_v51  ;;  %v12142_v51 = vld [vmem:[#allocation4 + $0xd6] sm:$0xff] }
 0x74c   : > { %16278 = vmatprep.mubr.msk.f32.mxu0 %vm4776_vm4, %v10873_v54  ;;  %v12143_v54 = vld [vmem:[#allocation4 + $0xde] sm:$0xff] }
 0x74f   : > { %16279 = vmatmul.mubr.msk.f32.gmra.mrb[68].mxu0 %vm4776_vm4, %v10874_v4  ;;  %v12144_v4 = vld [vmem:[#allocation4 + $0xe6] sm:$0xff] }
 0x750   : > { %16281 = vmatprep.mubr.msk.f32.mxu0 %vm4776_vm4, %v11300_v20  ;;  %v12146_v20 = vld [vmem:[#allocation4 + $0xf6] sm:$0xff] }
 0x753   : > { %16282 = vmatmul.mubr.msk.f32.gmra.mrb[70].mxu0 %vm4776_vm4, %v11301_v52  ;;  %v12147_v52 = vld [vmem:[#allocation4 + $0xfe] sm:$0xff] }
 0x754   : > { %16286 = vmatprep.mubr.msk.f32.mxu0 %vm4776_vm4, %v11693_v42  ;;  %v12148_v42 = vld [vmem:[#allocation4 + $0x106] sm:$0xff] }
 0x757   : > { %16287 = vmatmul.mubr.msk.f32.vlgmr.msra.gmra.mrb[36].mxu0 %vm4776_vm4, %v11694_v53  ;;  %v12149_v53 = vld [vmem:[#allocation4 + $0x10e] sm:$0xff] }
 0x758   : > { %16341 = vmatpush3.msra.mxu0 %v13843_v23  ;;  %16289 = vmatprep.mubr.msk.f32.mxu0 %vm4776_vm4, %v11695_v1  ;;  %v12145_v23 = vld [vmem:[#allocation4 + $0xee] sm:$0xff]  ;;  %v12150_v1 = vld [vmem:[#allocation4 + $0x116] sm:$0xff] }
 0x75b   : > { %16290 = vmatmul.mubr.msk.f32.gmra.mrb[38].mxu0 %vm4776_vm4, %v11696_v46  ;;  %v12151_v46 = vld [vmem:[#allocation4 + $0x11e] sm:$0xff] }
 0x75c   : > { %16292 = vmatprep.mubr.msk.f32.mxu0 %vm4776_vm4, %v11697_v35  ;;  %v12152_v35 = vld [vmem:[#allocation4 + $0x126] sm:$0xff] }
 0x75f   : > { %16293 = vmatmul.mubr.msk.f32.gmra.mrb[40].mxu0 %vm4776_vm4, %v11698_v39  ;;  %v12154_v39 = vld [vmem:[#allocation4 + $0x136] sm:$0xff] }
 0x760   : > { %16295 = vmatprep.mubr.msk.f32.mxu0 %vm4776_vm4, %v11699_v24  ;;  %v12153_v24 = vld [vmem:[#allocation4 + $0x12e] sm:$0xff] }
 0x763   : > { %16296 = vmatmul.mubr.msk.f32.gmra.mrb[42].mxu0 %vm4776_vm4, %v11700_v10  ;;  %v12155_v10 = vld [vmem:[#allocation4 + $0x13e] sm:$0xff] }
 0x764   : > { %16298 = vmatprep.mubr.msk.f32.mxu0 %vm4776_vm4, %v11701_v62  ;;  %v19755_v62 = vld [vmem:[%s19917_s8] ss:$0 sm:$0xff] }
 0x767   : > { %16299 = vmatmul.mubr.msk.f32.gmra.mrb[44].mxu0 %vm4776_vm4, %v11702_v8 }
 0x768   : > { %16301 = vmatprep.mubr.msk.f32.mxu0 %vm4776_vm4, %v11703_v59  ;;  %v19760_v59 = vld [vmem:[%s19918_s9] ss:$0 sm:$0xff] }
 0x76b   : > { %16302 = vmatmul.mubr.msk.f32.gmra.mrb[46].mxu0 %vm4776_vm4, %v11704_v45 }
 0x76c   : > { %16304 = vmatprep.mubr.msk.f32.mxu0 %vm4776_vm4, %v11705_v22 }
 0x76f   : > { %16305 = vmatmul.mubr.msk.f32.gmra.mrb[48].mxu0 %vm4776_vm4, %v11706_v15 }
 0x770   : > { %16307 = vmatprep.mubr.msk.f32.mxu0 %vm4776_vm4, %v11707_v36 }
 0x773   : > { %16308 = vmatmul.mubr.msk.f32.gmra.mrb[50].mxu0 %vm4776_vm4, %v11708_v18 }
 0x774   : > { %16310 = vmatprep.mubr.msk.f32.mxu0 %vm4776_vm4, %v11709_v19 }
 0x777   : > { %16311 = vmatmul.mubr.msk.f32.gmra.mrb[52].mxu0 %vm4776_vm4, %v11710_v11 }
 0x778   : > { %16313 = vmatprep.mubr.msk.f32.mxu0 %vm4776_vm4, %v11711_v3 }
 0x77b   : > { %16314 = vmatmul.mubr.msk.f32.gmra.mrb[54].mxu0 %vm4776_vm4, %v11712_v29 }
 0x77c   : > { %16316 = vmatprep.mubr.msk.f32.mxu0 %vm4776_vm4, %v11713_v30  ;;  %v12670_v30 = vld [vmem:[#allocation3 + $0x1b] sm:$0xff] }
 0x77f   : > { %16317 = vmatmul.mubr.msk.f32.gmra.mrb[56].mxu0 %vm4776_vm4, %v11714_v43 }
 0x780   : > { %16319 = vmatprep.mubr.msk.f32.mxu0 %vm4776_vm4, %v11715_v7 }
 0x783   : > { %16320 = vmatmul.mubr.msk.f32.gmra.mrb[58].mxu0 %vm4776_vm4, %v11716_v12 }
 0x784   : > { %16322 = vmatprep.mubr.msk.f32.mxu0 %vm4776_vm4, %v11717_v63  ;;  %v12669_v63 = vld [vmem:[#allocation3 + $0x13] sm:$0xff] }
 0x787   : > { %16323 = vmatmul.mubr.msk.f32.gmra.mrb[60].mxu0 %vm4776_vm4, %v11718_v55 }
 0x788   : > { %16325 = vmatprep.mubr.msk.f32.mxu0 %vm4776_vm4, %v11719_v33 }
 0x78b   : > { %16326 = vmatmul.mubr.msk.f32.gmra.mrb[62].mxu0 %vm4776_vm4, %v11720_v32 }
 0x78c   : > { %16328 = vmatprep.mubr.msk.f32.mxu0 %vm4776_vm4, %v11721_v41 }
 0x78f   : > { %16329 = vmatmul.mubr.msk.f32.gmra.mrb[64].mxu0 %vm4776_vm4, %v11722_v34 }
 0x790   : > { %16331 = vmatprep.mubr.msk.f32.mxu0 %vm4776_vm4, %v11723_v56 }
 0x793   : > { %16332 = vmatmul.mubr.msk.f32.gmra.mrb[66].mxu0 %vm4776_vm4, %v11724_v37 }
 0x794   : > { %16334 = vmatprep.mubr.msk.f32.mxu0 %vm4776_vm4, %v11725_v44  ;;  %v12672_v44 = vld [vmem:[#allocation3 + $0x2b] sm:$0xff] }
 0x797   : > { %16335 = vmatmul.mubr.msk.f32.gmra.mrb[68].mxu0 %vm4776_vm4, %v11726_v21 }
 0x798   : > { %16337 = vmatprep.mubr.msk.f32.mxu0 %vm4776_vm4, %v11727_v58 }
 0x79b   : > { %16338 = vmatmul.mubr.msk.f32.gmra.mrb[70].mxu0 %vm4776_vm4, %v11728_v13 }
 0x79c   : > { %16342 = vmatprep.mubr.msk.f32.mxu0 %vm4776_vm4, %v12120_v28  ;;  %v12671_v28 = vld [vmem:[#allocation3 + $0x23] sm:$0xff] }
 0x79f   : > { %16343 = vmatmul.mubr.msk.f32.vlgmr.msra.gmra.mrb[36].mxu0 %vm4776_vm4, %v12121_v40 }
 0x7a0   : > { %16345 = vmatprep.mubr.msk.f32.mxu0 %vm4776_vm4, %v12122_v17 }
 0x7a3   : > { %16346 = vmatmul.mubr.msk.f32.gmra.mrb[38].mxu0 %vm4776_vm4, %v12123_v57 }
 0x7a4   : > { %16348 = vmatprep.mubr.msk.f32.mxu0 %vm4776_vm4, %v12124_v31 }
 0x7a7   : > { %16349 = vmatmul.mubr.msk.f32.gmra.mrb[40].mxu0 %vm4776_vm4, %v12125_v49 }
 0x7a8   : > { %16351 = vmatprep.mubr.msk.f32.mxu0 %vm4776_vm4, %v12126_v38 }
 0x7ab   : > { %16352 = vmatmul.mubr.msk.f32.gmra.mrb[42].mxu0 %vm4776_vm4, %v12127_v47 }
 0x7ac   : > { %16354 = vmatprep.mubr.msk.f32.mxu0 %vm4776_vm4, %v12128_v60  ;;  %v12674_v60 = vld [vmem:[#allocation3 + $0x3b] sm:$0xff] }
 0x7af   : > { %16355 = vmatmul.mubr.msk.f32.gmra.mrb[44].mxu0 %vm4776_vm4, %v12129_v50 }
 0x7b0   : > { %16357 = vmatprep.mubr.msk.f32.mxu0 %vm4776_vm4, %v12130_v5 }
 0x7b3   : > { %16358 = vmatmul.mubr.msk.f32.gmra.mrb[46].mxu0 %vm4776_vm4, %v12131_v26 }
 0x7b4   : > { %16360 = vmatprep.mubr.msk.f32.mxu0 %vm4776_vm4, %v12132_v0  ;;  %v12673_v0 = vld [vmem:[#allocation3 + $0x33] sm:$0xff] }
 0x7b7   : > { %16361 = vmatmul.mubr.msk.f32.gmra.mrb[48].mxu0 %vm4776_vm4, %v12133_v9 }
 0x7b8   : > { %16363 = vmatprep.mubr.msk.f32.mxu0 %vm4776_vm4, %v12134_v2 }
 0x7bb   : > { %16364 = vmatmul.mubr.msk.f32.gmra.mrb[50].mxu0 %vm4776_vm4, %v12135_v27 }
 0x7bc   : > { %16366 = vmatprep.mubr.msk.f32.mxu0 %vm4776_vm4, %v12136_v16 }
 0x7bf   : > { %16367 = vmatmul.mubr.msk.f32.gmra.mrb[52].mxu0 %vm4776_vm4, %v12137_v14 }
 0x7c0   : > { %16369 = vmatprep.mubr.msk.f32.mxu0 %vm4776_vm4, %v12138_v48 }
 0x7c3   : > { %16370 = vmatmul.mubr.msk.f32.gmra.mrb[54].mxu0 %vm4776_vm4, %v12139_v6 }
 0x7c4   : > { %16372 = vmatprep.mubr.msk.f32.mxu0 %vm4776_vm4, %v12140_v61  ;;  %v12676_v61 = vld [vmem:[#allocation3 + $0x4b] sm:$0xff] }
 0x7c7   : > { %16373 = vmatmul.mubr.msk.f32.gmra.mrb[56].mxu0 %vm4776_vm4, %v12141_v25 }
 0x7c8   : > { %16375 = vmatprep.mubr.msk.f32.mxu0 %vm4776_vm4, %v12142_v51 }
 0x7cb   : > { %16376 = vmatmul.mubr.msk.f32.gmra.mrb[58].mxu0 %vm4776_vm4, %v12143_v54 }
 0x7cc   : > { %16378 = vmatprep.mubr.msk.f32.mxu0 %vm4776_vm4, %v12144_v4  ;;  %v12675_v4 = vld [vmem:[#allocation3 + $0x43] sm:$0xff] }
 0x7cf   : > { %16379 = vmatmul.mubr.msk.f32.gmra.mrb[60].mxu0 %vm4776_vm4, %v12145_v23 }
 0x7d0   : > { %16381 = vmatprep.mubr.msk.f32.mxu0 %vm4776_vm4, %v12146_v20 }
 0x7d3   : > { %16382 = vmatmul.mubr.msk.f32.gmra.mrb[62].mxu0 %vm4776_vm4, %v12147_v52 }
 0x7d4   : > { %16384 = vmatprep.mubr.msk.f32.mxu0 %vm4776_vm4, %v12148_v42 }
 0x7d7   : > { %16385 = vmatmul.mubr.msk.f32.gmra.mrb[64].mxu0 %vm4776_vm4, %v12149_v53 }
 0x7d8   : > { %16387 = vmatprep.mubr.msk.f32.mxu0 %vm4776_vm4, %v12150_v1 }
 0x7db   : > { %16388 = vmatmul.mubr.msk.f32.gmra.mrb[66].mxu0 %vm4776_vm4, %v12151_v46 }
 0x7dc   : > { %16390 = vmatprep.mubr.msk.f32.mxu0 %vm4776_vm4, %v12152_v35  ;;  %v12678_v35 = vld [vmem:[#allocation3 + $0x5b] sm:$0xff] }
 0x7df   : > { %16391 = vmatmul.mubr.msk.f32.gmra.mrb[68].mxu0 %vm4776_vm4, %v12153_v24 }
 0x7e0   : > { %16393 = vmatprep.mubr.msk.f32.mxu0 %vm4776_vm4, %v12154_v39 }
 0x7e3   : > { %16394 = vmatmul.mubr.msk.f32.gmra.mrb[70].mxu0 %vm4776_vm4, %v12155_v10 }
 0x872   : > { %v16344_v8 = vpop.f32.mrb[36].mxu0 }
 0x873   : > { %v12555_v45 = vmul.f32 %v16344_v8, %v19755_v62  ;;  %v12332_v22 = vpop.f32.mrb[37].mxu0  ;;  %v12677_v8 = vld [vmem:[#allocation3 + $0x53] sm:$0xff] }
 0x874   : > { %v12554_v15 = vmul.f32 %v19755_v62, %v12332_v22 }
 0x875   : > { %v12598_v36 = vadd.f32 %v19760_v59, %v12555_v45 }
 0x876   : > { %v12597_v18 = vadd.f32 %v19760_v59, %v12554_v15  ;;  %v16347_v19 = vpop.f32.mrb[38].mxu0 }
 0x877   : > { %v12634_v11 = vmax.f32 %v12598_v36, 0.0  ;;  %v12557_v3 = vmul.f32 %v16347_v19, %v19755_v62  ;;  %v12342_v29 = vpop.f32.mrb[39].mxu0 }
 0x878   : > { %v12633_v43 = vmax.f32 %v12597_v18, 0.0  ;;  %v12556_v7 = vmul.f32 %v19755_v62, %v12342_v29 }
 0x879   : > { %v12706_v12 = vadd.f32 %v12670_v30, %v12634_v11  ;;  %v12600_v55 = vadd.f32 %v19760_v59, %v12557_v3  ;;  %v12680_v3 = vld [vmem:[#allocation3 + $0x6b] sm:$0xff] }
 0x87a   : > { %v12705_v33 = vadd.f32 %v12669_v63, %v12633_v43  ;;  %v12599_v32 = vadd.f32 %v19760_v59, %v12556_v7  ;;  %v16350_v41 = vpop.f32.mrb[40].mxu0  ;;  %v12679_v7 = vld [vmem:[#allocation3 + $0x63] sm:$0xff] }
 0x87b   : > { %12742 = vst.msk [vmem:[%s17362_s27 + $0x8] sm:$0xff] %vm4776_vm4, %v12706_v12  ;;  %v12636_v34 = vmax.f32 %v12600_v55, 0.0  ;;  %v12559_v56 = vmul.f32 %v16350_v41, %v19755_v62  ;;  %v12352_v37 = vpop.f32.mrb[41].mxu0 }
 0x87c   : > { %12741 = vst.msk [vmem:[%s17362_s27] sm:$0xff] %vm4776_vm4, %v12705_v33  ;;  %v12635_v58 = vmax.f32 %v12599_v32, 0.0  ;;  %v12558_v21 = vmul.f32 %v19755_v62, %v12352_v37 }
 0x87d   : > { %v12708_v13 = vadd.f32 %v12672_v44, %v12636_v34  ;;  %v12602_v40 = vadd.f32 %v19760_v59, %v12559_v56  ;;  %v12682_v56 = vld [vmem:[#allocation3 + $0x7b] sm:$0xff] }
 0x87e   : > { %v12707_v17 = vadd.f32 %v12671_v28, %v12635_v58  ;;  %v12601_v57 = vadd.f32 %v19760_v59, %v12558_v21  ;;  %v16353_v31 = vpop.f32.mrb[42].mxu0  ;;  %v12681_v21 = vld [vmem:[#allocation3 + $0x73] sm:$0xff] }
 0x87f   : > { %12744 = vst.msk [vmem:[%s17362_s27 + $0x18] sm:$0xff] %vm4776_vm4, %v12708_v13  ;;  %v12638_v49 = vmax.f32 %v12602_v40, 0.0  ;;  %v12561_v38 = vmul.f32 %v16353_v31, %v19755_v62  ;;  %v12362_v47 = vpop.f32.mrb[43].mxu0 }
 0x880   : > { %12743 = vst.msk [vmem:[%s17362_s27 + $0x10] sm:$0xff] %vm4776_vm4, %v12707_v17  ;;  %v12637_v50 = vmax.f32 %v12601_v57, 0.0  ;;  %v12560_v5 = vmul.f32 %v19755_v62, %v12362_v47 }
 0x881   : > { %v12710_v26 = vadd.f32 %v12674_v60, %v12638_v49  ;;  %v12604_v9 = vadd.f32 %v19760_v59, %v12561_v38  ;;  %v12684_v38 = vld [vmem:[#allocation3 + $0x8b] sm:$0xff] }
 0x882   : > { %v12709_v2 = vadd.f32 %v12673_v0, %v12637_v50  ;;  %v12603_v27 = vadd.f32 %v19760_v59, %v12560_v5  ;;  %v16356_v16 = vpop.f32.mrb[44].mxu0  ;;  %v12683_v5 = vld [vmem:[#allocation3 + $0x83] sm:$0xff] }
 0x883   : > { %12746 = vst.msk [vmem:[%s17362_s27 + $0x28] sm:$0xff] %vm4776_vm4, %v12710_v26  ;;  %v12640_v14 = vmax.f32 %v12604_v9, 0.0  ;;  %v12563_v48 = vmul.f32 %v16356_v16, %v19755_v62  ;;  %v12372_v6 = vpop.f32.mrb[45].mxu0 }
 0x884   : > { %12745 = vst.msk [vmem:[%s17362_s27 + $0x20] sm:$0xff] %vm4776_vm4, %v12709_v2  ;;  %v12639_v25 = vmax.f32 %v12603_v27, 0.0  ;;  %v12562_v51 = vmul.f32 %v19755_v62, %v12372_v6 }
 0x885   : > { %v12712_v54 = vadd.f32 %v12676_v61, %v12640_v14  ;;  %v12606_v23 = vadd.f32 %v19760_v59, %v12563_v48  ;;  %v12686_v48 = vld [vmem:[#allocation3 + $0x9b] sm:$0xff] }
 0x886   : > { %v12711_v20 = vadd.f32 %v12675_v4, %v12639_v25  ;;  %v12605_v52 = vadd.f32 %v19760_v59, %v12562_v51  ;;  %v16359_v42 = vpop.f32.mrb[46].mxu0  ;;  %v12685_v51 = vld [vmem:[#allocation3 + $0x93] sm:$0xff] }
 0x887   : > { %12748 = vst.msk [vmem:[%s17362_s27 + $0x38] sm:$0xff] %vm4776_vm4, %v12712_v54  ;;  %v12642_v53 = vmax.f32 %v12606_v23, 0.0  ;;  %v12565_v1 = vmul.f32 %v16359_v42, %v19755_v62  ;;  %v12382_v46 = vpop.f32.mrb[47].mxu0 }
 0x888   : > { %12747 = vst.msk [vmem:[%s17362_s27 + $0x30] sm:$0xff] %vm4776_vm4, %v12711_v20  ;;  %v12641_v39 = vmax.f32 %v12605_v52, 0.0  ;;  %v12564_v24 = vmul.f32 %v19755_v62, %v12382_v46 }
 0x889   : > { %v12714_v10 = vadd.f32 %v12678_v35, %v12642_v53  ;;  %v12608_v45 = vadd.f32 %v19760_v59, %v12565_v1  ;;  %v12688_v1 = vld [vmem:[#allocation3 + $0xab] sm:$0xff] }
 0x88a   : > { %v12713_v22 = vadd.f32 %v12677_v8, %v12641_v39  ;;  %v12607_v15 = vadd.f32 %v19760_v59, %v12564_v24  ;;  %v16362_v36 = vpop.f32.mrb[48].mxu0  ;;  %v12687_v24 = vld [vmem:[#allocation3 + $0xa3] sm:$0xff] }
 0x88b   : > { %12750 = vst.msk [vmem:[%s17362_s27 + $0x48] sm:$0xff] %vm4776_vm4, %v12714_v10  ;;  %v12644_v18 = vmax.f32 %v12608_v45, 0.0  ;;  %v12567_v19 = vmul.f32 %v16362_v36, %v19755_v62  ;;  %v12392_v11 = vpop.f32.mrb[49].mxu0 }
 0x88c   : > { %12749 = vst.msk [vmem:[%s17362_s27 + $0x40] sm:$0xff] %vm4776_vm4, %v12713_v22  ;;  %v12643_v29 = vmax.f32 %v12607_v15, 0.0  ;;  %v12566_v30 = vmul.f32 %v19755_v62, %v12392_v11 }
 0x88d   : > { %v12716_v43 = vadd.f32 %v12680_v3, %v12644_v18  ;;  %v12610_v12 = vadd.f32 %v19760_v59, %v12567_v19  ;;  %v12690_v19 = vld [vmem:[#allocation3 + $0xbb] sm:$0xff] }
 0x88e   : > { %v12715_v63 = vadd.f32 %v12679_v7, %v12643_v29  ;;  %v12609_v55 = vadd.f32 %v19760_v59, %v12566_v30  ;;  %v16365_v33 = vpop.f32.mrb[50].mxu0  ;;  %v12689_v30 = vld [vmem:[#allocation3 + $0xb3] sm:$0xff] }
 0x88f   : > { %12752 = vst.msk [vmem:[%s17362_s27 + $0x58] sm:$0xff] %vm4776_vm4, %v12716_v43  ;;  %v12646_v32 = vmax.f32 %v12610_v12, 0.0  ;;  %v12569_v41 = vmul.f32 %v16365_v33, %v19755_v62  ;;  %v12402_v34 = vpop.f32.mrb[51].mxu0 }
 0x890   : > { %12751 = vst.msk [vmem:[%s17362_s27 + $0x50] sm:$0xff] %vm4776_vm4, %v12715_v63  ;;  %v12645_v37 = vmax.f32 %v12609_v55, 0.0  ;;  %v12568_v44 = vmul.f32 %v19755_v62, %v12402_v34 }
 0x891   : > { %v12718_v58 = vadd.f32 %v12682_v56, %v12646_v32  ;;  %v12612_v13 = vadd.f32 %v19760_v59, %v12569_v41  ;;  %v12692_v41 = vld [vmem:[#allocation3 + $0xcb] sm:$0xff] }
 0x892   : > { %v12717_v28 = vadd.f32 %v12681_v21, %v12645_v37  ;;  %v12611_v40 = vadd.f32 %v19760_v59, %v12568_v44  ;;  %v16368_v17 = vpop.f32.mrb[52].mxu0  ;;  %v12691_v44 = vld [vmem:[#allocation3 + $0xc3] sm:$0xff] }
 0x893   : > { %12754 = vst.msk [vmem:[%s17362_s27 + $0x68] sm:$0xff] %vm4776_vm4, %v12718_v58  ;;  %v12648_v57 = vmax.f32 %v12612_v13, 0.0  ;;  %v12571_v31 = vmul.f32 %v16368_v17, %v19755_v62  ;;  %v12412_v49 = vpop.f32.mrb[53].mxu0 }
 0x894   : > { %12753 = vst.msk [vmem:[%s17362_s27 + $0x60] sm:$0xff] %vm4776_vm4, %v12717_v28  ;;  %v12647_v47 = vmax.f32 %v12611_v40, 0.0  ;;  %v12570_v60 = vmul.f32 %v19755_v62, %v12412_v49 }
 0x895   : > { %v12720_v50 = vadd.f32 %v12684_v38, %v12648_v57  ;;  %v12614_v26 = vadd.f32 %v19760_v59, %v12571_v31  ;;  %v12694_v31 = vld [vmem:[#allocation3 + $0xdb] sm:$0xff] }
 0x896   : > { %v12719_v0 = vadd.f32 %v12683_v5, %v12647_v47  ;;  %v12613_v9 = vadd.f32 %v19760_v59, %v12570_v60  ;;  %v16371_v2 = vpop.f32.mrb[54].mxu0  ;;  %v12693_v60 = vld [vmem:[#allocation3 + $0xd3] sm:$0xff] }
 0x897   : > { %12756 = vst.msk [vmem:[%s17362_s27 + $0x78] sm:$0xff] %vm4776_vm4, %v12720_v50  ;;  %v12650_v27 = vmax.f32 %v12614_v26, 0.0  ;;  %v12573_v16 = vmul.f32 %v16371_v2, %v19755_v62  ;;  %v12422_v14 = vpop.f32.mrb[55].mxu0 }
 0x898   : > { %12755 = vst.msk [vmem:[%s17362_s27 + $0x70] sm:$0xff] %vm4776_vm4, %v12719_v0  ;;  %v12649_v6 = vmax.f32 %v12613_v9, 0.0  ;;  %v12572_v61 = vmul.f32 %v19755_v62, %v12422_v14 }
 0x899   : > { %v12722_v25 = vadd.f32 %v12686_v48, %v12650_v27  ;;  %v12616_v54 = vadd.f32 %v19760_v59, %v12573_v16  ;;  %v12696_v16 = vld [vmem:[#allocation3 + $0xeb] sm:$0xff] }
 0x89a   : > { %v12721_v4 = vadd.f32 %v12685_v51, %v12649_v6  ;;  %v12615_v23 = vadd.f32 %v19760_v59, %v12572_v61  ;;  %v16374_v20 = vpop.f32.mrb[56].mxu0  ;;  %v12695_v61 = vld [vmem:[#allocation3 + $0xe3] sm:$0xff] }
 0x89b   : > { %12758 = vst.msk [vmem:[%s17362_s27 + $0x88] sm:$0xff] %vm4776_vm4, %v12722_v25  ;;  %v12652_v52 = vmax.f32 %v12616_v54, 0.0  ;;  %v12575_v42 = vmul.f32 %v16374_v20, %v19755_v62  ;;  %v12432_v53 = vpop.f32.mrb[57].mxu0 }
 0x89c   : > { %12757 = vst.msk [vmem:[%s17362_s27 + $0x80] sm:$0xff] %vm4776_vm4, %v12721_v4  ;;  %v12651_v46 = vmax.f32 %v12615_v23, 0.0  ;;  %v12574_v35 = vmul.f32 %v19755_v62, %v12432_v53 }
 0x89d   : > { %v12724_v39 = vadd.f32 %v12688_v1, %v12652_v52  ;;  %v12618_v10 = vadd.f32 %v19760_v59, %v12575_v42  ;;  %v12698_v42 = vld [vmem:[#allocation3 + $0xfb] sm:$0xff] }
 0x89e   : > { %v12723_v8 = vadd.f32 %v12687_v24, %v12651_v46  ;;  %v12617_v45 = vadd.f32 %v19760_v59, %v12574_v35  ;;  %v16377_v22 = vpop.f32.mrb[58].mxu0  ;;  %v12697_v35 = vld [vmem:[#allocation3 + $0xf3] sm:$0xff] }
 0x89f   : > { %12760 = vst.msk [vmem:[%s17362_s27 + $0x98] sm:$0xff] %vm4776_vm4, %v12724_v39  ;;  %v12654_v15 = vmax.f32 %v12618_v10, 0.0  ;;  %v12577_v36 = vmul.f32 %v16377_v22, %v19755_v62  ;;  %v12442_v18 = vpop.f32.mrb[59].mxu0 }
 0x8a0   : > { %12759 = vst.msk [vmem:[%s17362_s27 + $0x90] sm:$0xff] %vm4776_vm4, %v12723_v8  ;;  %v12653_v11 = vmax.f32 %v12617_v45, 0.0  ;;  %v12576_v3 = vmul.f32 %v19755_v62, %v12442_v18 }
 0x8a1   : > { %v12726_v29 = vadd.f32 %v12690_v19, %v12654_v15  ;;  %v12620_v43 = vadd.f32 %v19760_v59, %v12577_v36  ;;  %v12700_v36 = vld [vmem:[#allocation3 + $0x10b] sm:$0xff] }
 0x8a2   : > { %v12725_v7 = vadd.f32 %v12689_v30, %v12653_v11  ;;  %v12619_v12 = vadd.f32 %v19760_v59, %v12576_v3  ;;  %v16380_v63 = vpop.f32.mrb[60].mxu0  ;;  %v12699_v3 = vld [vmem:[#allocation3 + $0x103] sm:$0xff] }
 0x8a3   : > { %12762 = vst.msk [vmem:[%s17362_s27 + $0xa8] sm:$0xff] %vm4776_vm4, %v12726_v29  ;;  %v12656_v55 = vmax.f32 %v12620_v43, 0.0  ;;  %v12579_v33 = vmul.f32 %v16380_v63, %v19755_v62  ;;  %v12452_v32 = vpop.f32.mrb[61].mxu0 }
 0x8a4   : > { %12761 = vst.msk [vmem:[%s17362_s27 + $0xa0] sm:$0xff] %vm4776_vm4, %v12725_v7  ;;  %v12655_v34 = vmax.f32 %v12619_v12, 0.0  ;;  %v12578_v56 = vmul.f32 %v19755_v62, %v12452_v32 }
 0x8a5   : > { %v12728_v37 = vadd.f32 %v12692_v41, %v12656_v55  ;;  %v12622_v58 = vadd.f32 %v19760_v59, %v12579_v33  ;;  %v12702_v33 = vld [vmem:[#allocation3 + $0x11b] sm:$0xff] }
 0x8a6   : > { %v12727_v21 = vadd.f32 %v12691_v44, %v12655_v34  ;;  %v12621_v13 = vadd.f32 %v19760_v59, %v12578_v56  ;;  %v16383_v28 = vpop.f32.mrb[62].mxu0  ;;  %v12701_v56 = vld [vmem:[#allocation3 + $0x113] sm:$0xff] }
 0x8a7   : > { %12764 = vst.msk [vmem:[%s17362_s27 + $0xb8] sm:$0xff] %vm4776_vm4, %v12728_v37  ;;  %v12658_v40 = vmax.f32 %v12622_v58, 0.0  ;;  %v12581_v17 = vmul.f32 %v16383_v28, %v19755_v62  ;;  %v12462_v57 = vpop.f32.mrb[63].mxu0 }
 0x8a8   : > { %12763 = vst.msk [vmem:[%s17362_s27 + $0xb0] sm:$0xff] %vm4776_vm4, %v12727_v21  ;;  %v12657_v49 = vmax.f32 %v12621_v13, 0.0  ;;  %v12580_v38 = vmul.f32 %v19755_v62, %v12462_v57  ;;  %v12704_v13 = vld [vmem:[#allocation3 + $0x12b] sm:$0xff] }
 0x8a9   : > { %v12730_v47 = vadd.f32 %v12694_v31, %v12658_v40  ;;  %v12624_v50 = vadd.f32 %v19760_v59, %v12581_v17  ;;  %v12703_v17 = vld [vmem:[#allocation3 + $0x123] sm:$0xff] }
 0x8aa   : > { %v12729_v5 = vadd.f32 %v12693_v60, %v12657_v49  ;;  %v12623_v26 = vadd.f32 %v19760_v59, %v12580_v38  ;;  %v16386_v0 = vpop.f32.mrb[64].mxu0 }
 0x8ab   : > { %12766 = vst.msk [vmem:[%s17362_s27 + $0xc8] sm:$0xff] %vm4776_vm4, %v12730_v47  ;;  %v12660_v9 = vmax.f32 %v12624_v50, 0.0  ;;  %v12583_v2 = vmul.f32 %v16386_v0, %v19755_v62  ;;  %v12472_v27 = vpop.f32.mrb[65].mxu0 }
 0x8ac   : > { %12765 = vst.msk [vmem:[%s17362_s27 + $0xc0] sm:$0xff] %vm4776_vm4, %v12729_v5  ;;  %v12659_v14 = vmax.f32 %v12623_v26, 0.0  ;;  %v12582_v48 = vmul.f32 %v19755_v62, %v12472_v27 }
 0x8ad   : > { %v12732_v6 = vadd.f32 %v12696_v16, %v12660_v9  ;;  %v12626_v25 = vadd.f32 %v19760_v59, %v12583_v2 }
 0x8ae   : > { %v12731_v51 = vadd.f32 %v12695_v61, %v12659_v14  ;;  %v12625_v54 = vadd.f32 %v19760_v59, %v12582_v48  ;;  %v16389_v4 = vpop.f32.mrb[66].mxu0 }
 0x8af   : > { %12768 = vst.msk [vmem:[%s17362_s27 + $0xd8] sm:$0xff] %vm4776_vm4, %v12732_v6  ;;  %v12662_v23 = vmax.f32 %v12626_v25, 0.0  ;;  %v12585_v20 = vmul.f32 %v16389_v4, %v19755_v62  ;;  %v12482_v52 = vpop.f32.mrb[67].mxu0 }
 0x8b0   : > { %12767 = vst.msk [vmem:[%s17362_s27 + $0xd0] sm:$0xff] %vm4776_vm4, %v12731_v51  ;;  %v12661_v53 = vmax.f32 %v12625_v54, 0.0  ;;  %v12584_v1 = vmul.f32 %v19755_v62, %v12482_v52 }
 0x8b1   : > { %v12734_v46 = vadd.f32 %v12698_v42, %v12662_v23  ;;  %v12628_v39 = vadd.f32 %v19760_v59, %v12585_v20 }
 0x8b2   : > { %v12733_v24 = vadd.f32 %v12697_v35, %v12661_v53  ;;  %v12627_v10 = vadd.f32 %v19760_v59, %v12584_v1  ;;  %v16392_v8 = vpop.f32.mrb[68].mxu0 }
 0x8b3   : > { %12770 = vst.msk [vmem:[%s17362_s27 + $0xe8] sm:$0xff] %vm4776_vm4, %v12734_v46  ;;  %v12664_v45 = vmax.f32 %v12628_v39, 0.0  ;;  %v12587_v22 = vmul.f32 %v16392_v8, %v19755_v62  ;;  %v12492_v15 = vpop.f32.mrb[69].mxu0 }
 0x8b4   : > { %12769 = vst.msk [vmem:[%s17362_s27 + $0xe0] sm:$0xff] %vm4776_vm4, %v12733_v24  ;;  %v12663_v18 = vmax.f32 %v12627_v10, 0.0  ;;  %v12586_v19 = vmul.f32 %v19755_v62, %v12492_v15 }
 0x8b5   : > { %v12736_v11 = vadd.f32 %v12700_v36, %v12664_v45  ;;  %v12630_v29 = vadd.f32 %v19760_v59, %v12587_v22 }
 0x8b6   : > { %v12735_v30 = vadd.f32 %v12699_v3, %v12663_v18  ;;  %v12629_v43 = vadd.f32 %v19760_v59, %v12586_v19  ;;  %v16395_v7 = vpop.f32.mrb[70].mxu0 }
 0x8b7   : > { %12772 = vst.msk [vmem:[%s17362_s27 + $0xf8] sm:$0xff] %vm4776_vm4, %v12736_v11  ;;  %v12666_v12 = vmax.f32 %v12630_v29, 0.0  ;;  %v12589_v63 = vmul.f32 %v16395_v7, %v19755_v62  ;;  %v12502_v55 = vpop.f32.mrb[71].mxu0 }
 0x8b8   : > { %12771 = vst.msk [vmem:[%s17362_s27 + $0xf0] sm:$0xff] %vm4776_vm4, %v12735_v30  ;;  %v12665_v32 = vmax.f32 %v12629_v43, 0.0  ;;  %v12588_v41 = vmul.f32 %v19755_v62, %v12502_v55 }
 0x8b9   : > { %v12738_v34 = vadd.f32 %v12702_v33, %v12666_v12  ;;  %v12632_v37 = vadd.f32 %v19760_v59, %v12589_v63 }
 0x8ba   : > { %v12737_v44 = vadd.f32 %v12701_v56, %v12665_v32  ;;  %v12631_v58 = vadd.f32 %v19760_v59, %v12588_v41 }
 0x8bb   : > { %12774 = vst.msk [vmem:[%s17362_s27 + $0x108] sm:$0xff] %vm4776_vm4, %v12738_v34  ;;  %v12668_v21 = vmax.f32 %v12632_v37, 0.0 }
 0x8bc   : > { %12773 = vst.msk [vmem:[%s17362_s27 + $0x100] sm:$0xff] %vm4776_vm4, %v12737_v44  ;;  %v12667_v28 = vmax.f32 %v12631_v58, 0.0 }
 0x8bd   : > { %v12740_v40 = vadd.f32 %v12704_v13, %v12668_v21 }
 0x8be   : > { %v12739_v57 = vadd.f32 %v12703_v17, %v12667_v28 }
 0x8bf   : > { %12776 = vst.msk [vmem:[%s17362_s27 + $0x118] sm:$0xff] %vm4776_vm4, %v12740_v40 }
 0x8c0   : > { %12775 = vst.msk [vmem:[%s17362_s27 + $0x110] sm:$0xff] %vm4776_vm4, %v12739_v57 }
 0x8c1 PF: > { %s21_s17 = sadd.s32 1, %s17282_s17  }
 0x8c2   : > { %p18_p5 = scmp.ge.s32.totalorder %s21_s17, 4  }
 0x8c4   :  { %20 = sbr.rel (!%p18_p5) target bundleno = 1 (0x1), region = 137 }

</bundles_post_ra>
